<compile_context>
chip_gen: v7x
topology: tpu7x:2x2x1
jax: 0.10.0
libtpu: 0.0.40
codegen_flags: <defaults>
</compile_context>

<pallas_src>
import jax
import jax.numpy as jnp
from jax.experimental import pallas as pl
from jax.experimental.pallas import tpu as pltpu

EPS = 1e-5                      # PyTorch BatchNorm2d default eps
TM = 256                        # base output-row tile (sweep 256-512 per chip)
PMAX = 6                        # max cov_size // 2 over the asterisk variants
ASTER_COVS = (5, 9, 13)
VMEM_LIMIT = 48 * 1024 * 1024   # explicit scoped-VMEM budget (v5e/v6e/v7x safe)


def _round_up(x, m):
    return ((x + m - 1) // m) * m


def _kdp(cov):
    # (kernel, dilation, padding) exactly as in the PyTorch module
    if cov == 5:
        return 3, 2, 2
    if cov == 9:
        return 5, 2, 4
    return 5, 3, 6


def _pad_cols(m, n):
    return m if m.shape[-1] == n else jnp.pad(m, ((0, 0), (0, n - m.shape[-1])))


def _pad_vec(v, n):
    return v if v.shape[-1] == n else jnp.pad(v, (0, n - v.shape[-1]))


# ----------------------------------------------------------------------------
# Generic fused kernel: out[r] = relu(sum_o x[r+off_o] @ W0[o] + s0), followed
# by optional extra fused pointwise stages relu(. @ Wi + si).
# The activation arrives as a (tm, cin) tile plus (if any offset > 0) the next
# tile as halo; offsets are static so taps are static slices of the window.
# ----------------------------------------------------------------------------
def _make_kernel(offsets, tm, n_stages, has_halo):
    offsets = tuple(int(o) for o in offsets)

    def kernel(*refs):
        o_ref = refs[-1]
        pos = 0
        xc = refs[pos][...]; pos += 1
        if has_halo:
            xn = refs[pos][...]; pos += 1
            xw = jnp.concatenate([xc, xn], axis=0)       # (2*tm, cin) bf16
        else:
            xw = xc
        w0_ref = refs[pos]; pos += 1
        shift0 = refs[pos][...]; pos += 1

        acc = None
        for k, off in enumerate(offsets):                # static offsets
            slab = xw[off:off + tm]
            part = jnp.dot(slab, w0_ref[k],
                           preferred_element_type=jnp.float32)
            acc = part if acc is None else acc + part
        h = jnp.maximum(acc + shift0, 0.0)

        for _ in range(1, n_stages):                     # fused 1x1 stages
            w = refs[pos][...]; pos += 1
            s = refs[pos][...]; pos += 1
            h = jnp.maximum(
                jnp.dot(h.astype(jnp.bfloat16), w,
                        preferred_element_type=jnp.float32) + s, 0.0)

        o_ref[...] = h.astype(o_ref.dtype)

    return kernel


def tap_matmul(x_flat, offsets, weights, shifts, out_dtype=jnp.bfloat16):
    """Row-tiled shifted-matmul + folded-BN shift + ReLU (+ fused 1x1 stages).

    x_flat: (R, cin).  weights[0]: (n_off, cin, N0) bf16, shifts[i]: (1, Ni)
    f32, weights[i>0]: (N(i-1), Ni) bf16.  Returns (nblocks*tm, N_last)."""
    offsets = tuple(int(o) for o in offsets)
    R, cin = x_flat.shape
    max_off = max(offsets)
    has_halo = max_off > 0
    tm = max(TM, _round_up(max_off, 64))     # halo (max_off) must fit one tile
    nb = -(-R // tm)
    rows = (nb + (1 if has_halo else 0)) * tm
    x_in = x_flat.astype(jnp.bfloat16)
    if rows > R:
        x_in = jnp.pad(x_in, ((0, rows - R), (0, 0)))
    n_out = weights[-1].shape[-1]

    in_specs = [pl.BlockSpec((tm, cin), lambda i: (i, 0))]
    args = [x_in]
    if has_halo:
        in_specs.append(pl.BlockSpec((tm, cin), lambda i: (i + 1, 0)))
        args.append(x_in)
    # Constant-index operands (merged weights / folded-BN shifts) stay resident.
    in_specs.append(pl.BlockSpec(weights[0].shape, lambda i: (0, 0, 0)))
    args.append(weights[0])
    in_specs.append(pl.BlockSpec(shifts[0].shape, lambda i: (0, 0)))
    args.append(shifts[0])
    for w, s in zip(weights[1:], shifts[1:]):
        in_specs.append(pl.BlockSpec(w.shape, lambda i: (0, 0)))
        args.append(w)
        in_specs.append(pl.BlockSpec(s.shape, lambda i: (0, 0)))
        args.append(s)

    return pl.pallas_call(
        _make_kernel(offsets, tm, len(weights), has_halo),
        out_shape=jax.ShapeDtypeStruct((nb * tm, n_out), out_dtype),
        grid=(nb,),
        in_specs=in_specs,
        out_specs=pl.BlockSpec((tm, n_out), lambda i: (i, 0)),
        compiler_params=pltpu.CompilerParams(
            dimension_semantics=("parallel",),
            vmem_limit_bytes=VMEM_LIMIT),
    )(*args)


# ----------------------------------------------------------------------------
# Asterisk skew transforms (NHWC) -- pure data movement in JAX (square H==W,
# exactly like the PyTorch reference implementation).
# ----------------------------------------------------------------------------
def h_transform(x):
    B, H, W, C = x.shape
    x = jnp.pad(x, ((0, 0), (0, 0), (0, W), (0, 0)))
    x = x.reshape(B, 2 * H * W, C)[:, :2 * H * W - W, :]
    return x.reshape(B, H, 2 * W - 1, C)


def inv_h_transform(x):
    B, H, W2, C = x.shape                  # W2 == 2H-1
    x = x.reshape(B, H * W2, C)
    x = jnp.pad(x, ((0, 0), (0, H), (0, 0)))
    x = x.reshape(B, H, 2 * H, C)
    return x[:, :, :H, :]


def v_transform(x):
    B, H, W, C = x.shape
    x = jnp.transpose(x, (0, 2, 1, 3))     # (B,W,H,C)
    x = jnp.pad(x, ((0, 0), (0, 0), (0, H), (0, 0)))
    x = x.reshape(B, 2 * W * H, C)[:, :2 * W * H - H, :]
    x = x.reshape(B, W, 2 * H - 1, C)
    return jnp.transpose(x, (0, 2, 1, 3))  # (B,2H-1,W,C)


def inv_v_transform(x):
    B, H2, W, C = x.shape                  # H2 == 2W-1
    x = jnp.transpose(x, (0, 2, 1, 3))
    x = x.reshape(B, W * H2, C)
    x = jnp.pad(x, ((0, 0), (0, W), (0, 0)))
    x = x.reshape(B, W, 2 * W, C)[:, :, :W, :]
    return jnp.transpose(x, (0, 2, 1, 3))


# ----------------------------------------------------------------------------
# One-time weight merging / BN folding (hoisted out of the traced forward)
# ----------------------------------------------------------------------------
def _fold_bn(bias, bn, lo=None, hi=None):
    gamma, beta, mean, var = bn
    if lo is not None:
        gamma, beta, mean, var = (a[lo:hi] for a in (gamma, beta, mean, var))
    if bias is None:
        bias = jnp.zeros_like(mean)
    scale = gamma / jnp.sqrt(var + EPS)
    shift = (bias - mean) * scale + beta
    return scale.astype(jnp.float32), shift.astype(jnp.float32)


def build_plan(params):
    """Fold BN (eval mode) into weights, merge the three asterisks, pre-permute
    channel orders, and pad all stored output widths to lane-dense multiples of
    128.  Pure one-time preprocessing."""
    asters = [params['aster1'], params['aster2'], params['aster3']]
    na = 3
    C = asters[0]['conv1_w'].shape[1]
    c4, c8, c2 = C // 4, C // 8, C // 2
    F = params['conv1_w'].shape[0]
    Fh = F // 2
    plan = {}

    def _entry(taps, w_stack, shift, n_valid):
        return {'taps': tuple(taps),
                'w0': w_stack.astype(jnp.bfloat16),
                's0': shift.reshape(1, -1).astype(jnp.float32),
                'n_valid': n_valid}

    # -- the three conv1 (1x1)+bn1+relu: shared input, concatenated Cout -----
    mats, c1sh = [], []
    for p in asters:
        scale, shift = _fold_bn(p['conv1_b'], p['bn1'])
        mats.append(p['conv1_w'].reshape(c4, C).T * scale[None, :])
        c1sh.append(shift)
    n_raw = na * c4
    n_pad = _round_up(n_raw, 128)
    plan['conv1'] = _entry(((0, 0),),
                           _pad_cols(jnp.concatenate(mats, axis=1), n_pad)[None],
                           _pad_vec(jnp.concatenate(c1sh), n_pad), n_raw)

    # -- dilated branches (bn2 folded per branch channel slice) --------------
    def branch_taps(branch, wname, bname, key_fn):
        taps, shs = {}, []
        for a, (p, cov) in enumerate(zip(asters, ASTER_COVS)):
            k, d, pad = _kdp(cov)
            wt = p[wname]                    # (c8,c4,1,k) or (c8,c4,k,1)
            scale, shift = _fold_bn(p[bname], p['bn2'],
                                    branch * c8, (branch + 1) * c8)
            shs.append(shift)
            for t in range(k):
                m = (wt[:, :, 0, t] if wt.shape[2] == 1 else wt[:, :, t, 0]).T
                key = key_fn(PMAX - pad + t * d)
                blk = taps.get(key, jnp.zeros((na * c4, na * c8), jnp.float32))
                taps[key] = blk.at[a * c4:(a + 1) * c4,
                                   a * c8:(a + 1) * c8].set(m * scale[None, :])
        return taps, jnp.concatenate(shs)

    # d1 (1,k along W) + d2 (k,1 along H), merged on one doubly padded input.
    t1, sh1 = branch_taps(0, 'd1_w', 'd1_b', lambda dlt: (PMAX, dlt))
    t2, sh2 = branch_taps(1, 'd2_w', 'd2_b', lambda dlt: (dlt, PMAX))
    keys = sorted(set(t1) | set(t2))
    n_raw = 2 * na * c8
    n_pad = _round_up(n_raw, 128)
    stack = []
    for key in keys:
        m = jnp.zeros((na * c4, n_pad), jnp.float32)
        if key in t1:
            m = m.at[:, :na * c8].set(t1[key])
        if key in t2:
            m = m.at[:, na * c8:n_raw].set(t2[key])
        stack.append(m)
    plan['d12'] = _entry(keys, jnp.stack(stack),
                         _pad_vec(jnp.concatenate([sh1, sh2]), n_pad), n_raw)

    # d3 ((k,1) along H of h_transform) and d4 ((1,k) along W of v_transform).
    for name, branch, wname, bname, key_fn in (
            ('d3', 2, 'd3_w', 'd3_b', lambda dlt: (dlt, 0)),
            ('d4', 3, 'd4_w', 'd4_b', lambda dlt: (0, dlt))):
        t, sh = branch_taps(branch, wname, bname, key_fn)
        keys = sorted(t)
        n_raw = na * c8
        n_pad = _round_up(n_raw, 128)
        plan[name] = _entry(keys,
                            jnp.stack([_pad_cols(t[k], n_pad) for k in keys]),
                            _pad_vec(sh, n_pad), n_raw)

    # -- fused head: ConvTranspose2d(3,s=2,p=1,op=1)+bn3+relu -> conv4+bn4+relu
    #    -> DecoderBlock 1x1+bn+relu, on the 4-phase deconv decomposition. ----
    cin = 4 * na * c8            # == na*c2, branch-major [x1|x2|x3|x4] channels
    n0, n1, n2 = 4 * na * c2, 4 * na * Fh, 4 * F
    n2p = _round_up(n2, 128)
    head_taps = ((0, 0), (0, 1), (1, 0), (1, 1))
    w0 = {tp: jnp.zeros((cin, n0), jnp.float32) for tp in head_taps}
    w1 = jnp.zeros((4, na, c2, 4, na, Fh), jnp.float32)
    sh3, sh4 = [], []
    for a, p in enumerate(asters):
        scale3, shift3 = _fold_bn(p['conv3_b'], p['bn3'])
        sh3.append(shift3)
        wt = p['conv3_w'] * scale3[None, :, None, None]   # (c2_in, c2_out, 3, 3)
        for pi in (0, 1):
            for pj in (0, 1):
                ph = pi * 2 + pj
                for dh in ((0,) if pi == 0 else (0, 1)):
                    kh = 1 if pi == 0 else 2 - 2 * dh
                    for dw in ((0,) if pj == 0 else (0, 1)):
                        kw = 1 if pj == 0 else 2 - 2 * dw
                        blk = wt[:, :, kh, kw].reshape(4, c8, c2)
                        cur = w0[(dh, dw)].reshape(4, na, c8, 4, na, c2)
                        w0[(dh, dw)] = cur.at[:, a, :, ph, a, :].set(
                            blk).reshape(cin, n0)
        scale4, shift4 = _fold_bn(p['conv4_b'], p['bn4'])
        sh4.append(shift4)
        m4 = p['conv4_w'].reshape(Fh, c2).T * scale4[None, :]
        for ph in range(4):
            w1 = w1.at[ph, a, :, ph, a, :].set(m4)
    scale_f, shift_f = _fold_bn(None, params['bn'])
    mf = params['conv1_w'].reshape(F, na * Fh).T * scale_f[None, :]
    w2 = jnp.zeros((4, na * Fh, 4, F), jnp.float32)
    for ph in range(4):
        w2 = w2.at[ph, :, ph, :].set(mf)
    plan['head'] = {
        'taps': head_taps,
        'w0': jnp.stack([w0[tp] for tp in head_taps]).astype(jnp.bfloat16),
        's0': jnp.tile(jnp.concatenate(sh3), 4).reshape(1, -1).astype(jnp.float32),
        'w1': w1.reshape(n0, n1).astype(jnp.bfloat16),
        's1': jnp.tile(jnp.concatenate(sh4), 4).reshape(1, -1).astype(jnp.float32),
        'w2': _pad_cols(w2.reshape(n1, n2), n2p).astype(jnp.bfloat16),
        's2': _pad_vec(jnp.tile(shift_f, 4), n2p).reshape(1, -1).astype(jnp.float32),
        'n_valid': n2,
    }
    return plan


# ----------------------------------------------------------------------------
# DecoderBlock forward (5 fused pallas_calls total)
# ----------------------------------------------------------------------------
def decoder_block_forward(x_nchw, plan):
    na = 3
    x = jnp.transpose(x_nchw, (0, 2, 3, 1))             # NCHW -> NHWC
    B, H, W, C = x.shape
    c4 = plan['conv1']['n_valid'] // na
    c8 = plan['d3']['n_valid'] // na
    F = plan['head']['n_valid'] // 4
    hp, wp = H + 2 * PMAX, W + 2 * PMAX

    # 1) the three conv1 (1x1)+bn1+relu in one call
    e = plan['conv1']
    o = tap_matmul(x.reshape(B * H * W, C), (0,), (e['w0'],), (e['s0'],))
    y = o[:B * H * W, :na * c4].reshape(B, H, W, na * c4)

    # 2) d1 (1,k along W) + d2 (k,1 along H): one call, one doubly padded input
    e = plan['d12']
    yp = jnp.pad(y, ((0, 0), (PMAX, PMAX), (PMAX, PMAX), (0, 0)))
    offs = tuple(dh * wp + dw for dh, dw in e['taps'])
    o = tap_matmul(yp.reshape(B * hp * wp, na * c4), offs, (e['w0'],), (e['s0'],))
    o = o[:B * hp * wp].reshape(B, hp, wp, -1)
    x1 = o[:, :H, :W, :na * c8]
    x2 = o[:, :H, :W, na * c8:2 * na * c8]

    # 3) d3: (k,1) conv along H of h_transform(y), via row-stride offsets
    e = plan['d3']
    w3 = 2 * W - 1
    htp = jnp.pad(h_transform(y), ((0, 0), (PMAX, PMAX), (0, 0), (0, 0)))
    offs = tuple(dh * w3 for dh, _ in e['taps'])
    o = tap_matmul(htp.reshape(B * hp * w3, na * c4), offs, (e['w0'],), (e['s0'],))
    o = o[:B * hp * w3].reshape(B, hp, w3, -1)
    x3 = inv_h_transform(o[:, :H, :, :na * c8])

    # 4) d4: (1,k) conv along W of v_transform(y)
    e = plan['d4']
    h4 = 2 * H - 1
    vtp = jnp.pad(v_transform(y), ((0, 0), (0, 0), (PMAX, PMAX), (0, 0)))
    offs = tuple(dw for _, dw in e['taps'])
    o = tap_matmul(vtp.reshape(B * h4 * wp, na * c4), offs, (e['w0'],), (e['s0'],))
    o = o[:B * h4 * wp].reshape(B, h4, wp, -1)
    x4 = inv_v_transform(o[:, :, :W, :na * c8])

    # 5) fused head: deconv (4-phase) + bn3 + relu + conv4 + bn4 + relu +
    #    final 1x1 + bn + relu, all in one kernel.  The branch->asterisk
    #    interleave is folded into the weight rows, so the input is a plain
    #    channel concat of x1..x4.
    e = plan['head']
    z = jnp.concatenate([x1, x2, x3, x4], axis=-1)       # (B,H,W,4*na*c8)
    zp = jnp.pad(z, ((0, 0), (0, 1), (0, 1), (0, 0)))
    wq = W + 1
    offs = tuple(dh * wq + dw for dh, dw in e['taps'])
    o = tap_matmul(zp.reshape(B * (H + 1) * wq, 4 * na * c8), offs,
                   (e['w0'], e['w1'], e['w2']), (e['s0'], e['s1'], e['s2']),
                   out_dtype=jnp.float32)
    o = o[:B * (H + 1) * wq, :4 * F].reshape(B, H + 1, wq, 2, 2, F)
    o = o[:, :H, :W]
    o = jnp.transpose(o, (0, 1, 3, 2, 4, 5)).reshape(B, 2 * H, 2 * W, F)
    return jnp.transpose(o, (0, 3, 1, 2))                # NHWC -> NCHW


# ----------------------------------------------------------------------------
# Deterministic parameter init (kaiming weights, identity BN running stats)
# ----------------------------------------------------------------------------
def kaiming(key, shape):
    fan_in = shape[1] * (shape[2] * shape[3] if len(shape) == 4 else 1)
    return (jax.random.normal(key, shape, jnp.float32)
            * jnp.sqrt(2.0 / fan_in)).astype(jnp.float32)


def bn_params(c):
    return (jnp.ones((c,), jnp.float32), jnp.zeros((c,), jnp.float32),
            jnp.zeros((c,), jnp.float32), jnp.ones((c,), jnp.float32))


def init_asterisk(key, in_ch, n_filters, cov_size):
    k = 3 if cov_size == 5 else 5
    C4, C8, C2 = in_ch // 4, in_ch // 8, in_ch // 2
    ks = jax.random.split(key, 14)

    def small(kk, c):
        return 0.01 * jax.random.normal(kk, (c,), jnp.float32)

    return {
        'conv1_w': kaiming(ks[0], (C4, in_ch, 1, 1)), 'conv1_b': small(ks[1], C4),
        'bn1': bn_params(C4),
        'd1_w': kaiming(ks[2], (C8, C4, 1, k)), 'd1_b': small(ks[3], C8),
        'd2_w': kaiming(ks[4], (C8, C4, k, 1)), 'd2_b': small(ks[5], C8),
        'd3_w': kaiming(ks[6], (C8, C4, k, 1)), 'd3_b': small(ks[7], C8),
        'd4_w': kaiming(ks[8], (C8, C4, 1, k)), 'd4_b': small(ks[9], C8),
        'bn2': bn_params(C2),
        'conv3_w': kaiming(ks[10], (C2, C2, 3, 3)), 'conv3_b': small(ks[11], C2),
        'bn3': bn_params(C2),
        'conv4_w': kaiming(ks[12], (n_filters, C2, 1, 1)),
        'conv4_b': small(ks[13], n_filters),
        'bn4': bn_params(n_filters),
    }


def init_decoder_block(key, in_channels, filters):
    k1, k2, k3, k4 = jax.random.split(key, 4)
    return {
        'aster1': init_asterisk(k1, in_channels, filters // 2, 5),
        'aster2': init_asterisk(k2, in_channels, filters // 2, 9),
        'aster3': init_asterisk(k3, in_channels, filters // 2, 13),
        'conv1_w': kaiming(k4, (filters, filters // 2 * 3, 1, 1)),
        'bn': bn_params(filters),
    }


if __name__ == "__main__":
    B, in_channels, H, W = 2, 16, 16, 16
    filters = 8

    key = jax.random.PRNGKey(0)
    kx, kp = jax.random.split(key)
    x = jax.random.normal(kx, (B, in_channels, H, W), jnp.float32)  # NCHW
    params = init_decoder_block(kp, in_channels, filters)

    plan = build_plan(params)         # one-time weight merging / BN folding
    fwd = jax.jit(lambda inp: decoder_block_forward(inp, plan))
    out = jax.block_until_ready(fwd(x))

    assert out.shape == (B, filters, 2 * H, 2 * W), out.shape
    assert bool(jnp.all(jnp.isfinite(out)))
    assert bool(jnp.all(out >= 0.0))   # final ReLU
    print("KERNEL_OK")
</pallas_src>

<mosaic_0001>
module attributes {stable_mosaic.version = 11 : i64} {
  func.func @kernel(%arg0: i32, %arg1: memref<256x16xbf16, #tpu.memory_space<vmem>>, %arg2: memref<1x16x128xbf16, #tpu.memory_space<vmem>>, %arg3: memref<1x128xf32, #tpu.memory_space<vmem>>, %arg4: memref<256x128xbf16, #tpu.memory_space<vmem>>) attributes {dimension_semantics = [#tpu.dimension_semantics<parallel>], iteration_bounds = array<i64: 2>, scalar_prefetch = 0 : i64, scratch_operands = 0 : i64, tpu.core_type = #tpu.core_type<tc>, window_params = [{transform_indices = @transform_0, window_bounds = array<i64: 256, 16>}, {pipeline_mode = #tpu.pipeline_mode<synchronous>, transform_indices = @transform_1, window_bounds = array<i64: 1, 16, 128>}, {pipeline_mode = #tpu.pipeline_mode<synchronous>, transform_indices = @transform_2, window_bounds = array<i64: 1, 128>}, {transform_indices = @transform_3, window_bounds = array<i64: 256, 128>}]} {
    %c0 = arith.constant 0 : index
    %c0_0 = arith.constant 0 : index
    %0 = vector.load %arg1[%c0, %c0_0] : memref<256x16xbf16, #tpu.memory_space<vmem>>, vector<256x16xbf16>
    %c0_1 = arith.constant 0 : index
    %c0_2 = arith.constant 0 : index
    %1 = vector.load %arg3[%c0_1, %c0_2] : memref<1x128xf32, #tpu.memory_space<vmem>>, vector<1x128xf32>
    %c0_3 = arith.constant 0 : index
    %c0_4 = arith.constant 0 : index
    %c0_5 = arith.constant 0 : index
    %2 = vector.load %arg2[%c0_3, %c0_4, %c0_5] : memref<1x16x128xbf16, #tpu.memory_space<vmem>>, vector<1x16x128xbf16>
    %3 = vector.shape_cast %2 : vector<1x16x128xbf16> to vector<16x128xbf16>
    %cst = arith.constant dense<0.000000e+00> : vector<256x128xf32>
    %4 = tpu.matmul %0, %3, %cst {dimension_numbers = #tpu.dot_dimension_numbers<[1], [0], [0], [1], [0, 0, 1, 1], [], []>} : vector<256x16xbf16>, vector<16x128xbf16>, vector<256x128xf32> -> vector<256x128xf32>
    %5 = vector.broadcast %1 : vector<1x128xf32> to vector<256x128xf32>
    %6 = arith.addf %4, %5 : vector<256x128xf32>
    %cst_6 = arith.constant 0.000000e+00 : f32
    %7 = vector.broadcast %cst_6 : f32 to vector<256x128xf32>
    %8 = arith.maximumf %6, %7 : vector<256x128xf32>
    %9 = arith.truncf %8 : vector<256x128xf32> to vector<256x128xbf16>
    %c0_7 = arith.constant 0 : index
    %c0_8 = arith.constant 0 : index
    %10 = vector.load %arg4[%c0_7, %c0_8] : memref<256x128xbf16, #tpu.memory_space<vmem>>, vector<256x128xbf16>
    tpu.vector_store %arg4[%c0_7, %c0_8], %9 {strides = array<i32>} : memref<256x128xbf16, #tpu.memory_space<vmem>>, vector<256x128xbf16>,
    return
  }
  func.func @transform_0(%arg0: i32) -> (i32, i32) {
    %c0_i32 = arith.constant 0 : i32
    %c0_i32_0 = arith.constant 0 : i32
    return %arg0, %c0_i32 : i32, i32
  }
  func.func @transform_1(%arg0: i32) -> (i32, i32, i32) {
    %c0_i32 = arith.constant 0 : i32
    %c0_i32_0 = arith.constant 0 : i32
    %c0_i32_1 = arith.constant 0 : i32
    %c0_i32_2 = arith.constant 0 : i32
    return %c0_i32, %c0_i32_0, %c0_i32_1 : i32, i32, i32
  }
  func.func @transform_2(%arg0: i32) -> (i32, i32) {
    %c0_i32 = arith.constant 0 : i32
    %c0_i32_0 = arith.constant 0 : i32
    %c0_i32_1 = arith.constant 0 : i32
    return %c0_i32, %c0_i32_0 : i32, i32
  }
  func.func @transform_3(%arg0: i32) -> (i32, i32) {
    %c0_i32 = arith.constant 0 : i32
    %c0_i32_0 = arith.constant 0 : i32
    return %arg0, %c0_i32 : i32, i32
  }
}

module attributes {stable_mosaic.version = 11 : i64} {
  func.func @kernel(%arg0: i32, %arg1: memref<384x12xbf16, #tpu.memory_space<vmem>>, %arg2: memref<384x12xbf16, #tpu.memory_space<vmem>>, %arg3: memref<17x12x128xbf16, #tpu.memory_space<vmem>>, %arg4: memref<1x128xf32, #tpu.memory_space<vmem>>, %arg5: memref<384x128xbf16, #tpu.memory_space<vmem>>) attributes {dimension_semantics = [#tpu.dimension_semantics<parallel>], iteration_bounds = array<i64: 5>, scalar_prefetch = 0 : i64, scratch_operands = 0 : i64, tpu.core_type = #tpu.core_type<tc>, window_params = [{transform_indices = @transform_0, window_bounds = array<i64: 384, 12>}, {transform_indices = @transform_1, window_bounds = array<i64: 384, 12>}, {pipeline_mode = #tpu.pipeline_mode<synchronous>, transform_indices = @transform_2, window_bounds = array<i64: 17, 12, 128>}, {pipeline_mode = #tpu.pipeline_mode<synchronous>, transform_indices = @transform_3, window_bounds = array<i64: 1, 128>}, {transform_indices = @transform_4, window_bounds = array<i64: 384, 128>}]} {
    %c0 = arith.constant 0 : index
    %c0_0 = arith.constant 0 : index
    %0 = vector.load %arg1[%c0, %c0_0] : memref<384x12xbf16, #tpu.memory_space<vmem>>, vector<384x12xbf16>
    %c0_1 = arith.constant 0 : index
    %c0_2 = arith.constant 0 : index
    %1 = vector.load %arg2[%c0_1, %c0_2] : memref<384x12xbf16, #tpu.memory_space<vmem>>, vector<384x12xbf16>
    %2 = tpu.concatenate %0, %1 in 0 : vector<384x12xbf16>, vector<384x12xbf16> -> vector<768x12xbf16>
    %c0_3 = arith.constant 0 : index
    %c0_4 = arith.constant 0 : index
    %3 = vector.load %arg4[%c0_3, %c0_4] : memref<1x128xf32, #tpu.memory_space<vmem>>, vector<1x128xf32>
    %4 = vector.extract_strided_slice %2 {offsets = [6, 0], sizes = [384, 12], strides = [1, 1]} : vector<768x12xbf16> to vector<384x12xbf16>
    %c0_5 = arith.constant 0 : index
    %c0_6 = arith.constant 0 : index
    %c0_7 = arith.constant 0 : index
    %5 = vector.load %arg3[%c0_5, %c0_6, %c0_7] : memref<17x12x128xbf16, #tpu.memory_space<vmem>>, vector<1x12x128xbf16>
    %6 = vector.shape_cast %5 : vector<1x12x128xbf16> to vector<12x128xbf16>
    %cst = arith.constant dense<0.000000e+00> : vector<384x128xf32>
    %7 = tpu.matmul %4, %6, %cst {dimension_numbers = #tpu.dot_dimension_numbers<[1], [0], [0], [1], [0, 0, 1, 1], [], []>} : vector<384x12xbf16>, vector<12x128xbf16>, vector<384x128xf32> -> vector<384x128xf32>
    %8 = vector.extract_strided_slice %2 {offsets = [62, 0], sizes = [384, 12], strides = [1, 1]} : vector<768x12xbf16> to vector<384x12xbf16>
    %c1 = arith.constant 1 : index
    %c0_8 = arith.constant 0 : index
    %c0_9 = arith.constant 0 : index
    %9 = vector.load %arg3[%c1, %c0_8, %c0_9] : memref<17x12x128xbf16, #tpu.memory_space<vmem>>, vector<1x12x128xbf16>
    %10 = vector.shape_cast %9 : vector<1x12x128xbf16> to vector<12x128xbf16>
    %cst_10 = arith.constant dense<0.000000e+00> : vector<384x128xf32>
    %11 = tpu.matmul %8, %10, %cst_10 {dimension_numbers = #tpu.dot_dimension_numbers<[1], [0], [0], [1], [0, 0, 1, 1], [], []>} : vector<384x12xbf16>, vector<12x128xbf16>, vector<384x128xf32> -> vector<384x128xf32>
    %12 = arith.addf %7, %11 : vector<384x128xf32>
    %13 = vector.extract_strided_slice %2 {offsets = [90, 0], sizes = [384, 12], strides = [1, 1]} : vector<768x12xbf16> to vector<384x12xbf16>
    %c2 = arith.constant 2 : index
    %c0_11 = arith.constant 0 : index
    %c0_12 = arith.constant 0 : index
    %14 = vector.load %arg3[%c2, %c0_11, %c0_12] : memref<17x12x128xbf16, #tpu.memory_space<vmem>>, vector<1x12x128xbf16>
    %15 = vector.shape_cast %14 : vector<1x12x128xbf16> to vector<12x128xbf16>
    %cst_13 = arith.constant dense<0.000000e+00> : vector<384x128xf32>
    %16 = tpu.matmul %13, %15, %cst_13 {dimension_numbers = #tpu.dot_dimension_numbers<[1], [0], [0], [1], [0, 0, 1, 1], [], []>} : vector<384x12xbf16>, vector<12x128xbf16>, vector<384x128xf32> -> vector<384x128xf32>
    %17 = arith.addf %12, %16 : vector<384x128xf32>
    %18 = vector.extract_strided_slice %2 {offsets = [118, 0], sizes = [384, 12], strides = [1, 1]} : vector<768x12xbf16> to vector<384x12xbf16>
    %c3 = arith.constant 3 : index
    %c0_14 = arith.constant 0 : index
    %c0_15 = arith.constant 0 : index
    %19 = vector.load %arg3[%c3, %c0_14, %c0_15] : memref<17x12x128xbf16, #tpu.memory_space<vmem>>, vector<1x12x128xbf16>
    %20 = vector.shape_cast %19 : vector<1x12x128xbf16> to vector<12x128xbf16>
    %cst_16 = arith.constant dense<0.000000e+00> : vector<384x128xf32>
    %21 = tpu.matmul %18, %20, %cst_16 {dimension_numbers = #tpu.dot_dimension_numbers<[1], [0], [0], [1], [0, 0, 1, 1], [], []>} : vector<384x12xbf16>, vector<12x128xbf16>, vector<384x128xf32> -> vector<384x128xf32>
    %22 = arith.addf %17, %21 : vector<384x128xf32>
    %23 = vector.extract_strided_slice %2 {offsets = [168, 0], sizes = [384, 12], strides = [1, 1]} : vector<768x12xbf16> to vector<384x12xbf16>
    %c4 = arith.constant 4 : index
    %c0_17 = arith.constant 0 : index
    %c0_18 = arith.constant 0 : index
    %24 = vector.load %arg3[%c4, %c0_17, %c0_18] : memref<17x12x128xbf16, #tpu.memory_space<vmem>>, vector<1x12x128xbf16>
    %25 = vector.shape_cast %24 : vector<1x12x128xbf16> to vector<12x128xbf16>
    %cst_19 = arith.constant dense<0.000000e+00> : vector<384x128xf32>
    %26 = tpu.matmul %23, %25, %cst_19 {dimension_numbers = #tpu.dot_dimension_numbers<[1], [0], [0], [1], [0, 0, 1, 1], [], []>} : vector<384x12xbf16>, vector<12x128xbf16>, vector<384x128xf32> -> vector<384x128xf32>
    %27 = arith.addf %22, %26 : vector<384x128xf32>
    %28 = vector.extract_strided_slice %2 {offsets = [170, 0], sizes = [384, 12], strides = [1, 1]} : vector<768x12xbf16> to vector<384x12xbf16>
    %c5 = arith.constant 5 : index
    %c0_20 = arith.constant 0 : index
    %c0_21 = arith.constant 0 : index
    %29 = vector.load %arg3[%c5, %c0_20, %c0_21] : memref<17x12x128xbf16, #tpu.memory_space<vmem>>, vector<1x12x128xbf16>
    %30 = vector.shape_cast %29 : vector<1x12x128xbf16> to vector<12x128xbf16>
    %cst_22 = arith.constant dense<0.000000e+00> : vector<384x128xf32>
    %31 = tpu.matmul %28, %30, %cst_22 {dimension_numbers = #tpu.dot_dimension_numbers<[1], [0], [0], [1], [0, 0, 1, 1], [], []>} : vector<384x12xbf16>, vector<12x128xbf16>, vector<384x128xf32> -> vector<384x128xf32>
    %32 = arith.addf %27, %31 : vector<384x128xf32>
    %33 = vector.extract_strided_slice %2 {offsets = [171, 0], sizes = [384, 12], strides = [1, 1]} : vector<768x12xbf16> to vector<384x12xbf16>
    %c6 = arith.constant 6 : index
    %c0_23 = arith.constant 0 : index
    %c0_24 = arith.constant 0 : index
    %34 = vector.load %arg3[%c6, %c0_23, %c0_24] : memref<17x12x128xbf16, #tpu.memory_space<vmem>>, vector<1x12x128xbf16>
    %35 = vector.shape_cast %34 : vector<1x12x128xbf16> to vector<12x128xbf16>
    %cst_25 = arith.constant dense<0.000000e+00> : vector<384x128xf32>
    %36 = tpu.matmul %33, %35, %cst_25 {dimension_numbers = #tpu.dot_dimension_numbers<[1], [0], [0], [1], [0, 0, 1, 1], [], []>} : vector<384x12xbf16>, vector<12x128xbf16>, vector<384x128xf32> -> vector<384x128xf32>
    %37 = arith.addf %32, %36 : vector<384x128xf32>
    %38 = vector.extract_strided_slice %2 {offsets = [172, 0], sizes = [384, 12], strides = [1, 1]} : vector<768x12xbf16> to vector<384x12xbf16>
    %c7 = arith.constant 7 : index
    %c0_26 = arith.constant 0 : index
    %c0_27 = arith.constant 0 : index
    %39 = vector.load %arg3[%c7, %c0_26, %c0_27] : memref<17x12x128xbf16, #tpu.memory_space<vmem>>, vector<1x12x128xbf16>
    %40 = vector.shape_cast %39 : vector<1x12x128xbf16> to vector<12x128xbf16>
    %cst_28 = arith.constant dense<0.000000e+00> : vector<384x128xf32>
    %41 = tpu.matmul %38, %40, %cst_28 {dimension_numbers = #tpu.dot_dimension_numbers<[1], [0], [0], [1], [0, 0, 1, 1], [], []>} : vector<384x12xbf16>, vector<12x128xbf16>, vector<384x128xf32> -> vector<384x128xf32>
    %42 = arith.addf %37, %41 : vector<384x128xf32>
    %43 = vector.extract_strided_slice %2 {offsets = [174, 0], sizes = [384, 12], strides = [1, 1]} : vector<768x12xbf16> to vector<384x12xbf16>
    %c8 = arith.constant 8 : index
    %c0_29 = arith.constant 0 : index
    %c0_30 = arith.constant 0 : index
    %44 = vector.load %arg3[%c8, %c0_29, %c0_30] : memref<17x12x128xbf16, #tpu.memory_space<vmem>>, vector<1x12x128xbf16>
    %45 = vector.shape_cast %44 : vector<1x12x128xbf16> to vector<12x128xbf16>
    %cst_31 = arith.constant dense<0.000000e+00> : vector<384x128xf32>
    %46 = tpu.matmul %43, %45, %cst_31 {dimension_numbers = #tpu.dot_dimension_numbers<[1], [0], [0], [1], [0, 0, 1, 1], [], []>} : vector<384x12xbf16>, vector<12x128xbf16>, vector<384x128xf32> -> vector<384x128xf32>
    %47 = arith.addf %42, %46 : vector<384x128xf32>
    %48 = vector.extract_strided_slice %2 {offsets = [176, 0], sizes = [384, 12], strides = [1, 1]} : vector<768x12xbf16> to vector<384x12xbf16>
    %c9 = arith.constant 9 : index
    %c0_32 = arith.constant 0 : index
    %c0_33 = arith.constant 0 : index
    %49 = vector.load %arg3[%c9, %c0_32, %c0_33] : memref<17x12x128xbf16, #tpu.memory_space<vmem>>, vector<1x12x128xbf16>
    %50 = vector.shape_cast %49 : vector<1x12x128xbf16> to vector<12x128xbf16>
    %cst_34 = arith.constant dense<0.000000e+00> : vector<384x128xf32>
    %51 = tpu.matmul %48, %50, %cst_34 {dimension_numbers = #tpu.dot_dimension_numbers<[1], [0], [0], [1], [0, 0, 1, 1], [], []>} : vector<384x12xbf16>, vector<12x128xbf16>, vector<384x128xf32> -> vector<384x128xf32>
    %52 = arith.addf %47, %51 : vector<384x128xf32>
    %53 = vector.extract_strided_slice %2 {offsets = [177, 0], sizes = [384, 12], strides = [1, 1]} : vector<768x12xbf16> to vector<384x12xbf16>
    %c10 = arith.constant 10 : index
    %c0_35 = arith.constant 0 : index
    %c0_36 = arith.constant 0 : index
    %54 = vector.load %arg3[%c10, %c0_35, %c0_36] : memref<17x12x128xbf16, #tpu.memory_space<vmem>>, vector<1x12x128xbf16>
    %55 = vector.shape_cast %54 : vector<1x12x128xbf16> to vector<12x128xbf16>
    %cst_37 = arith.constant dense<0.000000e+00> : vector<384x128xf32>
    %56 = tpu.matmul %53, %55, %cst_37 {dimension_numbers = #tpu.dot_dimension_numbers<[1], [0], [0], [1], [0, 0, 1, 1], [], []>} : vector<384x12xbf16>, vector<12x128xbf16>, vector<384x128xf32> -> vector<384x128xf32>
    %57 = arith.addf %52, %56 : vector<384x128xf32>
    %58 = vector.extract_strided_slice %2 {offsets = [178, 0], sizes = [384, 12], strides = [1, 1]} : vector<768x12xbf16> to vector<384x12xbf16>
    %c11 = arith.constant 11 : index
    %c0_38 = arith.constant 0 : index
    %c0_39 = arith.constant 0 : index
    %59 = vector.load %arg3[%c11, %c0_38, %c0_39] : memref<17x12x128xbf16, #tpu.memory_space<vmem>>, vector<1x12x128xbf16>
    %60 = vector.shape_cast %59 : vector<1x12x128xbf16> to vector<12x128xbf16>
    %cst_40 = arith.constant dense<0.000000e+00> : vector<384x128xf32>
    %61 = tpu.matmul %58, %60, %cst_40 {dimension_numbers = #tpu.dot_dimension_numbers<[1], [0], [0], [1], [0, 0, 1, 1], [], []>} : vector<384x12xbf16>, vector<12x128xbf16>, vector<384x128xf32> -> vector<384x128xf32>
    %62 = arith.addf %57, %61 : vector<384x128xf32>
    %63 = vector.extract_strided_slice %2 {offsets = [180, 0], sizes = [384, 12], strides = [1, 1]} : vector<768x12xbf16> to vector<384x12xbf16>
    %c12 = arith.constant 12 : index
    %c0_41 = arith.constant 0 : index
    %c0_42 = arith.constant 0 : index
    %64 = vector.load %arg3[%c12, %c0_41, %c0_42] : memref<17x12x128xbf16, #tpu.memory_space<vmem>>, vector<1x12x128xbf16>
    %65 = vector.shape_cast %64 : vector<1x12x128xbf16> to vector<12x128xbf16>
    %cst_43 = arith.constant dense<0.000000e+00> : vector<384x128xf32>
    %66 = tpu.matmul %63, %65, %cst_43 {dimension_numbers = #tpu.dot_dimension_numbers<[1], [0], [0], [1], [0, 0, 1, 1], [], []>} : vector<384x12xbf16>, vector<12x128xbf16>, vector<384x128xf32> -> vector<384x128xf32>
    %67 = arith.addf %62, %66 : vector<384x128xf32>
    %68 = vector.extract_strided_slice %2 {offsets = [230, 0], sizes = [384, 12], strides = [1, 1]} : vector<768x12xbf16> to vector<384x12xbf16>
    %c13 = arith.constant 13 : index
    %c0_44 = arith.constant 0 : index
    %c0_45 = arith.constant 0 : index
    %69 = vector.load %arg3[%c13, %c0_44, %c0_45] : memref<17x12x128xbf16, #tpu.memory_space<vmem>>, vector<1x12x128xbf16>
    %70 = vector.shape_cast %69 : vector<1x12x128xbf16> to vector<12x128xbf16>
    %cst_46 = arith.constant dense<0.000000e+00> : vector<384x128xf32>
    %71 = tpu.matmul %68, %70, %cst_46 {dimension_numbers = #tpu.dot_dimension_numbers<[1], [0], [0], [1], [0, 0, 1, 1], [], []>} : vector<384x12xbf16>, vector<12x128xbf16>, vector<384x128xf32> -> vector<384x128xf32>
    %72 = arith.addf %67, %71 : vector<384x128xf32>
    %73 = vector.extract_strided_slice %2 {offsets = [258, 0], sizes = [384, 12], strides = [1, 1]} : vector<768x12xbf16> to vector<384x12xbf16>
    %c14 = arith.constant 14 : index
    %c0_47 = arith.constant 0 : index
    %c0_48 = arith.constant 0 : index
    %74 = vector.load %arg3[%c14, %c0_47, %c0_48] : memref<17x12x128xbf16, #tpu.memory_space<vmem>>, vector<1x12x128xbf16>
    %75 = vector.shape_cast %74 : vector<1x12x128xbf16> to vector<12x128xbf16>
    %cst_49 = arith.constant dense<0.000000e+00> : vector<384x128xf32>
    %76 = tpu.matmul %73, %75, %cst_49 {dimension_numbers = #tpu.dot_dimension_numbers<[1], [0], [0], [1], [0, 0, 1, 1], [], []>} : vector<384x12xbf16>, vector<12x128xbf16>, vector<384x128xf32> -> vector<384x128xf32>
    %77 = arith.addf %72, %76 : vector<384x128xf32>
    %78 = vector.extract_strided_slice %2 {offsets = [286, 0], sizes = [384, 12], strides = [1, 1]} : vector<768x12xbf16> to vector<384x12xbf16>
    %c15 = arith.constant 15 : index
    %c0_50 = arith.constant 0 : index
    %c0_51 = arith.constant 0 : index
    %79 = vector.load %arg3[%c15, %c0_50, %c0_51] : memref<17x12x128xbf16, #tpu.memory_space<vmem>>, vector<1x12x128xbf16>
    %80 = vector.shape_cast %79 : vector<1x12x128xbf16> to vector<12x128xbf16>
    %cst_52 = arith.constant dense<0.000000e+00> : vector<384x128xf32>
    %81 = tpu.matmul %78, %80, %cst_52 {dimension_numbers = #tpu.dot_dimension_numbers<[1], [0], [0], [1], [0, 0, 1, 1], [], []>} : vector<384x12xbf16>, vector<12x128xbf16>, vector<384x128xf32> -> vector<384x128xf32>
    %82 = arith.addf %77, %81 : vector<384x128xf32>
    %83 = vector.extract_strided_slice %2 {offsets = [342, 0], sizes = [384, 12], strides = [1, 1]} : vector<768x12xbf16> to vector<384x12xbf16>
    %c16 = arith.constant 16 : index
    %c0_53 = arith.constant 0 : index
    %c0_54 = arith.constant 0 : index
    %84 = vector.load %arg3[%c16, %c0_53, %c0_54] : memref<17x12x128xbf16, #tpu.memory_space<vmem>>, vector<1x12x128xbf16>
    %85 = vector.shape_cast %84 : vector<1x12x128xbf16> to vector<12x128xbf16>
    %cst_55 = arith.constant dense<0.000000e+00> : vector<384x128xf32>
    %86 = tpu.matmul %83, %85, %cst_55 {dimension_numbers = #tpu.dot_dimension_numbers<[1], [0], [0], [1], [0, 0, 1, 1], [], []>} : vector<384x12xbf16>, vector<12x128xbf16>, vector<384x128xf32> -> vector<384x128xf32>
    %87 = arith.addf %82, %86 : vector<384x128xf32>
    %88 = vector.broadcast %3 : vector<1x128xf32> to vector<384x128xf32>
    %89 = arith.addf %87, %88 : vector<384x128xf32>
    %cst_56 = arith.constant 0.000000e+00 : f32
    %90 = vector.broadcast %cst_56 : f32 to vector<384x128xf32>
    %91 = arith.maximumf %89, %90 : vector<384x128xf32>
    %92 = arith.truncf %91 : vector<384x128xf32> to vector<384x128xbf16>
    %c0_57 = arith.constant 0 : index
    %c0_58 = arith.constant 0 : index
    %93 = vector.load %arg5[%c0_57, %c0_58] : memref<384x128xbf16, #tpu.memory_space<vmem>>, vector<384x128xbf16>
    tpu.vector_store %arg5[%c0_57, %c0_58], %92 {strides = array<i32>} : memref<384x128xbf16, #tpu.memory_space<vmem>>, vector<384x128xbf16>,
    return
  }
  func.func @transform_0(%arg0: i32) -> (i32, i32) {
    %c0_i32 = arith.constant 0 : i32
    %c0_i32_0 = arith.constant 0 : i32
    return %arg0, %c0_i32 : i32, i32
  }
  func.func @transform_1(%arg0: i32) -> (i32, i32) {
    %c1_i32 = arith.constant 1 : i32
    %0 = arith.addi %arg0, %c1_i32 : i32
    %c0_i32 = arith.constant 0 : i32
    %c0_i32_0 = arith.constant 0 : i32
    return %0, %c0_i32 : i32, i32
  }
  func.func @transform_2(%arg0: i32) -> (i32, i32, i32) {
    %c0_i32 = arith.constant 0 : i32
    %c0_i32_0 = arith.constant 0 : i32
    %c0_i32_1 = arith.constant 0 : i32
    %c0_i32_2 = arith.constant 0 : i32
    return %c0_i32, %c0_i32_0, %c0_i32_1 : i32, i32, i32
  }
  func.func @transform_3(%arg0: i32) -> (i32, i32) {
    %c0_i32 = arith.constant 0 : i32
    %c0_i32_0 = arith.constant 0 : i32
    %c0_i32_1 = arith.constant 0 : i32
    return %c0_i32, %c0_i32_0 : i32, i32
  }
  func.func @transform_4(%arg0: i32) -> (i32, i32) {
    %c0_i32 = arith.constant 0 : i32
    %c0_i32_0 = arith.constant 0 : i32
    return %arg0, %c0_i32 : i32, i32
  }
}

module attributes {stable_mosaic.version = 11 : i64} {
  func.func @kernel(%arg0: i32, %arg1: memref<384x12xbf16, #tpu.memory_space<vmem>>, %arg2: memref<384x12xbf16, #tpu.memory_space<vmem>>, %arg3: memref<9x12x128xbf16, #tpu.memory_space<vmem>>, %arg4: memref<1x128xf32, #tpu.memory_space<vmem>>, %arg5: memref<384x128xbf16, #tpu.memory_space<vmem>>) attributes {dimension_semantics = [#tpu.dimension_semantics<parallel>], iteration_bounds = array<i64: 5>, scalar_prefetch = 0 : i64, scratch_operands = 0 : i64, tpu.core_type = #tpu.core_type<tc>, window_params = [{transform_indices = @transform_0, window_bounds = array<i64: 384, 12>}, {transform_indices = @transform_1, window_bounds = array<i64: 384, 12>}, {pipeline_mode = #tpu.pipeline_mode<synchronous>, transform_indices = @transform_2, window_bounds = array<i64: 9, 12, 128>}, {pipeline_mode = #tpu.pipeline_mode<synchronous>, transform_indices = @transform_3, window_bounds = array<i64: 1, 128>}, {transform_indices = @transform_4, window_bounds = array<i64: 384, 128>}]} {
    %c0 = arith.constant 0 : index
    %c0_0 = arith.constant 0 : index
    %0 = vector.load %arg1[%c0, %c0_0] : memref<384x12xbf16, #tpu.memory_space<vmem>>, vector<384x12xbf16>
    %c0_1 = arith.constant 0 : index
    %c0_2 = arith.constant 0 : index
    %1 = vector.load %arg2[%c0_1, %c0_2] : memref<384x12xbf16, #tpu.memory_space<vmem>>, vector<384x12xbf16>
    %2 = tpu.concatenate %0, %1 in 0 : vector<384x12xbf16>, vector<384x12xbf16> -> vector<768x12xbf16>
    %c0_3 = arith.constant 0 : index
    %c0_4 = arith.constant 0 : index
    %3 = vector.load %arg4[%c0_3, %c0_4] : memref<1x128xf32, #tpu.memory_space<vmem>>, vector<1x128xf32>
    %4 = vector.extract_strided_slice %2 {offsets = [0, 0], sizes = [384, 12], strides = [1, 1]} : vector<768x12xbf16> to vector<384x12xbf16>
    %c0_5 = arith.constant 0 : index
    %c0_6 = arith.constant 0 : index
    %c0_7 = arith.constant 0 : index
    %5 = vector.load %arg3[%c0_5, %c0_6, %c0_7] : memref<9x12x128xbf16, #tpu.memory_space<vmem>>, vector<1x12x128xbf16>
    %6 = vector.shape_cast %5 : vector<1x12x128xbf16> to vector<12x128xbf16>
    %cst = arith.constant dense<0.000000e+00> : vector<384x128xf32>
    %7 = tpu.matmul %4, %6, %cst {dimension_numbers = #tpu.dot_dimension_numbers<[1], [0], [0], [1], [0, 0, 1, 1], [], []>} : vector<384x12xbf16>, vector<12x128xbf16>, vector<384x128xf32> -> vector<384x128xf32>
    %8 = vector.extract_strided_slice %2 {offsets = [62, 0], sizes = [384, 12], strides = [1, 1]} : vector<768x12xbf16> to vector<384x12xbf16>
    %c1 = arith.constant 1 : index
    %c0_8 = arith.constant 0 : index
    %c0_9 = arith.constant 0 : index
    %9 = vector.load %arg3[%c1, %c0_8, %c0_9] : memref<9x12x128xbf16, #tpu.memory_space<vmem>>, vector<1x12x128xbf16>
    %10 = vector.shape_cast %9 : vector<1x12x128xbf16> to vector<12x128xbf16>
    %cst_10 = arith.constant dense<0.000000e+00> : vector<384x128xf32>
    %11 = tpu.matmul %8, %10, %cst_10 {dimension_numbers = #tpu.dot_dimension_numbers<[1], [0], [0], [1], [0, 0, 1, 1], [], []>} : vector<384x12xbf16>, vector<12x128xbf16>, vector<384x128xf32> -> vector<384x128xf32>
    %12 = arith.addf %7, %11 : vector<384x128xf32>
    %13 = vector.extract_strided_slice %2 {offsets = [93, 0], sizes = [384, 12], strides = [1, 1]} : vector<768x12xbf16> to vector<384x12xbf16>
    %c2 = arith.constant 2 : index
    %c0_11 = arith.constant 0 : index
    %c0_12 = arith.constant 0 : index
    %14 = vector.load %arg3[%c2, %c0_11, %c0_12] : memref<9x12x128xbf16, #tpu.memory_space<vmem>>, vector<1x12x128xbf16>
    %15 = vector.shape_cast %14 : vector<1x12x128xbf16> to vector<12x128xbf16>
    %cst_13 = arith.constant dense<0.000000e+00> : vector<384x128xf32>
    %16 = tpu.matmul %13, %15, %cst_13 {dimension_numbers = #tpu.dot_dimension_numbers<[1], [0], [0], [1], [0, 0, 1, 1], [], []>} : vector<384x12xbf16>, vector<12x128xbf16>, vector<384x128xf32> -> vector<384x128xf32>
    %17 = arith.addf %12, %16 : vector<384x128xf32>
    %18 = vector.extract_strided_slice %2 {offsets = [124, 0], sizes = [384, 12], strides = [1, 1]} : vector<768x12xbf16> to vector<384x12xbf16>
    %c3 = arith.constant 3 : index
    %c0_14 = arith.constant 0 : index
    %c0_15 = arith.constant 0 : index
    %19 = vector.load %arg3[%c3, %c0_14, %c0_15] : memref<9x12x128xbf16, #tpu.memory_space<vmem>>, vector<1x12x128xbf16>
    %20 = vector.shape_cast %19 : vector<1x12x128xbf16> to vector<12x128xbf16>
    %cst_16 = arith.constant dense<0.000000e+00> : vector<384x128xf32>
    %21 = tpu.matmul %18, %20, %cst_16 {dimension_numbers = #tpu.dot_dimension_numbers<[1], [0], [0], [1], [0, 0, 1, 1], [], []>} : vector<384x12xbf16>, vector<12x128xbf16>, vector<384x128xf32> -> vector<384x128xf32>
    %22 = arith.addf %17, %21 : vector<384x128xf32>
    %23 = vector.extract_strided_slice %2 {offsets = [186, 0], sizes = [384, 12], strides = [1, 1]} : vector<768x12xbf16> to vector<384x12xbf16>
    %c4 = arith.constant 4 : index
    %c0_17 = arith.constant 0 : index
    %c0_18 = arith.constant 0 : index
    %24 = vector.load %arg3[%c4, %c0_17, %c0_18] : memref<9x12x128xbf16, #tpu.memory_space<vmem>>, vector<1x12x128xbf16>
    %25 = vector.shape_cast %24 : vector<1x12x128xbf16> to vector<12x128xbf16>
    %cst_19 = arith.constant dense<0.000000e+00> : vector<384x128xf32>
    %26 = tpu.matmul %23, %25, %cst_19 {dimension_numbers = #tpu.dot_dimension_numbers<[1], [0], [0], [1], [0, 0, 1, 1], [], []>} : vector<384x12xbf16>, vector<12x128xbf16>, vector<384x128xf32> -> vector<384x128xf32>
    %27 = arith.addf %22, %26 : vector<384x128xf32>
    %28 = vector.extract_strided_slice %2 {offsets = [248, 0], sizes = [384, 12], strides = [1, 1]} : vector<768x12xbf16> to vector<384x12xbf16>
    %c5 = arith.constant 5 : index
    %c0_20 = arith.constant 0 : index
    %c0_21 = arith.constant 0 : index
    %29 = vector.load %arg3[%c5, %c0_20, %c0_21] : memref<9x12x128xbf16, #tpu.memory_space<vmem>>, vector<1x12x128xbf16>
    %30 = vector.shape_cast %29 : vector<1x12x128xbf16> to vector<12x128xbf16>
    %cst_22 = arith.constant dense<0.000000e+00> : vector<384x128xf32>
    %31 = tpu.matmul %28, %30, %cst_22 {dimension_numbers = #tpu.dot_dimension_numbers<[1], [0], [0], [1], [0, 0, 1, 1], [], []>} : vector<384x12xbf16>, vector<12x128xbf16>, vector<384x128xf32> -> vector<384x128xf32>
    %32 = arith.addf %27, %31 : vector<384x128xf32>
    %33 = vector.extract_strided_slice %2 {offsets = [279, 0], sizes = [384, 12], strides = [1, 1]} : vector<768x12xbf16> to vector<384x12xbf16>
    %c6 = arith.constant 6 : index
    %c0_23 = arith.constant 0 : index
    %c0_24 = arith.constant 0 : index
    %34 = vector.load %arg3[%c6, %c0_23, %c0_24] : memref<9x12x128xbf16, #tpu.memory_space<vmem>>, vector<1x12x128xbf16>
    %35 = vector.shape_cast %34 : vector<1x12x128xbf16> to vector<12x128xbf16>
    %cst_25 = arith.constant dense<0.000000e+00> : vector<384x128xf32>
    %36 = tpu.matmul %33, %35, %cst_25 {dimension_numbers = #tpu.dot_dimension_numbers<[1], [0], [0], [1], [0, 0, 1, 1], [], []>} : vector<384x12xbf16>, vector<12x128xbf16>, vector<384x128xf32> -> vector<384x128xf32>
    %37 = arith.addf %32, %36 : vector<384x128xf32>
    %38 = vector.extract_strided_slice %2 {offsets = [310, 0], sizes = [384, 12], strides = [1, 1]} : vector<768x12xbf16> to vector<384x12xbf16>
    %c7 = arith.constant 7 : index
    %c0_26 = arith.constant 0 : index
    %c0_27 = arith.constant 0 : index
    %39 = vector.load %arg3[%c7, %c0_26, %c0_27] : memref<9x12x128xbf16, #tpu.memory_space<vmem>>, vector<1x12x128xbf16>
    %40 = vector.shape_cast %39 : vector<1x12x128xbf16> to vector<12x128xbf16>
    %cst_28 = arith.constant dense<0.000000e+00> : vector<384x128xf32>
    %41 = tpu.matmul %38, %40, %cst_28 {dimension_numbers = #tpu.dot_dimension_numbers<[1], [0], [0], [1], [0, 0, 1, 1], [], []>} : vector<384x12xbf16>, vector<12x128xbf16>, vector<384x128xf32> -> vector<384x128xf32>
    %42 = arith.addf %37, %41 : vector<384x128xf32>
    %43 = vector.extract_strided_slice %2 {offsets = [372, 0], sizes = [384, 12], strides = [1, 1]} : vector<768x12xbf16> to vector<384x12xbf16>
    %c8 = arith.constant 8 : index
    %c0_29 = arith.constant 0 : index
    %c0_30 = arith.constant 0 : index
    %44 = vector.load %arg3[%c8, %c0_29, %c0_30] : memref<9x12x128xbf16, #tpu.memory_space<vmem>>, vector<1x12x128xbf16>
    %45 = vector.shape_cast %44 : vector<1x12x128xbf16> to vector<12x128xbf16>
    %cst_31 = arith.constant dense<0.000000e+00> : vector<384x128xf32>
    %46 = tpu.matmul %43, %45, %cst_31 {dimension_numbers = #tpu.dot_dimension_numbers<[1], [0], [0], [1], [0, 0, 1, 1], [], []>} : vector<384x12xbf16>, vector<12x128xbf16>, vector<384x128xf32> -> vector<384x128xf32>
    %47 = arith.addf %42, %46 : vector<384x128xf32>
    %48 = vector.broadcast %3 : vector<1x128xf32> to vector<384x128xf32>
    %49 = arith.addf %47, %48 : vector<384x128xf32>
    %cst_32 = arith.constant 0.000000e+00 : f32
    %50 = vector.broadcast %cst_32 : f32 to vector<384x128xf32>
    %51 = arith.maximumf %49, %50 : vector<384x128xf32>
    %52 = arith.truncf %51 : vector<384x128xf32> to vector<384x128xbf16>
    %c0_33 = arith.constant 0 : index
    %c0_34 = arith.constant 0 : index
    %53 = vector.load %arg5[%c0_33, %c0_34] : memref<384x128xbf16, #tpu.memory_space<vmem>>, vector<384x128xbf16>
    tpu.vector_store %arg5[%c0_33, %c0_34], %52 {strides = array<i32>} : memref<384x128xbf16, #tpu.memory_space<vmem>>, vector<384x128xbf16>,
    return
  }
  func.func @transform_0(%arg0: i32) -> (i32, i32) {
    %c0_i32 = arith.constant 0 : i32
    %c0_i32_0 = arith.constant 0 : i32
    return %arg0, %c0_i32 : i32, i32
  }
  func.func @transform_1(%arg0: i32) -> (i32, i32) {
    %c1_i32 = arith.constant 1 : i32
    %0 = arith.addi %arg0, %c1_i32 : i32
    %c0_i32 = arith.constant 0 : i32
    %c0_i32_0 = arith.constant 0 : i32
    return %0, %c0_i32 : i32, i32
  }
  func.func @transform_2(%arg0: i32) -> (i32, i32, i32) {
    %c0_i32 = arith.constant 0 : i32
    %c0_i32_0 = arith.constant 0 : i32
    %c0_i32_1 = arith.constant 0 : i32
    %c0_i32_2 = arith.constant 0 : i32
    return %c0_i32, %c0_i32_0, %c0_i32_1 : i32, i32, i32
  }
  func.func @transform_3(%arg0: i32) -> (i32, i32) {
    %c0_i32 = arith.constant 0 : i32
    %c0_i32_0 = arith.constant 0 : i32
    %c0_i32_1 = arith.constant 0 : i32
    return %c0_i32, %c0_i32_0 : i32, i32
  }
  func.func @transform_4(%arg0: i32) -> (i32, i32) {
    %c0_i32 = arith.constant 0 : i32
    %c0_i32_0 = arith.constant 0 : i32
    return %arg0, %c0_i32 : i32, i32
  }
}

module attributes {stable_mosaic.version = 11 : i64} {
  func.func @kernel(%arg0: i32, %arg1: memref<256x12xbf16, #tpu.memory_space<vmem>>, %arg2: memref<256x12xbf16, #tpu.memory_space<vmem>>, %arg3: memref<9x12x128xbf16, #tpu.memory_space<vmem>>, %arg4: memref<1x128xf32, #tpu.memory_space<vmem>>, %arg5: memref<256x128xbf16, #tpu.memory_space<vmem>>) attributes {dimension_semantics = [#tpu.dimension_semantics<parallel>], iteration_bounds = array<i64: 7>, scalar_prefetch = 0 : i64, scratch_operands = 0 : i64, tpu.core_type = #tpu.core_type<tc>, window_params = [{transform_indices = @transform_0, window_bounds = array<i64: 256, 12>}, {transform_indices = @transform_1, window_bounds = array<i64: 256, 12>}, {pipeline_mode = #tpu.pipeline_mode<synchronous>, transform_indices = @transform_2, window_bounds = array<i64: 9, 12, 128>}, {pipeline_mode = #tpu.pipeline_mode<synchronous>, transform_indices = @transform_3, window_bounds = array<i64: 1, 128>}, {transform_indices = @transform_4, window_bounds = array<i64: 256, 128>}]} {
    %c0 = arith.constant 0 : index
    %c0_0 = arith.constant 0 : index
    %0 = vector.load %arg1[%c0, %c0_0] : memref<256x12xbf16, #tpu.memory_space<vmem>>, vector<256x12xbf16>
    %c0_1 = arith.constant 0 : index
    %c0_2 = arith.constant 0 : index
    %1 = vector.load %arg2[%c0_1, %c0_2] : memref<256x12xbf16, #tpu.memory_space<vmem>>, vector<256x12xbf16>
    %2 = tpu.concatenate %0, %1 in 0 : vector<256x12xbf16>, vector<256x12xbf16> -> vector<512x12xbf16>
    %c0_3 = arith.constant 0 : index
    %c0_4 = arith.constant 0 : index
    %3 = vector.load %arg4[%c0_3, %c0_4] : memref<1x128xf32, #tpu.memory_space<vmem>>, vector<1x128xf32>
    %4 = vector.extract_strided_slice %2 {offsets = [0, 0], sizes = [256, 12], strides = [1, 1]} : vector<512x12xbf16> to vector<256x12xbf16>
    %c0_5 = arith.constant 0 : index
    %c0_6 = arith.constant 0 : index
    %c0_7 = arith.constant 0 : index
    %5 = vector.load %arg3[%c0_5, %c0_6, %c0_7] : memref<9x12x128xbf16, #tpu.memory_space<vmem>>, vector<1x12x128xbf16>
    %6 = vector.shape_cast %5 : vector<1x12x128xbf16> to vector<12x128xbf16>
    %cst = arith.constant dense<0.000000e+00> : vector<256x128xf32>
    %7 = tpu.matmul %4, %6, %cst {dimension_numbers = #tpu.dot_dimension_numbers<[1], [0], [0], [1], [0, 0, 1, 1], [], []>} : vector<256x12xbf16>, vector<12x128xbf16>, vector<256x128xf32> -> vector<256x128xf32>
    %8 = vector.extract_strided_slice %2 {offsets = [2, 0], sizes = [256, 12], strides = [1, 1]} : vector<512x12xbf16> to vector<256x12xbf16>
    %c1 = arith.constant 1 : index
    %c0_8 = arith.constant 0 : index
    %c0_9 = arith.constant 0 : index
    %9 = vector.load %arg3[%c1, %c0_8, %c0_9] : memref<9x12x128xbf16, #tpu.memory_space<vmem>>, vector<1x12x128xbf16>
    %10 = vector.shape_cast %9 : vector<1x12x128xbf16> to vector<12x128xbf16>
    %cst_10 = arith.constant dense<0.000000e+00> : vector<256x128xf32>
    %11 = tpu.matmul %8, %10, %cst_10 {dimension_numbers = #tpu.dot_dimension_numbers<[1], [0], [0], [1], [0, 0, 1, 1], [], []>} : vector<256x12xbf16>, vector<12x128xbf16>, vector<256x128xf32> -> vector<256x128xf32>
    %12 = arith.addf %7, %11 : vector<256x128xf32>
    %13 = vector.extract_strided_slice %2 {offsets = [3, 0], sizes = [256, 12], strides = [1, 1]} : vector<512x12xbf16> to vector<256x12xbf16>
    %c2 = arith.constant 2 : index
    %c0_11 = arith.constant 0 : index
    %c0_12 = arith.constant 0 : index
    %14 = vector.load %arg3[%c2, %c0_11, %c0_12] : memref<9x12x128xbf16, #tpu.memory_space<vmem>>, vector<1x12x128xbf16>
    %15 = vector.shape_cast %14 : vector<1x12x128xbf16> to vector<12x128xbf16>
    %cst_13 = arith.constant dense<0.000000e+00> : vector<256x128xf32>
    %16 = tpu.matmul %13, %15, %cst_13 {dimension_numbers = #tpu.dot_dimension_numbers<[1], [0], [0], [1], [0, 0, 1, 1], [], []>} : vector<256x12xbf16>, vector<12x128xbf16>, vector<256x128xf32> -> vector<256x128xf32>
    %17 = arith.addf %12, %16 : vector<256x128xf32>
    %18 = vector.extract_strided_slice %2 {offsets = [4, 0], sizes = [256, 12], strides = [1, 1]} : vector<512x12xbf16> to vector<256x12xbf16>
    %c3 = arith.constant 3 : index
    %c0_14 = arith.constant 0 : index
    %c0_15 = arith.constant 0 : index
    %19 = vector.load %arg3[%c3, %c0_14, %c0_15] : memref<9x12x128xbf16, #tpu.memory_space<vmem>>, vector<1x12x128xbf16>
    %20 = vector.shape_cast %19 : vector<1x12x128xbf16> to vector<12x128xbf16>
    %cst_16 = arith.constant dense<0.000000e+00> : vector<256x128xf32>
    %21 = tpu.matmul %18, %20, %cst_16 {dimension_numbers = #tpu.dot_dimension_numbers<[1], [0], [0], [1], [0, 0, 1, 1], [], []>} : vector<256x12xbf16>, vector<12x128xbf16>, vector<256x128xf32> -> vector<256x128xf32>
    %22 = arith.addf %17, %21 : vector<256x128xf32>
    %23 = vector.extract_strided_slice %2 {offsets = [6, 0], sizes = [256, 12], strides = [1, 1]} : vector<512x12xbf16> to vector<256x12xbf16>
    %c4 = arith.constant 4 : index
    %c0_17 = arith.constant 0 : index
    %c0_18 = arith.constant 0 : index
    %24 = vector.load %arg3[%c4, %c0_17, %c0_18] : memref<9x12x128xbf16, #tpu.memory_space<vmem>>, vector<1x12x128xbf16>
    %25 = vector.shape_cast %24 : vector<1x12x128xbf16> to vector<12x128xbf16>
    %cst_19 = arith.constant dense<0.000000e+00> : vector<256x128xf32>
    %26 = tpu.matmul %23, %25, %cst_19 {dimension_numbers = #tpu.dot_dimension_numbers<[1], [0], [0], [1], [0, 0, 1, 1], [], []>} : vector<256x12xbf16>, vector<12x128xbf16>, vector<256x128xf32> -> vector<256x128xf32>
    %27 = arith.addf %22, %26 : vector<256x128xf32>
    %28 = vector.extract_strided_slice %2 {offsets = [8, 0], sizes = [256, 12], strides = [1, 1]} : vector<512x12xbf16> to vector<256x12xbf16>
    %c5 = arith.constant 5 : index
    %c0_20 = arith.constant 0 : index
    %c0_21 = arith.constant 0 : index
    %29 = vector.load %arg3[%c5, %c0_20, %c0_21] : memref<9x12x128xbf16, #tpu.memory_space<vmem>>, vector<1x12x128xbf16>
    %30 = vector.shape_cast %29 : vector<1x12x128xbf16> to vector<12x128xbf16>
    %cst_22 = arith.constant dense<0.000000e+00> : vector<256x128xf32>
    %31 = tpu.matmul %28, %30, %cst_22 {dimension_numbers = #tpu.dot_dimension_numbers<[1], [0], [0], [1], [0, 0, 1, 1], [], []>} : vector<256x12xbf16>, vector<12x128xbf16>, vector<256x128xf32> -> vector<256x128xf32>
    %32 = arith.addf %27, %31 : vector<256x128xf32>
    %33 = vector.extract_strided_slice %2 {offsets = [9, 0], sizes = [256, 12], strides = [1, 1]} : vector<512x12xbf16> to vector<256x12xbf16>
    %c6 = arith.constant 6 : index
    %c0_23 = arith.constant 0 : index
    %c0_24 = arith.constant 0 : index
    %34 = vector.load %arg3[%c6, %c0_23, %c0_24] : memref<9x12x128xbf16, #tpu.memory_space<vmem>>, vector<1x12x128xbf16>
    %35 = vector.shape_cast %34 : vector<1x12x128xbf16> to vector<12x128xbf16>
    %cst_25 = arith.constant dense<0.000000e+00> : vector<256x128xf32>
    %36 = tpu.matmul %33, %35, %cst_25 {dimension_numbers = #tpu.dot_dimension_numbers<[1], [0], [0], [1], [0, 0, 1, 1], [], []>} : vector<256x12xbf16>, vector<12x128xbf16>, vector<256x128xf32> -> vector<256x128xf32>
    %37 = arith.addf %32, %36 : vector<256x128xf32>
    %38 = vector.extract_strided_slice %2 {offsets = [10, 0], sizes = [256, 12], strides = [1, 1]} : vector<512x12xbf16> to vector<256x12xbf16>
    %c7 = arith.constant 7 : index
    %c0_26 = arith.constant 0 : index
    %c0_27 = arith.constant 0 : index
    %39 = vector.load %arg3[%c7, %c0_26, %c0_27] : memref<9x12x128xbf16, #tpu.memory_space<vmem>>, vector<1x12x128xbf16>
    %40 = vector.shape_cast %39 : vector<1x12x128xbf16> to vector<12x128xbf16>
    %cst_28 = arith.constant dense<0.000000e+00> : vector<256x128xf32>
    %41 = tpu.matmul %38, %40, %cst_28 {dimension_numbers = #tpu.dot_dimension_numbers<[1], [0], [0], [1], [0, 0, 1, 1], [], []>} : vector<256x12xbf16>, vector<12x128xbf16>, vector<256x128xf32> -> vector<256x128xf32>
    %42 = arith.addf %37, %41 : vector<256x128xf32>
    %43 = vector.extract_strided_slice %2 {offsets = [12, 0], sizes = [256, 12], strides = [1, 1]} : vector<512x12xbf16> to vector<256x12xbf16>
    %c8 = arith.constant 8 : index
    %c0_29 = arith.constant 0 : index
    %c0_30 = arith.constant 0 : index
    %44 = vector.load %arg3[%c8, %c0_29, %c0_30] : memref<9x12x128xbf16, #tpu.memory_space<vmem>>, vector<1x12x128xbf16>
    %45 = vector.shape_cast %44 : vector<1x12x128xbf16> to vector<12x128xbf16>
    %cst_31 = arith.constant dense<0.000000e+00> : vector<256x128xf32>
    %46 = tpu.matmul %43, %45, %cst_31 {dimension_numbers = #tpu.dot_dimension_numbers<[1], [0], [0], [1], [0, 0, 1, 1], [], []>} : vector<256x12xbf16>, vector<12x128xbf16>, vector<256x128xf32> -> vector<256x128xf32>
    %47 = arith.addf %42, %46 : vector<256x128xf32>
    %48 = vector.broadcast %3 : vector<1x128xf32> to vector<256x128xf32>
    %49 = arith.addf %47, %48 : vector<256x128xf32>
    %cst_32 = arith.constant 0.000000e+00 : f32
    %50 = vector.broadcast %cst_32 : f32 to vector<256x128xf32>
    %51 = arith.maximumf %49, %50 : vector<256x128xf32>
    %52 = arith.truncf %51 : vector<256x128xf32> to vector<256x128xbf16>
    %c0_33 = arith.constant 0 : index
    %c0_34 = arith.constant 0 : index
    %53 = vector.load %arg5[%c0_33, %c0_34] : memref<256x128xbf16, #tpu.memory_space<vmem>>, vector<256x128xbf16>
    tpu.vector_store %arg5[%c0_33, %c0_34], %52 {strides = array<i32>} : memref<256x128xbf16, #tpu.memory_space<vmem>>, vector<256x128xbf16>,
    return
  }
  func.func @transform_0(%arg0: i32) -> (i32, i32) {
    %c0_i32 = arith.constant 0 : i32
    %c0_i32_0 = arith.constant 0 : i32
    return %arg0, %c0_i32 : i32, i32
  }
  func.func @transform_1(%arg0: i32) -> (i32, i32) {
    %c1_i32 = arith.constant 1 : i32
    %0 = arith.addi %arg0, %c1_i32 : i32
    %c0_i32 = arith.constant 0 : i32
    %c0_i32_0 = arith.constant 0 : i32
    return %0, %c0_i32 : i32, i32
  }
  func.func @transform_2(%arg0: i32) -> (i32, i32, i32) {
    %c0_i32 = arith.constant 0 : i32
    %c0_i32_0 = arith.constant 0 : i32
    %c0_i32_1 = arith.constant 0 : i32
    %c0_i32_2 = arith.constant 0 : i32
    return %c0_i32, %c0_i32_0, %c0_i32_1 : i32, i32, i32
  }
  func.func @transform_3(%arg0: i32) -> (i32, i32) {
    %c0_i32 = arith.constant 0 : i32
    %c0_i32_0 = arith.constant 0 : i32
    %c0_i32_1 = arith.constant 0 : i32
    return %c0_i32, %c0_i32_0 : i32, i32
  }
  func.func @transform_4(%arg0: i32) -> (i32, i32) {
    %c0_i32 = arith.constant 0 : i32
    %c0_i32_0 = arith.constant 0 : i32
    return %arg0, %c0_i32 : i32, i32
  }
}

module attributes {stable_mosaic.version = 11 : i64} {
  func.func @kernel(%arg0: i32, %arg1: memref<256x24xbf16, #tpu.memory_space<vmem>>, %arg2: memref<256x24xbf16, #tpu.memory_space<vmem>>, %arg3: memref<4x24x96xbf16, #tpu.memory_space<vmem>>, %arg4: memref<1x96xf32, #tpu.memory_space<vmem>>, %arg5: memref<96x48xbf16, #tpu.memory_space<vmem>>, %arg6: memref<1x48xf32, #tpu.memory_space<vmem>>, %arg7: memref<48x128xbf16, #tpu.memory_space<vmem>>, %arg8: memref<1x128xf32, #tpu.memory_space<vmem>>, %arg9: memref<256x128xf32, #tpu.memory_space<vmem>>) attributes {dimension_semantics = [#tpu.dimension_semantics<parallel>], iteration_bounds = array<i64: 3>, scalar_prefetch = 0 : i64, scratch_operands = 0 : i64, tpu.core_type = #tpu.core_type<tc>, window_params = [{transform_indices = @transform_0, window_bounds = array<i64: 256, 24>}, {transform_indices = @transform_1, window_bounds = array<i64: 256, 24>}, {pipeline_mode = #tpu.pipeline_mode<synchronous>, transform_indices = @transform_2, window_bounds = array<i64: 4, 24, 96>}, {pipeline_mode = #tpu.pipeline_mode<synchronous>, transform_indices = @transform_3, window_bounds = array<i64: 1, 96>}, {pipeline_mode = #tpu.pipeline_mode<synchronous>, transform_indices = @transform_4, window_bounds = array<i64: 96, 48>}, {pipeline_mode = #tpu.pipeline_mode<synchronous>, transform_indices = @transform_5, window_bounds = array<i64: 1, 48>}, {pipeline_mode = #tpu.pipeline_mode<synchronous>, transform_indices = @transform_6, window_bounds = array<i64: 48, 128>}, {pipeline_mode = #tpu.pipeline_mode<synchronous>, transform_indices = @transform_7, window_bounds = array<i64: 1, 128>}, {transform_indices = @transform_8, window_bounds = array<i64: 256, 128>}]} {
    %c0 = arith.constant 0 : index
    %c0_0 = arith.constant 0 : index
    %0 = vector.load %arg1[%c0, %c0_0] : memref<256x24xbf16, #tpu.memory_space<vmem>>, vector<256x24xbf16>
    %c0_1 = arith.constant 0 : index
    %c0_2 = arith.constant 0 : index
    %1 = vector.load %arg2[%c0_1, %c0_2] : memref<256x24xbf16, #tpu.memory_space<vmem>>, vector<256x24xbf16>
    %2 = tpu.concatenate %0, %1 in 0 : vector<256x24xbf16>, vector<256x24xbf16> -> vector<512x24xbf16>
    %c0_3 = arith.constant 0 : index
    %c0_4 = arith.constant 0 : index
    %3 = vector.load %arg4[%c0_3, %c0_4] : memref<1x96xf32, #tpu.memory_space<vmem>>, vector<1x96xf32>
    %4 = vector.extract_strided_slice %2 {offsets = [0, 0], sizes = [256, 24], strides = [1, 1]} : vector<512x24xbf16> to vector<256x24xbf16>
    %c0_5 = arith.constant 0 : index
    %c0_6 = arith.constant 0 : index
    %c0_7 = arith.constant 0 : index
    %5 = vector.load %arg3[%c0_5, %c0_6, %c0_7] : memref<4x24x96xbf16, #tpu.memory_space<vmem>>, vector<1x24x96xbf16>
    %6 = vector.shape_cast %5 : vector<1x24x96xbf16> to vector<24x96xbf16>
    %cst = arith.constant dense<0.000000e+00> : vector<256x96xf32>
    %7 = tpu.matmul %4, %6, %cst {dimension_numbers = #tpu.dot_dimension_numbers<[1], [0], [0], [1], [0, 0, 1, 1], [], []>} : vector<256x24xbf16>, vector<24x96xbf16>, vector<256x96xf32> -> vector<256x96xf32>
    %8 = vector.extract_strided_slice %2 {offsets = [1, 0], sizes = [256, 24], strides = [1, 1]} : vector<512x24xbf16> to vector<256x24xbf16>
    %c1 = arith.constant 1 : index
    %c0_8 = arith.constant 0 : index
    %c0_9 = arith.constant 0 : index
    %9 = vector.load %arg3[%c1, %c0_8, %c0_9] : memref<4x24x96xbf16, #tpu.memory_space<vmem>>, vector<1x24x96xbf16>
    %10 = vector.shape_cast %9 : vector<1x24x96xbf16> to vector<24x96xbf16>
    %cst_10 = arith.constant dense<0.000000e+00> : vector<256x96xf32>
    %11 = tpu.matmul %8, %10, %cst_10 {dimension_numbers = #tpu.dot_dimension_numbers<[1], [0], [0], [1], [0, 0, 1, 1], [], []>} : vector<256x24xbf16>, vector<24x96xbf16>, vector<256x96xf32> -> vector<256x96xf32>
    %12 = arith.addf %7, %11 : vector<256x96xf32>
    %13 = vector.extract_strided_slice %2 {offsets = [17, 0], sizes = [256, 24], strides = [1, 1]} : vector<512x24xbf16> to vector<256x24xbf16>
    %c2 = arith.constant 2 : index
    %c0_11 = arith.constant 0 : index
    %c0_12 = arith.constant 0 : index
    %14 = vector.load %arg3[%c2, %c0_11, %c0_12] : memref<4x24x96xbf16, #tpu.memory_space<vmem>>, vector<1x24x96xbf16>
    %15 = vector.shape_cast %14 : vector<1x24x96xbf16> to vector<24x96xbf16>
    %cst_13 = arith.constant dense<0.000000e+00> : vector<256x96xf32>
    %16 = tpu.matmul %13, %15, %cst_13 {dimension_numbers = #tpu.dot_dimension_numbers<[1], [0], [0], [1], [0, 0, 1, 1], [], []>} : vector<256x24xbf16>, vector<24x96xbf16>, vector<256x96xf32> -> vector<256x96xf32>
    %17 = arith.addf %12, %16 : vector<256x96xf32>
    %18 = vector.extract_strided_slice %2 {offsets = [18, 0], sizes = [256, 24], strides = [1, 1]} : vector<512x24xbf16> to vector<256x24xbf16>
    %c3 = arith.constant 3 : index
    %c0_14 = arith.constant 0 : index
    %c0_15 = arith.constant 0 : index
    %19 = vector.load %arg3[%c3, %c0_14, %c0_15] : memref<4x24x96xbf16, #tpu.memory_space<vmem>>, vector<1x24x96xbf16>
    %20 = vector.shape_cast %19 : vector<1x24x96xbf16> to vector<24x96xbf16>
    %cst_16 = arith.constant dense<0.000000e+00> : vector<256x96xf32>
    %21 = tpu.matmul %18, %20, %cst_16 {dimension_numbers = #tpu.dot_dimension_numbers<[1], [0], [0], [1], [0, 0, 1, 1], [], []>} : vector<256x24xbf16>, vector<24x96xbf16>, vector<256x96xf32> -> vector<256x96xf32>
    %22 = arith.addf %17, %21 : vector<256x96xf32>
    %23 = vector.broadcast %3 : vector<1x96xf32> to vector<256x96xf32>
    %24 = arith.addf %22, %23 : vector<256x96xf32>
    %cst_17 = arith.constant 0.000000e+00 : f32
    %25 = vector.broadcast %cst_17 : f32 to vector<256x96xf32>
    %26 = arith.maximumf %24, %25 : vector<256x96xf32>
    %c0_18 = arith.constant 0 : index
    %c0_19 = arith.constant 0 : index
    %27 = vector.load %arg5[%c0_18, %c0_19] : memref<96x48xbf16, #tpu.memory_space<vmem>>, vector<96x48xbf16>
    %c0_20 = arith.constant 0 : index
    %c0_21 = arith.constant 0 : index
    %28 = vector.load %arg6[%c0_20, %c0_21] : memref<1x48xf32, #tpu.memory_space<vmem>>, vector<1x48xf32>
    %29 = arith.truncf %26 : vector<256x96xf32> to vector<256x96xbf16>
    %cst_22 = arith.constant dense<0.000000e+00> : vector<256x48xf32>
    %30 = tpu.matmul %29, %27, %cst_22 {dimension_numbers = #tpu.dot_dimension_numbers<[1], [0], [0], [1], [0, 0, 1, 1], [], []>} : vector<256x96xbf16>, vector<96x48xbf16>, vector<256x48xf32> -> vector<256x48xf32>
    %31 = vector.broadcast %28 : vector<1x48xf32> to vector<256x48xf32>
    %32 = arith.addf %30, %31 : vector<256x48xf32>
    %cst_23 = arith.constant 0.000000e+00 : f32
    %33 = vector.broadcast %cst_23 : f32 to vector<256x48xf32>
    %34 = arith.maximumf %32, %33 : vector<256x48xf32>
    %c0_24 = arith.constant 0 : index
    %c0_25 = arith.constant 0 : index
    %35 = vector.load %arg7[%c0_24, %c0_25] : memref<48x128xbf16, #tpu.memory_space<vmem>>, vector<48x128xbf16>
    %c0_26 = arith.constant 0 : index
    %c0_27 = arith.constant 0 : index
    %36 = vector.load %arg8[%c0_26, %c0_27] : memref<1x128xf32, #tpu.memory_space<vmem>>, vector<1x128xf32>
    %37 = arith.truncf %34 : vector<256x48xf32> to vector<256x48xbf16>
    %cst_28 = arith.constant dense<0.000000e+00> : vector<256x128xf32>
    %38 = tpu.matmul %37, %35, %cst_28 {dimension_numbers = #tpu.dot_dimension_numbers<[1], [0], [0], [1], [0, 0, 1, 1], [], []>} : vector<256x48xbf16>, vector<48x128xbf16>, vector<256x128xf32> -> vector<256x128xf32>
    %39 = vector.broadcast %36 : vector<1x128xf32> to vector<256x128xf32>
    %40 = arith.addf %38, %39 : vector<256x128xf32>
    %cst_29 = arith.constant 0.000000e+00 : f32
    %41 = vector.broadcast %cst_29 : f32 to vector<256x128xf32>
    %42 = arith.maximumf %40, %41 : vector<256x128xf32>
    %c0_30 = arith.constant 0 : index
    %c0_31 = arith.constant 0 : index
    %43 = vector.load %arg9[%c0_30, %c0_31] : memref<256x128xf32, #tpu.memory_space<vmem>>, vector<256x128xf32>
    tpu.vector_store %arg9[%c0_30, %c0_31], %42 {strides = array<i32>} : memref<256x128xf32, #tpu.memory_space<vmem>>, vector<256x128xf32>,
    return
  }
  func.func @transform_0(%arg0: i32) -> (i32, i32) {
    %c0_i32 = arith.constant 0 : i32
    %c0_i32_0 = arith.constant 0 : i32
    return %arg0, %c0_i32 : i32, i32
  }
  func.func @transform_1(%arg0: i32) -> (i32, i32) {
    %c1_i32 = arith.constant 1 : i32
    %0 = arith.addi %arg0, %c1_i32 : i32
    %c0_i32 = arith.constant 0 : i32
    %c0_i32_0 = arith.constant 0 : i32
    return %0, %c0_i32 : i32, i32
  }
  func.func @transform_2(%arg0: i32) -> (i32, i32, i32) {
    %c0_i32 = arith.constant 0 : i32
    %c0_i32_0 = arith.constant 0 : i32
    %c0_i32_1 = arith.constant 0 : i32
    %c0_i32_2 = arith.constant 0 : i32
    return %c0_i32, %c0_i32_0, %c0_i32_1 : i32, i32, i32
  }
  func.func @transform_3(%arg0: i32) -> (i32, i32) {
    %c0_i32 = arith.constant 0 : i32
    %c0_i32_0 = arith.constant 0 : i32
    %c0_i32_1 = arith.constant 0 : i32
    return %c0_i32, %c0_i32_0 : i32, i32
  }
  func.func @transform_4(%arg0: i32) -> (i32, i32) {
    %c0_i32 = arith.constant 0 : i32
    %c0_i32_0 = arith.constant 0 : i32
    %c0_i32_1 = arith.constant 0 : i32
    return %c0_i32, %c0_i32_0 : i32, i32
  }
  func.func @transform_5(%arg0: i32) -> (i32, i32) {
    %c0_i32 = arith.constant 0 : i32
    %c0_i32_0 = arith.constant 0 : i32
    %c0_i32_1 = arith.constant 0 : i32
    return %c0_i32, %c0_i32_0 : i32, i32
  }
  func.func @transform_6(%arg0: i32) -> (i32, i32) {
    %c0_i32 = arith.constant 0 : i32
    %c0_i32_0 = arith.constant 0 : i32
    %c0_i32_1 = arith.constant 0 : i32
    return %c0_i32, %c0_i32_0 : i32, i32
  }
  func.func @transform_7(%arg0: i32) -> (i32, i32) {
    %c0_i32 = arith.constant 0 : i32
    %c0_i32_0 = arith.constant 0 : i32
    %c0_i32_1 = arith.constant 0 : i32
    return %c0_i32, %c0_i32_0 : i32, i32
  }
  func.func @transform_8(%arg0: i32) -> (i32, i32) {
    %c0_i32 = arith.constant 0 : i32
    %c0_i32_0 = arith.constant 0 : i32
    return %arg0, %c0_i32 : i32, i32
  }
}

</mosaic_0001>

<bundles_post_ra>
// kernel: _lambda_.5
= control target key start
LH: loop header
LB: loop body
LE: loop exit
PB: predicated region body
PF: predicated region fallthrough
CT: control target
= control target key end

     0   :  { %s1070_s12 = smov 0   ;;  %s1186_s0 = inlined_call_operand.vmem [shape: bf16[512,16], index: 0, kind: input, shape index: {}]   ;;  %s1187_s1 = inlined_call_operand.vmem [shape: bf16[1,16,128], index: 1, kind: input, shape index: {}]   ;;  %s1188_s2 = inlined_call_operand.vmem [shape: f32[1,128], index: 2, kind: input, shape index: {}]   ;;  %s1189_s3 = inlined_call_operand.vmem [shape: bf16[512,128], index: 3, kind: output, shape index: {}]  }
   0x1 LB: > { %s760_s13 = sadd.s32 4294967295, %s1048_s12   ;;  %p764_p0 = scmp.ge.s32.totalorder %s1048_s12, 1  ;;  %s1048_s12 = sphi %s1070_s12, %s13_s12  }
   0x2   : > { %p138_p1 = scmp.lt.s32.totalorder %s1048_s12, 3 }
   0x4   : > { %p139_p2 = pnand %p764_p0, %p138_p1 }
   0x5   : > { %v1025_v0 = vld [vmem:[%s1187_s1] sm:$0xff] (!%p139_p2)   ;;  %s765_s16 = sshll.u32 (!%p139_p2), %s760_s13, 5  ;;  %vm302_vm0 = vcmask (!%p139_p2), 130048  }
   0x6   : > { %142 = sbr.rel (%p139_p2) target bundleno = 265 (0x109), region = 32  ;;  %p163_p3 = scmp.lt.s32.totalorder (!%p139_p2), %s765_s16, 63  ;;  %981 = vmatprep.subr.bf16.mxu0 (!%p139_p2), %v1025_v0  ;;  %1015 = vmatprep.subr.bf16.mxu1 (!%p139_p2), %v1025_v0  ;;  %v1126_v17 = vld [vmem:[%s1188_s2] ss:$0 sm:$0xff] (!%p139_p2) }
   0x7   : > { %982 = vmatpush3.bf16.msra.mxu0 (!%p139_p2), %v1025_v0  ;;  %1016 = vmatpush3.bf16.msra.mxu1 (!%p139_p2), %v1025_v0 }
   0xd   : > { %s1191_s16 = smov (!%p163_p3, %s765_s16), 63 }
   0xe   : > { %s766_s17 = sshll.u32 %s1191_s16, 2 }
   0xf   : > { %s1089_s20 = scalar_lea.vmem %s1186_s0, %s766_s17  ;;  %s1141_s25 = scalar_lea.vmem %s1189_s3, %s766_s17 }
  0x10   : > { %v1026_v1 = vld [vmem:[%s1089_s20] sm:$0xff]   ;;  %v1028_v3 = vld [vmem:[%s1089_s20 + $0x8] sm:$0xff]   ;;  %v1030_v5 = vld [vmem:[%s1089_s20 + $0x10] sm:$0xff]  }
  0x11   : > { %v1027_v2 = vld [vmem:[%s1089_s20 + $0x40] sm:$0xff]   ;;  %983 = vmatprep.mubr.msk.bf16.mxu0 %vm302_vm0, %v1026_v1  ;;  %v1029_v4 = vld [vmem:[%s1089_s20 + $0x48] sm:$0xff]   ;;  %v1031_v6 = vld [vmem:[%s1089_s20 + $0x50] sm:$0xff]  }
  0x12   : > { %999 = vmatprep.mubr.msk.bf16.mxu1 %vm302_vm0, %v1027_v2  ;;  %984 = vmatmul.mubr.msk.bf16.vlgmr.msra.gmra.mrb[0].mxu0 %vm302_vm0, %v1028_v3  ;;  %v1032_v7 = vld [vmem:[%s1089_s20 + $0x18] sm:$0xff]   ;;  %v1034_v9 = vld [vmem:[%s1089_s20 + $0x20] sm:$0xff]   ;;  %v1036_v11 = vld [vmem:[%s1089_s20 + $0x28] sm:$0xff]  }
  0x13   : > { %1000 = vmatmul.mubr.msk.bf16.vlgmr.msra.gmra.mrb[0].mxu1 %vm302_vm0, %v1029_v4  ;;  %987 = vmatprep.mubr.msk.bf16.mxu0 %vm302_vm0, %v1030_v5  ;;  %v1033_v8 = vld [vmem:[%s1089_s20 + $0x58] sm:$0xff]   ;;  %v1035_v10 = vld [vmem:[%s1089_s20 + $0x60] sm:$0xff]   ;;  %v1037_v12 = vld [vmem:[%s1089_s20 + $0x68] sm:$0xff]  }
  0x14   : > { %1003 = vmatprep.mubr.msk.bf16.mxu1 %vm302_vm0, %v1031_v6  ;;  %v1038_v13 = vld [vmem:[%s1089_s20 + $0x30] sm:$0xff]   ;;  %v1040_v15 = vld [vmem:[%s1089_s20 + $0x38] sm:$0xff]  }
  0x15   : > { %v1039_v14 = vld [vmem:[%s1089_s20 + $0x70] sm:$0xff]   ;;  %v1041_v16 = vld [vmem:[%s1089_s20 + $0x78] sm:$0xff]  }
  0x1a   : > { %988 = vmatmul.mubr.msk.bf16.gmra.mrb[4].mxu0 %vm302_vm0, %v1032_v7 }
  0x1b   : > { %1004 = vmatmul.mubr.msk.bf16.gmra.mrb[4].mxu1 %vm302_vm0, %v1033_v8  ;;  %991 = vmatprep.mubr.msk.bf16.mxu0 %vm302_vm0, %v1034_v9 }
  0x1c   : > { %1007 = vmatprep.mubr.msk.bf16.mxu1 %vm302_vm0, %v1035_v10 }
  0x22   : > { %992 = vmatmul.mubr.msk.bf16.gmra.mrb[8].mxu0 %vm302_vm0, %v1036_v11 }
  0x23   : > { %1008 = vmatmul.mubr.msk.bf16.gmra.mrb[8].mxu1 %vm302_vm0, %v1037_v12  ;;  %995 = vmatprep.mubr.msk.bf16.mxu0 %vm302_vm0, %v1038_v13 }
  0x24   : > { %1011 = vmatprep.mubr.msk.bf16.mxu1 %vm302_vm0, %v1039_v14 }
  0x2a   : > { %996 = vmatmul.mubr.msk.bf16.gmra.mrb[12].mxu0 %vm302_vm0, %v1040_v15 }
  0x2b   : > { %1012 = vmatmul.mubr.msk.bf16.gmra.mrb[12].mxu1 %vm302_vm0, %v1041_v16 }
  0xe5   : > { %v985_v18 = vpop.f32.mrb[0].mxu0 }
  0xe6   : > { %v394_v19 = vadd.f32 %v985_v18, %v1126_v17  ;;  %v1001_v20 = vpop.f32.mrb[0].mxu1  ;;  %v385_v21 = vpop.f32.mrb[1].mxu0 }
  0xe7   : > { %v458_v22 = vadd.f32 %v1001_v20, %v1126_v17  ;;  %v386_v23 = vadd.f32 %v1126_v17, %v385_v21  ;;  %v449_v24 = vpop.f32.mrb[1].mxu1  ;;  %v986_v25 = vpop.f32.mrb[2].mxu0 }
  0xe8   : > { %v450_v26 = vadd.f32 %v1126_v17, %v449_v24  ;;  %v397_v27 = vadd.f32 %v986_v25, %v1126_v17  ;;  %v1002_v28 = vpop.f32.mrb[2].mxu1  ;;  %v388_v29 = vpop.f32.mrb[3].mxu0  ;;  %v514_v33 = vmax.f32 %v394_v19, 0.0 }
  0xe9   : > { %v461_v30 = vadd.f32 %v1002_v28, %v1126_v17  ;;  %v389_v31 = vadd.f32 %v1126_v17, %v388_v29  ;;  %v452_v32 = vpop.f32.mrb[3].mxu1  ;;  %v530_v36 = vmax.f32 %v458_v22, 0.0  ;;  %v512_v37 = vmax.f32 %v386_v23, 0.0 }
  0xea   : > { %v515_v34 = vmax.f32 %v397_v27, 0.0  ;;  %v453_v35 = vadd.f32 %v1126_v17, %v452_v32  ;;  %v528_v40 = vmax.f32 %v450_v26, 0.0 }
  0xeb   : > { %v531_v38 = vmax.f32 %v461_v30, 0.0  ;;  %v513_v39 = vmax.f32 %v389_v31, 0.0 }
  0xec   : > { %v877_v41 = vpack.c.bf16 %v515_v34, %v514_v33  ;;  %v529_v42 = vmax.f32 %v453_v35, 0.0 }
  0xed   : > { %v917_v43 = vpack.c.bf16 %v531_v38, %v530_v36  ;;  %v872_v44 = vpack.c.bf16 %v513_v39, %v512_v37  ;;  %v989_v45 = vpop.f32.mrb[4].mxu0 }
  0xee   : > { %949 = vst [vmem:[%s1141_s25 + $0x8] sm:$0xff] %v877_v41   ;;  %v912_v46 = vpack.c.bf16 %v529_v42, %v528_v40  ;;  %v410_v47 = vadd.f32 %v989_v45, %v1126_v17  ;;  %v1005_v48 = vpop.f32.mrb[4].mxu1  ;;  %v401_v49 = vpop.f32.mrb[5].mxu0 }
  0xef   : > { %957 = vst [vmem:[%s1141_s25 + $0x48] sm:$0xff] %v917_v43   ;;  %873 = vst [vmem:[%s1141_s25] sm:$0xff] %v872_v44   ;;  %v474_v50 = vadd.f32 %v1005_v48, %v1126_v17  ;;  %v402_v51 = vadd.f32 %v1126_v17, %v401_v49  ;;  %v465_v52 = vpop.f32.mrb[5].mxu1  ;;  %v990_v53 = vpop.f32.mrb[6].mxu0 }
  0xf0   : > { %956 = vst [vmem:[%s1141_s25 + $0x40] sm:$0xff] %v912_v46   ;;  %v466_v54 = vadd.f32 %v1126_v17, %v465_v52  ;;  %v413_v55 = vadd.f32 %v990_v53, %v1126_v17  ;;  %v1006_v56 = vpop.f32.mrb[6].mxu1  ;;  %v404_v57 = vpop.f32.mrb[7].mxu0  ;;  %v518_v61 = vmax.f32 %v410_v47, 0.0 }
  0xf1   : > { %v477_v58 = vadd.f32 %v1006_v56, %v1126_v17  ;;  %v405_v59 = vadd.f32 %v1126_v17, %v404_v57  ;;  %v468_v60 = vpop.f32.mrb[7].mxu1  ;;  %v534_v0 = vmax.f32 %v474_v50, 0.0  ;;  %v516_v1 = vmax.f32 %v402_v51, 0.0 }
  0xf2   : > { %v519_v62 = vmax.f32 %v413_v55, 0.0  ;;  %v469_v63 = vadd.f32 %v1126_v17, %v468_v60  ;;  %v532_v4 = vmax.f32 %v466_v54, 0.0 }
  0xf3   : > { %v535_v2 = vmax.f32 %v477_v58, 0.0  ;;  %v517_v3 = vmax.f32 %v405_v59, 0.0 }
  0xf4   : > { %v887_v5 = vpack.c.bf16 %v519_v62, %v518_v61  ;;  %v533_v6 = vmax.f32 %v469_v63, 0.0 }
  0xf5   : > { %v927_v7 = vpack.c.bf16 %v535_v2, %v534_v0  ;;  %v882_v8 = vpack.c.bf16 %v517_v3, %v516_v1  ;;  %v993_v9 = vpop.f32.mrb[8].mxu0 }
  0xf6   : > { %951 = vst [vmem:[%s1141_s25 + $0x18] sm:$0xff] %v887_v5   ;;  %v922_v10 = vpack.c.bf16 %v533_v6, %v532_v4  ;;  %v426_v11 = vadd.f32 %v993_v9, %v1126_v17  ;;  %v1009_v12 = vpop.f32.mrb[8].mxu1  ;;  %v417_v13 = vpop.f32.mrb[9].mxu0 }
  0xf7   : > { %959 = vst [vmem:[%s1141_s25 + $0x58] sm:$0xff] %v927_v7   ;;  %950 = vst [vmem:[%s1141_s25 + $0x10] sm:$0xff] %v882_v8   ;;  %v490_v14 = vadd.f32 %v1009_v12, %v1126_v17  ;;  %v418_v15 = vadd.f32 %v1126_v17, %v417_v13  ;;  %v481_v16 = vpop.f32.mrb[9].mxu1  ;;  %v994_v18 = vpop.f32.mrb[10].mxu0 }
  0xf8   : > { %958 = vst [vmem:[%s1141_s25 + $0x50] sm:$0xff] %v922_v10   ;;  %v482_v19 = vadd.f32 %v1126_v17, %v481_v16  ;;  %v429_v20 = vadd.f32 %v994_v18, %v1126_v17  ;;  %v1010_v21 = vpop.f32.mrb[10].mxu1  ;;  %v420_v22 = vpop.f32.mrb[11].mxu0  ;;  %v522_v26 = vmax.f32 %v426_v11, 0.0 }
  0xf9   : > { %v493_v23 = vadd.f32 %v1010_v21, %v1126_v17  ;;  %v421_v24 = vadd.f32 %v1126_v17, %v420_v22  ;;  %v484_v25 = vpop.f32.mrb[11].mxu1  ;;  %v538_v29 = vmax.f32 %v490_v14, 0.0  ;;  %v520_v30 = vmax.f32 %v418_v15, 0.0 }
  0xfa   : > { %v523_v27 = vmax.f32 %v429_v20, 0.0  ;;  %v485_v28 = vadd.f32 %v1126_v17, %v484_v25  ;;  %v536_v33 = vmax.f32 %v482_v19, 0.0 }
  0xfb   : > { %v539_v31 = vmax.f32 %v493_v23, 0.0  ;;  %v521_v32 = vmax.f32 %v421_v24, 0.0 }
  0xfc   : > { %v897_v34 = vpack.c.bf16 %v523_v27, %v522_v26  ;;  %v537_v35 = vmax.f32 %v485_v28, 0.0 }
  0xfd   : > { %v937_v36 = vpack.c.bf16 %v539_v31, %v538_v29  ;;  %v892_v37 = vpack.c.bf16 %v521_v32, %v520_v30  ;;  %v997_v38 = vpop.f32.mrb[12].mxu0 }
  0xfe   : > { %953 = vst [vmem:[%s1141_s25 + $0x28] sm:$0xff] %v897_v34   ;;  %v932_v39 = vpack.c.bf16 %v537_v35, %v536_v33  ;;  %v442_v40 = vadd.f32 %v997_v38, %v1126_v17  ;;  %v1013_v41 = vpop.f32.mrb[12].mxu1  ;;  %v433_v42 = vpop.f32.mrb[13].mxu0 }
  0xff   : > { %961 = vst [vmem:[%s1141_s25 + $0x68] sm:$0xff] %v937_v36   ;;  %952 = vst [vmem:[%s1141_s25 + $0x20] sm:$0xff] %v892_v37   ;;  %v506_v43 = vadd.f32 %v1013_v41, %v1126_v17  ;;  %v434_v44 = vadd.f32 %v1126_v17, %v433_v42  ;;  %v497_v45 = vpop.f32.mrb[13].mxu1  ;;  %v998_v46 = vpop.f32.mrb[14].mxu0 }
 0x100   : > { %960 = vst [vmem:[%s1141_s25 + $0x60] sm:$0xff] %v932_v39   ;;  %v498_v47 = vadd.f32 %v1126_v17, %v497_v45  ;;  %v445_v48 = vadd.f32 %v998_v46, %v1126_v17  ;;  %v1014_v49 = vpop.f32.mrb[14].mxu1  ;;  %v436_v50 = vpop.f32.mrb[15].mxu0  ;;  %v526_v54 = vmax.f32 %v442_v40, 0.0 }
 0x101   : > { %v509_v51 = vadd.f32 %v1014_v49, %v1126_v17  ;;  %v437_v52 = vadd.f32 %v1126_v17, %v436_v50  ;;  %v500_v53 = vpop.f32.mrb[15].mxu1  ;;  %v542_v57 = vmax.f32 %v506_v43, 0.0  ;;  %v524_v58 = vmax.f32 %v434_v44, 0.0 }
 0x102   : > { %v527_v55 = vmax.f32 %v445_v48, 0.0  ;;  %v501_v56 = vadd.f32 %v1126_v17, %v500_v53  ;;  %v540_v61 = vmax.f32 %v498_v47, 0.0 }
 0x103   : > { %v543_v59 = vmax.f32 %v509_v51, 0.0  ;;  %v525_v60 = vmax.f32 %v437_v52, 0.0 }
 0x104   : > { %v907_v62 = vpack.c.bf16 %v527_v55, %v526_v54  ;;  %v541_v63 = vmax.f32 %v501_v56, 0.0 }
 0x105   : > { %v947_v0 = vpack.c.bf16 %v543_v59, %v542_v57  ;;  %v902_v1 = vpack.c.bf16 %v525_v60, %v524_v58 }
 0x106   : > { %955 = vst [vmem:[%s1141_s25 + $0x38] sm:$0xff] %v907_v62   ;;  %v942_v2 = vpack.c.bf16 %v541_v63, %v540_v61 }
 0x107   : > { %963 = vst [vmem:[%s1141_s25 + $0x78] sm:$0xff] %v947_v0   ;;  %954 = vst [vmem:[%s1141_s25 + $0x30] sm:$0xff] %v902_v1  }
 0x108   : > { %962 = vst [vmem:[%s1141_s25 + $0x70] sm:$0xff] %v942_v2  }
 0x109 PF: > { %s13_s12 = sadd.s32 1, %s1048_s12  }
 0x10a   : > { %p10_p4 = scmp.ge.s32.totalorder %s13_s12, 4  }
 0x10c   :  { %12 = sbr.rel (!%p10_p4) target bundleno = 1 (0x1), region = 62 }

// kernel: _lambda_.6
= control target key start
LH: loop header
LB: loop body
LE: loop exit
PB: predicated region body
PF: predicated region fallthrough
CT: control target
= control target key end

     0   :  { %s10220_s15 = smov 0   ;;  %s12333_s0 = inlined_call_operand.vmem [shape: bf16[2304,12], index: 0, kind: input, shape index: {}, may-alias: {0,1}]   ;;  %s12334_s1 = inlined_call_operand.vmem [shape: bf16[2304,12], index: 1, kind: input, shape index: {}, may-alias: {0,1}]   ;;  %s12335_s2 = inlined_call_operand.vmem [shape: bf16[17,12,128], index: 2, kind: input, shape index: {}]   ;;  %s12336_s3 = inlined_call_operand.vmem [shape: f32[1,128], index: 3, kind: input, shape index: {}]   ;;  %s12337_s4 = inlined_call_operand.vmem [shape: bf16[1920,128], index: 4, kind: output, shape index: {}]  }
   0x1 LB: > { %s7270_s16 = sadd.s32 4294967295, %s10193_s15   ;;  %p7274_p0 = scmp.ge.s32.totalorder %s10193_s15, 1  ;;  %s10193_s15 = sphi %s10220_s15, %s14_s15  }
   0x2   : > { %p178_p1 = scmp.lt.s32.totalorder %s10193_s15, 6 }
   0x4   : > { %p179_p2 = pnand %p7274_p0, %p178_p1 }
   0x6   : > { %182 = sbr.rel (%p179_p2) target bundleno = 1060 (0x424), region = 36 }
   0xd   : > { %v10094_v0 = vld [vmem:[%s12335_s2 + $0x8] sm:$0x3f]   ;;  %vm687_vm0 = vcmask 1045504   ;;  %s10231_s19 = smul.u32 48, %s7270_s16  ;;  %v10095_v1 = vld [vmem:[%s12335_s2 + $0x40] sm:$0x3f]  }
   0xe   : > { %10068 = vmatprep.subr.msk.bf16.mxu1 %vm687_vm0, %v10094_v0  ;;  %v689_v2 = vsel %vm687_vm0, %v10094_v0, 0  ;;  %10076 = vmatprep.subr.msk.bf16.mxu0 %vm687_vm0, %v10095_v1  ;;  %v10241_v3 = vsel %vm687_vm0, %v10095_v1, 0  ;;  %v10098_v4 = vld [vmem:[%s12335_s2] sm:$0x3f]   ;;  %s10246_s24 = sadd.s32 1, %s7270_s16  ;;  %vm559_vm1 = vcmask 1040384  }
   0xf   : > { %8449 = vmatpush3.bf16.msra.mxu1 %v689_v2  ;;  %p211_p3 = scmp.lt.s32.totalorder %s10231_s19, 287  ;;  %12473 = vst [vmem:[#allocation2_spill] sm:$0xff] %v10241_v3  ;;  %8849 = vmatpush3.bf16.msra.mxu0 %v10241_v3  ;;  %v10101_v5 = vld [vmem:[%s12335_s2 + $0x48] sm:$0x3f]   ;;  %s217_s6 = smul.u32 48, %s10246_s24  ;;  %vm614_vm2 = vcmask 97280  }
  0x10   : > { %10069 = vmatprep.subr.msk.bf16.mxu1 %vm687_vm0, %v10098_v4  ;;  %10078 = vmatprep.subr.msk.bf16.mxu0 %vm687_vm0, %v10101_v5  ;;  %v1044_v8 = vsel %vm687_vm0, %v10098_v4, 0  ;;  %v10291_v17 = vld [vmem:[%s12335_s2 + $0x10] sm:$0x3f]   ;;  %v4074_v21 = vsel %vm687_vm0, %v10101_v5, 0  ;;  %vm916_vm3 = vcmask 1044480   ;;  %vm1274_vm4 = vcmask 1042432  }
  0x11   : > { %s212_s25 = scalar_select %p211_p3, %s10231_s19, 287  ;;  %v10308_v23 = vld [vmem:[%s12335_s2 + $0x50] sm:$0x3f]   ;;  %vm4352_vm5 = vsmask.f32 7424  ;;  %vm4785_vm6 = vcmask 1046528  }
  0x12   : > { %p10281_p4 = scmp.lt.s32.totalorder %s217_s6, 287  ;;  %vm1999_vm7 = vcmask 1043456   ;;  %vm2714_vm8 = vsmask.f32 2304  ;;  %vm3295_vm9 = vcmask 1041408   ;;  %p225_p5 = scmp.lt.s32.totalorder %s10231_s19, 239 }
  0x13   : > { %s7275_s28 = sshll.u32 %s212_s25, 2 }
  0x14   : > { %s10258_s5 = scalar_lea.vmem %s12333_s0, %s7275_s28  ;;  %s12656_s6 = smov (!%p10281_p4, %s217_s6), 287 }
  0x15   : > { %v10262_v6 = vld [vmem:[%s10258_s5 + $0x18] sm:$0xff]   ;;  %v10265_v7 = vld [vmem:[%s10258_s5 + $0x20] sm:$0xff]   ;;  %v10271_v11 = vld [vmem:[%s10258_s5 + $0x50] sm:$0xff]   ;;  %s7276_s12 = sshll.u32 %s12656_s6, 2  ;;  %s12658_s19 = smov (!%p225_p5, %s10231_s19), 239 }
  0x16   : > { %v560_v9 = vrot.slane %v10262_v6, 7  ;;  %v561_v10 = vrot.slane %v10265_v7, 7  ;;  %v10274_v12 = vld [vmem:[%s10258_s5 + $0x58] sm:$0xff]   ;;  %v10277_v13 = vld [vmem:[%s10258_s5 + $0x28] sm:$0xff]   ;;  %v573_v15 = vrot.slane %v10271_v11, 7  ;;  %v10296_v19 = vld [vmem:[%s10258_s5 + $0x60] sm:$0xff]   ;;  %s10378_s16 = scalar_lea.vmem %s12334_s1, %s7276_s12 }
  0x17   : > { %12474 = vst [vmem:[#allocation3_spill] sm:$0xff] %v10274_v12  ;;  %v575_v16 = vrot.slane %v10274_v12, 7  ;;  %v563_v18 = vrot.slane %v10277_v13, 7  ;;  %v10303_v22 = vld [vmem:[%s10258_s5 + $0x30] sm:$0xff]   ;;  %v577_v25 = vrot.slane %v10296_v19, 7  ;;  %v10315_v26 = vld [vmem:[%s10258_s5 + $0x68] sm:$0xff]  }
  0x18   : > { %v562_v14 = vsel %vm559_vm1, %v560_v9, %v561_v10  ;;  %12476 = vst [vmem:[#allocation4_spill] sm:$0xff] %v10315_v26  ;;  %v565_v27 = vrot.slane %v10303_v22, 7  ;;  %v10320_v28 = vld [vmem:[%s10258_s5 + $0x38] sm:$0xff]   ;;  %v579_v30 = vrot.slane %v10315_v26, 7  ;;  %v10327_v31 = vld [vmem:[%s10258_s5 + $0x70] sm:$0xff]   ;;  %v10334_v34 = vld [vmem:[%s10258_s5 + $0x40] sm:$0xff]  }
  0x19   : > { %8450 = vmatprep.mubr.msk.bf16.mxu1 %vm614_vm2, %v562_v14  ;;  %v10299_v20 = vsel %vm559_vm1, %v573_v15, %v575_v16  ;;  %v564_v24 = vsel %vm559_vm1, %v561_v10, %v563_v18  ;;  %v10323_v29 = vsel %vm559_vm1, %v575_v16, %v577_v25  ;;  %12477 = vst [vmem:[#allocation5_spill] sm:$0xff] %v10327_v31  ;;  %v567_v33 = vrot.slane %v10320_v28, 7  ;;  %v10344_v37 = vld [vmem:[%s10258_s5 + $0x78] sm:$0xff]   ;;  %v10358_v41 = vld [vmem:[%s10258_s5 + $0x48] sm:$0xff]   ;;  %v10363_v44 = vld [vmem:[%s10258_s5 + $0x80] sm:$0xff]   ;;  %s7277_s20 = sshll.u32 %s12658_s19, 2 }
  0x1a   : > { %8850 = vmatprep.mubr.msk.bf16.mxu0 %vm614_vm2, %v10299_v20  ;;  %8451 = vmatmul.mubr.msk.bf16.vlgmr.msra.gmra.mrb[0].mxu1 %vm614_vm2, %v564_v24  ;;  %v566_v32 = vsel %vm559_vm1, %v563_v18, %v565_v27  ;;  %v10340_v35 = vsel %vm559_vm1, %v577_v25, %v579_v30  ;;  %v581_v36 = vrot.slane %v10327_v31, 7  ;;  %12478 = vst [vmem:[#allocation6_spill] sm:$0xff] %v10344_v37  ;;  %v569_v38 = vrot.slane %v10334_v34, 7  ;;  %v10368_v46 = vld [vmem:[%s10258_s5 + $0x88] sm:$0xff]   ;;  %v10385_v53 = vld [vmem:[%s10258_s5 + $0x90] sm:$0xff]   ;;  %v10390_v55 = vld [vmem:[%s10258_s5 + $0x98] sm:$0xff]   ;;  %s12246_s23 = scalar_lea.vmem %s12337_s4, %s7277_s20 }
  0x1b   : > { %8499 = vmatpush3.bf16.msra.mxu1 %v1044_v8  ;;  %8851 = vmatmul.mubr.msk.bf16.vlgmr.msra.gmra.mrb[0].mxu0 %vm614_vm2, %v10323_v29  ;;  %v568_v39 = vsel %vm559_vm1, %v565_v27, %v567_v33  ;;  %v583_v40 = vrot.slane %v10344_v37, 7  ;;  %12479 = vst [vmem:[#allocation7_spill] sm:$0xff] %v10363_v44  ;;  %12480 = vst [vmem:[#allocation8_spill] sm:$0xff] %v10368_v46  ;;  %v571_v47 = vrot.slane %v10358_v41, 7  ;;  %v585_v48 = vrot.slane %v10363_v44, 7  ;;  %v10397_v57 = vld [vmem:[%s10258_s5 + $0x10] sm:$0xff]  }
  0x1c   : > { %10070 = vmatprep.subr.msk.bf16.mxu1 %vm687_vm0, %v10291_v17  ;;  %8899 = vmatpush3.bf16.msra.mxu0 %v4074_v21  ;;  %v570_v42 = vsel %vm559_vm1, %v567_v33, %v569_v38  ;;  %v582_v43 = vsel %vm559_vm1, %v579_v30, %v581_v36  ;;  %v587_v49 = vrot.slane %v10368_v46, 7  ;;  %12481 = vst [vmem:[#allocation9_spill] sm:$0xff] %v10385_v53  ;;  %12482 = vst [vmem:[#allocation10_spill] sm:$0xff] %v10390_v55  ;;  %v10459_v25 = vld [vmem:[%s10258_s5 + $0xb0] sm:$0xff]   ;;  %v10487_v33 = vld [vmem:[%s12335_s2 + $0x58] sm:$0x3f]  }
  0x1d   : > { %8454 = vmatprep.mubr.msk.bf16.mxu1 %vm614_vm2, %v566_v32  ;;  %8854 = vmatprep.mubr.msk.bf16.mxu0 %vm614_vm2, %v10340_v35  ;;  %v584_v45 = vsel %vm559_vm1, %v581_v36, %v583_v40  ;;  %v572_v50 = vsel %vm559_vm1, %v569_v38, %v571_v47  ;;  %v574_v51 = vsel %vm559_vm1, %v571_v47, %v573_v15  ;;  %v589_v56 = vrot.slane %v10385_v53, 7  ;;  %v10437_v15 = vld [vmem:[%s10258_s5 + $0xa8] sm:$0xff]  }
  0x1e   : > { %10079 = vmatprep.subr.msk.bf16.mxu0 %vm687_vm0, %v10308_v23  ;;  %v586_v52 = vsel %vm559_vm1, %v583_v40, %v585_v48  ;;  %v588_v54 = vsel %vm559_vm1, %v585_v48, %v587_v49  ;;  %v922_v58 = vrot.slane %v10262_v6, 3  ;;  %v924_v59 = vrot.slane %v10265_v7, 3  ;;  %v10420_v7 = vld [vmem:[%s10258_s5 + $0xa0] sm:$0xff]   ;;  %12486 = vst [vmem:[#allocation14_spill] sm:$0xff] %v10437_v15  ;;  %12488 = vst [vmem:[#allocation16_spill] sm:$0xff] %v10459_v25  ;;  %v10539_v48 = vld [vmem:[%s10378_s16 + $0x8] sm:$0xff]  }
  0x1f   : > { %v591_v60 = vrot.slane %v10390_v55, 7  ;;  %v926_v61 = vrot.slane %v10277_v13, 3  ;;  %v928_v62 = vrot.slane %v10303_v22, 3  ;;  %v920_v63 = vrot.slane %v10397_v57, 3  ;;  %12484 = vst [vmem:[#allocation12_spill] sm:$0xff] %v10420_v7  ;;  %v10626_v57 = vld [vmem:[%s10378_s16 + $0x28] sm:$0xff]  }
  0x20   : > { %v10406_v0 = vsel %vm916_vm3, %v922_v58, %v924_v59  ;;  %v930_v1 = vrot.slane %v10320_v28, 3  ;;  %v932_v5 = vrot.slane %v10334_v34, 3  ;;  %v10417_v6 = vsel %vm559_vm1, %v587_v49, %v589_v56 }
  0x21   : > { %v10410_v2 = vsel %vm916_vm3, %v924_v59, %v926_v61  ;;  %v10413_v4 = vsel %vm916_vm3, %v926_v61, %v928_v62  ;;  %12483 = vst [vmem:[#allocation11_spill] sm:$0xff] %v10417_v6  ;;  %v10425_v8 = vsel %vm916_vm3, %v920_v63, %v922_v58  ;;  %v934_v10 = vrot.slane %v10358_v41, 3  ;;  %v10124_v59 = vld [vmem:[%s10258_s5] sm:$0xff]  }
  0x22   : > { %8455 = vmatmul.mubr.msk.bf16.gmra.mrb[4].mxu1 %vm614_vm2, %v568_v39  ;;  %v10428_v9 = vsel %vm916_vm3, %v928_v62, %v930_v1  ;;  %v10434_v14 = vsel %vm559_vm1, %v589_v56, %v591_v60  ;;  %v10440_v16 = vsel %vm916_vm3, %v930_v1, %v932_v5  ;;  %v595_v21 = vrot.slane %v10437_v15, 7  ;;  %v10512_v39 = vld [vmem:[%s10258_s5 + $0xb8] sm:$0xff]  }
  0x23   : > { %8458 = vmatprep.mubr.msk.bf16.mxu1 %vm614_vm2, %v570_v42  ;;  %8855 = vmatmul.mubr.msk.bf16.gmra.mrb[4].mxu0 %vm614_vm2, %v582_v43  ;;  %12485 = vst [vmem:[#allocation13_spill] sm:$0xff] %v10434_v14  ;;  %v10447_v18 = vsel %vm916_vm3, %v932_v5, %v934_v10  ;;  %v4507_v32 = vsel %vm687_vm0, %v10308_v23, 0  ;;  %v1275_v23 = vrot.slane %v10277_v13, 5  ;;  %v1278_v36 = vrot.slane %v10320_v28, 5  ;;  %v10518_v42 = vld [vmem:[%s10378_s16] sm:$0xff]   ;;  %v10566_v56 = vld [vmem:[%s10378_s16 + $0x18] sm:$0xff]  }
  0x24   : > { %8858 = vmatprep.mubr.msk.bf16.mxu0 %vm614_vm2, %v584_v45  ;;  %12491 = vst [vmem:[#allocation19_spill] sm:$0xff] %v10518_v42  ;;  %v599_v13 = vrot.slane %v10512_v39, 7  ;;  %v1280_v28 = vrot.slane %v10334_v34, 5  ;;  %v12338_v61 = vrot.slane %v10566_v56, 7  ;;  %v917_v62 = vrot.slane %v10124_v59, 3 }
  0x2a   : > { %8459 = vmatmul.mubr.msk.bf16.gmra.mrb[8].mxu1 %vm614_vm2, %v572_v50  ;;  %v10550_v50 = vld [vmem:[%s10378_s16 + $0x10] sm:$0xff]  }
  0x2b   : > { %8462 = vmatprep.mubr.msk.bf16.mxu1 %vm614_vm2, %v574_v51  ;;  %8859 = vmatmul.mubr.msk.bf16.gmra.mrb[8].mxu0 %vm614_vm2, %v586_v52  ;;  %v603_v51 = vrot.slane %v10539_v48, 7 }
  0x2c   : > { %8862 = vmatprep.mubr.msk.bf16.mxu0 %vm614_vm2, %v588_v54 }
  0x32   : > { %8463 = vmatmul.mubr.msk.bf16.gmra.mrb[12].mxu1 %vm614_vm2, %v10299_v20  ;;  %v593_v20 = vrot.slane %v10420_v7, 7 }
  0x33   : > { %8466 = vmatprep.mubr.msk.bf16.mxu1 %vm614_vm2, %v10323_v29  ;;  %8863 = vmatmul.mubr.msk.bf16.gmra.mrb[12].mxu0 %vm614_vm2, %v10417_v6  ;;  %v597_v29 = vrot.slane %v10459_v25, 7 }
  0x34   : > { %8866 = vmatprep.mubr.msk.bf16.mxu0 %vm614_vm2, %v10434_v14  ;;  %v10456_v24 = vsel %vm559_vm1, %v591_v60, %v593_v20  ;;  %v10464_v27 = vsel %vm559_vm1, %v593_v20, %v595_v21  ;;  %v10125_v60 = vld [vmem:[%s10258_s5 + $0x8] sm:$0xff]  }
  0x35   : > { %12487 = vst [vmem:[#allocation15_spill] sm:$0xff] %v10456_v24  ;;  %12489 = vst [vmem:[#allocation17_spill] sm:$0xff] %v10464_v27  ;;  %v10473_v30 = vsel %vm559_vm1, %v595_v21, %v597_v29  ;;  %v10536_v47 = vsel %vm559_vm1, %v597_v29, %v599_v13  ;;  %v918_v1 = vrot.slane %v10125_v60, 3  ;;  %v1402_v29 = vsel %vm687_vm0, %v10291_v17, 0  ;;  %v10623_v17 = vld [vmem:[%s10378_s16 + $0x20] sm:$0xff]  }
  0x36   : > { %12490 = vst [vmem:[#allocation18_spill] sm:$0xff] %v10473_v30  ;;  %12492 = vst [vmem:[#allocation20_spill] sm:$0xff] %v10536_v47 }
  0x37   : > { %v919_v20 = vsel %vm916_vm3, %v917_v62, %v918_v1  ;;  %v921_v21 = vsel %vm916_vm3, %v918_v1, %v920_v63  ;;  %v10637_v63 = vld [vmem:[%s10378_s16 + $0x30] sm:$0xff]  }
  0x38   : > { %v10689_v62 = vld [vmem:[%s10378_s16 + $0x50] sm:$0xff]  }
  0x3a   : > { %8467 = vmatmul.mubr.msk.bf16.gmra.mrb[16].mxu1 %vm614_vm2, %v10340_v35  ;;  %v1276_v35 = vrot.slane %v10303_v22, 5  ;;  %v601_v22 = vrot.slane %v10518_v42, 7 }
  0x3b   : > { %8470 = vmatprep.mubr.msk.bf16.mxu1 %vm614_vm2, %v582_v43  ;;  %8867 = vmatmul.mubr.msk.bf16.gmra.mrb[16].mxu0 %vm614_vm2, %v10456_v24  ;;  %v12342_v43 = vrot.slane %v10358_v41, 5 }
  0x3c   : > { %8870 = vmatprep.mubr.msk.bf16.mxu0 %vm614_vm2, %v10464_v27  ;;  %v10509_v38 = vsel %vm1274_vm4, %v1275_v23, %v1276_v35  ;;  %v10515_v40 = vsel %vm1274_vm4, %v1276_v35, %v1278_v36  ;;  %v10547_v49 = vsel %vm559_vm1, %v599_v13, %v601_v22  ;;  %v10659_v23 = vld [vmem:[%s10378_s16 + $0x40] sm:$0xff]   ;;  %v12340_v13 = vshrl.u32 %v10274_v12, 16 }
  0x3d   : > { %v10544_v34 = vsel %vm1274_vm4, %v1280_v28, %v12342_v43  ;;  %12493 = vst [vmem:[#allocation21_spill] sm:$0xff] %v10547_v49 }
  0x42   : > { %8471 = vmatmul.mubr.msk.bf16.gmra.mrb[20].mxu1 %vm614_vm2, %v584_v45  ;;  %v10533_v45 = vsel %vm1274_vm4, %v1278_v36, %v1280_v28  ;;  %v10665_v36 = vld [vmem:[%s10378_s16 + $0x48] sm:$0xff]  }
  0x43   : > { %8474 = vmatprep.mubr.msk.bf16.mxu1 %vm614_vm2, %v586_v52  ;;  %8871 = vmatmul.mubr.msk.bf16.gmra.mrb[20].mxu0 %vm614_vm2, %v10473_v30  ;;  %v605_v52 = vrot.slane %v10550_v50, 7 }
  0x44   : > { %8900 = vmatprep.mubr.msk.bf16.mxu0 %vm614_vm2, %v10274_v12 }
  0x45   : > { %v10569_v58 = vsel %vm559_vm1, %v603_v51, %v605_v52  ;;  %v10585_v5 = vsel %vm559_vm1, %v605_v52, %v12338_v61  ;;  %v946_v61 = vrot.slane %v10344_v37, 3 }
  0x46   : > { %12495 = vst [vmem:[#allocation23_spill] sm:$0xff] %v10569_v58  ;;  %12496 = vst [vmem:[#allocation24_spill] sm:$0xff] %v10585_v5 }
  0x4a   : > { %8475 = vmatmul.mubr.msk.bf16.gmra.mrb[24].mxu1 %vm614_vm2, %v588_v54  ;;  %v10563_v54 = vsel %vm559_vm1, %v601_v22, %v603_v51  ;;  %v12341_v22 = vshll.u32 %v10296_v19, 16  ;;  %v942_v51 = vrot.slane %v10315_v26, 3 }
  0x4b   : > { %8478 = vmatprep.mubr.msk.bf16.mxu1 %vm614_vm2, %v10417_v6  ;;  %8901 = vmatmul.mubr.msk.bf16.vlgmr.msra.gmra.mrb[0].mxu0 %vm614_vm2, %v10296_v19  ;;  %12494 = vst [vmem:[#allocation22_spill] sm:$0xff] %v10563_v54 }
  0x4c   : > { %8949 = vmatpush3.bf16.msra.mxu0 %v4507_v32  ;;  %8904 = vmatprep.mubr.msk.bf16.mxu0 %vm614_vm2, %v10315_v26  ;;  %v10603_v32 = vld [vmem:[%s12335_s2 + $0x18] sm:$0x3f]   ;;  %v4355_v59 = vrot.slane %v12341_v22, 1 }
  0x4d   : > { %10080 = vmatprep.subr.msk.bf16.mxu0 %vm687_vm0, %v10487_v33 }
  0x52   : > { %8479 = vmatmul.mubr.msk.bf16.gmra.mrb[28].mxu1 %vm614_vm2, %v10434_v14  ;;  %v11027_v14 = vld [vmem:[%s10258_s5 + $0x60] sm:$0xff]  }
  0x53   : > { %8482 = vmatprep.mubr.msk.bf16.mxu1 %vm614_vm2, %v10456_v24  ;;  %8905 = vmatmul.mubr.msk.bf16.gmra.mrb[4].mxu0 %vm614_vm2, %v10327_v31  ;;  %v4787_v6 = vrot.slane %v11027_v14, 1 }
  0x54   : > { %8908 = vmatprep.mubr.msk.bf16.mxu0 %vm614_vm2, %v10344_v37 }
  0x5a   : > { %8483 = vmatmul.mubr.msk.bf16.gmra.mrb[32].mxu1 %vm614_vm2, %v10464_v27 }
  0x5b   : > { %8486 = vmatprep.mubr.msk.bf16.mxu1 %vm614_vm2, %v10473_v30  ;;  %8909 = vmatmul.mubr.msk.bf16.gmra.mrb[8].mxu0 %vm614_vm2, %v10363_v44 }
  0x5c   : > { %8912 = vmatprep.mubr.msk.bf16.mxu0 %vm614_vm2, %v10368_v46 }
  0x62   : > { %8487 = vmatmul.mubr.msk.bf16.gmra.mrb[36].mxu1 %vm614_vm2, %v10536_v47 }
  0x63   : > { %8490 = vmatprep.mubr.msk.bf16.mxu1 %vm614_vm2, %v10547_v49  ;;  %8913 = vmatmul.mubr.msk.bf16.gmra.mrb[12].mxu0 %vm614_vm2, %v10385_v53 }
  0x64   : > { %8916 = vmatprep.mubr.msk.bf16.mxu0 %vm614_vm2, %v10390_v55 }
  0x6a   : > { %8491 = vmatmul.mubr.msk.bf16.gmra.mrb[40].mxu1 %vm614_vm2, %v10563_v54 }
  0x6b   : > { %8494 = vmatprep.mubr.msk.bf16.mxu1 %vm614_vm2, %v10569_v58  ;;  %8917 = vmatmul.mubr.msk.bf16.gmra.mrb[16].mxu0 %vm614_vm2, %v10420_v7 }
  0x6c   : > { %8920 = vmatprep.mubr.msk.bf16.mxu0 %vm614_vm2, %v10437_v15 }
  0x72   : > { %8495 = vmatmul.mubr.msk.bf16.gmra.mrb[44].mxu1 %vm614_vm2, %v10585_v5 }
  0x73   : > { %8500 = vmatprep.mubr.msk.bf16.mxu1 %vm614_vm2, %v919_v20  ;;  %8921 = vmatmul.mubr.msk.bf16.gmra.mrb[20].mxu0 %vm614_vm2, %v10459_v25  ;;  %v12343_v20 = vshll.u32 %v10315_v26, 16 }
  0x74   : > { %8924 = vmatprep.mubr.msk.bf16.mxu0 %vm614_vm2, %v10512_v39 }
  0x7a   : > { %8501 = vmatmul.mubr.msk.bf16.vlgmr.msra.gmra.mrb[0].mxu1 %vm614_vm2, %v921_v21  ;;  %v12347_v21 = vshrl.u32 %v10296_v19, 16 }
  0x7b   : > { %8549 = vmatpush3.bf16.msra.mxu1 %v1402_v29  ;;  %8504 = vmatprep.mubr.msk.bf16.mxu1 %vm614_vm2, %v10425_v8  ;;  %v12339_v8 = vshll.u32 %v10274_v12, 16 }
  0x7c   : > { %8925 = vmatmul.mubr.msk.bf16.gmra.mrb[24].mxu0 %vm614_vm2, %v10518_v42  ;;  %10071 = vmatprep.subr.msk.bf16.mxu1 %vm687_vm0, %v10603_v32 }
  0x7d   : > { %8928 = vmatprep.mubr.msk.bf16.mxu0 %vm614_vm2, %v10539_v48  ;;  %v4353_v28 = vrot.slane %v12339_v8, 1 }
  0x7f   : > { %v4354_v52 = vor.u32 %v4353_v28, %v12340_v13  ;;  %v944_v28 = vrot.slane %v10327_v31, 3 }
  0x81   : > { %v4356_v29 = vsel %vm4352_vm5, %v4354_v52, %v4355_v59  ;;  %v4357_v52 = vor.u32 %v4355_v59, %v12347_v21  ;;  %v10717_v22 = vsel %vm916_vm3, %v942_v51, %v944_v28  ;;  %v10720_v43 = vsel %vm916_vm3, %v944_v28, %v946_v61  ;;  %v10735_v28 = vld [vmem:[%s12335_s2 + $0x60] sm:$0x3f]  }
  0x82   : > { %8505 = vmatmul.mubr.msk.bf16.gmra.mrb[4].mxu1 %vm614_vm2, %v10406_v0  ;;  %v10640_v0 = vld [vmem:[%s10378_s16 + $0x38] sm:$0xff]   ;;  %v12353_v59 = vshrl.u32 %v10327_v31, 16 }
  0x83   : > { %8508 = vmatprep.mubr.msk.bf16.mxu1 %vm614_vm2, %v10410_v2  ;;  %v936_v2 = vrot.slane %v10271_v11, 3 }
  0x84   : > { %8929 = vmatmul.mubr.msk.bf16.gmra.mrb[28].mxu0 %vm614_vm2, %v10550_v50 }
  0x85   : > { %8932 = vmatprep.mubr.msk.bf16.mxu0 %vm614_vm2, %v10566_v56 }
  0x8a   : > { %8509 = vmatmul.mubr.msk.bf16.gmra.mrb[8].mxu1 %vm614_vm2, %v10413_v4  ;;  %v938_v4 = vrot.slane %v10274_v12, 3 }
  0x8b   : > { %8512 = vmatprep.mubr.msk.bf16.mxu1 %vm614_vm2, %v10428_v9  ;;  %v10656_v9 = vsel %vm916_vm3, %v934_v10, %v936_v2  ;;  %v940_v10 = vrot.slane %v10296_v19, 3 }
  0x8c   : > { %8933 = vmatmul.mubr.msk.bf16.gmra.mrb[32].mxu0 %vm614_vm2, %v10623_v17  ;;  %v10662_v35 = vsel %vm916_vm3, %v936_v2, %v938_v4  ;;  %v12346_v2 = vshrl.u32 %v10315_v26, 16 }
  0x8d   : > { %8936 = vmatprep.mubr.msk.bf16.mxu0 %vm614_vm2, %v10626_v57  ;;  %v10686_v60 = vsel %vm916_vm3, %v938_v4, %v940_v10  ;;  %v10692_v1 = vsel %vm916_vm3, %v940_v10, %v942_v51  ;;  %v12345_v4 = vshll.u32 %v10327_v31, 16  ;;  %v4358_v10 = vrot.slane %v12343_v20, 1 }
  0x8e   : > { %v12350_v20 = vshll.u32 %v10344_v37, 16  ;;  %v12352_v51 = vshrl.u32 %v10344_v37, 16 }
  0x8f   : > { %v4360_v8 = vor.u32 %v4358_v10, %v12346_v2  ;;  %v4361_v13 = vrot.slane %v12345_v4, 1  ;;  %v4359_v3 = vsel %vm4352_vm5, %v4357_v52, %v4358_v10  ;;  %v12351_v2 = vshll.u32 %v10363_v44, 16 }
  0x90   : > { %v948_v10 = vrot.slane %v10363_v44, 3 }
  0x91   : > { %v4362_v4 = vsel %vm4352_vm5, %v4360_v8, %v4361_v13  ;;  %v950_v8 = vrot.slane %v10368_v46, 3  ;;  %v4363_v52 = vor.u32 %v4361_v13, %v12353_v59  ;;  %v4367_v5 = vrot.slane %v12351_v2, 1 }
  0x92   : > { %8513 = vmatmul.mubr.msk.bf16.gmra.mrb[12].mxu1 %vm614_vm2, %v10440_v16  ;;  %v12363_v13 = vshrl.u32 %v10363_v44, 16  ;;  %v12362_v59 = vshll.u32 %v10385_v53, 16 }
  0x93   : > { %8516 = vmatprep.mubr.msk.bf16.mxu1 %vm614_vm2, %v10447_v18 }
  0x94   : > { %8937 = vmatmul.mubr.msk.bf16.gmra.mrb[36].mxu0 %vm614_vm2, %v10637_v63  ;;  %v4373_v58 = vrot.slane %v12362_v59, 1  ;;  %v12369_v59 = vshll.u32 %v10420_v7, 16 }
  0x95   : > { %8940 = vmatprep.mubr.msk.bf16.mxu0 %vm614_vm2, %v10640_v0 }
  0x9a   : > { %8517 = vmatmul.mubr.msk.bf16.gmra.mrb[16].mxu1 %vm614_vm2, %v10656_v9 }
  0x9b   : > { %8520 = vmatprep.mubr.msk.bf16.mxu1 %vm614_vm2, %v10662_v35 }
  0x9c   : > { %8941 = vmatmul.mubr.msk.bf16.gmra.mrb[40].mxu0 %vm614_vm2, %v10659_v23 }
  0x9d   : > { %8944 = vmatprep.mubr.msk.bf16.mxu0 %vm614_vm2, %v10665_v36 }
  0xa2   : > { %8521 = vmatmul.mubr.msk.bf16.gmra.mrb[20].mxu1 %vm614_vm2, %v10686_v60 }
  0xa3   : > { %8524 = vmatprep.mubr.msk.bf16.mxu1 %vm614_vm2, %v10692_v1 }
  0xa4   : > { %8945 = vmatmul.mubr.msk.bf16.gmra.mrb[44].mxu0 %vm614_vm2, %v10689_v62 }
  0xa5   : > { %8950 = vmatprep.mubr.msk.bf16.mxu0 %vm614_vm2, %v4356_v29  ;;  %v4913_v29 = vsel %vm687_vm0, %v10487_v33, 0  ;;  %v4364_v33 = vrot.slane %v12350_v20, 1  ;;  %v10757_v20 = vsel %vm916_vm3, %v948_v10, %v950_v8 }
  0xa7   : > { %v4366_v21 = vor.u32 %v4364_v33, %v12352_v51  ;;  %v12361_v51 = vshrl.u32 %v10368_v46, 16 }
  0xa9   : > { %v4368_v2 = vsel %vm4352_vm5, %v4366_v21, %v4367_v5  ;;  %v4369_v21 = vor.u32 %v4367_v5, %v12363_v13  ;;  %v4379_v13 = vrot.slane %v12369_v59, 1  ;;  %v12375_v59 = vshll.u32 %v10459_v25, 16 }
  0xaa   : > { %8525 = vmatmul.mubr.msk.bf16.gmra.mrb[24].mxu1 %vm614_vm2, %v10717_v22 }
  0xab   : > { %8528 = vmatprep.mubr.msk.bf16.mxu1 %vm614_vm2, %v10720_v43 }
  0xac   : > { %8951 = vmatmul.mubr.msk.bf16.vlgmr.msra.gmra.mrb[0].mxu0 %vm614_vm2, %v4359_v3  ;;  %v10754_v3 = vsel %vm916_vm3, %v946_v61, %v948_v10  ;;  %v952_v61 = vrot.slane %v10385_v53, 3 }
  0xad   : > { %8999 = vmatpush3.bf16.msra.mxu0 %v4913_v29  ;;  %8954 = vmatprep.mubr.msk.bf16.mxu0 %vm614_vm2, %v4362_v4  ;;  %v12358_v4 = vshll.u32 %v10368_v46, 16  ;;  %v4365_v29 = vsel %vm4352_vm5, %v4363_v52, %v4364_v33  ;;  %v954_v33 = vrot.slane %v10390_v55, 3 }
  0xae   : > { %10081 = vmatprep.subr.msk.bf16.mxu0 %vm687_vm0, %v10735_v28  ;;  %v10782_v54 = vsel %vm916_vm3, %v950_v8, %v952_v61  ;;  %v956_v8 = vrot.slane %v10420_v7, 3 }
  0xaf   : > { %v4370_v10 = vrot.slane %v12358_v4, 1  ;;  %v12366_v4 = vshll.u32 %v10390_v55, 16 }
  0xb0   : > { %v10810_v47 = vsel %vm916_vm3, %v954_v33, %v956_v8 }
  0xb1   : > { %v4372_v52 = vor.u32 %v4370_v10, %v12361_v51  ;;  %v4371_v49 = vsel %vm4352_vm5, %v4369_v21, %v4370_v10  ;;  %v12368_v51 = vshrl.u32 %v10390_v55, 16  ;;  %v958_v10 = vrot.slane %v10437_v15, 3 }
  0xb2   : > { %8529 = vmatmul.mubr.msk.bf16.gmra.mrb[28].mxu1 %vm614_vm2, %v10754_v3 }
  0xb3   : > { %8532 = vmatprep.mubr.msk.bf16.mxu1 %vm614_vm2, %v10757_v20  ;;  %v4374_v5 = vsel %vm4352_vm5, %v4372_v52, %v4373_v58 }
  0xb4   : > { %8955 = vmatmul.mubr.msk.bf16.gmra.mrb[4].mxu0 %vm614_vm2, %v4365_v29  ;;  %v10785_v29 = vsel %vm916_vm3, %v952_v61, %v954_v33  ;;  %v4376_v61 = vrot.slane %v12366_v4, 1  ;;  %v12372_v4 = vshll.u32 %v10437_v15, 16  ;;  %v960_v33 = vrot.slane %v10459_v25, 3 }
  0xb5   : > { %8958 = vmatprep.mubr.msk.bf16.mxu0 %vm614_vm2, %v4368_v2  ;;  %v12370_v2 = vshrl.u32 %v10385_v53, 16 }
  0xb6   : > { %v4378_v52 = vor.u32 %v4376_v61, %v12368_v51  ;;  %v12374_v51 = vshrl.u32 %v10437_v15, 16  ;;  %v10838_v27 = vsel %vm916_vm3, %v958_v10, %v960_v33 }
  0xb7   : > { %v4375_v21 = vor.u32 %v4373_v58, %v12370_v2  ;;  %v4385_v2 = vrot.slane %v12375_v59, 1  ;;  %v12379_v59 = vshll.u32 %v10518_v42, 16 }
  0xb8   : > { %v4380_v58 = vsel %vm4352_vm5, %v4378_v52, %v4379_v13 }
  0xb9   : > { %v4377_v30 = vsel %vm4352_vm5, %v4375_v21, %v4376_v61  ;;  %v962_v61 = vrot.slane %v10512_v39, 3 }
  0xba   : > { %8533 = vmatmul.mubr.msk.bf16.gmra.mrb[32].mxu1 %vm614_vm2, %v10782_v54 }
  0xbb   : > { %8536 = vmatprep.mubr.msk.bf16.mxu1 %vm614_vm2, %v10785_v29 }
  0xbc   : > { %8959 = vmatmul.mubr.msk.bf16.gmra.mrb[8].mxu0 %vm614_vm2, %v4371_v49  ;;  %v10813_v49 = vsel %vm916_vm3, %v956_v8, %v958_v10  ;;  %v4382_v8 = vrot.slane %v12372_v4, 1  ;;  %v12377_v4 = vshll.u32 %v10512_v39, 16  ;;  %v12397_v10 = vrot.slane %v10518_v42, 3 }
  0xbd   : > { %8962 = vmatprep.mubr.msk.bf16.mxu0 %vm614_vm2, %v4374_v5  ;;  %v12376_v5 = vshrl.u32 %v10420_v7, 16 }
  0xbe   : > { %v4384_v52 = vor.u32 %v4382_v8, %v12374_v51  ;;  %v12378_v51 = vshrl.u32 %v10512_v39, 16 }
  0xbf   : > { %v4381_v21 = vor.u32 %v4379_v13, %v12376_v5  ;;  %v10867_v5 = vsel %vm916_vm3, %v962_v61, %v12397_v10 }
  0xc0   : > { %v4386_v13 = vsel %vm4352_vm5, %v4384_v52, %v4385_v2  ;;  %v4391_v52 = vrot.slane %v12379_v59, 1  ;;  %v12382_v59 = vshll.u32 %v10550_v50, 16 }
  0xc1   : > { %v4383_v24 = vsel %vm4352_vm5, %v4381_v21, %v4382_v8 }
  0xc2   : > { %8537 = vmatmul.mubr.msk.bf16.gmra.mrb[36].mxu1 %vm614_vm2, %v10810_v47 }
  0xc3   : > { %8540 = vmatprep.mubr.msk.bf16.mxu1 %vm614_vm2, %v10813_v49 }
  0xc4   : > { %8963 = vmatmul.mubr.msk.bf16.gmra.mrb[12].mxu0 %vm614_vm2, %v4377_v30  ;;  %v10841_v30 = vsel %vm916_vm3, %v960_v33, %v962_v61  ;;  %v4388_v33 = vrot.slane %v12377_v4, 1 }
  0xc5   : > { %8966 = vmatprep.mubr.msk.bf16.mxu0 %vm614_vm2, %v4380_v58  ;;  %v12380_v58 = vshrl.u32 %v10459_v25, 16 }
  0xc6   : > { %v4390_v21 = vor.u32 %v4388_v33, %v12378_v51  ;;  %v12384_v51 = vshrl.u32 %v10539_v48, 16 }
  0xc7   : > { %v4387_v8 = vor.u32 %v4385_v2, %v12380_v58  ;;  %v1721_v58 = vsel %vm687_vm0, %v10603_v32, 0  ;;  %v12387_v32 = vshll.u32 %v10623_v17, 16 }
  0xc8   : > { %v4392_v2 = vsel %vm4352_vm5, %v4390_v21, %v4391_v52  ;;  %v4397_v21 = vrot.slane %v12382_v59, 1  ;;  %v12385_v59 = vshrl.u32 %v10566_v56, 16 }
  0xc9   : > { %v4389_v4 = vsel %vm4352_vm5, %v4387_v8, %v4388_v33 }
  0xca   : > { %8541 = vmatmul.mubr.msk.bf16.gmra.mrb[40].mxu1 %vm614_vm2, %v10838_v27 }
  0xcb   : > { %8544 = vmatprep.mubr.msk.bf16.mxu1 %vm614_vm2, %v10841_v30 }
  0xcc   : > { %8967 = vmatmul.mubr.msk.bf16.gmra.mrb[16].mxu0 %vm614_vm2, %v4383_v24  ;;  %v12381_v24 = vshll.u32 %v10539_v48, 16 }
  0xcd   : > { %8970 = vmatprep.mubr.msk.bf16.mxu0 %vm614_vm2, %v4386_v13  ;;  %v12393_v13 = vshrl.u32 %v10518_v42, 16 }
  0xce   : > { %v4394_v61 = vrot.slane %v12381_v24, 1 }
  0xcf   : > { %v4393_v33 = vor.u32 %v4391_v52, %v12393_v13  ;;  %v12391_v52 = vshrl.u32 %v10550_v50, 16  ;;  %v12399_v13 = vshrl.u32 %v10659_v23, 16 }
  0xd0   : > { %v4396_v8 = vor.u32 %v4394_v61, %v12384_v51  ;;  %v12390_v51 = vshrl.u32 %v10623_v17, 16 }
  0xd2   : > { %8545 = vmatmul.mubr.msk.bf16.gmra.mrb[44].mxu1 %vm614_vm2, %v10867_v5  ;;  %v4398_v24 = vsel %vm4352_vm5, %v4396_v8, %v4397_v21  ;;  %v12497_v8 = vrot.slane %v10358_v41, 5  ;;  %v1286_v41 = vrot.slane %v10274_v12, 5 }
  0xd3   : > { %8550 = vmatprep.mubr.msk.bf16.mxu1 %vm614_vm2, %v10509_v38  ;;  %v12383_v38 = vshll.u32 %v10566_v56, 16 }
  0xd4   : > { %8971 = vmatmul.mubr.msk.bf16.gmra.mrb[20].mxu0 %vm614_vm2, %v4389_v4  ;;  %v10895_v4 = vld [vmem:[%s12335_s2 + $0x20] sm:$0x3f]  }
  0xd5   : > { %8974 = vmatprep.mubr.msk.bf16.mxu0 %vm614_vm2, %v4392_v2  ;;  %v4395_v2 = vsel %vm4352_vm5, %v4393_v33, %v4394_v61  ;;  %v4400_v61 = vrot.slane %v12383_v38, 1  ;;  %v1284_v33 = vrot.slane %v10271_v11, 5  ;;  %v12386_v11 = vshll.u32 %v10626_v57, 16 }
  0xda   : > { %8551 = vmatmul.mubr.msk.bf16.vlgmr.msra.gmra.mrb[0].mxu1 %vm614_vm2, %v10515_v40  ;;  %v4399_v40 = vor.u32 %v4397_v21, %v12391_v52  ;;  %v12388_v21 = vshrl.u32 %v10626_v57, 16 }
  0xdb   : > { %8599 = vmatpush3.bf16.msra.mxu1 %v1721_v58  ;;  %8554 = vmatprep.mubr.msk.bf16.mxu1 %vm614_vm2, %v10533_v45  ;;  %v4402_v58 = vor.u32 %v4400_v61, %v12385_v59  ;;  %v4403_v45 = vrot.slane %v12387_v32, 1  ;;  %v12389_v59 = vshll.u32 %v10637_v63, 16 }
  0xdc   : > { %8975 = vmatmul.mubr.msk.bf16.gmra.mrb[24].mxu0 %vm614_vm2, %v4395_v2  ;;  %10072 = vmatprep.subr.msk.bf16.mxu1 %vm687_vm0, %v10895_v4  ;;  %v1285_v2 = vsel %vm1274_vm4, %v12497_v8, %v1284_v33  ;;  %v4401_v38 = vsel %vm4352_vm5, %v4399_v40, %v4400_v61  ;;  %v4406_v61 = vrot.slane %v12386_v11, 1  ;;  %v1288_v40 = vrot.slane %v10296_v19, 5 }
  0xdd   : > { %8978 = vmatprep.mubr.msk.bf16.mxu0 %vm614_vm2, %v4398_v24  ;;  %v4404_v24 = vsel %vm4352_vm5, %v4402_v58, %v4403_v45  ;;  %v4409_v8 = vrot.slane %v12389_v59, 1  ;;  %v12392_v11 = vshll.u32 %v10640_v0, 16  ;;  %v12394_v59 = vshll.u32 %v10659_v23, 16 }
  0xde   : > { %v4408_v58 = vor.u32 %v4406_v61, %v12388_v21  ;;  %v12395_v21 = vshrl.u32 %v10640_v0, 16 }
  0xe2   : > { %8555 = vmatmul.mubr.msk.bf16.gmra.mrb[4].mxu1 %vm614_vm2, %v10544_v34  ;;  %v4405_v34 = vor.u32 %v4403_v45, %v12390_v51  ;;  %v4410_v45 = vsel %vm4352_vm5, %v4408_v58, %v4409_v8  ;;  %v4415_v51 = vrot.slane %v12394_v59, 1  ;;  %v12400_v59 = vshrl.u32 %v10665_v36, 16 }
  0xe3   : > { %8558 = vmatprep.mubr.msk.bf16.mxu1 %vm614_vm2, %v1285_v2  ;;  %v10944_v2 = vsel %vm1274_vm4, %v1284_v33, %v1286_v41  ;;  %v1290_v33 = vrot.slane %v10315_v26, 5 }
  0xe4   : > { %8979 = vmatmul.mubr.msk.bf16.gmra.mrb[28].mxu0 %vm614_vm2, %v4401_v38  ;;  %v10947_v38 = vsel %vm1274_vm4, %v1286_v41, %v1288_v40  ;;  %v4407_v32 = vsel %vm4352_vm5, %v4405_v34, %v4406_v61  ;;  %v4412_v41 = vrot.slane %v12392_v11, 1  ;;  %v1292_v61 = vrot.slane %v10327_v31, 5 }
  0xe5   : > { %8982 = vmatprep.mubr.msk.bf16.mxu0 %vm614_vm2, %v4404_v24  ;;  %v12396_v24 = vshrl.u32 %v10637_v63, 16  ;;  %v10972_v52 = vsel %vm1274_vm4, %v1288_v40, %v1290_v33  ;;  %v12398_v11 = vshll.u32 %v10665_v36, 16  ;;  %v12401_v40 = vshll.u32 %v10689_v62, 16 }
  0xe6   : > { %v4414_v58 = vor.u32 %v4412_v41, %v12395_v21  ;;  %v10996_v21 = vld [vmem:[%s10378_s16 + $0x58] sm:$0xff]  }
  0xe7   : > { %v4411_v34 = vor.u32 %v4409_v8, %v12396_v24  ;;  %v4421_v10 = vrot.slane %v12401_v40, 1  ;;  %v11023_v40 = vld [vmem:[%s10258_s5 + $0x58] sm:$0xff]  }
  0xe8   : > { %v4416_v8 = vsel %vm4352_vm5, %v4414_v58, %v4415_v51  ;;  %v4417_v58 = vor.u32 %v4415_v51, %v12399_v13  ;;  %v12406_v51 = vshrl.u32 %v10689_v62, 16  ;;  %v4425_v13 = vshll.u32 %v10996_v21, 16 }
  0xea   : > { %8559 = vmatmul.mubr.msk.bf16.gmra.mrb[8].mxu1 %vm614_vm2, %v10944_v2 }
  0xeb   : > { %8562 = vmatprep.mubr.msk.bf16.mxu1 %vm614_vm2, %v10947_v38 }
  0xec   : > { %8983 = vmatmul.mubr.msk.bf16.gmra.mrb[32].mxu0 %vm614_vm2, %v4407_v32  ;;  %v10975_v32 = vsel %vm1274_vm4, %v1290_v33, %v1292_v61  ;;  %v1294_v33 = vrot.slane %v10344_v37, 5 }
  0xed   : > { %8986 = vmatprep.mubr.msk.bf16.mxu0 %vm614_vm2, %v4410_v45  ;;  %v4413_v45 = vsel %vm4352_vm5, %v4411_v34, %v4412_v41  ;;  %v4418_v41 = vrot.slane %v12398_v11, 1  ;;  %v1296_v34 = vrot.slane %v10363_v44, 5 }
  0xef   : > { %v4420_v24 = vor.u32 %v4418_v41, %v12400_v59  ;;  %v11006_v11 = vsel %vm1274_vm4, %v1294_v33, %v1296_v34 }
  0xf1   : > { %v4422_v59 = vsel %vm4352_vm5, %v4420_v24, %v4421_v10  ;;  %v4786_v24 = vrot.slane %v11023_v40, 1 }
  0xf2   : > { %8563 = vmatmul.mubr.msk.bf16.gmra.mrb[12].mxu1 %vm614_vm2, %v10972_v52 }
  0xf3   : > { %8566 = vmatprep.mubr.msk.bf16.mxu1 %vm614_vm2, %v10975_v32 }
  0xf4   : > { %8987 = vmatmul.mubr.msk.bf16.gmra.mrb[36].mxu0 %vm614_vm2, %v4413_v45  ;;  %v11003_v45 = vsel %vm1274_vm4, %v1292_v61, %v1294_v33  ;;  %v1298_v61 = vrot.slane %v10368_v46, 5  ;;  %v1300_v33 = vrot.slane %v10385_v53, 5 }
  0xf5   : > { %8990 = vmatprep.mubr.msk.bf16.mxu0 %vm614_vm2, %v4416_v8  ;;  %v4419_v8 = vsel %vm4352_vm5, %v4417_v58, %v4418_v41  ;;  %v4423_v41 = vor.u32 %v4421_v10, %v12406_v51  ;;  %v4427_v58 = vrot.slane %v4425_v13, 1  ;;  %v4788_v10 = vsel %vm4785_vm6, %v4786_v24, %v4787_v6 }
  0xf6   : > { %v11031_v26 = vsel %vm1274_vm4, %v1296_v34, %v1298_v61  ;;  %v1302_v13 = vrot.slane %v10390_v55, 5  ;;  %v1304_v34 = vrot.slane %v10420_v7, 5 }
  0xf8   : > { %v11052_v51 = vsel %vm1274_vm4, %v1300_v33, %v1302_v13  ;;  %v11055_v24 = vsel %vm1274_vm4, %v1302_v13, %v1304_v34  ;;  %v4795_v13 = vrot.slane %v10363_v44, 1 }
  0xf9   : > { %12498 = vst [vmem:[#allocation25_spill] sm:$0xff] %v11052_v51  ;;  %12499 = vst [vmem:[#allocation26_spill] sm:$0xff] %v11055_v24 }
  0xfa   : > { %8567 = vmatmul.mubr.msk.bf16.gmra.mrb[16].mxu1 %vm614_vm2, %v11003_v45 }
  0xfb   : > { %8570 = vmatprep.mubr.msk.bf16.mxu1 %vm614_vm2, %v11006_v11 }
  0xfc   : > { %8991 = vmatmul.mubr.msk.bf16.gmra.mrb[40].mxu0 %vm614_vm2, %v4419_v8  ;;  %v11034_v8 = vsel %vm1274_vm4, %v1298_v61, %v1300_v33  ;;  %v11047_v61 = vld [vmem:[%s10258_s5 + $0x68] sm:$0xff]   ;;  %v1306_v33 = vrot.slane %v10437_v15, 5 }
  0xfd   : > { %8994 = vmatprep.mubr.msk.bf16.mxu0 %vm614_vm2, %v4422_v59  ;;  %v4428_v59 = vsel %vm4352_vm5, %v4423_v41, %v4427_v58  ;;  %v4789_v41 = vrot.slane %v11047_v61, 1  ;;  %v4791_v58 = vrot.slane %v10327_v31, 1  ;;  %v11066_v31 = vld [vmem:[%s12335_s2 + $0x68] sm:$0x3f]  }
  0xff   : > { %v4790_v12 = vsel %vm4785_vm6, %v4787_v6, %v4789_v41  ;;  %v1308_v6 = vrot.slane %v10459_v25, 5 }
 0x102   : > { %8571 = vmatmul.mubr.msk.bf16.gmra.mrb[20].mxu1 %vm614_vm2, %v11031_v26 }
 0x103   : > { %8574 = vmatprep.mubr.msk.bf16.mxu1 %vm614_vm2, %v11034_v8 }
 0x104   : > { %8995 = vmatmul.mubr.msk.bf16.gmra.mrb[44].mxu0 %vm614_vm2, %v4428_v59  ;;  %v5319_v59 = vsel %vm687_vm0, %v10735_v28, 0  ;;  %v4793_v28 = vrot.slane %v10344_v37, 1 }
 0x105   : > { %9000 = vmatprep.mubr.msk.bf16.mxu0 %vm614_vm2, %v4788_v10  ;;  %v4792_v10 = vsel %vm4785_vm6, %v4789_v41, %v4791_v58  ;;  %v11079_v41 = vsel %vm1274_vm4, %v1304_v34, %v1306_v33  ;;  %v1312_v34 = vrot.slane %v10518_v42, 5 }
 0x106   : > { %12500 = vst [vmem:[#allocation27_spill] sm:$0xff] %v11079_v41 }
 0x10a   : > { %8575 = vmatmul.mubr.msk.bf16.gmra.mrb[24].mxu1 %vm614_vm2, %v11052_v51 }
 0x10b   : > { %8578 = vmatprep.mubr.msk.bf16.mxu1 %vm614_vm2, %v11055_v24  ;;  %v11082_v24 = vsel %vm1274_vm4, %v1306_v33, %v1308_v6  ;;  %v4797_v33 = vrot.slane %v10368_v46, 1 }
 0x10c   : > { %9001 = vmatmul.mubr.msk.bf16.vlgmr.msra.gmra.mrb[0].mxu0 %vm614_vm2, %v4790_v12  ;;  %12501 = vst [vmem:[#allocation28_spill] sm:$0xff] %v11082_v24  ;;  %v4794_v12 = vsel %vm4785_vm6, %v4791_v58, %v4793_v28  ;;  %v4799_v58 = vrot.slane %v10385_v53, 1 }
 0x10d   : > { %9049 = vmatpush3.bf16.msra.mxu0 %v5319_v59  ;;  %9004 = vmatprep.mubr.msk.bf16.mxu0 %vm614_vm2, %v4792_v10  ;;  %v4796_v59 = vsel %vm4785_vm6, %v4793_v28, %v4795_v13  ;;  %v1310_v10 = vrot.slane %v10512_v39, 5  ;;  %v11103_v37 = vsel %vm4785_vm6, %v4795_v13, %v4797_v33  ;;  %v4801_v13 = vrot.slane %v10390_v55, 1 }
 0x10e   : > { %10082 = vmatprep.subr.msk.bf16.mxu0 %vm687_vm0, %v11066_v31  ;;  %12504 = vst [vmem:[#allocation31_spill] sm:$0xff] %v11103_v37 }
 0x10f   : > { %v11097_v44 = vsel %vm1274_vm4, %v1308_v6, %v1310_v10  ;;  %v11100_v28 = vsel %vm1274_vm4, %v1310_v10, %v1312_v34  ;;  %v1316_v6 = vrot.slane %v10550_v50, 5  ;;  %v4803_v10 = vrot.slane %v10420_v7, 1 }
 0x110   : > { %12502 = vst [vmem:[#allocation29_spill] sm:$0xff] %v11097_v44  ;;  %12503 = vst [vmem:[#allocation30_spill] sm:$0xff] %v11100_v28  ;;  %v11127_v46 = vsel %vm4785_vm6, %v4799_v58, %v4801_v13  ;;  %v1318_v7 = vrot.slane %v10566_v56, 5 }
 0x111   : > { %12508 = vst [vmem:[#allocation35_spill] sm:$0xff] %v11127_v46 }
 0x112   : > { %8579 = vmatmul.mubr.msk.bf16.gmra.mrb[28].mxu1 %vm614_vm2, %v11079_v41 }
 0x113   : > { %8582 = vmatprep.mubr.msk.bf16.mxu1 %vm614_vm2, %v11082_v24  ;;  %v11404_v24 = vld [vmem:[%s10258_s5 + $0x50] sm:$0xff]  }
 0x114   : > { %9005 = vmatmul.mubr.msk.bf16.gmra.mrb[4].mxu0 %vm614_vm2, %v4794_v12  ;;  %v11108_v12 = vsel %vm4785_vm6, %v4797_v33, %v4799_v58  ;;  %v4805_v58 = vrot.slane %v10437_v15, 1 }
 0x115   : > { %9008 = vmatprep.mubr.msk.bf16.mxu0 %vm614_vm2, %v4796_v59  ;;  %12505 = vst [vmem:[#allocation32_spill] sm:$0xff] %v11108_v12  ;;  %v1314_v59 = vrot.slane %v10539_v48, 5 }
 0x117   : > { %v11121_v33 = vsel %vm1274_vm4, %v1312_v34, %v1314_v59  ;;  %v11124_v53 = vsel %vm1274_vm4, %v1314_v59, %v1316_v6  ;;  %v1320_v34 = vrot.slane %v10623_v17, 5  ;;  %v4807_v59 = vrot.slane %v10459_v25, 1 }
 0x118   : > { %12506 = vst [vmem:[#allocation33_spill] sm:$0xff] %v11121_v33  ;;  %12507 = vst [vmem:[#allocation34_spill] sm:$0xff] %v11124_v53  ;;  %v12431_v25 = vrot.slane %v10626_v57, 5 }
 0x119   : > { %v11148_v55 = vsel %vm1274_vm4, %v1318_v7, %v1320_v34 }
 0x11a   : > { %8583 = vmatmul.mubr.msk.bf16.gmra.mrb[32].mxu1 %vm614_vm2, %v11097_v44  ;;  %12511 = vst [vmem:[#allocation38_spill] sm:$0xff] %v11148_v55  ;;  %v12461_v44 = vrot.slane %v10640_v0, 3 }
 0x11b   : > { %8586 = vmatprep.mubr.msk.bf16.mxu1 %vm614_vm2, %v11100_v28  ;;  %v11132_v28 = vsel %vm4785_vm6, %v4801_v13, %v4803_v10  ;;  %v11145_v13 = vsel %vm1274_vm4, %v1316_v6, %v1318_v7  ;;  %v4809_v7 = vrot.slane %v10512_v39, 1  ;;  %v4811_v6 = vrot.slane %v10518_v42, 1 }
 0x11c   : > { %9009 = vmatmul.mubr.msk.bf16.gmra.mrb[8].mxu0 %vm614_vm2, %v11103_v37  ;;  %12509 = vst [vmem:[#allocation36_spill] sm:$0xff] %v11132_v28  ;;  %12510 = vst [vmem:[#allocation37_spill] sm:$0xff] %v11145_v13 }
 0x11d   : > { %9012 = vmatprep.mubr.msk.bf16.mxu0 %vm614_vm2, %v11108_v12  ;;  %v11178_v15 = vsel %vm4785_vm6, %v4809_v7, %v4811_v6  ;;  %v11386_v12 = vld [vmem:[%s10258_s5 + $0xb0] sm:$0xff]  }
 0x11e   : > { %12516 = vst [vmem:[#allocation43_spill] sm:$0xff] %v11178_v15 }
 0x122   : > { %8587 = vmatmul.mubr.msk.bf16.gmra.mrb[36].mxu1 %vm614_vm2, %v11121_v33 }
 0x123   : > { %8590 = vmatprep.mubr.msk.bf16.mxu1 %vm614_vm2, %v11124_v53  ;;  %v11151_v53 = vsel %vm4785_vm6, %v4803_v10, %v4805_v58  ;;  %v11170_v10 = vsel %vm1274_vm4, %v1320_v34, %v12431_v25  ;;  %v4813_v34 = vrot.slane %v10539_v48, 1  ;;  %v2127_v25 = vsel %vm687_vm0, %v10895_v4, 0 }
 0x124   : > { %9013 = vmatmul.mubr.msk.bf16.gmra.mrb[12].mxu0 %vm614_vm2, %v11127_v46  ;;  %12512 = vst [vmem:[#allocation39_spill] sm:$0xff] %v11151_v53  ;;  %v11156_v46 = vsel %vm4785_vm6, %v4805_v58, %v4807_v59  ;;  %12514 = vst [vmem:[#allocation41_spill] sm:$0xff] %v11170_v10  ;;  %v11173_v58 = vsel %vm4785_vm6, %v4807_v59, %v4809_v7  ;;  %v4815_v59 = vrot.slane %v10550_v50, 1  ;;  %v11193_v7 = vld [vmem:[%s12335_s2 + $0x28] sm:$0x3f]   ;;  %v4817_v4 = vrot.slane %v10566_v56, 1 }
 0x125   : > { %9016 = vmatprep.mubr.msk.bf16.mxu0 %vm614_vm2, %v11132_v28  ;;  %12513 = vst [vmem:[#allocation40_spill] sm:$0xff] %v11156_v46  ;;  %12515 = vst [vmem:[#allocation42_spill] sm:$0xff] %v11173_v58 }
 0x12a   : > { %8591 = vmatmul.mubr.msk.bf16.gmra.mrb[40].mxu1 %vm614_vm2, %v11145_v13  ;;  %v1688_v13 = vrot.slane %v10626_v57, 3 }
 0x12b   : > { %8594 = vmatprep.mubr.msk.bf16.mxu1 %vm614_vm2, %v11148_v55  ;;  %v11362_v55 = vld [vmem:[%s10258_s5 + $0xa0] sm:$0xff]  }
 0x12c   : > { %9017 = vmatmul.mubr.msk.bf16.gmra.mrb[16].mxu0 %vm614_vm2, %v11151_v53 }
 0x12d   : > { %9020 = vmatprep.mubr.msk.bf16.mxu0 %vm614_vm2, %v11156_v46 }
 0x132   : > { %8595 = vmatmul.mubr.msk.bf16.gmra.mrb[44].mxu1 %vm614_vm2, %v11170_v10  ;;  %v1684_v10 = vrot.slane %v10566_v56, 3 }
 0x133   : > { %8600 = vmatprep.mubr.msk.bf16.mxu1 %vm614_vm2, %v10440_v16  ;;  %v11196_v16 = vsel %vm4785_vm6, %v4811_v6, %v4813_v34  ;;  %v11214_v6 = vsel %vm4785_vm6, %v4815_v59, %v4817_v4 }
 0x134   : > { %9021 = vmatmul.mubr.msk.bf16.gmra.mrb[20].mxu0 %vm614_vm2, %v11173_v58  ;;  %12517 = vst [vmem:[#allocation44_spill] sm:$0xff] %v11196_v16  ;;  %12519 = vst [vmem:[#allocation46_spill] sm:$0xff] %v11214_v6 }
 0x135   : > { %9024 = vmatprep.mubr.msk.bf16.mxu0 %vm614_vm2, %v11178_v15  ;;  %v11201_v15 = vsel %vm4785_vm6, %v4813_v34, %v4815_v59  ;;  %v4823_v34 = vrot.slane %v10637_v63, 1 }
 0x136   : > { %12518 = vst [vmem:[#allocation45_spill] sm:$0xff] %v11201_v15 }
 0x13a   : > { %8601 = vmatmul.mubr.msk.bf16.vlgmr.msra.gmra.mrb[0].mxu1 %vm614_vm2, %v10447_v18  ;;  %v4819_v18 = vrot.slane %v10623_v17, 1 }
 0x13b   : > { %8649 = vmatpush3.bf16.msra.mxu1 %v2127_v25  ;;  %8604 = vmatprep.mubr.msk.bf16.mxu1 %vm614_vm2, %v10656_v9  ;;  %v4821_v9 = vrot.slane %v10626_v57, 1 }
 0x13c   : > { %9025 = vmatmul.mubr.msk.bf16.gmra.mrb[24].mxu0 %vm614_vm2, %v11196_v16  ;;  %10073 = vmatprep.subr.msk.bf16.mxu1 %vm687_vm0, %v11193_v7  ;;  %v11219_v25 = vsel %vm4785_vm6, %v4817_v4, %v4819_v18  ;;  %v4827_v4 = vrot.slane %v10659_v23, 1  ;;  %v12528_v16 = vrot.slane %v10518_v42, 3 }
 0x13d   : > { %9028 = vmatprep.mubr.msk.bf16.mxu0 %vm614_vm2, %v11201_v15  ;;  %12520 = vst [vmem:[#allocation47_spill] sm:$0xff] %v11219_v25  ;;  %v11230_v59 = vsel %vm4785_vm6, %v4819_v18, %v4821_v9  ;;  %v11336_v15 = vld [vmem:[%s10258_s5 + $0x90] sm:$0xff]  }
 0x13e   : > { %12521 = vst [vmem:[#allocation48_spill] sm:$0xff] %v11230_v59 }
 0x142   : > { %8605 = vmatmul.mubr.msk.bf16.gmra.mrb[4].mxu1 %vm614_vm2, %v10662_v35  ;;  %v11235_v35 = vsel %vm4785_vm6, %v4821_v9, %v4823_v34  ;;  %v4831_v9 = vrot.slane %v10689_v62, 1 }
 0x143   : > { %8608 = vmatprep.mubr.msk.bf16.mxu1 %vm614_vm2, %v10686_v60  ;;  %12522 = vst [vmem:[#allocation49_spill] sm:$0xff] %v11235_v35  ;;  %v4825_v60 = vrot.slane %v10640_v0, 1 }
 0x144   : > { %9029 = vmatmul.mubr.msk.bf16.gmra.mrb[28].mxu0 %vm614_vm2, %v11214_v6  ;;  %v11332_v6 = vld [vmem:[%s10258_s5 + $0x88] sm:$0xff]  }
 0x145   : > { %9032 = vmatprep.mubr.msk.bf16.mxu0 %vm614_vm2, %v11219_v25  ;;  %v11246_v18 = vsel %vm4785_vm6, %v4823_v34, %v4825_v60 }
 0x146   : > { %12523 = vst [vmem:[#allocation50_spill] sm:$0xff] %v11246_v18 }
 0x14a   : > { %8609 = vmatmul.mubr.msk.bf16.gmra.mrb[8].mxu1 %vm614_vm2, %v10692_v1  ;;  %v11251_v1 = vsel %vm4785_vm6, %v4825_v60, %v4827_v4 }
 0x14b   : > { %8612 = vmatprep.mubr.msk.bf16.mxu1 %vm614_vm2, %v10717_v22  ;;  %12524 = vst [vmem:[#allocation51_spill] sm:$0xff] %v11251_v1  ;;  %v4829_v22 = vrot.slane %v10665_v36, 1 }
 0x14c   : > { %9033 = vmatmul.mubr.msk.bf16.gmra.mrb[32].mxu0 %vm614_vm2, %v11230_v59 }
 0x14d   : > { %9036 = vmatprep.mubr.msk.bf16.mxu0 %vm614_vm2, %v11235_v35  ;;  %v11262_v34 = vsel %vm4785_vm6, %v4827_v4, %v4829_v22  ;;  %v11267_v60 = vsel %vm4785_vm6, %v4829_v22, %v4831_v9  ;;  %v5192_v4 = vrot.slane %v11023_v40, 2 }
 0x14e   : > { %12525 = vst [vmem:[#allocation52_spill] sm:$0xff] %v11262_v34  ;;  %12526 = vst [vmem:[#allocation53_spill] sm:$0xff] %v11267_v60 }
 0x152   : > { %8613 = vmatmul.mubr.msk.bf16.gmra.mrb[12].mxu1 %vm614_vm2, %v10720_v43 }
 0x153   : > { %8616 = vmatprep.mubr.msk.bf16.mxu1 %vm614_vm2, %v10754_v3 }
 0x154   : > { %9037 = vmatmul.mubr.msk.bf16.gmra.mrb[36].mxu0 %vm614_vm2, %v11246_v18  ;;  %v5193_v18 = vrot.slane %v11027_v14, 2 }
 0x155   : > { %9040 = vmatprep.mubr.msk.bf16.mxu0 %vm614_vm2, %v11251_v1  ;;  %v12438_v1 = vrot.slane %v10996_v21, 1 }
 0x156   : > { %v5194_v35 = vsel %vm687_vm0, %v5192_v4, %v5193_v18  ;;  %v5638_v4 = vsel %vm687_vm0, %v11066_v31, 0 }
 0x157   : > { %v11281_v22 = vsel %vm4785_vm6, %v4831_v9, %v12438_v1 }
 0x158   : > { %12527 = vst [vmem:[#allocation54_spill] sm:$0xff] %v11281_v22 }
 0x15a   : > { %8617 = vmatmul.mubr.msk.bf16.gmra.mrb[16].mxu1 %vm614_vm2, %v10757_v20 }
 0x15b   : > { %8620 = vmatprep.mubr.msk.bf16.mxu1 %vm614_vm2, %v10782_v54 }
 0x15c   : > { %9041 = vmatmul.mubr.msk.bf16.gmra.mrb[40].mxu0 %vm614_vm2, %v11262_v34  ;;  %v11293_v34 = vld [vmem:[%s10258_s5 + $0x70] sm:$0xff]  }
 0x15d   : > { %9044 = vmatprep.mubr.msk.bf16.mxu0 %vm614_vm2, %v11267_v60  ;;  %v5195_v60 = vrot.slane %v11047_v61, 2  ;;  %v5197_v9 = vrot.slane %v11293_v34, 2 }
 0x15f   : > { %v5196_v1 = vsel %vm687_vm0, %v5193_v18, %v5195_v60  ;;  %v5198_v59 = vsel %vm687_vm0, %v5195_v60, %v5197_v9  ;;  %v11312_v18 = vld [vmem:[%s10258_s5 + $0x78] sm:$0xff]   ;;  %v11316_v60 = vld [vmem:[%s10258_s5 + $0x80] sm:$0xff]  }
 0x160   : > { %v5199_v31 = vrot.slane %v11312_v18, 2 }
 0x162   : > { %8621 = vmatmul.mubr.msk.bf16.gmra.mrb[20].mxu1 %vm614_vm2, %v10785_v29  ;;  %v5200_v25 = vsel %vm687_vm0, %v5197_v9, %v5199_v31  ;;  %v5203_v9 = vrot.slane %v11332_v6, 2 }
 0x163   : > { %8624 = vmatprep.mubr.msk.bf16.mxu1 %vm614_vm2, %v10810_v47 }
 0x164   : > { %9045 = vmatmul.mubr.msk.bf16.gmra.mrb[44].mxu0 %vm614_vm2, %v11281_v22  ;;  %v5201_v22 = vrot.slane %v11316_v60, 2 }
 0x165   : > { %9050 = vmatprep.mubr.msk.bf16.mxu0 %vm614_vm2, %v5194_v35  ;;  %v11305_v35 = vld [vmem:[%s12335_s2 + $0x70] sm:$0x3f]  }
 0x166   : > { %v5204_v46 = vsel %vm687_vm0, %v5201_v22, %v5203_v9 }
 0x16a   : > { %8625 = vmatmul.mubr.msk.bf16.gmra.mrb[24].mxu1 %vm614_vm2, %v10813_v49 }
 0x16b   : > { %8628 = vmatprep.mubr.msk.bf16.mxu1 %vm614_vm2, %v10838_v27 }
 0x16c   : > { %9051 = vmatmul.mubr.msk.bf16.vlgmr.msra.gmra.mrb[0].mxu0 %vm614_vm2, %v5196_v1  ;;  %v5202_v1 = vsel %vm687_vm0, %v5199_v31, %v5201_v22  ;;  %v5205_v31 = vrot.slane %v11336_v15, 2 }
 0x16d   : > { %9099 = vmatpush3.bf16.msra.mxu0 %v5638_v4  ;;  %9054 = vmatprep.mubr.msk.bf16.mxu0 %vm614_vm2, %v5198_v59  ;;  %v1680_v59 = vrot.slane %v10539_v48, 3  ;;  %v1682_v4 = vrot.slane %v10550_v50, 3 }
 0x16e   : > { %10083 = vmatprep.subr.msk.bf16.mxu0 %vm687_vm0, %v11305_v35 }
 0x16f   : > { %v11342_v58 = vsel %vm916_vm3, %v12528_v16, %v1680_v59  ;;  %v1686_v16 = vrot.slane %v10623_v17, 3  ;;  %v11366_v53 = vsel %vm916_vm3, %v1682_v4, %v1684_v10 }
 0x171   : > { %v11369_v28 = vsel %vm916_vm3, %v1684_v10, %v1686_v16  ;;  %v11382_v10 = vld [vmem:[%s10258_s5 + $0xa8] sm:$0xff]   ;;  %v11390_v33 = vsel %vm916_vm3, %v1686_v16, %v1688_v13  ;;  %v2000_v16 = vrot.slane %v11404_v24, 4 }
 0x172   : > { %8629 = vmatmul.mubr.msk.bf16.gmra.mrb[28].mxu1 %vm614_vm2, %v10841_v30  ;;  %12529 = vst [vmem:[#allocation55_spill] sm:$0xff] %v11390_v33 }
 0x173   : > { %8632 = vmatprep.mubr.msk.bf16.mxu1 %vm614_vm2, %v10867_v5 }
 0x174   : > { %9055 = vmatmul.mubr.msk.bf16.gmra.mrb[4].mxu0 %vm614_vm2, %v5200_v25  ;;  %v11345_v25 = vsel %vm916_vm3, %v1680_v59, %v1682_v4  ;;  %v11358_v59 = vld [vmem:[%s10258_s5 + $0x98] sm:$0xff]   ;;  %v1690_v4 = vrot.slane %v10637_v63, 3 }
 0x175   : > { %9058 = vmatprep.mubr.msk.bf16.mxu0 %vm614_vm2, %v5202_v1  ;;  %v5206_v1 = vsel %vm687_vm0, %v5203_v9, %v5205_v31  ;;  %v5207_v22 = vrot.slane %v11358_v59, 2  ;;  %v5209_v9 = vrot.slane %v11362_v55, 2 }
 0x176   : > { %v11393_v37 = vsel %vm916_vm3, %v1688_v13, %v1690_v4  ;;  %v2001_v13 = vrot.slane %v11023_v40, 4  ;;  %v11414_v41 = vsel %vm916_vm3, %v1690_v4, %v12461_v44  ;;  %v5219_v4 = vrot.slane %v10539_v48, 2 }
 0x177   : > { %12530 = vst [vmem:[#allocation56_spill] sm:$0xff] %v11393_v37  ;;  %12531 = vst [vmem:[#allocation57_spill] sm:$0xff] %v11414_v41  ;;  %v2436_v44 = vsel %vm687_vm0, %v11193_v7, 0  ;;  %v2009_v7 = vrot.slane %v11312_v18, 4 }
 0x17a   : > { %8633 = vmatmul.mubr.msk.bf16.gmra.mrb[32].mxu1 %vm614_vm2, %v11342_v58 }
 0x17b   : > { %8636 = vmatprep.mubr.msk.bf16.mxu1 %vm614_vm2, %v11345_v25 }
 0x17c   : > { %9059 = vmatmul.mubr.msk.bf16.gmra.mrb[8].mxu0 %vm614_vm2, %v5204_v46  ;;  %v5208_v46 = vsel %vm687_vm0, %v5205_v31, %v5207_v22  ;;  %v5211_v31 = vrot.slane %v11382_v10, 2 }
 0x17d   : > { %9062 = vmatprep.mubr.msk.bf16.mxu0 %vm614_vm2, %v5206_v1  ;;  %v5210_v1 = vsel %vm687_vm0, %v5207_v22, %v5209_v9  ;;  %v5213_v22 = vrot.slane %v11386_v12, 2 }
 0x182   : > { %8637 = vmatmul.mubr.msk.bf16.gmra.mrb[36].mxu1 %vm614_vm2, %v11366_v53 }
 0x183   : > { %8640 = vmatprep.mubr.msk.bf16.mxu1 %vm614_vm2, %v11369_v28 }
 0x184   : > { %9063 = vmatmul.mubr.msk.bf16.gmra.mrb[12].mxu0 %vm614_vm2, %v5208_v46  ;;  %v5212_v46 = vsel %vm687_vm0, %v5209_v9, %v5211_v31  ;;  %v5215_v9 = vrot.slane %v10512_v39, 2 }
 0x185   : > { %9066 = vmatprep.mubr.msk.bf16.mxu0 %vm614_vm2, %v5210_v1  ;;  %v5214_v1 = vsel %vm687_vm0, %v5211_v31, %v5213_v22  ;;  %v5217_v31 = vrot.slane %v10518_v42, 2  ;;  %v2005_v42 = vrot.slane %v11047_v61, 4 }
 0x186   : > { %v5216_v51 = vsel %vm687_vm0, %v5213_v22, %v5215_v9 }
 0x187   : > { %v5218_v40 = vsel %vm687_vm0, %v5215_v9, %v5217_v31 }
 0x18a   : > { %8641 = vmatmul.mubr.msk.bf16.gmra.mrb[40].mxu1 %vm614_vm2, %v11390_v33 }
 0x18b   : > { %8644 = vmatprep.mubr.msk.bf16.mxu1 %vm614_vm2, %v11393_v37 }
 0x18c   : > { %9067 = vmatmul.mubr.msk.bf16.gmra.mrb[16].mxu0 %vm614_vm2, %v5212_v46  ;;  %v2002_v46 = vsel %vm1999_vm7, %v2000_v16, %v2001_v13  ;;  %v5221_v16 = vrot.slane %v10550_v50, 2 }
 0x18d   : > { %9070 = vmatprep.mubr.msk.bf16.mxu0 %vm614_vm2, %v5214_v1  ;;  %v2003_v1 = vrot.slane %v11027_v14, 4  ;;  %v11435_v14 = vld [vmem:[%s12335_s2 + $0x30] sm:$0x3f]  }
 0x18e   : > { %v5222_v61 = vsel %vm687_vm0, %v5219_v4, %v5221_v16 }
 0x18f   : > { %v2004_v22 = vsel %vm1999_vm7, %v2001_v13, %v2003_v1  ;;  %v2006_v9 = vsel %vm1999_vm7, %v2003_v1, %v2005_v42  ;;  %v2007_v13 = vrot.slane %v11293_v34, 4 }
 0x192   : > { %8645 = vmatmul.mubr.msk.bf16.gmra.mrb[44].mxu1 %vm614_vm2, %v11414_v41 }
 0x193   : > { %8650 = vmatprep.mubr.msk.bf16.mxu1 %vm614_vm2, %v2002_v46  ;;  %v5225_v46 = vrot.slane %v10623_v17, 2 }
 0x194   : > { %9071 = vmatmul.mubr.msk.bf16.gmra.mrb[20].mxu0 %vm614_vm2, %v5216_v51  ;;  %v5220_v51 = vsel %vm687_vm0, %v5217_v31, %v5219_v4  ;;  %v5223_v31 = vrot.slane %v10566_v56, 2 }
 0x195   : > { %9074 = vmatprep.mubr.msk.bf16.mxu0 %vm614_vm2, %v5218_v40  ;;  %v2008_v40 = vsel %vm1999_vm7, %v2005_v42, %v2007_v13  ;;  %v5227_v42 = vrot.slane %v10626_v57, 2 }
 0x196   : > { %v5224_v1 = vsel %vm687_vm0, %v5221_v16, %v5223_v31  ;;  %v5226_v4 = vsel %vm687_vm0, %v5223_v31, %v5225_v46 }
 0x19a   : > { %8651 = vmatmul.mubr.msk.bf16.vlgmr.msra.gmra.mrb[0].mxu1 %vm614_vm2, %v2004_v22  ;;  %v2011_v22 = vrot.slane %v11316_v60, 4 }
 0x19b   : > { %8699 = vmatpush3.bf16.msra.mxu1 %v2436_v44  ;;  %8654 = vmatprep.mubr.msk.bf16.mxu1 %vm614_vm2, %v2006_v9  ;;  %v2010_v44 = vsel %vm1999_vm7, %v2007_v13, %v2009_v7  ;;  %v2013_v9 = vrot.slane %v11332_v6, 4  ;;  %v5228_v13 = vsel %vm687_vm0, %v5225_v46, %v5227_v42 }
 0x19c   : > { %9075 = vmatmul.mubr.msk.bf16.gmra.mrb[24].mxu0 %vm614_vm2, %v5220_v51  ;;  %10074 = vmatprep.subr.msk.bf16.mxu1 %vm687_vm0, %v11435_v14  ;;  %v5229_v51 = vrot.slane %v10637_v63, 2  ;;  %v2012_v16 = vsel %vm1999_vm7, %v2009_v7, %v2011_v22  ;;  %v5231_v7 = vrot.slane %v10640_v0, 2 }
 0x19d   : > { %9078 = vmatprep.mubr.msk.bf16.mxu0 %vm614_vm2, %v5222_v61  ;;  %v2014_v61 = vsel %vm1999_vm7, %v2011_v22, %v2013_v9 }
 0x19e   : > { %v5230_v31 = vsel %vm687_vm0, %v5227_v42, %v5229_v51  ;;  %v5232_v22 = vsel %vm687_vm0, %v5229_v51, %v5231_v7 }
 0x1a2   : > { %8655 = vmatmul.mubr.msk.bf16.gmra.mrb[4].mxu1 %vm614_vm2, %v2008_v40  ;;  %v2015_v40 = vrot.slane %v11336_v15, 4 }
 0x1a3   : > { %8658 = vmatprep.mubr.msk.bf16.mxu1 %vm614_vm2, %v2010_v44  ;;  %v2017_v44 = vrot.slane %v11358_v59, 4 }
 0x1a4   : > { %9079 = vmatmul.mubr.msk.bf16.gmra.mrb[28].mxu0 %vm614_vm2, %v5224_v1  ;;  %v5233_v1 = vrot.slane %v10659_v23, 2  ;;  %v2016_v46 = vsel %vm1999_vm7, %v2013_v9, %v2015_v40  ;;  %v5235_v9 = vrot.slane %v10665_v36, 2 }
 0x1a5   : > { %9082 = vmatprep.mubr.msk.bf16.mxu0 %vm614_vm2, %v5226_v4  ;;  %v2018_v4 = vsel %vm1999_vm7, %v2015_v40, %v2017_v44 }
 0x1a6   : > { %v5234_v42 = vsel %vm687_vm0, %v5231_v7, %v5233_v1  ;;  %v5236_v40 = vsel %vm687_vm0, %v5233_v1, %v5235_v9 }
 0x1aa   : > { %8659 = vmatmul.mubr.msk.bf16.gmra.mrb[8].mxu1 %vm614_vm2, %v2012_v16  ;;  %v2019_v16 = vrot.slane %v11362_v55, 4 }
 0x1ab   : > { %8662 = vmatprep.mubr.msk.bf16.mxu1 %vm614_vm2, %v2014_v61  ;;  %v2021_v61 = vrot.slane %v11382_v10, 4 }
 0x1ac   : > { %9083 = vmatmul.mubr.msk.bf16.gmra.mrb[32].mxu0 %vm614_vm2, %v5228_v13  ;;  %v5237_v13 = vrot.slane %v10689_v62, 2  ;;  %v2020_v51 = vsel %vm1999_vm7, %v2017_v44, %v2019_v16 }
 0x1ad   : > { %9086 = vmatprep.mubr.msk.bf16.mxu0 %vm614_vm2, %v5230_v31  ;;  %v2022_v31 = vsel %vm1999_vm7, %v2019_v16, %v2021_v61 }
 0x1ae   : > { %v5238_v7 = vsel %vm687_vm0, %v5235_v9, %v5237_v13  ;;  %v11505_v9 = vld [vmem:[%s10378_s16] sm:$0xff]  }
 0x1b2   : > { %8663 = vmatmul.mubr.msk.bf16.gmra.mrb[12].mxu1 %vm614_vm2, %v2016_v46  ;;  %v2023_v46 = vrot.slane %v11386_v12, 4 }
 0x1b3   : > { %8666 = vmatprep.mubr.msk.bf16.mxu1 %vm614_vm2, %v2018_v4  ;;  %v11494_v4 = vld [vmem:[%s10258_s5 + $0xb8] sm:$0xff]  }
 0x1b4   : > { %9087 = vmatmul.mubr.msk.bf16.gmra.mrb[36].mxu0 %vm614_vm2, %v5232_v22  ;;  %v2025_v44 = vrot.slane %v11494_v4, 4  ;;  %v5239_v22 = vrot.slane %v10996_v21, 2  ;;  %v2024_v1 = vsel %vm1999_vm7, %v2021_v61, %v2023_v46 }
 0x1b5   : > { %9090 = vmatprep.mubr.msk.bf16.mxu0 %vm614_vm2, %v5234_v42 }
 0x1b6   : > { %v2026_v42 = vsel %vm1999_vm7, %v2023_v46, %v2025_v44  ;;  %v5240_v16 = vsel %vm687_vm0, %v5237_v13, %v5239_v22  ;;  %v11523_v46 = vld [vmem:[%s12335_s2 + $0x78] sm:$0x3f]   ;;  %v11527_v22 = vld [vmem:[%s10378_s16 + $0x10] sm:$0xff]  }
 0x1ba   : > { %8667 = vmatmul.mubr.msk.bf16.gmra.mrb[16].mxu1 %vm614_vm2, %v2020_v51  ;;  %v2027_v51 = vrot.slane %v11505_v9, 4 }
 0x1bb   : > { %8670 = vmatprep.mubr.msk.bf16.mxu1 %vm614_vm2, %v2022_v31  ;;  %v11510_v31 = vld [vmem:[%s10378_s16 + $0x8] sm:$0xff]  }
 0x1bc   : > { %9091 = vmatmul.mubr.msk.bf16.gmra.mrb[40].mxu0 %vm614_vm2, %v5236_v40  ;;  %v2029_v61 = vrot.slane %v11510_v31, 4  ;;  %v2028_v13 = vsel %vm1999_vm7, %v2025_v44, %v2027_v51  ;;  %v11533_v44 = vld [vmem:[%s10378_s16 + $0x18] sm:$0xff]  }
 0x1bd   : > { %9094 = vmatprep.mubr.msk.bf16.mxu0 %vm614_vm2, %v5238_v7  ;;  %v5947_v7 = vsel %vm687_vm0, %v11305_v35, 0  ;;  %v2033_v35 = vrot.slane %v11533_v44, 4 }
 0x1be   : > { %v2030_v40 = vsel %vm1999_vm7, %v2027_v51, %v2029_v61 }
 0x1c2   : > { %8671 = vmatmul.mubr.msk.bf16.gmra.mrb[20].mxu1 %vm614_vm2, %v2024_v1 }
 0x1c3   : > { %8674 = vmatprep.mubr.msk.bf16.mxu1 %vm614_vm2, %v2026_v42 }
 0x1c4   : > { %9095 = vmatmul.mubr.msk.bf16.gmra.mrb[44].mxu0 %vm614_vm2, %v5240_v16  ;;  %v12532_v16 = vshrl.u32 %v10296_v19, 16 }
 0x1c5   : > { %9100 = vmatprep.mubr.msk.bf16.mxu0 %vm614_vm2, %v10720_v43  ;;  %v2031_v43 = vrot.slane %v11527_v22, 4 }
 0x1c6   : > { %v2735_v51 = vrot.slane %v12532_v16, 5 }
 0x1c7   : > { %v2032_v1 = vsel %vm1999_vm7, %v2029_v61, %v2031_v43  ;;  %v2034_v42 = vsel %vm1999_vm7, %v2031_v43, %v2033_v35  ;;  %v11555_v61 = vld [vmem:[%s10378_s16 + $0x28] sm:$0xff]  }
 0x1ca   : > { %8675 = vmatmul.mubr.msk.bf16.gmra.mrb[24].mxu1 %vm614_vm2, %v2028_v13 }
 0x1cb   : > { %8678 = vmatprep.mubr.msk.bf16.mxu1 %vm614_vm2, %v2030_v40 }
 0x1cc   : > { %9101 = vmatmul.mubr.msk.bf16.vlgmr.msra.gmra.mrb[0].mxu0 %vm614_vm2, %v10754_v3  ;;  %v12533_v3 = vshll.u32 %v10296_v19, 16 }
 0x1cd   : > { %9149 = vmatpush3.bf16.msra.mxu0 %v5947_v7  ;;  %9104 = vmatprep.mubr.msk.bf16.mxu0 %vm614_vm2, %v10757_v20  ;;  %v11549_v20 = vld [vmem:[%s10378_s16 + $0x20] sm:$0xff]   ;;  %v2037_v7 = vrot.slane %v11555_v61, 4 }
 0x1ce   : > { %10084 = vmatprep.subr.msk.bf16.mxu0 %vm687_vm0, %v11523_v46  ;;  %v2738_v13 = vrot.slane %v12533_v3, 6  ;;  %v2035_v40 = vrot.slane %v11549_v20, 4  ;;  %v11583_v3 = vld [vmem:[%s10378_s16 + $0x40] sm:$0xff]  }
 0x1d0   : > { %v11560_v19 = vor.u32 %v2738_v13, %v2735_v51  ;;  %v2036_v43 = vsel %vm1999_vm7, %v2033_v35, %v2035_v40  ;;  %v11589_v13 = vld [vmem:[%s10378_s16 + $0x48] sm:$0xff]  }
 0x1d2   : > { %8679 = vmatmul.mubr.msk.bf16.gmra.mrb[28].mxu1 %vm614_vm2, %v2032_v1  ;;  %v2038_v1 = vsel %vm1999_vm7, %v2035_v40, %v2037_v7  ;;  %v2045_v40 = vrot.slane %v11589_v13, 4 }
 0x1d3   : > { %8682 = vmatprep.mubr.msk.bf16.mxu1 %vm614_vm2, %v2034_v42 }
 0x1d4   : > { %9105 = vmatmul.mubr.msk.bf16.gmra.mrb[4].mxu0 %vm614_vm2, %v10782_v54  ;;  %v11567_v54 = vld [vmem:[%s10378_s16 + $0x30] sm:$0xff]  }
 0x1d5   : > { %9108 = vmatprep.mubr.msk.bf16.mxu0 %vm614_vm2, %v10785_v29  ;;  %v2039_v42 = vrot.slane %v11567_v54, 4  ;;  %v11573_v29 = vld [vmem:[%s10378_s16 + $0x38] sm:$0xff]  }
 0x1d6   : > { %v2041_v16 = vrot.slane %v11573_v29, 4 }
 0x1d7   : > { %v2040_v35 = vsel %vm1999_vm7, %v2037_v7, %v2039_v42 }
 0x1d8   : > { %v2042_v51 = vsel %vm1999_vm7, %v2039_v42, %v2041_v16 }
 0x1da   : > { %8683 = vmatmul.mubr.msk.bf16.gmra.mrb[32].mxu1 %vm614_vm2, %v2036_v43  ;;  %v11599_v43 = vld [vmem:[%s10378_s16 + $0x50] sm:$0xff]  }
 0x1db   : > { %8686 = vmatprep.mubr.msk.bf16.mxu1 %vm614_vm2, %v2038_v1  ;;  %v2047_v1 = vrot.slane %v11599_v43, 4 }
 0x1dc   : > { %9109 = vmatmul.mubr.msk.bf16.gmra.mrb[8].mxu0 %vm614_vm2, %v10810_v47  ;;  %v2043_v47 = vrot.slane %v11583_v3, 4 }
 0x1dd   : > { %9112 = vmatprep.mubr.msk.bf16.mxu0 %vm614_vm2, %v10813_v49  ;;  %v2048_v42 = vsel %vm1999_vm7, %v2045_v40, %v2047_v1 }
 0x1de   : > { %v2044_v49 = vsel %vm1999_vm7, %v2041_v16, %v2043_v47  ;;  %v2046_v7 = vsel %vm1999_vm7, %v2043_v47, %v2045_v40  ;;  %v3017_v16 = vsel %vm687_vm0, %v11435_v14, 0  ;;  %v11671_v40 = vld [vmem:[%s10378_s16 + $0x68] sm:$0xff]  }
 0x1df   : > { %v5607_v1 = vrot.slane %v11671_v40, 3 }
 0x1e2   : > { %8687 = vmatmul.mubr.msk.bf16.gmra.mrb[36].mxu1 %vm614_vm2, %v2040_v35  ;;  %v11619_v35 = vld [vmem:[%s12335_s2 + $0x38] sm:$0x3f]  }
 0x1e3   : > { %8690 = vmatprep.mubr.msk.bf16.mxu1 %vm614_vm2, %v2042_v51  ;;  %v5603_v51 = vrot.slane %v10996_v21, 3 }
 0x1e4   : > { %9113 = vmatmul.mubr.msk.bf16.gmra.mrb[12].mxu0 %vm614_vm2, %v10838_v27 }
 0x1e5   : > { %9116 = vmatprep.mubr.msk.bf16.mxu0 %vm614_vm2, %v10841_v30 }
 0x1ea   : > { %8691 = vmatmul.mubr.msk.bf16.gmra.mrb[40].mxu1 %vm614_vm2, %v2044_v49  ;;  %v12539_v49 = vld [vmem:[#allocation25_spill] sm:$0xff] }
 0x1eb   : > { %8694 = vmatprep.mubr.msk.bf16.mxu1 %vm614_vm2, %v2046_v7 }
 0x1ec   : > { %9117 = vmatmul.mubr.msk.bf16.gmra.mrb[16].mxu0 %vm614_vm2, %v10867_v5 }
 0x1ed   : > { %9120 = vmatprep.mubr.msk.bf16.mxu0 %vm614_vm2, %v11342_v58 }
 0x1f2   : > { %8695 = vmatmul.mubr.msk.bf16.gmra.mrb[44].mxu1 %vm614_vm2, %v2048_v42  ;;  %v11685_v42 = vld [vmem:[%s10378_s16 + $0x70] sm:$0xff]  }
 0x1f3   : > { %8700 = vmatprep.mubr.msk.bf16.mxu1 %vm614_vm2, %v10944_v2  ;;  %v5599_v2 = vrot.slane %v11589_v13, 3 }
 0x1f4   : > { %9121 = vmatmul.mubr.msk.bf16.gmra.mrb[20].mxu0 %vm614_vm2, %v11345_v25 }
 0x1f5   : > { %9124 = vmatprep.mubr.msk.bf16.mxu0 %vm614_vm2, %v11366_v53 }
 0x1fa   : > { %8701 = vmatmul.mubr.msk.bf16.vlgmr.msra.gmra.mrb[0].mxu1 %vm614_vm2, %v10947_v38  ;;  %v12534_v38 = vrot.slane %v10640_v0, 3 }
 0x1fb   : > { %8749 = vmatpush3.bf16.msra.mxu1 %v3017_v16  ;;  %8704 = vmatprep.mubr.msk.bf16.mxu1 %vm614_vm2, %v10972_v52  ;;  %v5597_v52 = vrot.slane %v11583_v3, 3  ;;  %v12541_v16 = vld [vmem:[#allocation26_spill] sm:$0xff] }
 0x1fc   : > { %9125 = vmatmul.mubr.msk.bf16.gmra.mrb[24].mxu0 %vm614_vm2, %v11369_v28  ;;  %10075 = vmatprep.subr.msk.bf16.mxu1 %vm687_vm0, %v11619_v35 }
 0x1fd   : > { %9128 = vmatprep.mubr.msk.bf16.mxu0 %vm614_vm2, %v11390_v33  ;;  %v11644_v14 = vsel %vm916_vm3, %v12534_v38, %v5597_v52  ;;  %v12462_v38 = vrot.slane %v11685_v42, 3  ;;  %v12566_v33 = vld [vmem:[#allocation45_spill] sm:$0xff] }
 0x1fe   : > { %12535 = vst [vmem:[#allocation58_spill] sm:$0xff] %v11644_v14 }
 0x202   : > { %8705 = vmatmul.mubr.msk.bf16.gmra.mrb[4].mxu1 %vm614_vm2, %v10975_v32  ;;  %v11649_v32 = vsel %vm916_vm3, %v5597_v52, %v5599_v2 }
 0x203   : > { %8708 = vmatprep.mubr.msk.bf16.mxu1 %vm614_vm2, %v11003_v45  ;;  %12536 = vst [vmem:[#allocation59_spill] sm:$0xff] %v11649_v32  ;;  %v5601_v45 = vrot.slane %v11599_v43, 3 }
 0x204   : > { %9129 = vmatmul.mubr.msk.bf16.gmra.mrb[28].mxu0 %vm614_vm2, %v11393_v37 }
 0x205   : > { %9132 = vmatprep.mubr.msk.bf16.mxu0 %vm614_vm2, %v11414_v41  ;;  %v11660_v47 = vsel %vm916_vm3, %v5599_v2, %v5601_v45  ;;  %v12543_v2 = vld [vmem:[#allocation27_spill] sm:$0xff] }
 0x206   : > { %12537 = vst [vmem:[#allocation60_spill] sm:$0xff] %v11660_v47 }
 0x20a   : > { %8709 = vmatmul.mubr.msk.bf16.gmra.mrb[8].mxu1 %vm614_vm2, %v11006_v11  ;;  %v11663_v11 = vld [vmem:[%s10378_s16 + $0x60] sm:$0xff]  }
 0x20b   : > { %8712 = vmatprep.mubr.msk.bf16.mxu1 %vm614_vm2, %v11031_v26  ;;  %v11668_v26 = vsel %vm916_vm3, %v5601_v45, %v5603_v51  ;;  %v5605_v7 = vrot.slane %v11663_v11, 3  ;;  %v11702_v45 = vsel %vm916_vm3, %v5607_v1, %v12462_v38  ;;  %v12551_v38 = vld [vmem:[#allocation35_spill] sm:$0xff] }
 0x20c   : > { %9133 = vmatmul.mubr.msk.bf16.gmra.mrb[32].mxu0 %vm614_vm2, %v11644_v14  ;;  %12538 = vst [vmem:[#allocation61_spill] sm:$0xff] %v11668_v26  ;;  %12544 = vst [vmem:[#allocation27_spill] sm:$0xff] %v11702_v45 }
 0x20d   : > { %9136 = vmatprep.mubr.msk.bf16.mxu0 %vm614_vm2, %v11649_v32  ;;  %v11690_v52 = vsel %vm916_vm3, %v5605_v7, %v5607_v1  ;;  %v11719_v1 = vld [vmem:[%s12335_s2 + $0x80] sm:$0x3f]  }
 0x20e   : > { %12542 = vst [vmem:[#allocation26_spill] sm:$0xff] %v11690_v52 }
 0x212   : > { %8713 = vmatmul.mubr.msk.bf16.gmra.mrb[12].mxu1 %vm614_vm2, %v11034_v8  ;;  %v11682_v8 = vsel %vm916_vm3, %v5603_v51, %v5605_v7  ;;  %v12545_v51 = vld [vmem:[#allocation28_spill] sm:$0xff]  ;;  %v12547_v7 = vld [vmem:[#allocation31_spill] sm:$0xff] }
 0x213   : > { %8716 = vmatprep.mubr.msk.bf16.mxu1 %vm614_vm2, %v12539_v49  ;;  %12540 = vst [vmem:[#allocation25_spill] sm:$0xff] %v11682_v8  ;;  %v12546_v49 = vld [vmem:[#allocation29_spill] sm:$0xff] }
 0x214   : > { %9137 = vmatmul.mubr.msk.bf16.gmra.mrb[36].mxu0 %vm614_vm2, %v11660_v47  ;;  %v12563_v47 = vld [vmem:[#allocation3_spill] sm:$0xff] }
 0x215   : > { %9140 = vmatprep.mubr.msk.bf16.mxu0 %vm614_vm2, %v11668_v26  ;;  %v12562_v26 = vld [vmem:[#allocation44_spill] sm:$0xff]  ;;  %v12564_v32 = vshrl.u32 %v12563_v47, 16  ;;  %v12565_v41 = vshll.u32 %v12563_v47, 16 }
 0x217   : > { %v2726_v14 = vrot.slane %v12564_v32, 5  ;;  %v2729_v37 = vrot.slane %v12565_v41, 6  ;;  %v12568_v41 = vld [vmem:[#allocation4_spill] sm:$0xff] }
 0x21a   : > { %8717 = vmatmul.mubr.msk.bf16.gmra.mrb[16].mxu1 %vm614_vm2, %v12541_v16  ;;  %v12548_v16 = vld [vmem:[#allocation30_spill] sm:$0xff] }
 0x21b   : > { %8720 = vmatprep.mubr.msk.bf16.mxu1 %vm614_vm2, %v12543_v2  ;;  %v6266_v2 = vsel %vm687_vm0, %v11523_v46, 0  ;;  %v12553_v46 = vld [vmem:[#allocation37_spill] sm:$0xff] }
 0x21c   : > { %9141 = vmatmul.mubr.msk.bf16.gmra.mrb[40].mxu0 %vm614_vm2, %v11682_v8  ;;  %v2716_v8 = vshrl.u32 %v11404_v24, 16 }
 0x21d   : > { %9144 = vmatprep.mubr.msk.bf16.mxu0 %vm614_vm2, %v11690_v52 }
 0x222   : > { %8721 = vmatmul.mubr.msk.bf16.gmra.mrb[20].mxu1 %vm614_vm2, %v12545_v51  ;;  %v12549_v51 = vld [vmem:[#allocation33_spill] sm:$0xff] }
 0x223   : > { %8724 = vmatprep.mubr.msk.bf16.mxu1 %vm614_vm2, %v12546_v49  ;;  %v12550_v49 = vld [vmem:[#allocation32_spill] sm:$0xff] }
 0x224   : > { %9145 = vmatmul.mubr.msk.bf16.gmra.mrb[44].mxu0 %vm614_vm2, %v11702_v45  ;;  %v12558_v45 = vld [vmem:[#allocation40_spill] sm:$0xff] }
 0x225   : > { %9150 = vmatprep.mubr.msk.bf16.mxu0 %vm614_vm2, %v12547_v7  ;;  %v12552_v7 = vld [vmem:[#allocation34_spill] sm:$0xff] }
 0x22a   : > { %8725 = vmatmul.mubr.msk.bf16.gmra.mrb[24].mxu1 %vm614_vm2, %v12548_v16  ;;  %v12554_v16 = vld [vmem:[#allocation36_spill] sm:$0xff] }
 0x22b   : > { %8728 = vmatprep.mubr.msk.bf16.mxu1 %vm614_vm2, %v12549_v51  ;;  %v12555_v51 = vld [vmem:[#allocation39_spill] sm:$0xff] }
 0x22c   : > { %9151 = vmatmul.mubr.msk.bf16.vlgmr.msra.gmra.mrb[0].mxu0 %vm614_vm2, %v12550_v49  ;;  %v12556_v49 = vld [vmem:[#allocation38_spill] sm:$0xff] }
 0x22d   : > { %9199 = vmatpush3.bf16.msra.mxu0 %v6266_v2  ;;  %9154 = vmatprep.mubr.msk.bf16.mxu0 %vm614_vm2, %v12551_v38  ;;  %v12557_v2 = vld [vmem:[#allocation41_spill] sm:$0xff]  ;;  %v2405_v38 = vrot.slane %v11567_v54, 5 }
 0x22e   : > { %10085 = vmatprep.subr.msk.bf16.mxu0 %vm687_vm0, %v11719_v1 }
 0x232   : > { %8729 = vmatmul.mubr.msk.bf16.gmra.mrb[28].mxu1 %vm614_vm2, %v12552_v7  ;;  %v2407_v7 = vrot.slane %v11573_v29, 5 }
 0x233   : > { %8732 = vmatprep.mubr.msk.bf16.mxu1 %vm614_vm2, %v12553_v46  ;;  %v12559_v46 = vld [vmem:[#allocation42_spill] sm:$0xff] }
 0x234   : > { %9155 = vmatmul.mubr.msk.bf16.gmra.mrb[4].mxu0 %vm614_vm2, %v12554_v16  ;;  %v12560_v16 = vrot.slane %v10626_v57, 5  ;;  %v2408_v52 = vsel %vm1274_vm4, %v2405_v38, %v2407_v7 }
 0x235   : > { %9158 = vmatprep.mubr.msk.bf16.mxu0 %vm614_vm2, %v12555_v51 }
 0x236   : > { %v2406_v51 = vsel %vm1274_vm4, %v12560_v16, %v2405_v38 }
 0x23a   : > { %8733 = vmatmul.mubr.msk.bf16.gmra.mrb[32].mxu1 %vm614_vm2, %v12556_v49  ;;  %v2409_v49 = vrot.slane %v11583_v3, 5 }
 0x23b   : > { %8736 = vmatprep.mubr.msk.bf16.mxu1 %vm614_vm2, %v12557_v2  ;;  %v2411_v2 = vrot.slane %v11589_v13, 5 }
 0x23c   : > { %9159 = vmatmul.mubr.msk.bf16.gmra.mrb[8].mxu0 %vm614_vm2, %v12558_v45  ;;  %v12561_v45 = vld [vmem:[#allocation43_spill] sm:$0xff]  ;;  %v2410_v38 = vsel %vm1274_vm4, %v2407_v7, %v2409_v49  ;;  %v2730_v7 = vor.u32 %v2729_v37, %v2726_v14  ;;  %v12572_v14 = vld [vmem:[#allocation48_spill] sm:$0xff] }
 0x23d   : > { %9162 = vmatprep.mubr.msk.bf16.mxu0 %vm614_vm2, %v12559_v46  ;;  %v2719_v46 = vshll.u32 %v11404_v24, 16  ;;  %v2412_v16 = vsel %vm1274_vm4, %v2409_v49, %v2411_v2  ;;  %v12567_v49 = vld [vmem:[#allocation46_spill] sm:$0xff] }
 0x242   : > { %8737 = vmatmul.mubr.msk.bf16.gmra.mrb[36].mxu1 %vm614_vm2, %v2406_v51  ;;  %v2718_v51 = vrot.slane %v2716_v8, 5  ;;  %v12569_v8 = vshrl.u32 %v12568_v41, 16 }
 0x243   : > { %8740 = vmatprep.mubr.msk.bf16.mxu1 %vm614_vm2, %v2408_v52  ;;  %v2721_v52 = vrot.slane %v2719_v46, 6 }
 0x244   : > { %9163 = vmatmul.mubr.msk.bf16.gmra.mrb[12].mxu0 %vm614_vm2, %v12561_v45  ;;  %v2413_v45 = vrot.slane %v11599_v43, 5  ;;  %v2744_v46 = vrot.slane %v12569_v8, 5 }
 0x245   : > { %9166 = vmatprep.mubr.msk.bf16.mxu0 %vm614_vm2, %v12562_v26  ;;  %v2722_v26 = vor.u32 %v2721_v52, %v2718_v51  ;;  %v12573_v51 = vld [vmem:[#allocation5_spill] sm:$0xff] }
 0x246   : > { %v2414_v32 = vsel %vm1274_vm4, %v2411_v2, %v2413_v45  ;;  %v2740_v2 = vsel %vm2714_vm8, %v2730_v7, %v11560_v19  ;;  %v12574_v52 = vshrl.u32 %v12573_v51, 16 }
 0x247   : > { %v2731_v47 = vsel %vm2714_vm8, %v2722_v26, %v2730_v7  ;;  %v12575_v26 = vshll.u32 %v12573_v51, 16 }
 0x248   : > { %v2753_v45 = vrot.slane %v12574_v52, 5 }
 0x24a   : > { %8741 = vmatmul.mubr.msk.bf16.gmra.mrb[40].mxu1 %vm614_vm2, %v2410_v38  ;;  %v12570_v38 = vshll.u32 %v12568_v41, 16  ;;  %v12576_v41 = vld [vmem:[#allocation6_spill] sm:$0xff] }
 0x24b   : > { %8744 = vmatprep.mubr.msk.bf16.mxu1 %vm614_vm2, %v2412_v16  ;;  %v12577_v8 = vshrl.u32 %v12576_v41, 16 }
 0x24c   : > { %9167 = vmatmul.mubr.msk.bf16.gmra.mrb[16].mxu0 %vm614_vm2, %v12566_v33  ;;  %v2747_v16 = vrot.slane %v12570_v38, 6  ;;  %v12571_v33 = vld [vmem:[#allocation47_spill] sm:$0xff]  ;;  %v12578_v38 = vshll.u32 %v12576_v41, 16 }
 0x24d   : > { %9170 = vmatprep.mubr.msk.bf16.mxu0 %vm614_vm2, %v12567_v49  ;;  %v2756_v49 = vrot.slane %v12575_v26, 6 }
 0x24e   : > { %v2748_v37 = vor.u32 %v2747_v16, %v2744_v46  ;;  %v2762_v46 = vrot.slane %v12577_v8, 5  ;;  %v2765_v16 = vrot.slane %v12578_v38, 6 }
 0x24f   : > { %v2757_v7 = vor.u32 %v2756_v49, %v2753_v45 }
 0x251   : > { %v2758_v51 = vsel %vm2714_vm8, %v2748_v37, %v2757_v7 }
 0x252   : > { %8745 = vmatmul.mubr.msk.bf16.gmra.mrb[44].mxu1 %vm614_vm2, %v2414_v32  ;;  %v3423_v32 = vsel %vm687_vm0, %v11619_v35, 0  ;;  %v12580_v35 = vld [vmem:[#allocation50_spill] sm:$0xff] }
 0x253   : > { %8750 = vmatprep.mubr.msk.bf16.mxu1 %vm614_vm2, %v2731_v47  ;;  %v2749_v47 = vsel %vm2714_vm8, %v11560_v19, %v2748_v37  ;;  %v10182_v19 = vld [vmem:[%s12335_s2 + $0x40] sm:$0x3f]   ;;  %v12587_v37 = vld [vmem:[#allocation51_spill] sm:$0xff] }
 0x254   : > { %9171 = vmatmul.mubr.msk.bf16.gmra.mrb[20].mxu0 %vm614_vm2, %v12571_v33  ;;  %v12579_v33 = vld [vmem:[#allocation49_spill] sm:$0xff] }
 0x255   : > { %9174 = vmatprep.mubr.msk.bf16.mxu0 %vm614_vm2, %v12572_v14  ;;  %v2766_v14 = vor.u32 %v2765_v16, %v2762_v46 }
 0x25a   : > { %8751 = vmatmul.mubr.msk.bf16.vlgmr.msra.gmra.mrb[0].mxu1 %vm614_vm2, %v2740_v2  ;;  %v12581_v2 = vld [vmem:[#allocation7_spill] sm:$0xff] }
 0x25b   : > { %8799 = vmatpush3.bf16.msra.mxu1 %v3423_v32  ;;  %8754 = vmatprep.mubr.msk.bf16.mxu1 %vm614_vm2, %v2749_v47  ;;  %v12582_v52 = vshrl.u32 %v12581_v2, 16  ;;  %v12583_v45 = vshll.u32 %v12581_v2, 16  ;;  %v2767_v32 = vsel %vm2714_vm8, %v2757_v7, %v2766_v14  ;;  %v12584_v47 = vld [vmem:[#allocation8_spill] sm:$0xff] }
 0x25c   : > { %9175 = vmatmul.mubr.msk.bf16.gmra.mrb[24].mxu0 %vm614_vm2, %v12579_v33  ;;  %10077 = vmatprep.subr.msk.bf16.mxu1 %vm687_vm0, %v10182_v19  ;;  %v12585_v41 = vshrl.u32 %v12584_v47, 16  ;;  %v12586_v46 = vshll.u32 %v12584_v47, 16  ;;  %v12588_v19 = vld [vmem:[#allocation52_spill] sm:$0xff] }
 0x25d   : > { %9178 = vmatprep.mubr.msk.bf16.mxu0 %vm614_vm2, %v12580_v35  ;;  %v2771_v26 = vrot.slane %v12582_v52, 5  ;;  %v2774_v49 = vrot.slane %v12583_v45, 6  ;;  %v12589_v35 = vld [vmem:[#allocation9_spill] sm:$0xff] }
 0x25e   : > { %v2780_v8 = vrot.slane %v12585_v41, 5  ;;  %v2783_v38 = vrot.slane %v12586_v46, 6  ;;  %v12590_v2 = vshrl.u32 %v12589_v35, 16  ;;  %v12591_v45 = vshll.u32 %v12589_v35, 16  ;;  %v12592_v41 = vld [vmem:[#allocation10_spill] sm:$0xff] }
 0x25f   : > { %v2775_v16 = vor.u32 %v2774_v49, %v2771_v26  ;;  %v12594_v49 = vshll.u32 %v12592_v41, 16 }
 0x260   : > { %v2784_v33 = vor.u32 %v2783_v38, %v2780_v8  ;;  %v2789_v52 = vrot.slane %v12590_v2, 5  ;;  %v2792_v47 = vrot.slane %v12591_v45, 6  ;;  %v12595_v8 = vld [vmem:[#allocation53_spill] sm:$0xff]  ;;  %v12597_v2 = vld [vmem:[#allocation12_spill] sm:$0xff] }
 0x261   : > { %v2776_v7 = vsel %vm2714_vm8, %v2766_v14, %v2775_v16  ;;  %v2801_v46 = vrot.slane %v12594_v49, 6  ;;  %v12598_v45 = vshrl.u32 %v12597_v2, 16 }
 0x262   : > { %8755 = vmatmul.mubr.msk.bf16.gmra.mrb[4].mxu1 %vm614_vm2, %v2758_v51  ;;  %v2785_v51 = vsel %vm2714_vm8, %v2775_v16, %v2784_v33  ;;  %v2793_v14 = vor.u32 %v2792_v47, %v2789_v52  ;;  %v5916_v16 = vrot.slane %v11663_v11, 1  ;;  %v12600_v47 = vld [vmem:[#allocation14_spill] sm:$0xff] }
 0x263   : > { %8758 = vmatprep.mubr.msk.bf16.mxu1 %vm614_vm2, %v2767_v32  ;;  %v12593_v32 = vshrl.u32 %v12592_v41, 16  ;;  %v12602_v49 = vshll.u32 %v12600_v47, 16 }
 0x264   : > { %9179 = vmatmul.mubr.msk.bf16.gmra.mrb[28].mxu0 %vm614_vm2, %v12587_v37  ;;  %v12596_v37 = vld [vmem:[#allocation54_spill] sm:$0xff]  ;;  %v2794_v35 = vsel %vm2714_vm8, %v2784_v33, %v2793_v14 }
 0x265   : > { %9182 = vmatprep.mubr.msk.bf16.mxu0 %vm614_vm2, %v12588_v19  ;;  %v2798_v26 = vrot.slane %v12593_v32, 5  ;;  %v5918_v19 = vrot.slane %v11671_v40, 1  ;;  %v12601_v32 = vshrl.u32 %v12600_v47, 16 }
 0x267   : > { %v2802_v38 = vor.u32 %v2801_v46, %v2798_v26  ;;  %v2816_v26 = vrot.slane %v12601_v32, 5  ;;  %v2819_v46 = vrot.slane %v12602_v49, 6  ;;  %v5919_v33 = vsel %vm4785_vm6, %v5916_v16, %v5918_v19 }
 0x269   : > { %v2803_v52 = vsel %vm2714_vm8, %v2793_v14, %v2802_v38 }
 0x26a   : > { %8759 = vmatmul.mubr.msk.bf16.gmra.mrb[8].mxu1 %vm614_vm2, %v2776_v7  ;;  %v2807_v7 = vrot.slane %v12598_v45, 5  ;;  %v11860_v45 = vld [vmem:[%s10378_s16 + $0x78] sm:$0xff]  }
 0x26b   : > { %8762 = vmatprep.mubr.msk.bf16.mxu1 %vm614_vm2, %v2785_v51  ;;  %v12599_v51 = vshll.u32 %v12597_v2, 16  ;;  %v2820_v2 = vor.u32 %v2819_v46, %v2816_v26  ;;  %v12608_v26 = vshll.u32 %v10512_v39, 16 }
 0x26c   : > { %9183 = vmatmul.mubr.msk.bf16.gmra.mrb[32].mxu0 %vm614_vm2, %v12595_v8  ;;  %v12603_v8 = vrot.slane %v10996_v21, 1  ;;  %v5922_v21 = vrot.slane %v11860_v45, 1 }
 0x26d   : > { %9186 = vmatprep.mubr.msk.bf16.mxu0 %vm614_vm2, %v12596_v37  ;;  %v2810_v41 = vrot.slane %v12599_v51, 6  ;;  %v5920_v51 = vrot.slane %v11685_v42, 1  ;;  %v2837_v46 = vrot.slane %v12608_v26, 6 }
 0x26e   : > { %v5917_v37 = vsel %vm4785_vm6, %v12603_v8, %v5916_v16 }
 0x26f   : > { %v2811_v14 = vor.u32 %v2810_v41, %v2807_v7  ;;  %v12607_v7 = vshrl.u32 %v10512_v39, 16 }
 0x271   : > { %v2812_v47 = vsel %vm2714_vm8, %v2802_v38, %v2811_v14  ;;  %v2834_v41 = vrot.slane %v12607_v7, 5  ;;  %v5923_v38 = vsel %vm4785_vm6, %v5920_v51, %v5922_v21 }
 0x272   : > { %8763 = vmatmul.mubr.msk.bf16.gmra.mrb[12].mxu1 %vm614_vm2, %v2794_v35  ;;  %v12604_v35 = vld [vmem:[#allocation16_spill] sm:$0xff] }
 0x273   : > { %8766 = vmatprep.mubr.msk.bf16.mxu1 %vm614_vm2, %v2803_v52  ;;  %v12605_v32 = vshrl.u32 %v12604_v35, 16  ;;  %v12606_v49 = vshll.u32 %v12604_v35, 16  ;;  %v2821_v52 = vsel %vm2714_vm8, %v2811_v14, %v2820_v2  ;;  %v2838_v14 = vor.u32 %v2837_v46, %v2834_v41 }
 0x274   : > { %9187 = vmatmul.mubr.msk.bf16.gmra.mrb[36].mxu0 %vm614_vm2, %v5917_v37  ;;  %v5921_v37 = vsel %vm4785_vm6, %v5918_v19, %v5920_v51 }
 0x275   : > { %9190 = vmatprep.mubr.msk.bf16.mxu0 %vm614_vm2, %v5919_v33  ;;  %v2825_v16 = vrot.slane %v12605_v32, 5  ;;  %v2828_v8 = vrot.slane %v12606_v49, 6  ;;  %v11879_v33 = vld [vmem:[%s10378_s16 + $0x80] sm:$0xff]   ;;  %v12609_v49 = vld [vmem:[#allocation19_spill] sm:$0xff] }
 0x276   : > { %v5924_v32 = vrot.slane %v11879_v33, 1  ;;  %v12610_v19 = vshrl.u32 %v12609_v49, 16  ;;  %v12611_v26 = vshll.u32 %v12609_v49, 16  ;;  %v12615_v49 = vshrl.u32 %v10550_v50, 16 }
 0x277   : > { %v2829_v35 = vor.u32 %v2828_v8, %v2825_v16  ;;  %v12613_v8 = vshll.u32 %v10539_v48, 16 }
 0x278   : > { %v2843_v7 = vrot.slane %v12610_v19, 5  ;;  %v5925_v46 = vsel %vm4785_vm6, %v5922_v21, %v5924_v32  ;;  %v2861_v19 = vrot.slane %v12615_v49, 5  ;;  %v12617_v32 = vshrl.u32 %v10566_v56, 16 }
 0x279   : > { %v2830_v39 = vsel %vm2714_vm8, %v2820_v2, %v2829_v35  ;;  %v2839_v51 = vsel %vm2714_vm8, %v2829_v35, %v2838_v14  ;;  %v2855_v41 = vrot.slane %v12613_v8, 6 }
 0x27a   : > { %8767 = vmatmul.mubr.msk.bf16.gmra.mrb[16].mxu1 %vm614_vm2, %v2812_v47  ;;  %v2846_v47 = vrot.slane %v12611_v26, 6 }
 0x27b   : > { %8770 = vmatprep.mubr.msk.bf16.mxu1 %vm614_vm2, %v2821_v52  ;;  %v12612_v52 = vshrl.u32 %v10539_v48, 16  ;;  %v12616_v48 = vshll.u32 %v10550_v50, 16 }
 0x27c   : > { %9191 = vmatmul.mubr.msk.bf16.gmra.mrb[40].mxu0 %vm614_vm2, %v5921_v37  ;;  %v2847_v2 = vor.u32 %v2846_v47, %v2843_v7  ;;  %v12618_v7 = vshll.u32 %v10566_v56, 16 }
 0x27d   : > { %9194 = vmatprep.mubr.msk.bf16.mxu0 %vm614_vm2, %v5923_v38  ;;  %v2852_v16 = vrot.slane %v12612_v52, 5  ;;  %v12614_v38 = vld [vmem:[#allocation11_spill] sm:$0xff]  ;;  %v2864_v26 = vrot.slane %v12616_v48, 6  ;;  %v12619_v52 = vld [vmem:[#allocation13_spill] sm:$0xff] }
 0x27e   : > { %v2848_v35 = vsel %vm2714_vm8, %v2838_v14, %v2847_v2  ;;  %v2873_v47 = vrot.slane %v12618_v7, 6 }
 0x27f   : > { %v2856_v37 = vor.u32 %v2855_v41, %v2852_v16  ;;  %v2865_v14 = vor.u32 %v2864_v26, %v2861_v19  ;;  %v12620_v16 = vld [vmem:[#allocation15_spill] sm:$0xff]  ;;  %v12621_v41 = vshrl.u32 %v10623_v17, 16  ;;  %v12624_v19 = vshll.u32 %v10626_v57, 16 }
 0x281   : > { %v2857_v21 = vsel %vm2714_vm8, %v2847_v2, %v2856_v37  ;;  %v2866_v8 = vsel %vm2714_vm8, %v2856_v37, %v2865_v14  ;;  %v12622_v2 = vshll.u32 %v10623_v17, 16  ;;  %v2891_v48 = vrot.slane %v12624_v19, 6  ;;  %v12625_v37 = vld [vmem:[#allocation17_spill] sm:$0xff] }
 0x282   : > { %8771 = vmatmul.mubr.msk.bf16.gmra.mrb[20].mxu1 %vm614_vm2, %v2830_v39  ;;  %v2870_v39 = vrot.slane %v12617_v32, 5  ;;  %v12626_v32 = vld [vmem:[#allocation18_spill] sm:$0xff]  ;;  %v12635_v19 = vshrl.u32 %v10665_v36, 16 }
 0x283   : > { %8774 = vmatprep.mubr.msk.bf16.mxu1 %vm614_vm2, %v2839_v51  ;;  %v6585_v51 = vsel %vm687_vm0, %v11719_v1, 0 }
 0x284   : > { %9195 = vmatmul.mubr.msk.bf16.gmra.mrb[44].mxu0 %vm614_vm2, %v5925_v46  ;;  %v2874_v50 = vor.u32 %v2873_v47, %v2870_v39  ;;  %v2879_v46 = vrot.slane %v12621_v41, 5  ;;  %v12627_v39 = vshrl.u32 %v10637_v63, 16 }
 0x285   : > { %9200 = vmatprep.mubr.msk.bf16.mxu0 %vm614_vm2, %v12614_v38  ;;  %v2882_v38 = vrot.slane %v12622_v2, 6  ;;  %v12632_v2 = vld [vmem:[#allocation21_spill] sm:$0xff] }
 0x286   : > { %v2875_v1 = vsel %vm2714_vm8, %v2865_v14, %v2874_v50  ;;  %v2897_v7 = vrot.slane %v12627_v39, 5  ;;  %v12629_v14 = vshrl.u32 %v10640_v0, 16  ;;  %v3701_v39 = vrot.slane %v11549_v20, 7 }
 0x287   : > { %v2883_v26 = vor.u32 %v2882_v38, %v2879_v46  ;;  %v12633_v38 = vshrl.u32 %v10659_v23, 16 }
 0x289   : > { %v2884_v17 = vsel %vm2714_vm8, %v2874_v50, %v2883_v26  ;;  %v12631_v50 = vld [vmem:[#allocation20_spill] sm:$0xff] }
 0x28a   : > { %8775 = vmatmul.mubr.msk.bf16.gmra.mrb[24].mxu1 %vm614_vm2, %v2848_v35  ;;  %v12623_v35 = vshrl.u32 %v10626_v57, 16  ;;  %v12628_v57 = vshll.u32 %v10637_v63, 16 }
 0x28b   : > { %8778 = vmatprep.mubr.msk.bf16.mxu1 %vm614_vm2, %v2857_v21 }
 0x28c   : > { %9201 = vmatmul.mubr.msk.bf16.vlgmr.msra.gmra.mrb[0].mxu0 %vm614_vm2, %v12619_v52  ;;  %v2888_v49 = vrot.slane %v12623_v35, 5  ;;  %v2900_v47 = vrot.slane %v12628_v57, 6  ;;  %v2906_v52 = vrot.slane %v12629_v14, 5 }
 0x28d   : > { %9249 = vmatpush3.bf16.msra.mxu0 %v6585_v51  ;;  %9204 = vmatprep.mubr.msk.bf16.mxu0 %vm614_vm2, %v12620_v16  ;;  %v12630_v16 = vshll.u32 %v10640_v0, 16  ;;  %v12634_v0 = vshll.u32 %v10659_v23, 16  ;;  %v12638_v23 = vld [vmem:[#allocation23_spill] sm:$0xff] }
 0x28e   : > { %v2892_v21 = vor.u32 %v2891_v48, %v2888_v49  ;;  %v2901_v41 = vor.u32 %v2900_v47, %v2897_v7  ;;  %v2924_v48 = vrot.slane %v12635_v19, 5  ;;  %v12640_v47 = vshll.u32 %v10689_v62, 16 }
 0x28f   : > { %v2918_v35 = vrot.slane %v12634_v0, 6 }
 0x290   : > { %v2893_v51 = vsel %vm2714_vm8, %v2883_v26, %v2892_v21  ;;  %v2902_v63 = vsel %vm2714_vm8, %v2892_v21, %v2901_v41  ;;  %v12636_v26 = vshll.u32 %v10665_v36, 16  ;;  %v12639_v36 = vshrl.u32 %v10689_v62, 16  ;;  %v10183_v62 = vld [vmem:[%s10258_s5 + $0x58] sm:$0xff]  }
 0x292   : > { %8779 = vmatmul.mubr.msk.bf16.gmra.mrb[28].mxu1 %vm614_vm2, %v2866_v8  ;;  %v2909_v8 = vrot.slane %v12630_v16, 6  ;;  %v2933_v57 = vrot.slane %v12639_v36, 5 }
 0x293   : > { %8782 = vmatprep.mubr.msk.bf16.mxu1 %vm614_vm2, %v2875_v1  ;;  %v2915_v1 = vrot.slane %v12633_v38, 5  ;;  %v3705_v38 = vrot.slane %v11567_v54, 7 }
 0x294   : > { %9205 = vmatmul.mubr.msk.bf16.gmra.mrb[4].mxu0 %vm614_vm2, %v12625_v37  ;;  %v2910_v46 = vor.u32 %v2909_v8, %v2906_v52  ;;  %v2927_v37 = vrot.slane %v12636_v26, 6  ;;  %v12641_v52 = vrot.slane %v10566_v56, 7  ;;  %v3703_v56 = vrot.slane %v11555_v61, 7 }
 0x295   : > { %9208 = vmatprep.mubr.msk.bf16.mxu0 %vm614_vm2, %v12626_v32  ;;  %v2919_v21 = vor.u32 %v2918_v35, %v2915_v1  ;;  %v12637_v32 = vld [vmem:[#allocation22_spill] sm:$0xff] }
 0x296   : > { %v2911_v49 = vsel %vm2714_vm8, %v2901_v41, %v2910_v46  ;;  %v11980_v16 = vsel %vm559_vm1, %v12641_v52, %v3701_v39  ;;  %v12642_v41 = vld [vmem:[#allocation24_spill] sm:$0xff]  ;;  %v11994_v35 = vsel %vm559_vm1, %v3701_v39, %v3703_v56  ;;  %v3713_v52 = vrot.slane %v11599_v43, 7 }
 0x297   : > { %v2920_v7 = vsel %vm2714_vm8, %v2910_v46, %v2919_v21  ;;  %v3296_v46 = vrot.slane %v11404_v24, 6  ;;  %v11998_v24 = vsel %vm559_vm1, %v3703_v56, %v3705_v38  ;;  %v10186_v56 = vld [vmem:[%s10378_s16 + $0x58] sm:$0xff]  }
 0x29a   : > { %8783 = vmatmul.mubr.msk.bf16.gmra.mrb[32].mxu1 %vm614_vm2, %v2884_v17  ;;  %v2928_v17 = vor.u32 %v2927_v37, %v2924_v48  ;;  %v10185_v48 = vld [vmem:[%s10258_s5 + $0x68] sm:$0xff]   ;;  %v3707_v37 = vrot.slane %v11573_v29, 7 }
 0x29b   : > { %8786 = vmatprep.mubr.msk.bf16.mxu1 %vm614_vm2, %v2893_v51  ;;  %v2936_v51 = vrot.slane %v12640_v47, 6  ;;  %v3301_v26 = vrot.slane %v10185_v48, 6  ;;  %v3303_v47 = vrot.slane %v11293_v34, 6  ;;  %v3313_v48 = vrot.slane %v11358_v59, 6 }
 0x29c   : > { %9209 = vmatmul.mubr.msk.bf16.gmra.mrb[8].mxu0 %vm614_vm2, %v12631_v50  ;;  %v2929_v14 = vsel %vm2714_vm8, %v2919_v21, %v2928_v17  ;;  %v3709_v21 = vrot.slane %v11583_v3, 7  ;;  %v3315_v59 = vrot.slane %v11362_v55, 6 }
 0x29d   : > { %9212 = vmatprep.mubr.msk.bf16.mxu0 %vm614_vm2, %v12632_v2  ;;  %v2937_v8 = vor.u32 %v2936_v51, %v2933_v57  ;;  %v12643_v57 = vld [vmem:[#allocation2_spill] sm:$0xff]  ;;  %v3305_v51 = vrot.slane %v11312_v18, 6  ;;  %v3307_v18 = vrot.slane %v11316_v60, 6 }
 0x29e   : > { %v12016_v36 = vsel %vm559_vm1, %v3707_v37, %v3709_v21 }
 0x29f   : > { %v2938_v1 = vsel %vm2714_vm8, %v2928_v17, %v2937_v8  ;;  %v3304_v8 = vsel %vm3295_vm9, %v3301_v26, %v3303_v47 }
 0x2a2   : > { %8787 = vmatmul.mubr.msk.bf16.gmra.mrb[36].mxu1 %vm614_vm2, %v2902_v63  ;;  %v3297_v63 = vrot.slane %v10183_v62, 6 }
 0x2a3   : > { %8790 = vmatprep.mubr.msk.bf16.mxu1 %vm614_vm2, %v2911_v49  ;;  %v10184_v49 = vld [vmem:[%s10258_s5 + $0x60] sm:$0xff]  }
 0x2a4   : > { %9213 = vmatmul.mubr.msk.bf16.gmra.mrb[12].mxu0 %vm614_vm2, %v12637_v32  ;;  %v3298_v0 = vsel %vm3295_vm9, %v3296_v46, %v3297_v63  ;;  %v3299_v19 = vrot.slane %v10184_v49, 6  ;;  %v3306_v46 = vsel %vm3295_vm9, %v3303_v47, %v3305_v51  ;;  %v3316_v47 = vsel %vm3295_vm9, %v3313_v48, %v3315_v59 }
 0x2a5   : > { %9216 = vmatprep.mubr.msk.bf16.mxu0 %vm614_vm2, %v12638_v23 }
 0x2a6   : > { %v3300_v17 = vsel %vm3295_vm9, %v3297_v63, %v3299_v19  ;;  %v3302_v39 = vsel %vm3295_vm9, %v3299_v19, %v3301_v26  ;;  %v3309_v63 = vrot.slane %v11332_v6, 6  ;;  %v3311_v6 = vrot.slane %v11336_v15, 6 }
 0x2a7   : > { %v6231_v26 = vrot.slane %v11685_v42, 7 }
 0x2a8   : > { %v3310_v49 = vsel %vm3295_vm9, %v3307_v18, %v3309_v63 }
 0x2aa   : > { %8791 = vmatmul.mubr.msk.bf16.gmra.mrb[40].mxu1 %vm614_vm2, %v2920_v7  ;;  %v12012_v7 = vsel %vm559_vm1, %v3705_v38, %v3707_v37  ;;  %v6225_v38 = vrot.slane %v10186_v56, 7  ;;  %v3312_v37 = vsel %vm3295_vm9, %v3309_v63, %v3311_v6 }
 0x2ab   : > { %8794 = vmatprep.mubr.msk.bf16.mxu1 %vm614_vm2, %v2929_v14  ;;  %v3711_v14 = vrot.slane %v11589_v13, 7 }
 0x2ac   : > { %9217 = vmatmul.mubr.msk.bf16.gmra.mrb[16].mxu0 %vm614_vm2, %v12642_v41  ;;  %v6226_v19 = vsel %vm559_vm1, %v3713_v52, %v6225_v38 }
 0x2ad   : > { %9220 = vmatprep.mubr.msk.bf16.mxu0 %vm614_vm2, %v11980_v16  ;;  %v12031_v62 = vsel %vm559_vm1, %v3709_v21, %v3711_v14  ;;  %v12035_v34 = vsel %vm559_vm1, %v3711_v14, %v3713_v52  ;;  %v3314_v21 = vsel %vm3295_vm9, %v3311_v6, %v3313_v48  ;;  %v12074_v52 = vld [vmem:[%s10378_s16 + $0x88] sm:$0xff]   ;;  %v12646_v6 = vld [vmem:[#allocation57_spill] sm:$0xff] }
 0x2ae   : > { %v12648_v48 = vld [vmem:[#allocation59_spill] sm:$0xff] }
 0x2b2   : > { %8795 = vmatmul.mubr.msk.bf16.gmra.mrb[44].mxu1 %vm614_vm2, %v2938_v1  ;;  %v6227_v1 = vrot.slane %v11663_v11, 7  ;;  %v6229_v11 = vrot.slane %v11671_v40, 7  ;;  %v3317_v40 = vrot.slane %v11382_v10, 6  ;;  %v3319_v10 = vrot.slane %v11386_v12, 6 }
 0x2b3   : > { %8800 = vmatprep.mubr.msk.bf16.mxu1 %vm614_vm2, %v3298_v0  ;;  %v3308_v0 = vsel %vm3295_vm9, %v3305_v51, %v3307_v18  ;;  %v3323_v12 = vrot.slane %v11505_v9, 6  ;;  %v3329_v9 = vrot.slane %v11533_v44, 6  ;;  %v3335_v44 = vrot.slane %v11567_v54, 6  ;;  %v12645_v54 = vld [vmem:[#allocation56_spill] sm:$0xff] }
 0x2b4   : > { %9221 = vmatmul.mubr.msk.bf16.gmra.mrb[20].mxu0 %vm614_vm2, %v11994_v35  ;;  %v6228_v60 = vsel %vm559_vm1, %v6225_v38, %v6227_v1  ;;  %v6232_v15 = vsel %vm559_vm1, %v6229_v11, %v6231_v26  ;;  %v3318_v51 = vsel %vm3295_vm9, %v3315_v59, %v3317_v40  ;;  %v3320_v18 = vsel %vm3295_vm9, %v3317_v40, %v3319_v10  ;;  %v10155_v59 = vld [vmem:[%s10378_s16 + $0xa0] sm:$0xff]  }
 0x2b5   : > { %9224 = vmatprep.mubr.msk.bf16.mxu0 %vm614_vm2, %v11998_v24  ;;  %v6554_v40 = vrot.slane %v10155_v59, 3 }
 0x2ba   : > { %8801 = vmatmul.mubr.msk.bf16.vlgmr.msra.gmra.mrb[0].mxu1 %vm614_vm2, %v3300_v17  ;;  %v6230_v17 = vsel %vm559_vm1, %v6227_v1, %v6229_v11  ;;  %v12649_v11 = vld [vmem:[#allocation60_spill] sm:$0xff] }
 0x2bb   : > { %9299 = vmatpush3.bf16.msra.mxu1 %v12643_v57  ;;  %8804 = vmatprep.mubr.msk.bf16.mxu1 %vm614_vm2, %v3302_v39  ;;  %v6233_v39 = vrot.slane %v11860_v45, 7  ;;  %v6235_v57 = vrot.slane %v11879_v33, 7 }
 0x2bc   : > { %9225 = vmatmul.mubr.msk.bf16.gmra.mrb[24].mxu0 %vm614_vm2, %v12012_v7 }
 0x2bd   : > { %9228 = vmatprep.mubr.msk.bf16.mxu0 %vm614_vm2, %v12016_v36  ;;  %v6234_v14 = vsel %vm559_vm1, %v6231_v26, %v6233_v39  ;;  %v6236_v55 = vsel %vm559_vm1, %v6233_v39, %v6235_v57  ;;  %v12651_v26 = vld [vmem:[#allocation25_spill] sm:$0xff] }
 0x2c2   : > { %8805 = vmatmul.mubr.msk.bf16.gmra.mrb[4].mxu1 %vm614_vm2, %v3304_v8  ;;  %v3321_v8 = vrot.slane %v11494_v4, 6  ;;  %v3325_v4 = vrot.slane %v11510_v31, 6 }
 0x2c3   : > { %8808 = vmatprep.mubr.msk.bf16.mxu1 %vm614_vm2, %v3306_v46  ;;  %v6237_v46 = vrot.slane %v12074_v52, 7 }
 0x2c4   : > { %9229 = vmatmul.mubr.msk.bf16.gmra.mrb[28].mxu0 %vm614_vm2, %v12031_v62  ;;  %v3322_v63 = vsel %vm3295_vm9, %v3319_v10, %v3321_v8  ;;  %v3324_v38 = vsel %vm3295_vm9, %v3321_v8, %v3323_v12  ;;  %v3326_v1 = vsel %vm3295_vm9, %v3323_v12, %v3325_v4 }
 0x2c5   : > { %9232 = vmatprep.mubr.msk.bf16.mxu0 %vm614_vm2, %v12035_v34  ;;  %v6238_v56 = vsel %vm559_vm1, %v6235_v57, %v6237_v46  ;;  %v10156_v57 = vld [vmem:[%s10378_s16 + $0xa8] sm:$0xff]  }
 0x2ca   : > { %8809 = vmatmul.mubr.msk.bf16.gmra.mrb[8].mxu1 %vm614_vm2, %v3308_v0  ;;  %v3327_v0 = vrot.slane %v11527_v22, 6 }
 0x2cb   : > { %8812 = vmatprep.mubr.msk.bf16.mxu1 %vm614_vm2, %v3310_v49  ;;  %v3331_v49 = vrot.slane %v11549_v20, 6 }
 0x2cc   : > { %9233 = vmatmul.mubr.msk.bf16.gmra.mrb[32].mxu0 %vm614_vm2, %v6226_v19  ;;  %v3330_v31 = vsel %vm3295_vm9, %v3327_v0, %v3329_v9  ;;  %v12644_v19 = vld [vmem:[#allocation55_spill] sm:$0xff] }
 0x2cd   : > { %9236 = vmatprep.mubr.msk.bf16.mxu0 %vm614_vm2, %v6228_v60  ;;  %v3343_v60 = vrot.slane %v11599_v43, 6  ;;  %v12650_v43 = vld [vmem:[#allocation61_spill] sm:$0xff] }
 0x2d2   : > { %8813 = vmatmul.mubr.msk.bf16.gmra.mrb[12].mxu1 %vm614_vm2, %v3312_v37  ;;  %v6546_v37 = vrot.slane %v11879_v33, 3 }
 0x2d3   : > { %8816 = vmatprep.mubr.msk.bf16.mxu1 %vm614_vm2, %v3314_v21  ;;  %v12654_v21 = vrot.slane %v11685_v42, 3 }
 0x2d4   : > { %9237 = vmatmul.mubr.msk.bf16.gmra.mrb[36].mxu0 %vm614_vm2, %v6230_v17 }
 0x2d5   : > { %9240 = vmatprep.mubr.msk.bf16.mxu0 %vm614_vm2, %v6232_v15  ;;  %v10154_v15 = vld [vmem:[%s10378_s16 + $0x98] sm:$0xff]  }
 0x2da   : > { %8817 = vmatmul.mubr.msk.bf16.gmra.mrb[16].mxu1 %vm614_vm2, %v3316_v47 }
 0x2db   : > { %8820 = vmatprep.mubr.msk.bf16.mxu1 %vm614_vm2, %v3318_v51 }
 0x2dc   : > { %9241 = vmatmul.mubr.msk.bf16.gmra.mrb[40].mxu0 %vm614_vm2, %v6234_v14 }
 0x2dd   : > { %9244 = vmatprep.mubr.msk.bf16.mxu0 %vm614_vm2, %v6236_v55 }
 0x2e2   : > { %8821 = vmatmul.mubr.msk.bf16.gmra.mrb[20].mxu1 %vm614_vm2, %v3320_v18 }
 0x2e3   : > { %8824 = vmatprep.mubr.msk.bf16.mxu1 %vm614_vm2, %v3322_v63 }
 0x2e4   : > { %9245 = vmatmul.mubr.msk.bf16.gmra.mrb[44].mxu0 %vm614_vm2, %v6238_v56 }
 0x2e5   : > { %9250 = vmatprep.mubr.msk.bf16.mxu0 %vm614_vm2, %v10838_v27  ;;  %v3328_v27 = vsel %vm3295_vm9, %v3325_v4, %v3327_v0 }
 0x2ea   : > { %8825 = vmatmul.mubr.msk.bf16.gmra.mrb[24].mxu1 %vm614_vm2, %v3324_v38 }
 0x2eb   : > { %8828 = vmatprep.mubr.msk.bf16.mxu1 %vm614_vm2, %v3326_v1 }
 0x2ec   : > { %9251 = vmatmul.mubr.msk.bf16.vlgmr.msra.gmra.mrb[0].mxu0 %vm614_vm2, %v10841_v30  ;;  %v3333_v30 = vrot.slane %v11555_v61, 6  ;;  %v3339_v61 = vrot.slane %v11583_v3, 6  ;;  %v12647_v3 = vld [vmem:[#allocation58_spill] sm:$0xff] }
 0x2ed   : > { %9254 = vmatprep.mubr.msk.bf16.mxu0 %vm614_vm2, %v10867_v5  ;;  %v3332_v5 = vsel %vm3295_vm9, %v3329_v9, %v3331_v49 }
 0x2ee   : > { %v3334_v22 = vsel %vm3295_vm9, %v3331_v49, %v3333_v30 }
 0x2f2   : > { %8829 = vmatmul.mubr.msk.bf16.gmra.mrb[28].mxu1 %vm614_vm2, %v3328_v27 }
 0x2f3   : > { %8832 = vmatprep.mubr.msk.bf16.mxu1 %vm614_vm2, %v3330_v31 }
 0x2f4   : > { %9255 = vmatmul.mubr.msk.bf16.gmra.mrb[4].mxu0 %vm614_vm2, %v11342_v58  ;;  %v3337_v58 = vrot.slane %v11573_v29, 6 }
 0x2f5   : > { %9258 = vmatprep.mubr.msk.bf16.mxu0 %vm614_vm2, %v11345_v25  ;;  %v3336_v25 = vsel %vm3295_vm9, %v3333_v30, %v3335_v44 }
 0x2f6   : > { %v3338_v20 = vsel %vm3295_vm9, %v3335_v44, %v3337_v58 }
 0x2fa   : > { %8833 = vmatmul.mubr.msk.bf16.gmra.mrb[32].mxu1 %vm614_vm2, %v3332_v5 }
 0x2fb   : > { %8836 = vmatprep.mubr.msk.bf16.mxu1 %vm614_vm2, %v3334_v22  ;;  %v12236_v22 = vld [vmem:[%s12336_s3] ss:$0 sm:$0xff] }
 0x2fc   : > { %9259 = vmatmul.mubr.msk.bf16.gmra.mrb[8].mxu0 %vm614_vm2, %v11366_v53  ;;  %v3341_v53 = vrot.slane %v11589_v13, 6 }
 0x2fd   : > { %9262 = vmatprep.mubr.msk.bf16.mxu0 %vm614_vm2, %v11369_v28  ;;  %v3340_v28 = vsel %vm3295_vm9, %v3337_v58, %v3339_v61 }
 0x2fe   : > { %v3342_v29 = vsel %vm3295_vm9, %v3339_v61, %v3341_v53  ;;  %v3344_v13 = vsel %vm3295_vm9, %v3341_v53, %v3343_v60 }
 0x302   : > { %8837 = vmatmul.mubr.msk.bf16.gmra.mrb[36].mxu1 %vm614_vm2, %v3336_v25 }
 0x303   : > { %8840 = vmatprep.mubr.msk.bf16.mxu1 %vm614_vm2, %v3338_v20 }
 0x304   : > { %9263 = vmatmul.mubr.msk.bf16.gmra.mrb[12].mxu0 %vm614_vm2, %v12644_v19 }
 0x305   : > { %9266 = vmatprep.mubr.msk.bf16.mxu0 %vm614_vm2, %v12645_v54 }
 0x30a   : > { %8841 = vmatmul.mubr.msk.bf16.gmra.mrb[40].mxu1 %vm614_vm2, %v3340_v28 }
 0x30b   : > { %8844 = vmatprep.mubr.msk.bf16.mxu1 %vm614_vm2, %v3342_v29 }
 0x30c   : > { %9267 = vmatmul.mubr.msk.bf16.gmra.mrb[16].mxu0 %vm614_vm2, %v12646_v6 }
 0x30d   : > { %9270 = vmatprep.mubr.msk.bf16.mxu0 %vm614_vm2, %v12647_v3 }
 0x312   : > { %8845 = vmatmul.mubr.msk.bf16.gmra.mrb[44].mxu1 %vm614_vm2, %v3344_v13 }
 0x313   : > { %8874 = vmatprep.mubr.msk.bf16.mxu1 %vm614_vm2, %v12631_v50  ;;  %v12652_v50 = vld [vmem:[#allocation26_spill] sm:$0xff] }
 0x314   : > { %9271 = vmatmul.mubr.msk.bf16.gmra.mrb[20].mxu0 %vm614_vm2, %v12648_v48 }
 0x315   : > { %9274 = vmatprep.mubr.msk.bf16.mxu0 %vm614_vm2, %v12649_v11 }
 0x31a   : > { %8875 = vmatmul.mubr.msk.bf16.vlgmr.msra.gmra.mrb[24].mxu1 %vm614_vm2, %v12632_v2  ;;  %v12653_v2 = vld [vmem:[#allocation27_spill] sm:$0xff] }
 0x31b   : > { %8878 = vmatprep.mubr.msk.bf16.mxu1 %vm614_vm2, %v12637_v32  ;;  %v6544_v32 = vrot.slane %v11860_v45, 3  ;;  %v6548_v45 = vrot.slane %v12074_v52, 3 }
 0x31c   : > { %9275 = vmatmul.mubr.msk.bf16.gmra.mrb[24].mxu0 %vm614_vm2, %v12650_v43 }
 0x31d   : > { %9278 = vmatprep.mubr.msk.bf16.mxu0 %vm614_vm2, %v12651_v26  ;;  %v6545_v17 = vsel %vm916_vm3, %v12654_v21, %v6544_v32  ;;  %v6549_v42 = vsel %vm916_vm3, %v6546_v37, %v6548_v45 }
 0x322   : > { %8879 = vmatmul.mubr.msk.bf16.gmra.mrb[28].mxu1 %vm614_vm2, %v12638_v23  ;;  %v6547_v23 = vsel %vm916_vm3, %v6544_v32, %v6546_v37 }
 0x323   : > { %8882 = vmatprep.mubr.msk.bf16.mxu1 %vm614_vm2, %v12642_v41  ;;  %v10153_v41 = vld [vmem:[%s10378_s16 + $0x90] sm:$0xff]  }
 0x324   : > { %9279 = vmatmul.mubr.msk.bf16.gmra.mrb[28].mxu0 %vm614_vm2, %v12652_v50  ;;  %v6550_v33 = vrot.slane %v10153_v41, 3 }
 0x325   : > { %9282 = vmatprep.mubr.msk.bf16.mxu0 %vm614_vm2, %v12653_v2 }
 0x32a   : > { %8883 = vmatmul.mubr.msk.bf16.gmra.mrb[32].mxu1 %vm614_vm2, %v11980_v16  ;;  %v6551_v16 = vsel %vm916_vm3, %v6548_v45, %v6550_v33 }
 0x32b   : > { %8886 = vmatprep.mubr.msk.bf16.mxu1 %vm614_vm2, %v11994_v35  ;;  %v6552_v35 = vrot.slane %v10154_v15, 3 }
 0x32c   : > { %9283 = vmatmul.mubr.msk.bf16.gmra.mrb[32].mxu0 %vm614_vm2, %v6545_v17 }
 0x32d   : > { %9286 = vmatprep.mubr.msk.bf16.mxu0 %vm614_vm2, %v6547_v23  ;;  %v6553_v39 = vsel %vm916_vm3, %v6550_v33, %v6552_v35 }
 0x332   : > { %8887 = vmatmul.mubr.msk.bf16.gmra.mrb[36].mxu1 %vm614_vm2, %v11998_v24  ;;  %v6555_v24 = vsel %vm916_vm3, %v6552_v35, %v6554_v40 }
 0x333   : > { %8890 = vmatprep.mubr.msk.bf16.mxu1 %vm614_vm2, %v12012_v7  ;;  %v6556_v7 = vrot.slane %v10156_v57, 3 }
 0x334   : > { %9287 = vmatmul.mubr.msk.bf16.gmra.mrb[36].mxu0 %vm614_vm2, %v6549_v42 }
 0x335   : > { %9290 = vmatprep.mubr.msk.bf16.mxu0 %vm614_vm2, %v6551_v16  ;;  %v6557_v47 = vsel %vm916_vm3, %v6554_v40, %v6556_v7 }
 0x33a   : > { %8891 = vmatmul.mubr.msk.bf16.gmra.mrb[40].mxu1 %vm614_vm2, %v12016_v36 }
 0x33b   : > { %8894 = vmatprep.mubr.msk.bf16.mxu1 %vm614_vm2, %v12031_v62 }
 0x33c   : > { %9291 = vmatmul.mubr.msk.bf16.gmra.mrb[40].mxu0 %vm614_vm2, %v6553_v39 }
 0x33d   : > { %9294 = vmatprep.mubr.msk.bf16.mxu0 %vm614_vm2, %v6555_v24 }
 0x342   : > { %8895 = vmatmul.mubr.msk.bf16.gmra.mrb[44].mxu1 %vm614_vm2, %v12035_v34 }
 0x344   : > { %9295 = vmatmul.mubr.msk.bf16.gmra.mrb[44].mxu0 %vm614_vm2, %v6557_v47 }
 0x38d   : > { %v8802_v51 = vpop.f32.mrb[0].mxu1 }
 0x38e   : > { %v3459_v14 = vpop.f32.mrb[1].mxu1 }
 0x38f   : > { %v8803_v36 = vpop.f32.mrb[2].mxu1 }
 0x390   : > { %v3462_v52 = vpop.f32.mrb[3].mxu1 }
 0x395   : > { %v8806_v55 = vpop.f32.mrb[4].mxu1 }
 0x396   : > { %v3475_v10 = vpop.f32.mrb[5].mxu1 }
 0x397   : > { %v8807_v8 = vpop.f32.mrb[6].mxu1 }
 0x398   : > { %v3478_v62 = vpop.f32.mrb[7].mxu1 }
 0x39d   : > { %v8810_v46 = vpop.f32.mrb[8].mxu1 }
 0x39e   : > { %v3491_v18 = vpop.f32.mrb[9].mxu1 }
 0x39f   : > { %v12204_v63 = vpop.f32.mrb[10].mxu1 }
 0x3a0   : > { %v12206_v56 = vpop.f32.mrb[11].mxu1 }
 0x3a5   : > { %v12208_v12 = vpop.f32.mrb[12].mxu1 }
 0x3a6   : > { %v12210_v34 = vpop.f32.mrb[13].mxu1 }
 0x3a7   : > { %v12212_v4 = vpop.f32.mrb[14].mxu1 }
 0x3a8   : > { %v12214_v38 = vpop.f32.mrb[15].mxu1 }
 0x3ad   : > { %v12216_v1 = vpop.f32.mrb[16].mxu1 }
 0x3ae   : > { %v12218_v0 = vpop.f32.mrb[17].mxu1 }
 0x3af   : > { %v12220_v9 = vpop.f32.mrb[18].mxu1 }
 0x3b0   : > { %v12222_v27 = vpop.f32.mrb[19].mxu1 }
 0x3b5   : > { %v12224_v31 = vpop.f32.mrb[20].mxu1 }
 0x3b6   : > { %v12226_v49 = vpop.f32.mrb[21].mxu1 }
 0x3b7   : > { %v12228_v30 = vpop.f32.mrb[22].mxu1 }
 0x3b8   : > { %v12230_v5 = vpop.f32.mrb[23].mxu1 }
 0x3bf   : > { %v9252_v44 = vpop.f32.mrb[0].mxu0 }
 0x3c0   : > { %v9300_v58 = vadd.f32 %v9252_v44, %v8802_v51  ;;  %v6621_v25 = vpop.f32.mrb[1].mxu0 }
 0x3c1   : > { %v9301_v20 = vadd.f32 %v6621_v25, %v3459_v14  ;;  %v9253_v61 = vpop.f32.mrb[2].mxu0 }
 0x3c2   : > { %v6868_v19 = vadd.f32 %v9300_v58, %v12236_v22  ;;  %v9302_v53 = vadd.f32 %v9253_v61, %v8803_v36  ;;  %v6624_v54 = vpop.f32.mrb[3].mxu0 }
 0x3c3   : > { %v6866_v28 = vadd.f32 %v9301_v20, %v12236_v22  ;;  %v9303_v29 = vadd.f32 %v6624_v54, %v3462_v52 }
 0x3c4   : > { %v6869_v60 = vadd.f32 %v9302_v53, %v12236_v22  ;;  %v6916_v3 = vmax.f32 %v6868_v19, 0.0 }
 0x3c5   : > { %v6867_v6 = vadd.f32 %v9303_v29, %v12236_v22  ;;  %v6914_v48 = vmax.f32 %v6866_v28, 0.0 }
 0x3c6   : > { %v6917_v13 = vmax.f32 %v6869_v60, 0.0 }
 0x3c7   : > { %v6915_v11 = vmax.f32 %v6867_v6, 0.0  ;;  %v9256_v43 = vpop.f32.mrb[4].mxu0 }
 0x3c8   : > { %v7888_v26 = vpack.c.bf16 %v6917_v13, %v6916_v3  ;;  %v9304_v50 = vadd.f32 %v9256_v43, %v8806_v55  ;;  %v6637_v2 = vpop.f32.mrb[5].mxu0 }
 0x3c9   : > { %v7883_v32 = vpack.c.bf16 %v6915_v11, %v6914_v48  ;;  %v9305_v37 = vadd.f32 %v6637_v2, %v3475_v10  ;;  %v9257_v21 = vpop.f32.mrb[6].mxu0 }
 0x3ca   : > { %8000 = vst [vmem:[%s12246_s23 + $0x8] sm:$0xff] %v7888_v26   ;;  %v6872_v17 = vadd.f32 %v9304_v50, %v12236_v22  ;;  %v9306_v23 = vadd.f32 %v9257_v21, %v8807_v8  ;;  %v6640_v41 = vpop.f32.mrb[7].mxu0 }
 0x3cb   : > { %7884 = vst [vmem:[%s12246_s23] sm:$0xff] %v7883_v32   ;;  %v6870_v45 = vadd.f32 %v9305_v37, %v12236_v22  ;;  %v9307_v33 = vadd.f32 %v6640_v41, %v3478_v62 }
 0x3cc   : > { %v6873_v42 = vadd.f32 %v9306_v23, %v12236_v22  ;;  %v6920_v16 = vmax.f32 %v6872_v17, 0.0 }
 0x3cd   : > { %v6871_v15 = vadd.f32 %v9307_v33, %v12236_v22  ;;  %v6918_v35 = vmax.f32 %v6870_v45, 0.0 }
 0x3ce   : > { %v6921_v59 = vmax.f32 %v6873_v42, 0.0 }
 0x3cf   : > { %v6919_v40 = vmax.f32 %v6871_v15, 0.0  ;;  %v9260_v39 = vpop.f32.mrb[8].mxu0 }
 0x3d0   : > { %v7898_v57 = vpack.c.bf16 %v6921_v59, %v6920_v16  ;;  %v9308_v24 = vadd.f32 %v9260_v39, %v8810_v46  ;;  %v6653_v7 = vpop.f32.mrb[9].mxu0 }
 0x3d1   : > { %v7893_v47 = vpack.c.bf16 %v6919_v40, %v6918_v35  ;;  %v9309_v51 = vadd.f32 %v6653_v7, %v3491_v18  ;;  %v9261_v14 = vpop.f32.mrb[10].mxu0 }
 0x3d2   : > { %8002 = vst [vmem:[%s12246_s23 + $0x18] sm:$0xff] %v7898_v57   ;;  %v6876_v36 = vadd.f32 %v9308_v24, %v12236_v22  ;;  %v9310_v52 = vadd.f32 %v9261_v14, %v12204_v63  ;;  %v6656_v55 = vpop.f32.mrb[11].mxu0 }
 0x3d3   : > { %8001 = vst [vmem:[%s12246_s23 + $0x10] sm:$0xff] %v7893_v47   ;;  %v6874_v10 = vadd.f32 %v9309_v51, %v12236_v22  ;;  %v9311_v8 = vadd.f32 %v6656_v55, %v12206_v56 }
 0x3d4   : > { %v6877_v62 = vadd.f32 %v9310_v52, %v12236_v22  ;;  %v6924_v44 = vmax.f32 %v6876_v36, 0.0 }
 0x3d5   : > { %v6875_v46 = vadd.f32 %v9311_v8, %v12236_v22  ;;  %v6922_v58 = vmax.f32 %v6874_v10, 0.0 }
 0x3d6   : > { %v6925_v18 = vmax.f32 %v6877_v62, 0.0 }
 0x3d7   : > { %v6923_v25 = vmax.f32 %v6875_v46, 0.0  ;;  %v9264_v20 = vpop.f32.mrb[12].mxu0 }
 0x3d8   : > { %v7908_v61 = vpack.c.bf16 %v6925_v18, %v6924_v44  ;;  %v9312_v63 = vadd.f32 %v9264_v20, %v12208_v12  ;;  %v6669_v19 = vpop.f32.mrb[13].mxu0 }
 0x3d9   : > { %v7903_v53 = vpack.c.bf16 %v6923_v25, %v6922_v58  ;;  %v9313_v54 = vadd.f32 %v6669_v19, %v12210_v34  ;;  %v9265_v28 = vpop.f32.mrb[14].mxu0 }
 0x3da   : > { %8004 = vst [vmem:[%s12246_s23 + $0x28] sm:$0xff] %v7908_v61   ;;  %v6880_v56 = vadd.f32 %v9312_v63, %v12236_v22  ;;  %v9314_v29 = vadd.f32 %v9265_v28, %v12212_v4  ;;  %v6672_v60 = vpop.f32.mrb[15].mxu0 }
 0x3db   : > { %8003 = vst [vmem:[%s12246_s23 + $0x20] sm:$0xff] %v7903_v53   ;;  %v6878_v6 = vadd.f32 %v9313_v54, %v12236_v22  ;;  %v9315_v3 = vadd.f32 %v6672_v60, %v12214_v38 }
 0x3dc   : > { %v6881_v13 = vadd.f32 %v9314_v29, %v12236_v22  ;;  %v6928_v48 = vmax.f32 %v6880_v56, 0.0 }
 0x3dd   : > { %v6879_v12 = vadd.f32 %v9315_v3, %v12236_v22  ;;  %v6926_v11 = vmax.f32 %v6878_v6, 0.0 }
 0x3de   : > { %v6929_v34 = vmax.f32 %v6881_v13, 0.0 }
 0x3df   : > { %v6927_v43 = vmax.f32 %v6879_v12, 0.0  ;;  %v9268_v26 = vpop.f32.mrb[16].mxu0 }
 0x3e0   : > { %v7918_v50 = vpack.c.bf16 %v6929_v34, %v6928_v48  ;;  %v9316_v4 = vadd.f32 %v9268_v26, %v12216_v1  ;;  %v6685_v2 = vpop.f32.mrb[17].mxu0 }
 0x3e1   : > { %v7913_v32 = vpack.c.bf16 %v6927_v43, %v6926_v11  ;;  %v9317_v37 = vadd.f32 %v6685_v2, %v12218_v0  ;;  %v9269_v21 = vpop.f32.mrb[18].mxu0 }
 0x3e2   : > { %8006 = vst [vmem:[%s12246_s23 + $0x38] sm:$0xff] %v7918_v50   ;;  %v6884_v38 = vadd.f32 %v9316_v4, %v12236_v22  ;;  %v9318_v17 = vadd.f32 %v9269_v21, %v12220_v9  ;;  %v6688_v23 = vpop.f32.mrb[19].mxu0 }
 0x3e3   : > { %8005 = vst [vmem:[%s12246_s23 + $0x30] sm:$0xff] %v7913_v32   ;;  %v6882_v41 = vadd.f32 %v9317_v37, %v12236_v22  ;;  %v9319_v45 = vadd.f32 %v6688_v23, %v12222_v27 }
 0x3e4   : > { %v6885_v33 = vadd.f32 %v9318_v17, %v12236_v22  ;;  %v6932_v42 = vmax.f32 %v6884_v38, 0.0 }
 0x3e5   : > { %v6883_v1 = vadd.f32 %v9319_v45, %v12236_v22  ;;  %v6930_v15 = vmax.f32 %v6882_v41, 0.0 }
 0x3e6   : > { %v6933_v0 = vmax.f32 %v6885_v33, 0.0 }
 0x3e7   : > { %v6931_v16 = vmax.f32 %v6883_v1, 0.0  ;;  %v9272_v59 = vpop.f32.mrb[20].mxu0 }
 0x3e8   : > { %v7928_v35 = vpack.c.bf16 %v6933_v0, %v6932_v42  ;;  %v9320_v9 = vadd.f32 %v9272_v59, %v12224_v31  ;;  %v6701_v40 = vpop.f32.mrb[21].mxu0 }
 0x3e9   : > { %v7923_v39 = vpack.c.bf16 %v6931_v16, %v6930_v15  ;;  %v9321_v57 = vadd.f32 %v6701_v40, %v12226_v49  ;;  %v9273_v24 = vpop.f32.mrb[22].mxu0 }
 0x3ea   : > { %8008 = vst [vmem:[%s12246_s23 + $0x48] sm:$0xff] %v7928_v35   ;;  %v6888_v27 = vadd.f32 %v9320_v9, %v12236_v22  ;;  %v9322_v7 = vadd.f32 %v9273_v24, %v12228_v30  ;;  %v6704_v47 = vpop.f32.mrb[23].mxu0 }
 0x3eb   : > { %8007 = vst [vmem:[%s12246_s23 + $0x40] sm:$0xff] %v7923_v39   ;;  %v6886_v51 = vadd.f32 %v9321_v57, %v12236_v22  ;;  %v9323_v14 = vadd.f32 %v6704_v47, %v12230_v5 }
 0x3ec   : > { %v6889_v36 = vadd.f32 %v9322_v7, %v12236_v22  ;;  %v6936_v55 = vmax.f32 %v6888_v27, 0.0 }
 0x3ed   : > { %v6887_v31 = vadd.f32 %v9323_v14, %v12236_v22  ;;  %v8876_v52 = vpop.f32.mrb[24].mxu1  ;;  %v6934_v8 = vmax.f32 %v6886_v51, 0.0 }
 0x3ee   : > { %v6937_v49 = vmax.f32 %v6889_v36, 0.0  ;;  %v3874_v10 = vpop.f32.mrb[25].mxu1 }
 0x3ef   : > { %v6935_v62 = vmax.f32 %v6887_v31, 0.0  ;;  %v9276_v46 = vpop.f32.mrb[24].mxu0  ;;  %v8877_v30 = vpop.f32.mrb[26].mxu1 }
 0x3f0   : > { %v7938_v44 = vpack.c.bf16 %v6937_v49, %v6936_v55  ;;  %v9324_v18 = vadd.f32 %v9276_v46, %v8876_v52  ;;  %v6717_v58 = vpop.f32.mrb[25].mxu0  ;;  %v3877_v25 = vpop.f32.mrb[27].mxu1 }
 0x3f1   : > { %v7933_v20 = vpack.c.bf16 %v6935_v62, %v6934_v8  ;;  %v9325_v5 = vadd.f32 %v6717_v58, %v3874_v10  ;;  %v9277_v61 = vpop.f32.mrb[26].mxu0 }
 0x3f2   : > { %8010 = vst [vmem:[%s12246_s23 + $0x58] sm:$0xff] %v7938_v44   ;;  %v6892_v63 = vadd.f32 %v9324_v18, %v12236_v22  ;;  %v9326_v19 = vadd.f32 %v9277_v61, %v8877_v30  ;;  %v6720_v53 = vpop.f32.mrb[27].mxu0 }
 0x3f3   : > { %8009 = vst [vmem:[%s12246_s23 + $0x50] sm:$0xff] %v7933_v20   ;;  %v6890_v54 = vadd.f32 %v9325_v5, %v12236_v22  ;;  %v9327_v28 = vadd.f32 %v6720_v53, %v3877_v25 }
 0x3f4   : > { %v6893_v56 = vadd.f32 %v9326_v19, %v12236_v22  ;;  %v6940_v6 = vmax.f32 %v6892_v63, 0.0 }
 0x3f5   : > { %v6891_v29 = vadd.f32 %v9327_v28, %v12236_v22  ;;  %v8880_v60 = vpop.f32.mrb[28].mxu1  ;;  %v6938_v12 = vmax.f32 %v6890_v54, 0.0 }
 0x3f6   : > { %v6941_v3 = vmax.f32 %v6893_v56, 0.0  ;;  %v3890_v13 = vpop.f32.mrb[29].mxu1 }
 0x3f7   : > { %v6939_v48 = vmax.f32 %v6891_v29, 0.0  ;;  %v9280_v34 = vpop.f32.mrb[28].mxu0  ;;  %v8881_v11 = vpop.f32.mrb[30].mxu1 }
 0x3f8   : > { %v7948_v43 = vpack.c.bf16 %v6941_v3, %v6940_v6  ;;  %v9328_v26 = vadd.f32 %v9280_v34, %v8880_v60  ;;  %v6733_v50 = vpop.f32.mrb[29].mxu0  ;;  %v3893_v4 = vpop.f32.mrb[31].mxu1 }
 0x3f9   : > { %v7943_v2 = vpack.c.bf16 %v6939_v48, %v6938_v12  ;;  %v9329_v32 = vadd.f32 %v6733_v50, %v3890_v13  ;;  %v9281_v37 = vpop.f32.mrb[30].mxu0 }
 0x3fa   : > { %8012 = vst [vmem:[%s12246_s23 + $0x68] sm:$0xff] %v7948_v43   ;;  %v6896_v21 = vadd.f32 %v9328_v26, %v12236_v22  ;;  %v9330_v38 = vadd.f32 %v9281_v37, %v8881_v11  ;;  %v6736_v17 = vpop.f32.mrb[31].mxu0 }
 0x3fb   : > { %8011 = vst [vmem:[%s12246_s23 + $0x60] sm:$0xff] %v7943_v2   ;;  %v6894_v23 = vadd.f32 %v9329_v32, %v12236_v22  ;;  %v9331_v41 = vadd.f32 %v6736_v17, %v3893_v4 }
 0x3fc   : > { %v6897_v45 = vadd.f32 %v9330_v38, %v12236_v22  ;;  %v6944_v42 = vmax.f32 %v6896_v21, 0.0 }
 0x3fd   : > { %v6895_v33 = vadd.f32 %v9331_v41, %v12236_v22  ;;  %v8884_v1 = vpop.f32.mrb[32].mxu1  ;;  %v6942_v16 = vmax.f32 %v6894_v23, 0.0 }
 0x3fe   : > { %v6945_v0 = vmax.f32 %v6897_v45, 0.0  ;;  %v3906_v15 = vpop.f32.mrb[33].mxu1 }
 0x3ff   : > { %v6943_v59 = vmax.f32 %v6895_v33, 0.0  ;;  %v9284_v35 = vpop.f32.mrb[32].mxu0  ;;  %v8885_v9 = vpop.f32.mrb[34].mxu1 }
 0x400   : > { %v7958_v40 = vpack.c.bf16 %v6945_v0, %v6944_v42  ;;  %v9332_v39 = vadd.f32 %v9284_v35, %v8884_v1  ;;  %v6749_v57 = vpop.f32.mrb[33].mxu0  ;;  %v3909_v24 = vpop.f32.mrb[35].mxu1 }
 0x401   : > { %v7953_v27 = vpack.c.bf16 %v6943_v59, %v6942_v16  ;;  %v9333_v7 = vadd.f32 %v6749_v57, %v3906_v15  ;;  %v9285_v47 = vpop.f32.mrb[34].mxu0 }
 0x402   : > { %8014 = vst [vmem:[%s12246_s23 + $0x78] sm:$0xff] %v7958_v40   ;;  %v6900_v51 = vadd.f32 %v9332_v39, %v12236_v22  ;;  %v9334_v14 = vadd.f32 %v9285_v47, %v8885_v9  ;;  %v6752_v36 = vpop.f32.mrb[35].mxu0 }
 0x403   : > { %8013 = vst [vmem:[%s12246_s23 + $0x70] sm:$0xff] %v7953_v27   ;;  %v6898_v31 = vadd.f32 %v9333_v7, %v12236_v22  ;;  %v9335_v52 = vadd.f32 %v6752_v36, %v3909_v24 }
 0x404   : > { %v6901_v55 = vadd.f32 %v9334_v14, %v12236_v22  ;;  %v6948_v8 = vmax.f32 %v6900_v51, 0.0 }
 0x405   : > { %v6899_v49 = vadd.f32 %v9335_v52, %v12236_v22  ;;  %v8888_v10 = vpop.f32.mrb[36].mxu1  ;;  %v6946_v30 = vmax.f32 %v6898_v31, 0.0 }
 0x406   : > { %v6949_v62 = vmax.f32 %v6901_v55, 0.0  ;;  %v3922_v46 = vpop.f32.mrb[37].mxu1 }
 0x407   : > { %v6947_v44 = vmax.f32 %v6899_v49, 0.0  ;;  %v9288_v18 = vpop.f32.mrb[36].mxu0  ;;  %v8889_v58 = vpop.f32.mrb[38].mxu1 }
 0x408   : > { %v7968_v25 = vpack.c.bf16 %v6949_v62, %v6948_v8  ;;  %v9336_v20 = vadd.f32 %v9288_v18, %v8888_v10  ;;  %v6765_v5 = vpop.f32.mrb[37].mxu0  ;;  %v3925_v61 = vpop.f32.mrb[39].mxu1 }
 0x409   : > { %v7963_v63 = vpack.c.bf16 %v6947_v44, %v6946_v30  ;;  %v9337_v19 = vadd.f32 %v6765_v5, %v3922_v46  ;;  %v9289_v53 = vpop.f32.mrb[38].mxu0 }
 0x40a   : > { %8016 = vst [vmem:[%s12246_s23 + $0x88] sm:$0xff] %v7968_v25   ;;  %v6904_v54 = vadd.f32 %v9336_v20, %v12236_v22  ;;  %v9338_v28 = vadd.f32 %v9289_v53, %v8889_v58  ;;  %v6768_v56 = vpop.f32.mrb[39].mxu0 }
 0x40b   : > { %8015 = vst [vmem:[%s12246_s23 + $0x80] sm:$0xff] %v7963_v63   ;;  %v6902_v29 = vadd.f32 %v9337_v19, %v12236_v22  ;;  %v9339_v60 = vadd.f32 %v6768_v56, %v3925_v61 }
 0x40c   : > { %v6905_v6 = vadd.f32 %v9338_v28, %v12236_v22  ;;  %v6952_v12 = vmax.f32 %v6904_v54, 0.0 }
 0x40d   : > { %v6903_v3 = vadd.f32 %v9339_v60, %v12236_v22  ;;  %v8892_v13 = vpop.f32.mrb[40].mxu1  ;;  %v6950_v11 = vmax.f32 %v6902_v29, 0.0 }
 0x40e   : > { %v6953_v48 = vmax.f32 %v6905_v6, 0.0  ;;  %v3938_v34 = vpop.f32.mrb[41].mxu1 }
 0x40f   : > { %v6951_v43 = vmax.f32 %v6903_v3, 0.0  ;;  %v9292_v26 = vpop.f32.mrb[40].mxu0  ;;  %v8893_v50 = vpop.f32.mrb[42].mxu1 }
 0x410   : > { %v7978_v4 = vpack.c.bf16 %v6953_v48, %v6952_v12  ;;  %v9340_v2 = vadd.f32 %v9292_v26, %v8892_v13  ;;  %v6781_v32 = vpop.f32.mrb[41].mxu0  ;;  %v3941_v37 = vpop.f32.mrb[43].mxu1 }
 0x411   : > { %v7973_v21 = vpack.c.bf16 %v6951_v43, %v6950_v11  ;;  %v9341_v38 = vadd.f32 %v6781_v32, %v3938_v34  ;;  %v9293_v17 = vpop.f32.mrb[42].mxu0 }
 0x412   : > { %8018 = vst [vmem:[%s12246_s23 + $0x98] sm:$0xff] %v7978_v4   ;;  %v6908_v23 = vadd.f32 %v9340_v2, %v12236_v22  ;;  %v9342_v41 = vadd.f32 %v9293_v17, %v8893_v50  ;;  %v6784_v45 = vpop.f32.mrb[43].mxu0 }
 0x413   : > { %8017 = vst [vmem:[%s12246_s23 + $0x90] sm:$0xff] %v7973_v21   ;;  %v6906_v33 = vadd.f32 %v9341_v38, %v12236_v22  ;;  %v9343_v1 = vadd.f32 %v6784_v45, %v3941_v37 }
 0x414   : > { %v6909_v42 = vadd.f32 %v9342_v41, %v12236_v22  ;;  %v6956_v16 = vmax.f32 %v6908_v23, 0.0 }
 0x415   : > { %v6907_v0 = vadd.f32 %v9343_v1, %v12236_v22  ;;  %v8896_v15 = vpop.f32.mrb[44].mxu1  ;;  %v6954_v9 = vmax.f32 %v6906_v33, 0.0 }
 0x416   : > { %v6957_v59 = vmax.f32 %v6909_v42, 0.0  ;;  %v3954_v35 = vpop.f32.mrb[45].mxu1 }
 0x417   : > { %v6955_v40 = vmax.f32 %v6907_v0, 0.0  ;;  %v9296_v39 = vpop.f32.mrb[44].mxu0  ;;  %v8897_v57 = vpop.f32.mrb[46].mxu1 }
 0x418   : > { %v7988_v24 = vpack.c.bf16 %v6957_v59, %v6956_v16  ;;  %v9344_v27 = vadd.f32 %v9296_v39, %v8896_v15  ;;  %v6797_v7 = vpop.f32.mrb[45].mxu0  ;;  %v3957_v47 = vpop.f32.mrb[47].mxu1 }
 0x419   : > { %v7983_v51 = vpack.c.bf16 %v6955_v40, %v6954_v9  ;;  %v9345_v14 = vadd.f32 %v6797_v7, %v3954_v35  ;;  %v9297_v36 = vpop.f32.mrb[46].mxu0 }
 0x41a   : > { %8020 = vst [vmem:[%s12246_s23 + $0xa8] sm:$0xff] %v7988_v24   ;;  %v6912_v31 = vadd.f32 %v9344_v27, %v12236_v22  ;;  %v9346_v52 = vadd.f32 %v9297_v36, %v8897_v57  ;;  %v6800_v55 = vpop.f32.mrb[47].mxu0 }
 0x41b   : > { %8019 = vst [vmem:[%s12246_s23 + $0xa0] sm:$0xff] %v7983_v51   ;;  %v6910_v49 = vadd.f32 %v9345_v14, %v12236_v22  ;;  %v9347_v10 = vadd.f32 %v6800_v55, %v3957_v47 }
 0x41c   : > { %v6913_v8 = vadd.f32 %v9346_v52, %v12236_v22  ;;  %v6960_v46 = vmax.f32 %v6912_v31, 0.0 }
 0x41d   : > { %v6911_v62 = vadd.f32 %v9347_v10, %v12236_v22  ;;  %v6958_v44 = vmax.f32 %v6910_v49, 0.0 }
 0x41e   : > { %v6961_v30 = vmax.f32 %v6913_v8, 0.0 }
 0x41f   : > { %v6959_v18 = vmax.f32 %v6911_v62, 0.0 }
 0x420   : > { %v7998_v58 = vpack.c.bf16 %v6961_v30, %v6960_v46 }
 0x421   : > { %v7993_v25 = vpack.c.bf16 %v6959_v18, %v6958_v44 }
 0x422   : > { %8022 = vst [vmem:[%s12246_s23 + $0xb8] sm:$0xff] %v7998_v58  }
 0x423   : > { %8021 = vst [vmem:[%s12246_s23 + $0xb0] sm:$0xff] %v7993_v25  }
 0x424 PF: > { %s14_s15 = sadd.s32 1, %s10193_s15  }
 0x425   : > { %p11_p6 = scmp.ge.s32.totalorder %s14_s15, 7  }
 0x427   :  { %13 = sbr.rel (!%p11_p6) target bundleno = 1 (0x1), region = 85 }

// kernel: _lambda_.7
= control target key start
LH: loop header
LB: loop body
LE: loop exit
PB: predicated region body
PF: predicated region fallthrough
CT: control target
= control target key end

     0   :  { %s6495_s15 = smov 0   ;;  %s7680_s0 = inlined_call_operand.vmem [shape: bf16[2304,12], index: 0, kind: input, shape index: {}, may-alias: {0,1}]   ;;  %s7681_s1 = inlined_call_operand.vmem [shape: bf16[2304,12], index: 1, kind: input, shape index: {}, may-alias: {0,1}]   ;;  %s7682_s2 = inlined_call_operand.vmem [shape: bf16[9,12,128], index: 2, kind: input, shape index: {}]   ;;  %s7683_s3 = inlined_call_operand.vmem [shape: f32[1,128], index: 3, kind: input, shape index: {}]   ;;  %s7684_s4 = inlined_call_operand.vmem [shape: bf16[1920,128], index: 4, kind: output, shape index: {}]  }
   0x1 LB: > { %s4753_s16 = sadd.s32 4294967295, %s6468_s15   ;;  %p4757_p0 = scmp.ge.s32.totalorder %s6468_s15, 1  ;;  %s6468_s15 = sphi %s6495_s15, %s14_s15  }
   0x2   : > { %p178_p1 = scmp.lt.s32.totalorder %s6468_s15, 6 }
   0x4   : > { %p179_p2 = pnand %p4757_p0, %p178_p1 }
   0x5   : > { %v6371_v0 = vld [vmem:[%s7682_s2 + $0x8] sm:$0x3f] (!%p179_p2)   ;;  %vm701_vm0 = vcmask (!%p179_p2), 1045504   ;;  %s6506_s19 = smul.u32 (!%p179_p2), 48, %s4753_s16  ;;  %v6372_v1 = vld [vmem:[%s7682_s2 + $0x20] sm:$0x3f] (!%p179_p2)  }
   0x6   : > { %182 = sbr.rel (%p179_p2) target bundleno = 672 (0x2a0), region = 36  ;;  %6353 = vmatprep.subr.msk.bf16.mxu1 (!%p179_p2), %vm701_vm0, %v6371_v0  ;;  %v703_v2 = vsel (!%p179_p2), %vm701_vm0, %v6371_v0, 0  ;;  %6357 = vmatprep.subr.msk.bf16.mxu0 (!%p179_p2), %vm701_vm0, %v6372_v1  ;;  %v6516_v3 = vsel (!%p179_p2), %vm701_vm0, %v6372_v1, 0  ;;  %v6375_v4 = vld [vmem:[%s7682_s2] sm:$0x3f] (!%p179_p2)   ;;  %s6528_s28 = sadd.s32 (!%p179_p2), 1, %s4753_s16 }
   0x7   : > { %5518 = vmatpush3.bf16.msra.mxu1 (!%p179_p2), %v703_v2  ;;  %p211_p3 = scmp.lt.s32.totalorder (!%p179_p2), %s6506_s19, 287  ;;  %5718 = vmatpush3.bf16.msra.mxu0 (!%p179_p2), %v6516_v3  ;;  %v6378_v5 = vld [vmem:[%s7682_s2 + $0x28] sm:$0x3f] (!%p179_p2)   ;;  %vm573_vm1 = vcmask (!%p179_p2), 1040384   ;;  %vm628_vm2 = vcmask (!%p179_p2), 97280   ;;  %vm2206_vm3 = vcmask (!%p179_p2), 1042432  }
   0x8   : > { %6354 = vmatprep.subr.msk.bf16.mxu1 (!%p179_p2), %vm701_vm0, %v6375_v4  ;;  %6359 = vmatprep.subr.msk.bf16.mxu0 (!%p179_p2), %vm701_vm0, %v6378_v5  ;;  %v1008_v8 = vsel (!%p179_p2), %vm701_vm0, %v6375_v4, 0  ;;  %s217_s6 = smul.u32 (!%p179_p2), 48, %s6528_s28  ;;  %v2740_v14 = vsel (!%p179_p2), %vm701_vm0, %v6378_v5, 0  ;;  %v6561_v18 = vld [vmem:[%s7682_s2 + $0x10] sm:$0x3f] (!%p179_p2)   ;;  %vm2612_vm4 = vcmask (!%p179_p2), 1043456  }
   0x9   : > { %v6575_v23 = vld [vmem:[%s7682_s2 + $0x30] sm:$0x3f] (!%p179_p2)   ;;  %vm3018_vm5 = vsmask.f32 (!%p179_p2), 4352  ;;  %vm1238_vm6 = vsmask.f32 (!%p179_p2), 1280 }
   0xa   : > { %p6579_p4 = scmp.lt.s32.totalorder (!%p179_p2), %s217_s6, 287  ;;  %vm3534_vm7 = vcmask (!%p179_p2), 1044480   ;;  %vm1800_vm8 = vcmask (!%p179_p2), 1041408   ;;  %p225_p5 = scmp.lt.s32.totalorder (!%p179_p2), %s6506_s19, 239 }
   0xd   : > { %s212_s24 = scalar_select %p211_p3, %s6506_s19, 287 }
   0xe   : > { %s7727_s6 = smov (!%p6579_p4, %s217_s6), 287  ;;  %s7729_s19 = smov (!%p225_p5, %s6506_s19), 239 }
   0xf   : > { %s4758_s27 = sshll.u32 %s212_s24, 2  ;;  %s4759_s12 = sshll.u32 %s7727_s6, 2 }
  0x10   : > { %s6533_s5 = scalar_lea.vmem %s7680_s0, %s4758_s27  ;;  %s6649_s16 = scalar_lea.vmem %s7681_s1, %s4759_s12 }
  0x11   : > { %v6536_v6 = vld [vmem:[%s6533_s5 + $0x18] sm:$0xff]   ;;  %v6539_v7 = vld [vmem:[%s6533_s5 + $0x20] sm:$0xff]   ;;  %v6552_v13 = vld [vmem:[%s6533_s5 + $0x28] sm:$0xff]   ;;  %s4760_s28 = sshll.u32 %s7729_s19, 2 }
  0x12   : > { %v574_v9 = vrot.slane %v6536_v6, 7  ;;  %v575_v10 = vrot.slane %v6539_v7, 7  ;;  %v6546_v11 = vld [vmem:[%s6533_s5 + $0x58] sm:$0xff]   ;;  %v6549_v12 = vld [vmem:[%s6533_s5 + $0x60] sm:$0xff]   ;;  %v577_v19 = vrot.slane %v6552_v13, 7  ;;  %v6566_v20 = vld [vmem:[%s6533_s5 + $0x68] sm:$0xff]  }
  0x13   : > { %v2207_v16 = vrot.slane %v6546_v11, 5  ;;  %v2208_v17 = vrot.slane %v6549_v12, 5  ;;  %v6570_v22 = vld [vmem:[%s6533_s5 + $0x30] sm:$0xff]   ;;  %v2210_v25 = vrot.slane %v6566_v20, 5  ;;  %v6592_v28 = vld [vmem:[%s6533_s5 + $0x38] sm:$0xff]   ;;  %v6603_v34 = vld [vmem:[%s6533_s5 + $0x40] sm:$0xff]  }
  0x14   : > { %v576_v15 = vsel %vm573_vm1, %v574_v9, %v575_v10  ;;  %v578_v24 = vsel %vm573_vm1, %v575_v10, %v577_v19  ;;  %v6587_v26 = vld [vmem:[%s6533_s5 + $0x70] sm:$0xff]   ;;  %v579_v27 = vrot.slane %v6570_v22, 7  ;;  %v6597_v31 = vld [vmem:[%s6533_s5 + $0x78] sm:$0xff]   ;;  %v581_v33 = vrot.slane %v6592_v28, 7  ;;  %v6611_v37 = vld [vmem:[%s6533_s5 + $0x80] sm:$0xff]  }
  0x15   : > { %5519 = vmatprep.mubr.msk.bf16.mxu1 %vm628_vm2, %v576_v15  ;;  %v2209_v21 = vsel %vm2206_vm3, %v2207_v16, %v2208_v17  ;;  %v2211_v29 = vsel %vm2206_vm3, %v2208_v17, %v2210_v25  ;;  %v2212_v30 = vrot.slane %v6587_v26, 5  ;;  %v2214_v36 = vrot.slane %v6597_v31, 5  ;;  %v6624_v41 = vld [vmem:[%s6533_s5 + $0x48] sm:$0xff]   ;;  %v6628_v43 = vld [vmem:[%s6533_s5 + $0x50] sm:$0xff]   ;;  %v6655_v55 = vld [vmem:[%s6533_s5 + $0x98] sm:$0xff]  }
  0x16   : > { %5719 = vmatprep.mubr.msk.bf16.mxu0 %vm628_vm2, %v2209_v21  ;;  %5520 = vmatmul.mubr.msk.bf16.vlgmr.msra.gmra.mrb[0].mxu1 %vm628_vm2, %v578_v24  ;;  %v580_v32 = vsel %vm573_vm1, %v577_v19, %v579_v27  ;;  %v583_v38 = vrot.slane %v6603_v34, 7  ;;  %v582_v39 = vsel %vm573_vm1, %v579_v27, %v581_v33  ;;  %v2216_v40 = vrot.slane %v6611_v37, 5  ;;  %v6632_v45 = vld [vmem:[%s6533_s5 + $0x88] sm:$0xff]   ;;  %v6637_v47 = vld [vmem:[%s6533_s5 + $0x90] sm:$0xff]   ;;  %v6660_v57 = vld [vmem:[%s6533_s5 + $0xa0] sm:$0xff]  }
  0x17   : > { %5568 = vmatpush3.bf16.msra.mxu1 %v1008_v8  ;;  %5720 = vmatmul.mubr.msk.bf16.vlgmr.msra.gmra.mrb[0].mxu0 %vm628_vm2, %v2211_v29  ;;  %v2213_v35 = vsel %vm2206_vm3, %v2210_v25, %v2212_v30  ;;  %v2215_v44 = vsel %vm2206_vm3, %v2212_v30, %v2214_v36  ;;  %v585_v48 = vrot.slane %v6624_v41, 7  ;;  %v587_v49 = vrot.slane %v6628_v43, 7  ;;  %v6673_v1 = vld [vmem:[%s6533_s5 + $0xa8] sm:$0xff]   ;;  %v6678_v4 = vld [vmem:[%s6533_s5 + $0xb0] sm:$0xff]   ;;  %v6691_v17 = vld [vmem:[%s6533_s5 + $0xb8] sm:$0xff]  }
  0x18   : > { %6355 = vmatprep.subr.msk.bf16.mxu1 %vm701_vm0, %v6561_v18  ;;  %5768 = vmatpush3.bf16.msra.mxu0 %v2740_v14  ;;  %v584_v42 = vsel %vm573_vm1, %v581_v33, %v583_v38  ;;  %v2217_v46 = vsel %vm2206_vm3, %v2214_v36, %v2216_v40  ;;  %v2218_v50 = vrot.slane %v6632_v45, 5  ;;  %v2220_v51 = vrot.slane %v6637_v47, 5 }
  0x19   : > { %5523 = vmatprep.mubr.msk.bf16.mxu1 %vm628_vm2, %v580_v32  ;;  %5723 = vmatprep.mubr.msk.bf16.mxu0 %vm628_vm2, %v2213_v35  ;;  %v586_v52 = vsel %vm573_vm1, %v583_v38, %v585_v48  ;;  %v588_v53 = vsel %vm573_vm1, %v585_v48, %v587_v49  ;;  %v589_v58 = vrot.slane %v6546_v11, 7  ;;  %v591_v59 = vrot.slane %v6549_v12, 7 }
  0x1a   : > { %6360 = vmatprep.subr.msk.bf16.mxu0 %vm701_vm0, %v6575_v23  ;;  %v2219_v54 = vsel %vm2206_vm3, %v2216_v40, %v2218_v50  ;;  %v2221_v56 = vsel %vm2206_vm3, %v2218_v50, %v2220_v51  ;;  %v2222_v60 = vrot.slane %v6655_v55, 5  ;;  %v2224_v61 = vrot.slane %v6660_v57, 5  ;;  %v6727_v50 = vld [vmem:[%s7682_s2 + $0x38] sm:$0x3f]  }
  0x1b   : > { %v590_v62 = vsel %vm573_vm1, %v587_v49, %v589_v58  ;;  %v592_v63 = vsel %vm573_vm1, %v589_v58, %v591_v59  ;;  %v593_v5 = vrot.slane %v6566_v20, 7  ;;  %v595_v8 = vrot.slane %v6587_v26, 7 }
  0x1c   : > { %v2223_v0 = vsel %vm2206_vm3, %v2220_v51, %v2222_v60  ;;  %v2225_v2 = vsel %vm2206_vm3, %v2222_v60, %v2224_v61  ;;  %v2226_v9 = vrot.slane %v6673_v1, 5  ;;  %v2228_v10 = vrot.slane %v6678_v4, 5 }
  0x1d   : > { %v594_v14 = vsel %vm573_vm1, %v591_v59, %v593_v5  ;;  %v596_v15 = vsel %vm573_vm1, %v593_v5, %v595_v8  ;;  %v597_v21 = vrot.slane %v6597_v31, 7  ;;  %v599_v24 = vrot.slane %v6611_v37, 7  ;;  %v6753_v5 = vld [vmem:[%s6649_s16] sm:$0xff]  }
  0x1e   : > { %5524 = vmatmul.mubr.msk.bf16.gmra.mrb[4].mxu1 %vm628_vm2, %v582_v39  ;;  %v2227_v16 = vsel %vm2206_vm3, %v2224_v61, %v2226_v9  ;;  %v2229_v19 = vsel %vm2206_vm3, %v2226_v9, %v2228_v10  ;;  %v7685_v25 = vrot.slane %v6691_v17, 5  ;;  %v2613_v27 = vrot.slane %v6597_v31, 4 }
  0x1f   : > { %5527 = vmatprep.mubr.msk.bf16.mxu1 %vm628_vm2, %v584_v42  ;;  %5724 = vmatmul.mubr.msk.bf16.gmra.mrb[4].mxu0 %vm628_vm2, %v2215_v44  ;;  %v2614_v29 = vrot.slane %v6611_v37, 4  ;;  %v598_v30 = vsel %vm573_vm1, %v595_v8, %v597_v21  ;;  %v600_v32 = vsel %vm573_vm1, %v597_v21, %v599_v24  ;;  %v601_v36 = vrot.slane %v6632_v45, 7  ;;  %v6767_v21 = vld [vmem:[%s6649_s16 + $0x8] sm:$0xff]  }
  0x20   : > { %5727 = vmatprep.mubr.msk.bf16.mxu0 %vm628_vm2, %v2217_v46  ;;  %v2231_v33 = vsel %vm2206_vm3, %v2228_v10, %v7685_v25  ;;  %v603_v38 = vrot.slane %v6637_v47, 7  ;;  %v2616_v39 = vrot.slane %v6632_v45, 4  ;;  %v2618_v40 = vrot.slane %v6637_v47, 4 }
  0x21   : > { %v2615_v35 = vsel %vm2612_vm4, %v2613_v27, %v2614_v29  ;;  %v602_v42 = vsel %vm573_vm1, %v599_v24, %v601_v36  ;;  %v3256_v48 = vsel %vm701_vm0, %v6575_v23, 0  ;;  %v605_v51 = vrot.slane %v6655_v55, 7  ;;  %v6771_v27 = vld [vmem:[%s6649_s16 + $0x10] sm:$0xff]  }
  0x22   : > { %v604_v44 = vsel %vm573_vm1, %v601_v36, %v603_v38  ;;  %v2617_v46 = vsel %vm2612_vm4, %v2614_v29, %v2616_v39  ;;  %v2619_v49 = vsel %vm2612_vm4, %v2616_v39, %v2618_v40  ;;  %v2620_v23 = vrot.slane %v6655_v55, 4  ;;  %v6785_v39 = vld [vmem:[%s6649_s16 + $0x18] sm:$0xff]  }
  0x23   : > { %v609_v60 = vrot.slane %v6673_v1, 7  ;;  %v611_v61 = vrot.slane %v6678_v4, 7  ;;  %v613_v10 = vrot.slane %v6691_v17, 7  ;;  %v2634_v36 = vrot.slane %v6771_v27, 4 }
  0x24   : > { %v2621_v58 = vsel %vm2612_vm4, %v2618_v40, %v2620_v23 }
  0x26   : > { %5528 = vmatmul.mubr.msk.bf16.gmra.mrb[8].mxu1 %vm628_vm2, %v586_v52  ;;  %v607_v52 = vrot.slane %v6660_v57, 7 }
  0x27   : > { %5531 = vmatprep.mubr.msk.bf16.mxu1 %vm628_vm2, %v588_v53  ;;  %5728 = vmatmul.mubr.msk.bf16.gmra.mrb[8].mxu0 %vm628_vm2, %v2219_v54  ;;  %v2622_v53 = vrot.slane %v6660_v57, 4  ;;  %v606_v54 = vsel %vm573_vm1, %v603_v38, %v605_v51 }
  0x28   : > { %5731 = vmatprep.mubr.msk.bf16.mxu0 %vm628_vm2, %v2221_v56  ;;  %v608_v56 = vsel %vm573_vm1, %v605_v51, %v607_v52 }
  0x29   : > { %v2623_v59 = vsel %vm2612_vm4, %v2620_v23, %v2622_v53  ;;  %v6401_v23 = vld [vmem:[%s6533_s5] sm:$0xff]  }
  0x2e   : > { %5532 = vmatmul.mubr.msk.bf16.gmra.mrb[12].mxu1 %vm628_vm2, %v590_v62  ;;  %v2624_v62 = vrot.slane %v6673_v1, 4 }
  0x2f   : > { %5535 = vmatprep.mubr.msk.bf16.mxu1 %vm628_vm2, %v592_v63  ;;  %5732 = vmatmul.mubr.msk.bf16.gmra.mrb[12].mxu0 %vm628_vm2, %v2223_v0  ;;  %v2626_v63 = vrot.slane %v6678_v4, 4  ;;  %v610_v0 = vsel %vm573_vm1, %v607_v52, %v609_v60 }
  0x30   : > { %5735 = vmatprep.mubr.msk.bf16.mxu0 %vm628_vm2, %v2225_v2  ;;  %v612_v2 = vsel %vm573_vm1, %v609_v60, %v611_v61  ;;  %v2625_v8 = vsel %vm2612_vm4, %v2622_v53, %v2624_v62  ;;  %v6404_v60 = vld [vmem:[%s6533_s5 + $0x8] sm:$0xff]  }
  0x31   : > { %v2627_v9 = vsel %vm2612_vm4, %v2624_v62, %v2626_v63  ;;  %v6406_v62 = vld [vmem:[%s6533_s5 + $0x10] sm:$0xff]  }
  0x36   : > { %5536 = vmatmul.mubr.msk.bf16.gmra.mrb[16].mxu1 %vm628_vm2, %v594_v14  ;;  %v615_v14 = vrot.slane %v6753_v5, 7 }
  0x37   : > { %5539 = vmatprep.mubr.msk.bf16.mxu1 %vm628_vm2, %v596_v15  ;;  %5736 = vmatmul.mubr.msk.bf16.gmra.mrb[16].mxu0 %vm628_vm2, %v2227_v16  ;;  %v2628_v15 = vrot.slane %v6691_v17, 4  ;;  %v2630_v16 = vrot.slane %v6753_v5, 4 }
  0x38   : > { %5739 = vmatprep.mubr.msk.bf16.mxu0 %vm628_vm2, %v2229_v19  ;;  %v614_v19 = vsel %vm573_vm1, %v611_v61, %v613_v10  ;;  %v616_v24 = vsel %vm573_vm1, %v613_v10, %v615_v14  ;;  %v6832_v10 = vld [vmem:[%s6649_s16 + $0x40] sm:$0xff]  }
  0x39   : > { %v2629_v29 = vsel %vm2612_vm4, %v2626_v63, %v2628_v15  ;;  %v1522_v63 = vsel %vm701_vm0, %v6561_v18, 0  ;;  %v1334_v18 = vshrl.u32 %v6632_v45, 16 }
  0x3e   : > { %5540 = vmatmul.mubr.msk.bf16.gmra.mrb[20].mxu1 %vm628_vm2, %v598_v30  ;;  %v2631_v30 = vsel %vm2612_vm4, %v2628_v15, %v2630_v16 }
  0x3f   : > { %5543 = vmatprep.mubr.msk.bf16.mxu1 %vm628_vm2, %v600_v32  ;;  %5740 = vmatmul.mubr.msk.bf16.gmra.mrb[20].mxu0 %vm628_vm2, %v2231_v33  ;;  %v617_v32 = vrot.slane %v6767_v21, 7  ;;  %v619_v33 = vrot.slane %v6771_v27, 7 }
  0x40   : > { %5769 = vmatprep.mubr.msk.bf16.mxu0 %vm628_vm2, %v2615_v35  ;;  %v2632_v35 = vrot.slane %v6767_v21, 4 }
  0x41   : > { %v618_v38 = vsel %vm573_vm1, %v615_v14, %v617_v32  ;;  %v620_v40 = vsel %vm573_vm1, %v617_v32, %v619_v33  ;;  %v1337_v14 = vshll.u32 %v6632_v45, 16  ;;  %v6847_v32 = vld [vmem:[%s6649_s16 + $0x48] sm:$0xff]  }
  0x46   : > { %5544 = vmatmul.mubr.msk.bf16.gmra.mrb[24].mxu1 %vm628_vm2, %v602_v42  ;;  %v2633_v42 = vsel %vm2612_vm4, %v2630_v16, %v2632_v35  ;;  %v1336_v16 = vrot.slane %v1334_v18, 6 }
  0x47   : > { %5547 = vmatprep.mubr.msk.bf16.mxu1 %vm628_vm2, %v604_v44  ;;  %5770 = vmatmul.mubr.msk.bf16.vlgmr.msra.gmra.mrb[0].mxu0 %vm628_vm2, %v2617_v46  ;;  %v2635_v44 = vsel %vm2612_vm4, %v2632_v35, %v2634_v36  ;;  %v6792_v46 = vld [vmem:[%s6649_s16 + $0x20] sm:$0xff]   ;;  %v6853_v35 = vld [vmem:[%s6649_s16 + $0x50] sm:$0xff]  }
  0x48   : > { %5818 = vmatpush3.bf16.msra.mxu0 %v3256_v48  ;;  %5773 = vmatprep.mubr.msk.bf16.mxu0 %vm628_vm2, %v2619_v49  ;;  %v621_v48 = vrot.slane %v6785_v39, 7  ;;  %v2636_v49 = vrot.slane %v6785_v39, 4  ;;  %v2638_v51 = vrot.slane %v6792_v46, 4 }
  0x49   : > { %6361 = vmatprep.subr.msk.bf16.mxu0 %vm701_vm0, %v6727_v50 }
  0x4a   : > { %v622_v52 = vsel %vm573_vm1, %v619_v33, %v621_v48  ;;  %v2637_v53 = vsel %vm2612_vm4, %v2634_v36, %v2636_v49  ;;  %v2648_v36 = vrot.slane %v6847_v32, 4 }
  0x4e   : > { %5548 = vmatmul.mubr.msk.bf16.gmra.mrb[28].mxu1 %vm628_vm2, %v606_v54  ;;  %v6804_v54 = vld [vmem:[%s6649_s16 + $0x28] sm:$0xff]  }
  0x4f   : > { %5551 = vmatprep.mubr.msk.bf16.mxu1 %vm628_vm2, %v608_v56  ;;  %5774 = vmatmul.mubr.msk.bf16.gmra.mrb[4].mxu0 %vm628_vm2, %v2621_v58  ;;  %v2639_v56 = vsel %vm2612_vm4, %v2636_v49, %v2638_v51  ;;  %v6809_v58 = vld [vmem:[%s6649_s16 + $0x30] sm:$0xff]  }
  0x50   : > { %5777 = vmatprep.mubr.msk.bf16.mxu0 %vm628_vm2, %v2623_v59  ;;  %v2640_v59 = vrot.slane %v6804_v54, 4  ;;  %v2642_v61 = vrot.slane %v6809_v58, 4 }
  0x56   : > { %5552 = vmatmul.mubr.msk.bf16.gmra.mrb[32].mxu1 %vm628_vm2, %v610_v0  ;;  %v6823_v0 = vld [vmem:[%s7682_s2 + $0x18] sm:$0x3f]  }
  0x57   : > { %5555 = vmatprep.mubr.msk.bf16.mxu1 %vm628_vm2, %v612_v2  ;;  %5778 = vmatmul.mubr.msk.bf16.gmra.mrb[8].mxu0 %vm628_vm2, %v2625_v8  ;;  %v2641_v2 = vsel %vm2612_vm4, %v2638_v51, %v2640_v59  ;;  %v6827_v8 = vld [vmem:[%s6649_s16 + $0x38] sm:$0xff]   ;;  %v6879_v51 = vld [vmem:[%s6649_s16 + $0x68] sm:$0xff]  }
  0x58   : > { %5781 = vmatprep.mubr.msk.bf16.mxu0 %vm628_vm2, %v2627_v9  ;;  %v2643_v9 = vsel %vm2612_vm4, %v2640_v59, %v2642_v61  ;;  %v2644_v15 = vrot.slane %v6827_v8, 4  ;;  %v1342_v59 = vshrl.u32 %v6637_v47, 16 }
  0x5e   : > { %5556 = vmatmul.mubr.msk.bf16.gmra.mrb[36].mxu1 %vm628_vm2, %v614_v19  ;;  %v1339_v19 = vrot.slane %v1337_v14, 7 }
  0x5f   : > { %5559 = vmatprep.mubr.msk.bf16.mxu1 %vm628_vm2, %v616_v24  ;;  %5782 = vmatmul.mubr.msk.bf16.gmra.mrb[12].mxu0 %vm628_vm2, %v2629_v29  ;;  %v2646_v24 = vrot.slane %v6832_v10, 4 }
  0x60   : > { %5785 = vmatprep.mubr.msk.bf16.mxu0 %vm628_vm2, %v2631_v30  ;;  %v6843_v29 = vor.u32 %v1339_v19, %v1336_v16  ;;  %v2645_v30 = vsel %vm2612_vm4, %v2642_v61, %v2644_v15  ;;  %v1350_v19 = vshrl.u32 %v6655_v55, 16 }
  0x61   : > { %v2647_v33 = vsel %vm2612_vm4, %v2644_v15, %v2646_v24  ;;  %v3022_v15 = vrot.slane %v1342_v59, 3 }
  0x66   : > { %5560 = vmatmul.mubr.msk.bf16.gmra.mrb[40].mxu1 %vm628_vm2, %v618_v38  ;;  %v2650_v38 = vrot.slane %v6853_v35, 4 }
  0x67   : > { %5563 = vmatprep.mubr.msk.bf16.mxu1 %vm628_vm2, %v620_v40  ;;  %5786 = vmatmul.mubr.msk.bf16.gmra.mrb[16].mxu0 %vm628_vm2, %v2633_v42  ;;  %v2649_v40 = vsel %vm2612_vm4, %v2646_v24, %v2648_v36  ;;  %v1353_v24 = vshll.u32 %v6655_v55, 16 }
  0x68   : > { %5789 = vmatprep.mubr.msk.bf16.mxu0 %vm628_vm2, %v2635_v44  ;;  %v2651_v42 = vsel %vm2612_vm4, %v2648_v36, %v2650_v38  ;;  %v7704_v36 = vshll.u32 %v6660_v57, 16 }
  0x6e   : > { %5564 = vmatmul.mubr.msk.bf16.gmra.mrb[44].mxu1 %vm628_vm2, %v622_v52 }
  0x6f   : > { %5569 = vmatprep.mubr.msk.bf16.mxu1 %vm628_vm2, %v6401_v23  ;;  %5790 = vmatmul.mubr.msk.bf16.gmra.mrb[20].mxu0 %vm628_vm2, %v2637_v53  ;;  %v6885_v23 = vld [vmem:[%s6649_s16 + $0x70] sm:$0xff]   ;;  %v2656_v53 = vrot.slane %v6879_v51, 4 }
  0x70   : > { %5793 = vmatprep.mubr.msk.bf16.mxu0 %vm628_vm2, %v2639_v56  ;;  %v2658_v56 = vrot.slane %v6885_v23, 4 }
  0x76   : > { %5570 = vmatmul.mubr.msk.bf16.vlgmr.msra.gmra.mrb[0].mxu1 %vm628_vm2, %v6404_v60  ;;  %v1345_v60 = vshll.u32 %v6637_v47, 16 }
  0x77   : > { %5618 = vmatpush3.bf16.msra.mxu1 %v1522_v63  ;;  %5573 = vmatprep.mubr.msk.bf16.mxu1 %vm628_vm2, %v6406_v62  ;;  %v6897_v62 = vld [vmem:[%s6649_s16 + $0x78] sm:$0xff]   ;;  %v3019_v63 = vrot.slane %v1334_v18, 3 }
  0x78   : > { %5794 = vmatmul.mubr.msk.bf16.gmra.mrb[24].mxu0 %vm628_vm2, %v2641_v2  ;;  %6356 = vmatprep.subr.msk.bf16.mxu1 %vm701_vm0, %v6823_v0  ;;  %v2659_v2 = vsel %vm2612_vm4, %v2656_v53, %v2658_v56  ;;  %v3023_v16 = vrot.slane %v1345_v60, 4  ;;  %v2660_v18 = vrot.slane %v6897_v62, 4 }
  0x79   : > { %5797 = vmatprep.mubr.msk.bf16.mxu0 %vm628_vm2, %v2643_v9  ;;  %v3020_v9 = vrot.slane %v1337_v14, 4 }
  0x7b   : > { %v3021_v14 = vor.u32 %v3020_v9, %v3019_v63  ;;  %v7700_v63 = vshll.u32 %v6678_v4, 16 }
  0x7e   : > { %5574 = vmatmul.mubr.msk.bf16.gmra.mrb[4].mxu1 %vm628_vm2, %v6536_v6  ;;  %v6863_v6 = vld [vmem:[%s6649_s16 + $0x58] sm:$0xff]  }
  0x7f   : > { %5577 = vmatprep.mubr.msk.bf16.mxu1 %vm628_vm2, %v6539_v7  ;;  %v6869_v7 = vld [vmem:[%s6649_s16 + $0x60] sm:$0xff]   ;;  %v2652_v44 = vrot.slane %v6863_v6, 4 }
  0x80   : > { %5798 = vmatmul.mubr.msk.bf16.gmra.mrb[28].mxu0 %vm628_vm2, %v2645_v30  ;;  %v2654_v48 = vrot.slane %v6869_v7, 4  ;;  %v3024_v30 = vor.u32 %v3023_v16, %v3022_v15  ;;  %v3662_v15 = vsel %vm701_vm0, %v6727_v50, 0  ;;  %v7699_v50 = vshrl.u32 %v6691_v17, 16 }
  0x81   : > { %5801 = vmatprep.mubr.msk.bf16.mxu0 %vm628_vm2, %v2647_v33  ;;  %v2653_v49 = vsel %vm2612_vm4, %v2650_v38, %v2652_v44  ;;  %v1358_v33 = vshrl.u32 %v6660_v57, 16  ;;  %v2661_v38 = vsel %vm2612_vm4, %v2658_v56, %v2660_v18 }
  0x82   : > { %v2655_v52 = vsel %vm2612_vm4, %v2652_v44, %v2654_v48  ;;  %v2657_v61 = vsel %vm2612_vm4, %v2654_v48, %v2656_v53  ;;  %v3025_v44 = vsel %vm3018_vm5, %v3021_v14, %v3024_v30  ;;  %v7703_v53 = vshrl.u32 %v6673_v1, 16 }
  0x83   : > { %v3030_v48 = vrot.slane %v1358_v33, 3  ;;  %v3039_v14 = vrot.slane %v7700_v63, 4 }
  0x84   : > { %v3034_v9 = vrot.slane %v7703_v53, 3  ;;  %v7143_v53 = vld [vmem:[%s6649_s16 + $0x88] sm:$0xff]  }
  0x86   : > { %5578 = vmatmul.mubr.msk.bf16.gmra.mrb[8].mxu1 %vm628_vm2, %v6552_v13 }
  0x87   : > { %5581 = vmatprep.mubr.msk.bf16.mxu1 %vm628_vm2, %v6570_v22 }
  0x88   : > { %5802 = vmatmul.mubr.msk.bf16.gmra.mrb[32].mxu0 %vm628_vm2, %v2649_v40  ;;  %v3026_v40 = vrot.slane %v1350_v19, 3 }
  0x89   : > { %5805 = vmatprep.mubr.msk.bf16.mxu0 %vm628_vm2, %v2651_v42  ;;  %v3027_v42 = vrot.slane %v1353_v24, 4 }
  0x8e   : > { %5582 = vmatmul.mubr.msk.bf16.gmra.mrb[12].mxu1 %vm628_vm2, %v6592_v28 }
  0x8f   : > { %5585 = vmatprep.mubr.msk.bf16.mxu1 %vm628_vm2, %v6603_v34 }
  0x90   : > { %5806 = vmatmul.mubr.msk.bf16.gmra.mrb[36].mxu0 %vm628_vm2, %v2653_v49  ;;  %v3031_v49 = vrot.slane %v7704_v36, 4 }
  0x91   : > { %5809 = vmatprep.mubr.msk.bf16.mxu0 %vm628_vm2, %v2655_v52  ;;  %v3028_v52 = vor.u32 %v3027_v42, %v3026_v40  ;;  %v7695_v42 = vshrl.u32 %v6753_v5, 16 }
  0x92   : > { %v3032_v56 = vor.u32 %v3031_v49, %v3030_v48  ;;  %v3042_v48 = vrot.slane %v7699_v50, 3 }
  0x94   : > { %v3033_v16 = vsel %vm3018_vm5, %v3028_v52, %v3032_v56 }
  0x96   : > { %5586 = vmatmul.mubr.msk.bf16.gmra.mrb[16].mxu1 %vm628_vm2, %v6624_v41 }
  0x97   : > { %5589 = vmatprep.mubr.msk.bf16.mxu1 %vm628_vm2, %v6628_v43 }
  0x98   : > { %5810 = vmatmul.mubr.msk.bf16.gmra.mrb[40].mxu0 %vm628_vm2, %v2657_v61  ;;  %v7701_v61 = vshrl.u32 %v6678_v4, 16 }
  0x99   : > { %5813 = vmatprep.mubr.msk.bf16.mxu0 %vm628_vm2, %v2659_v2  ;;  %v3029_v2 = vsel %vm3018_vm5, %v3024_v30, %v3028_v52  ;;  %v6952_v30 = vld [vmem:[%s7682_s2 + $0x40] sm:$0x3f]  }
  0x9a   : > { %v3038_v18 = vrot.slane %v7701_v61, 3  ;;  %v7120_v61 = vld [vmem:[%s6649_s16 + $0x80] sm:$0xff]  }
  0x9c   : > { %v3040_v40 = vor.u32 %v3039_v14, %v3038_v18  ;;  %v7686_v18 = vshll.u32 %v6771_v27, 16 }
  0x9e   : > { %5590 = vmatmul.mubr.msk.bf16.gmra.mrb[20].mxu1 %vm628_vm2, %v6546_v11  ;;  %v7702_v11 = vshll.u32 %v6673_v1, 16 }
  0x9f   : > { %5593 = vmatprep.mubr.msk.bf16.mxu1 %vm628_vm2, %v6549_v12 }
  0xa0   : > { %5814 = vmatmul.mubr.msk.bf16.gmra.mrb[44].mxu0 %vm628_vm2, %v2661_v38  ;;  %v3035_v12 = vrot.slane %v7702_v11, 4  ;;  %v7698_v38 = vshll.u32 %v6691_v17, 16 }
  0xa1   : > { %5819 = vmatprep.mubr.msk.bf16.mxu0 %vm628_vm2, %v3025_v44  ;;  %v7694_v44 = vshll.u32 %v6753_v5, 16 }
  0xa2   : > { %v3043_v49 = vrot.slane %v7698_v38, 4 }
  0xa6   : > { %5594 = vmatmul.mubr.msk.bf16.gmra.mrb[24].mxu1 %vm628_vm2, %v6566_v20  ;;  %v3036_v20 = vor.u32 %v3035_v12, %v3034_v9  ;;  %v3047_v9 = vrot.slane %v7694_v44, 4  ;;  %v7693_v12 = vshrl.u32 %v6767_v21, 16 }
  0xa7   : > { %5597 = vmatprep.mubr.msk.bf16.mxu1 %vm628_vm2, %v6587_v26 }
  0xa8   : > { %5820 = vmatmul.mubr.msk.bf16.vlgmr.msra.gmra.mrb[0].mxu0 %vm628_vm2, %v3029_v2  ;;  %v3037_v26 = vsel %vm3018_vm5, %v3032_v56, %v3036_v20  ;;  %v3041_v52 = vsel %vm3018_vm5, %v3036_v20, %v3040_v40  ;;  %v3046_v2 = vrot.slane %v7695_v42, 3  ;;  %v3044_v56 = vor.u32 %v3043_v49, %v3042_v48 }
  0xa9   : > { %5868 = vmatpush3.bf16.msra.mxu0 %v3662_v15  ;;  %5823 = vmatprep.mubr.msk.bf16.mxu0 %vm628_vm2, %v3033_v16  ;;  %v7691_v16 = vshrl.u32 %v6771_v27, 16  ;;  %v3050_v20 = vrot.slane %v7693_v12, 3  ;;  %v3055_v49 = vrot.slane %v7686_v18, 4 }
  0xaa   : > { %6362 = vmatprep.subr.msk.bf16.mxu0 %vm701_vm0, %v6952_v30  ;;  %v3048_v15 = vor.u32 %v3047_v9, %v3046_v2  ;;  %v3045_v14 = vsel %vm3018_vm5, %v3040_v40, %v3044_v56  ;;  %v7688_v9 = vshrl.u32 %v6792_v46, 16 }
  0xab   : > { %v3054_v48 = vrot.slane %v7691_v16, 3  ;;  %v3071_v16 = vshrl.u32 %v6809_v58, 16 }
  0xad   : > { %v3056_v2 = vor.u32 %v3055_v49, %v3054_v48  ;;  %v1242_v48 = vshll.u32 %v6552_v13, 16  ;;  %v1246_v49 = vshrl.u32 %v6570_v22, 16 }
  0xae   : > { %5598 = vmatmul.mubr.msk.bf16.gmra.mrb[28].mxu1 %vm628_vm2, %v6597_v31  ;;  %v7692_v31 = vshll.u32 %v6767_v21, 16 }
  0xaf   : > { %5601 = vmatprep.mubr.msk.bf16.mxu1 %vm628_vm2, %v6611_v37  ;;  %v1244_v12 = vrot.slane %v1242_v48, 7  ;;  %v1248_v44 = vrot.slane %v1246_v49, 6  ;;  %v1262_v48 = vshrl.u32 %v6603_v34, 16  ;;  %v1265_v49 = vshll.u32 %v6603_v34, 16 }
  0xb0   : > { %5824 = vmatmul.mubr.msk.bf16.gmra.mrb[4].mxu0 %vm628_vm2, %v3037_v26  ;;  %v3051_v37 = vrot.slane %v7692_v31, 4  ;;  %v3049_v26 = vsel %vm3018_vm5, %v3044_v56, %v3048_v15  ;;  %v7689_v56 = vshll.u32 %v6792_v46, 16 }
  0xb1   : > { %5827 = vmatprep.mubr.msk.bf16.mxu0 %vm628_vm2, %v3041_v52  ;;  %v7690_v52 = vshrl.u32 %v6785_v39, 16 }
  0xb2   : > { %v3052_v40 = vor.u32 %v3051_v37, %v3050_v20  ;;  %v3062_v37 = vrot.slane %v7688_v9, 3  ;;  %v7697_v9 = vshrl.u32 %v6804_v54, 16 }
  0xb3   : > { %v3058_v18 = vrot.slane %v7690_v52, 3 }
  0xb4   : > { %v3053_v25 = vsel %vm3018_vm5, %v3048_v15, %v3052_v40  ;;  %v3057_v20 = vsel %vm3018_vm5, %v3052_v40, %v3056_v2  ;;  %v1239_v15 = vshrl.u32 %v6552_v13, 16 }
  0xb6   : > { %5602 = vmatmul.mubr.msk.bf16.gmra.mrb[32].mxu1 %vm628_vm2, %v6632_v45  ;;  %v7687_v45 = vshll.u32 %v6785_v39, 16  ;;  %v1241_v31 = vrot.slane %v1239_v15, 6 }
  0xb7   : > { %5605 = vmatprep.mubr.msk.bf16.mxu1 %vm628_vm2, %v6637_v47 }
  0xb8   : > { %5828 = vmatmul.mubr.msk.bf16.gmra.mrb[8].mxu0 %vm628_vm2, %v3045_v14  ;;  %v3059_v14 = vrot.slane %v7687_v45, 4  ;;  %v1249_v45 = vshll.u32 %v6570_v22, 16  ;;  %v3066_v22 = vrot.slane %v7697_v9, 3  ;;  %v3089_v9 = vshrl.u32 %v6832_v10, 16 }
  0xb9   : > { %5831 = vmatprep.mubr.msk.bf16.mxu0 %vm628_vm2, %v3049_v26  ;;  %v3063_v26 = vrot.slane %v7689_v56, 4  ;;  %v7696_v56 = vshll.u32 %v6804_v54, 16 }
  0xba   : > { %v3060_v40 = vor.u32 %v3059_v14, %v3058_v18  ;;  %v1251_v13 = vrot.slane %v1249_v45, 7  ;;  %v1254_v45 = vshrl.u32 %v6592_v28, 16 }
  0xbb   : > { %v3064_v52 = vor.u32 %v3063_v26, %v3062_v37  ;;  %v3067_v18 = vrot.slane %v7696_v56, 4  ;;  %v1245_v26 = vor.u32 %v1244_v12, %v1241_v31  ;;  %v1264_v31 = vrot.slane %v1262_v48, 6 }
  0xbc   : > { %v3061_v42 = vsel %vm3018_vm5, %v3056_v2, %v3060_v40  ;;  %v1257_v2 = vshll.u32 %v6592_v28, 16  ;;  %v1252_v15 = vor.u32 %v1251_v13, %v1248_v44  ;;  %v3092_v28 = vshll.u32 %v6832_v10, 16 }
  0xbd   : > { %v3065_v14 = vsel %vm3018_vm5, %v3060_v40, %v3064_v52  ;;  %v3068_v40 = vor.u32 %v3067_v18, %v3066_v22  ;;  %v1267_v13 = vrot.slane %v1265_v49, 7  ;;  %v1281_v48 = vshll.u32 %v6628_v43, 16 }
  0xbe   : > { %5606 = vmatmul.mubr.msk.bf16.gmra.mrb[36].mxu1 %vm628_vm2, %v6655_v55  ;;  %v1259_v12 = vrot.slane %v1257_v2, 7  ;;  %v1253_v44 = vsel %vm1238_vm6, %v1245_v26, %v1252_v15  ;;  %v1273_v2 = vshll.u32 %v6624_v41, 16 }
  0xbf   : > { %5609 = vmatprep.mubr.msk.bf16.mxu1 %vm628_vm2, %v6660_v57  ;;  %v3069_v34 = vsel %vm3018_vm5, %v3064_v52, %v3068_v40  ;;  %v1268_v26 = vor.u32 %v1267_v13, %v1264_v31  ;;  %v1278_v52 = vshrl.u32 %v6628_v43, 16  ;;  %v1928_v43 = vsel %vm701_vm0, %v6823_v0, 0  ;;  %v7073_v0 = vld [vmem:[%s6533_s5 + $0x58] sm:$0xff]  }
  0xc0   : > { %5832 = vmatmul.mubr.msk.bf16.gmra.mrb[12].mxu0 %vm628_vm2, %v3053_v25  ;;  %v3074_v25 = vshll.u32 %v6809_v58, 16  ;;  %v1283_v13 = vrot.slane %v1281_v48, 7 }
  0xc1   : > { %5835 = vmatprep.mubr.msk.bf16.mxu0 %vm628_vm2, %v3057_v20  ;;  %v3073_v20 = vrot.slane %v3071_v16, 3  ;;  %v3080_v16 = vshrl.u32 %v6827_v8, 16  ;;  %v1280_v31 = vrot.slane %v1278_v52, 6 }
  0xc2   : > { %v3076_v37 = vrot.slane %v3074_v25, 4  ;;  %v3083_v25 = vshll.u32 %v6827_v8, 16 }
  0xc4   : > { %v3077_v56 = vor.u32 %v3076_v37, %v3073_v20  ;;  %v3085_v22 = vrot.slane %v3083_v25, 4  ;;  %v3091_v20 = vrot.slane %v3089_v9, 3  ;;  %v3094_v37 = vrot.slane %v3092_v28, 4 }
  0xc5   : > { %v3098_v9 = vshrl.u32 %v6847_v32, 16  ;;  %v3107_v25 = vshrl.u32 %v6853_v35, 16  ;;  %v3110_v28 = vshll.u32 %v6853_v35, 16 }
  0xc6   : > { %5610 = vmatmul.mubr.msk.bf16.gmra.mrb[40].mxu1 %vm628_vm2, %v6673_v1  ;;  %v3078_v18 = vsel %vm3018_vm5, %v3068_v40, %v3077_v56  ;;  %v3101_v40 = vshll.u32 %v6847_v32, 16 }
  0xc7   : > { %5613 = vmatprep.mubr.msk.bf16.mxu1 %vm628_vm2, %v6678_v4 }
  0xc8   : > { %5836 = vmatmul.mubr.msk.bf16.gmra.mrb[16].mxu0 %vm628_vm2, %v3061_v42  ;;  %v1256_v42 = vrot.slane %v1254_v45, 6  ;;  %v1270_v45 = vshrl.u32 %v6624_v41, 16 }
  0xc9   : > { %5839 = vmatprep.mubr.msk.bf16.mxu0 %vm628_vm2, %v3065_v14  ;;  %v3082_v14 = vrot.slane %v3080_v16, 3  ;;  %v3095_v16 = vor.u32 %v3094_v37, %v3091_v20  ;;  %v3112_v20 = vrot.slane %v3110_v28, 4 }
  0xca   : > { %v1260_v38 = vor.u32 %v1259_v12, %v1256_v42  ;;  %v1272_v42 = vrot.slane %v1270_v45, 6  ;;  %v1275_v12 = vrot.slane %v1273_v2, 7  ;;  %v1289_v45 = vshll.u32 %v7073_v0, 16  ;;  %v7079_v2 = vld [vmem:[%s6533_s5 + $0x60] sm:$0xff]  }
  0xcb   : > { %v3086_v49 = vor.u32 %v3085_v22, %v3082_v14  ;;  %v3100_v14 = vrot.slane %v3098_v9, 3  ;;  %v3103_v22 = vrot.slane %v3101_v40, 4  ;;  %v1294_v52 = vshrl.u32 %v7079_v2, 16 }
  0xcc   : > { %v1261_v41 = vsel %vm1238_vm6, %v1252_v15, %v1260_v38  ;;  %v3109_v15 = vrot.slane %v3107_v25, 3  ;;  %v1276_v37 = vor.u32 %v1275_v12, %v1272_v42  ;;  %v1297_v48 = vshll.u32 %v7079_v2, 16 }
  0xcd   : > { %v3104_v9 = vor.u32 %v3103_v22, %v3100_v14  ;;  %v3116_v40 = vshrl.u32 %v6863_v6, 16  ;;  %v3119_v25 = vshll.u32 %v6863_v6, 16  ;;  %v3128_v42 = vshll.u32 %v6869_v7, 16 }
  0xce   : > { %5614 = vmatmul.mubr.msk.bf16.gmra.mrb[44].mxu1 %vm628_vm2, %v6691_v17  ;;  %v3113_v28 = vor.u32 %v3112_v20, %v3109_v15  ;;  %v1277_v12 = vsel %vm1238_vm6, %v1268_v26, %v1276_v37 }
  0xcf   : > { %5619 = vmatprep.mubr.msk.bf16.mxu1 %vm628_vm2, %v1253_v44  ;;  %v1269_v44 = vsel %vm1238_vm6, %v1260_v38, %v1268_v26  ;;  %v1286_v38 = vshrl.u32 %v7073_v0, 16  ;;  %v3105_v14 = vsel %vm3018_vm5, %v3095_v16, %v3104_v9  ;;  %v3118_v22 = vrot.slane %v3116_v40, 3 }
  0xd0   : > { %5840 = vmatmul.mubr.msk.bf16.gmra.mrb[20].mxu0 %vm628_vm2, %v3069_v34  ;;  %v3087_v34 = vsel %vm3018_vm5, %v3077_v56, %v3086_v49  ;;  %v1284_v56 = vor.u32 %v1283_v13, %v1280_v31  ;;  %v1296_v13 = vrot.slane %v1294_v52, 6  ;;  %v3114_v15 = vsel %vm3018_vm5, %v3104_v9, %v3113_v28  ;;  %v7105_v52 = vld [vmem:[%s6533_s5 + $0x70] sm:$0xff]  }
  0xd1   : > { %5843 = vmatprep.mubr.msk.bf16.mxu0 %vm628_vm2, %v3078_v18  ;;  %v3096_v18 = vsel %vm3018_vm5, %v3086_v49, %v3095_v16  ;;  %v6430_v49 = vld [vmem:[%s7682_s2 + $0x20] sm:$0x3f]   ;;  %v1313_v9 = vshll.u32 %v7105_v52, 16 }
  0xd2   : > { %v1285_v31 = vsel %vm1238_vm6, %v1276_v37, %v1284_v56 }
  0xd6   : > { %5620 = vmatmul.mubr.msk.bf16.vlgmr.msra.gmra.mrb[0].mxu1 %vm628_vm2, %v1261_v41  ;;  %v3125_v41 = vshrl.u32 %v6869_v7, 16 }
  0xd7   : > { %5668 = vmatpush3.bf16.msra.mxu1 %v1928_v43  ;;  %5623 = vmatprep.mubr.msk.bf16.mxu1 %vm628_vm2, %v1269_v44  ;;  %v1288_v43 = vrot.slane %v1286_v38, 6  ;;  %v1291_v44 = vrot.slane %v1289_v45, 7  ;;  %v7099_v38 = vld [vmem:[%s6533_s5 + $0x68] sm:$0xff]  }
  0xd8   : > { %5844 = vmatmul.mubr.msk.bf16.gmra.mrb[24].mxu0 %vm628_vm2, %v3087_v34  ;;  %6358 = vmatprep.subr.msk.bf16.mxu1 %vm701_vm0, %v6430_v49  ;;  %v1299_v34 = vrot.slane %v1297_v48, 7  ;;  %v3127_v20 = vrot.slane %v3125_v41, 3  ;;  %v3130_v49 = vrot.slane %v3128_v42, 4  ;;  %v1302_v37 = vshrl.u32 %v7099_v38, 16 }
  0xd9   : > { %5847 = vmatprep.mubr.msk.bf16.mxu0 %vm628_vm2, %v3096_v18  ;;  %v3121_v18 = vrot.slane %v3119_v25, 4  ;;  %v1292_v26 = vor.u32 %v1291_v44, %v1288_v43  ;;  %v1305_v45 = vshll.u32 %v7099_v38, 16  ;;  %v1310_v48 = vshrl.u32 %v7105_v52, 16 }
  0xda   : > { %v1300_v16 = vor.u32 %v1299_v34, %v1296_v13  ;;  %v3134_v25 = vshrl.u32 %v6879_v51, 16  ;;  %v3137_v41 = vshll.u32 %v6879_v51, 16  ;;  %v3131_v42 = vor.u32 %v3130_v49, %v3127_v20 }
  0xdb   : > { %v3122_v40 = vor.u32 %v3121_v18, %v3118_v22  ;;  %v3146_v43 = vshll.u32 %v6885_v23, 16  ;;  %v1293_v44 = vsel %vm1238_vm6, %v1284_v56, %v1292_v26  ;;  %v1307_v13 = vrot.slane %v1305_v45, 7 }
  0xdc   : > { %v1301_v34 = vsel %vm1238_vm6, %v1292_v26, %v1300_v16  ;;  %v3136_v18 = vrot.slane %v3134_v25, 3  ;;  %v3139_v50 = vrot.slane %v3137_v41, 4  ;;  %v3152_v41 = vshrl.u32 %v6897_v62, 16 }
  0xdd   : > { %v3123_v22 = vsel %vm3018_vm5, %v3113_v28, %v3122_v40  ;;  %v3132_v20 = vsel %vm3018_vm5, %v3122_v40, %v3131_v42  ;;  %v3148_v63 = vrot.slane %v3146_v43, 4 }
  0xde   : > { %5624 = vmatmul.mubr.msk.bf16.gmra.mrb[4].mxu1 %vm628_vm2, %v1277_v12  ;;  %v3143_v12 = vshrl.u32 %v6885_v23, 16  ;;  %v3140_v25 = vor.u32 %v3139_v50, %v3136_v18  ;;  %v3154_v50 = vrot.slane %v3152_v41, 3  ;;  %v1344_v41 = vrot.slane %v1342_v59, 6  ;;  %v7165_v59 = vld [vmem:[%s6533_s5 + $0x98] sm:$0xff]  }
  0xdf   : > { %5627 = vmatprep.mubr.msk.bf16.mxu1 %vm628_vm2, %v1285_v31  ;;  %v1304_v31 = vrot.slane %v1302_v37, 6  ;;  %v7124_v37 = vld [vmem:[%s6533_s5 + $0x78] sm:$0xff]   ;;  %v3535_v47 = vrot.slane %v7165_v59, 3 }
  0xe0   : > { %5848 = vmatmul.mubr.msk.bf16.gmra.mrb[28].mxu0 %vm628_vm2, %v3105_v14  ;;  %v1312_v14 = vrot.slane %v1310_v48, 6  ;;  %v3145_v49 = vrot.slane %v3143_v12, 3  ;;  %v1318_v26 = vshrl.u32 %v7124_v37, 16  ;;  %v1321_v45 = vshll.u32 %v7124_v37, 16  ;;  %v7130_v48 = vld [vmem:[%s6533_s5 + $0x80] sm:$0xff]  }
  0xe1   : > { %5851 = vmatprep.mubr.msk.bf16.mxu0 %vm628_vm2, %v3114_v15  ;;  %v1315_v15 = vrot.slane %v1313_v9, 7  ;;  %v1308_v56 = vor.u32 %v1307_v13, %v1304_v31  ;;  %v1326_v9 = vshrl.u32 %v7130_v48, 16  ;;  %v1329_v40 = vshll.u32 %v7130_v48, 16 }
  0xe2   : > { %v3155_v12 = vshll.u32 %v6897_v62, 16  ;;  %v3149_v43 = vor.u32 %v3148_v63, %v3145_v49  ;;  %v3164_v31 = vshll.u32 %v7120_v61, 16 }
  0xe3   : > { %v1316_v28 = vor.u32 %v1315_v15, %v1312_v14  ;;  %v1309_v13 = vsel %vm1238_vm6, %v1300_v16, %v1308_v56  ;;  %v1323_v14 = vrot.slane %v1321_v45, 7  ;;  %v1331_v11 = vrot.slane %v1329_v40, 7 }
  0xe4   : > { %v3157_v18 = vrot.slane %v3155_v12, 4  ;;  %v3150_v63 = vsel %vm3018_vm5, %v3140_v25, %v3149_v43  ;;  %v3166_v36 = vrot.slane %v3164_v31, 4  ;;  %v3173_v45 = vshll.u32 %v7143_v53, 16 }
  0xe5   : > { %v1317_v15 = vsel %vm1238_vm6, %v1308_v56, %v1316_v28 }
  0xe6   : > { %5628 = vmatmul.mubr.msk.bf16.gmra.mrb[8].mxu1 %vm628_vm2, %v1293_v44  ;;  %v3161_v44 = vshrl.u32 %v7120_v61, 16  ;;  %v3175_v31 = vrot.slane %v3173_v45, 4 }
  0xe7   : > { %5631 = vmatprep.mubr.msk.bf16.mxu1 %vm628_vm2, %v1301_v34  ;;  %v1320_v34 = vrot.slane %v1318_v26, 6  ;;  %v3158_v26 = vor.u32 %v3157_v18, %v3154_v50  ;;  %v7706_v50 = vshll.u32 %v6660_v57, 16  ;;  %v7195_v57 = vld [vmem:[%s6533_s5 + $0xb0] sm:$0xff]  }
  0xe8   : > { %5852 = vmatmul.mubr.msk.bf16.gmra.mrb[32].mxu0 %vm628_vm2, %v3123_v22  ;;  %v1328_v22 = vrot.slane %v1326_v9, 6  ;;  %v3163_v49 = vrot.slane %v3161_v44, 3 }
  0xe9   : > { %5855 = vmatprep.mubr.msk.bf16.mxu0 %vm628_vm2, %v3132_v20  ;;  %v3141_v20 = vsel %vm3018_vm5, %v3131_v42, %v3140_v25  ;;  %v1324_v16 = vor.u32 %v1323_v14, %v1320_v34  ;;  %v3170_v42 = vshrl.u32 %v7143_v53, 16  ;;  %v3159_v12 = vsel %vm3018_vm5, %v3149_v43, %v3158_v26 }
  0xea   : > { %v1332_v56 = vor.u32 %v1331_v11, %v1328_v22  ;;  %v3167_v9 = vor.u32 %v3166_v36, %v3163_v49  ;;  %v1347_v11 = vrot.slane %v1345_v60, 7  ;;  %v7169_v60 = vld [vmem:[%s6533_s5 + $0xa0] sm:$0xff]   ;;  %v1352_v14 = vrot.slane %v1350_v19, 6 }
  0xeb   : > { %v1325_v40 = vsel %vm1238_vm6, %v1316_v28, %v1324_v16  ;;  %v3172_v44 = vrot.slane %v3170_v42, 3  ;;  %v3536_v43 = vrot.slane %v7169_v60, 3  ;;  %v1363_v18 = vrot.slane %v7706_v50, 7 }
  0xec   : > { %v1333_v25 = vsel %vm1238_vm6, %v1324_v16, %v1332_v56  ;;  %v1348_v36 = vor.u32 %v1347_v11, %v1344_v41  ;;  %v1341_v34 = vsel %vm1238_vm6, %v1332_v56, %v6843_v29  ;;  %v7707_v56 = vshrl.u32 %v6673_v1, 16 }
  0xed   : > { %v3176_v28 = vor.u32 %v3175_v31, %v3172_v44  ;;  %v3537_v49 = vsel %vm3534_vm7, %v3535_v47, %v3536_v43  ;;  %v7708_v42 = vshll.u32 %v6673_v1, 16  ;;  %v7710_v41 = vshll.u32 %v6678_v4, 16 }
  0xee   : > { %5632 = vmatmul.mubr.msk.bf16.gmra.mrb[12].mxu1 %vm628_vm2, %v1309_v13  ;;  %v3168_v13 = vsel %vm3018_vm5, %v3158_v26, %v3167_v9  ;;  %v1349_v22 = vsel %vm1238_vm6, %v6843_v29, %v1348_v36  ;;  %v7191_v29 = vld [vmem:[%s6533_s5 + $0xa8] sm:$0xff]   ;;  %v1368_v26 = vrot.slane %v7707_v56, 6  ;;  %v4068_v44 = vsel %vm701_vm0, %v6952_v30, 0 }
  0xef   : > { %5635 = vmatprep.mubr.msk.bf16.mxu1 %vm628_vm2, %v1317_v15  ;;  %v1355_v15 = vrot.slane %v1353_v24, 7  ;;  %v3538_v24 = vrot.slane %v7191_v29, 3  ;;  %v1371_v45 = vrot.slane %v7708_v42, 7  ;;  %v1379_v11 = vrot.slane %v7710_v41, 7 }
  0xf0   : > { %5856 = vmatmul.mubr.msk.bf16.gmra.mrb[36].mxu0 %vm628_vm2, %v3141_v20  ;;  %v1360_v20 = vrot.slane %v1358_v33, 6  ;;  %v3540_v33 = vrot.slane %v7195_v57, 3  ;;  %v7711_v47 = vshrl.u32 %v6691_v17, 16  ;;  %v7716_v56 = vshll.u32 %v6767_v21, 16 }
  0xf1   : > { %5859 = vmatprep.mubr.msk.bf16.mxu0 %vm628_vm2, %v3150_v63  ;;  %v3177_v63 = vsel %vm3018_vm5, %v3167_v9, %v3176_v28  ;;  %v1356_v19 = vor.u32 %v1355_v15, %v1352_v14  ;;  %v1372_v1 = vor.u32 %v1371_v45, %v1368_v26  ;;  %v7713_v15 = vshrl.u32 %v6753_v5, 16 }
  0xf2   : > { %v1364_v55 = vor.u32 %v1363_v18, %v1360_v20  ;;  %v3541_v31 = vsel %vm3534_vm7, %v3538_v24, %v3540_v33  ;;  %v1384_v30 = vrot.slane %v7711_v47, 6  ;;  %v7714_v20 = vshll.u32 %v6753_v5, 16 }
  0xf3   : > { %v1357_v16 = vsel %vm1238_vm6, %v1348_v36, %v1356_v19  ;;  %v3544_v36 = vrot.slane %v6753_v5, 3  ;;  %v1405_v26 = vrot.slane %v7716_v56, 7  ;;  %v7717_v45 = vshrl.u32 %v6771_v27, 16  ;;  %v6440_v56 = vld [vmem:[%s6533_s5 + $0x40] sm:$0xff]  }
  0xf4   : > { %v1365_v9 = vsel %vm1238_vm6, %v1356_v19, %v1364_v55  ;;  %v1373_v28 = vsel %vm1238_vm6, %v1364_v55, %v1372_v1  ;;  %v1396_v50 = vrot.slane %v7714_v20, 7  ;;  %v3546_v55 = vrot.slane %v6767_v21, 3 }
  0xf5   : > { %v7721_v47 = vshrl.u32 %v6792_v46, 16  ;;  %v3554_v20 = vrot.slane %v6804_v54, 3 }
  0xf6   : > { %5636 = vmatmul.mubr.msk.bf16.gmra.mrb[16].mxu1 %vm628_vm2, %v1325_v40  ;;  %v7709_v40 = vshrl.u32 %v6678_v4, 16  ;;  %v3542_v4 = vrot.slane %v6691_v17, 3  ;;  %v3547_v41 = vsel %vm3534_vm7, %v3544_v36, %v3546_v55 }
  0xf7   : > { %5639 = vmatprep.mubr.msk.bf16.mxu1 %vm628_vm2, %v1333_v25 }
  0xf8   : > { %5860 = vmatmul.mubr.msk.bf16.gmra.mrb[40].mxu0 %vm628_vm2, %v3159_v12  ;;  %v1376_v25 = vrot.slane %v7709_v40, 6  ;;  %v3539_v12 = vsel %vm3534_vm7, %v3536_v43, %v3538_v24  ;;  %v7712_v43 = vshll.u32 %v6691_v17, 16  ;;  %v3543_v18 = vsel %vm3534_vm7, %v3540_v33, %v3542_v4 }
  0xf9   : > { %5863 = vmatprep.mubr.msk.bf16.mxu0 %vm628_vm2, %v3168_v13  ;;  %v3548_v24 = vrot.slane %v6771_v27, 3  ;;  %v7715_v33 = vshrl.u32 %v6767_v21, 16  ;;  %v7718_v40 = vshll.u32 %v6771_v27, 16 }
  0xfa   : > { %v1380_v13 = vor.u32 %v1379_v11, %v1376_v25 }
  0xfb   : > { %v1414_v25 = vrot.slane %v7718_v40, 7  ;;  %v3549_v11 = vsel %vm3534_vm7, %v3546_v55, %v3548_v24 }
  0xfc   : > { %v1381_v14 = vsel %vm1238_vm6, %v1372_v1, %v1380_v13  ;;  %v7719_v1 = vshrl.u32 %v6785_v39, 16 }
  0xfe   : > { %5640 = vmatmul.mubr.msk.bf16.gmra.mrb[20].mxu1 %vm628_vm2, %v1341_v34  ;;  %v1387_v34 = vrot.slane %v7712_v43, 7  ;;  %v7722_v43 = vshll.u32 %v6792_v46, 16 }
  0xff   : > { %5643 = vmatprep.mubr.msk.bf16.mxu1 %vm628_vm2, %v1349_v22  ;;  %v1393_v22 = vrot.slane %v7713_v15, 6 }
 0x100   : > { %5864 = vmatmul.mubr.msk.bf16.gmra.mrb[44].mxu0 %vm628_vm2, %v3177_v63  ;;  %v3545_v63 = vsel %vm3534_vm7, %v3542_v4, %v3544_v36  ;;  %v7720_v4 = vshll.u32 %v6785_v39, 16 }
 0x101   : > { %5869 = vmatprep.mubr.msk.bf16.mxu0 %vm628_vm2, %v3537_v49  ;;  %v1388_v49 = vor.u32 %v1387_v34, %v1384_v30  ;;  %v1397_v19 = vor.u32 %v1396_v50, %v1393_v22  ;;  %v1429_v30 = vrot.slane %v7721_v47, 6  ;;  %v1432_v34 = vrot.slane %v7722_v43, 7 }
 0x102   : > { %v1423_v36 = vrot.slane %v7720_v4, 7  ;;  %v3568_v4 = vrot.slane %v6869_v7, 3  ;;  %v3570_v7 = vrot.slane %v6879_v51, 3  ;;  %v3572_v47 = vrot.slane %v6885_v23, 3 }
 0x103   : > { %v1389_v5 = vsel %vm1238_vm6, %v1380_v13, %v1388_v49  ;;  %v1398_v42 = vsel %vm1238_vm6, %v1388_v49, %v1397_v19  ;;  %v1420_v13 = vrot.slane %v7719_v1, 6  ;;  %v7724_v49 = vshll.u32 %v6804_v54, 16 }
 0x104   : > { %v1818_v51 = vrot.slane %v7130_v48, 6  ;;  %v3574_v23 = vrot.slane %v6897_v62, 3  ;;  %v6443_v48 = vld [vmem:[%s6533_s5 + $0x88] sm:$0xff]   ;;  %v6444_v62 = vld [vmem:[%s6533_s5 + $0x90] sm:$0xff]  }
 0x105   : > { %v1424_v22 = vor.u32 %v1423_v36, %v1420_v13  ;;  %v1808_v13 = vrot.slane %v7073_v0, 6 }
 0x106   : > { %5644 = vmatmul.mubr.msk.bf16.gmra.mrb[24].mxu1 %vm628_vm2, %v1357_v16  ;;  %v1402_v16 = vrot.slane %v7715_v33, 6 }
 0x107   : > { %5647 = vmatprep.mubr.msk.bf16.mxu1 %vm628_vm2, %v1365_v9  ;;  %v1411_v9 = vrot.slane %v7717_v45, 6 }
 0x108   : > { %5870 = vmatmul.mubr.msk.bf16.vlgmr.msra.gmra.mrb[0].mxu0 %vm628_vm2, %v3539_v12  ;;  %v1406_v12 = vor.u32 %v1405_v26, %v1402_v16  ;;  %v3558_v26 = vrot.slane %v6827_v8, 3  ;;  %v6442_v8 = vld [vmem:[%s6533_s5 + $0x50] sm:$0xff]  }
 0x109   : > { %5918 = vmatpush3.bf16.msra.mxu0 %v4068_v44  ;;  %5873 = vmatprep.mubr.msk.bf16.mxu0 %vm628_vm2, %v3541_v31  ;;  %v1415_v21 = vor.u32 %v1414_v25, %v1411_v9  ;;  %v3550_v44 = vrot.slane %v6785_v39, 3  ;;  %v3552_v31 = vrot.slane %v6792_v46, 3  ;;  %v1433_v39 = vor.u32 %v1432_v34, %v1429_v30 }
 0x10a   : > { %v1407_v27 = vsel %vm1238_vm6, %v1397_v19, %v1406_v12  ;;  %v3556_v46 = vrot.slane %v6809_v58, 3  ;;  %v1441_v19 = vrot.slane %v7724_v49, 7  ;;  %v6439_v58 = vld [vmem:[%s6533_s5 + $0x38] sm:$0xff]   ;;  %v3571_v34 = vsel %vm3534_vm7, %v3568_v4, %v3570_v7 }
 0x10b   : > { %v3553_v15 = vsel %vm3534_vm7, %v3550_v44, %v3552_v31  ;;  %v1425_v50 = vsel %vm1238_vm6, %v1415_v21, %v1424_v22  ;;  %v1434_v55 = vsel %vm1238_vm6, %v1424_v22, %v1433_v39  ;;  %v1801_v16 = vrot.slane %v6439_v58, 6 }
 0x10c   : > { %v3559_v40 = vsel %vm3534_vm7, %v3556_v46, %v3558_v26  ;;  %v1826_v58 = vrot.slane %v7169_v60, 6 }
 0x10e   : > { %5648 = vmatmul.mubr.msk.bf16.gmra.mrb[28].mxu1 %vm628_vm2, %v1373_v28  ;;  %v1416_v28 = vsel %vm1238_vm6, %v1406_v12, %v1415_v21  ;;  %v1806_v12 = vrot.slane %v6442_v8, 6  ;;  %v3564_v21 = vrot.slane %v6853_v35, 3  ;;  %v3566_v35 = vrot.slane %v6863_v6, 3  ;;  %v7386_v8 = vld [vmem:[%s6649_s16 + $0x10] sm:$0xff]  }
 0x10f   : > { %5651 = vmatprep.mubr.msk.bf16.mxu1 %vm628_vm2, %v1381_v14  ;;  %v3551_v14 = vsel %vm3534_vm7, %v3548_v24, %v3550_v44  ;;  %v3555_v24 = vsel %vm3534_vm7, %v3552_v31, %v3554_v20  ;;  %v1814_v6 = vrot.slane %v7105_v52, 6  ;;  %v1816_v52 = vrot.slane %v7124_v37, 6 }
 0x110   : > { %5874 = vmatmul.mubr.msk.bf16.gmra.mrb[4].mxu0 %vm628_vm2, %v3543_v18  ;;  %v7723_v18 = vshrl.u32 %v6804_v54, 16  ;;  %v1802_v54 = vrot.slane %v6440_v56, 6  ;;  %v1809_v36 = vsel %vm1800_vm8, %v1806_v12, %v1808_v13  ;;  %v3569_v0 = vsel %vm3534_vm7, %v3566_v35, %v3568_v4  ;;  %v6445_v56 = vld [vmem:[%s6533_s5 + $0xb8] sm:$0xff]  }
 0x111   : > { %5877 = vmatprep.mubr.msk.bf16.mxu0 %vm628_vm2, %v3545_v63  ;;  %v1819_v22 = vsel %vm1800_vm8, %v1816_v52, %v1818_v51 }
 0x112   : > { %v1438_v63 = vrot.slane %v7723_v18, 6  ;;  %v1803_v9 = vsel %vm1800_vm8, %v1801_v16, %v1802_v54  ;;  %v3578_v18 = vrot.slane %v7143_v53, 3 }
 0x114   : > { %v1442_v33 = vor.u32 %v1441_v19, %v1438_v63 }
 0x116   : > { %5652 = vmatmul.mubr.msk.bf16.gmra.mrb[32].mxu1 %vm628_vm2, %v1389_v5  ;;  %v3557_v5 = vsel %vm3534_vm7, %v3554_v20, %v3556_v46  ;;  %v1443_v45 = vsel %vm1238_vm6, %v1433_v39, %v1442_v33  ;;  %v3575_v39 = vsel %vm3534_vm7, %v3572_v47, %v3574_v23  ;;  %v7343_v20 = vld [vmem:[%s6649_s16 + $0x90] sm:$0xff]   ;;  %v1820_v46 = vrot.slane %v6443_v48, 6 }
 0x117   : > { %5655 = vmatprep.mubr.msk.bf16.mxu1 %vm628_vm2, %v1398_v42  ;;  %v3560_v42 = vrot.slane %v6832_v10, 3  ;;  %v3562_v10 = vrot.slane %v6847_v32, 3  ;;  %v1810_v32 = vrot.slane %v7079_v2, 6  ;;  %v1812_v2 = vrot.slane %v7099_v38, 6 }
 0x118   : > { %5878 = vmatmul.mubr.msk.bf16.gmra.mrb[8].mxu0 %vm628_vm2, %v3547_v41  ;;  %v6441_v41 = vld [vmem:[%s6533_s5 + $0x48] sm:$0xff]   ;;  %v3573_v38 = vsel %vm3534_vm7, %v3570_v7, %v3572_v47  ;;  %v3580_v63 = vrot.slane %v7343_v20, 3  ;;  %v1821_v49 = vsel %vm1800_vm8, %v1818_v51, %v1820_v46  ;;  %v1824_v33 = vrot.slane %v7165_v59, 6  ;;  %v7421_v7 = vld [vmem:[%s6649_s16 + $0x30] sm:$0xff]   ;;  %s7593_s5 = scalar_lea.vmem %s7684_s4, %s4760_s28 }
 0x119   : > { %5881 = vmatprep.mubr.msk.bf16.mxu0 %vm628_vm2, %v3549_v11  ;;  %v3561_v25 = vsel %vm3534_vm7, %v3558_v26, %v3560_v42  ;;  %v1804_v11 = vrot.slane %v6441_v41, 6  ;;  %v3565_v1 = vsel %vm3534_vm7, %v3562_v10, %v3564_v21  ;;  %v1813_v30 = vsel %vm1800_vm8, %v1810_v32, %v1812_v2  ;;  %v7368_v26 = vld [vmem:[%s6649_s16] sm:$0xff]   ;;  %v7382_v41 = vld [vmem:[%s6649_s16 + $0x8] sm:$0xff]  }
 0x11a   : > { %v1815_v43 = vsel %vm1800_vm8, %v1812_v2, %v1814_v6  ;;  %v1827_v59 = vsel %vm1800_vm8, %v1824_v33, %v1826_v58  ;;  %v7417_v2 = vld [vmem:[%s6649_s16 + $0x28] sm:$0xff]   ;;  %v3954_v47 = vrot.slane %v7421_v7, 2 }
 0x11b   : > { %v1805_v44 = vsel %vm1800_vm8, %v1802_v54, %v1804_v11  ;;  %v1807_v31 = vsel %vm1800_vm8, %v1804_v11, %v1806_v12  ;;  %v3941_v54 = vrot.slane %v6445_v56, 2  ;;  %v3944_v11 = vrot.slane %v7382_v41, 2 }
 0x11c   : > { %v3946_v12 = vrot.slane %v7386_v8, 2 }
 0x11e   : > { %5656 = vmatmul.mubr.msk.bf16.gmra.mrb[36].mxu1 %vm628_vm2, %v1407_v27  ;;  %v3563_v27 = vsel %vm3534_vm7, %v3560_v42, %v3562_v10  ;;  %v3942_v42 = vrot.slane %v7368_v26, 2 }
 0x11f   : > { %5659 = vmatprep.mubr.msk.bf16.mxu1 %vm628_vm2, %v1416_v28  ;;  %v1811_v28 = vsel %vm1800_vm8, %v1808_v13, %v1810_v32  ;;  %v7403_v13 = vld [vmem:[%s6649_s16 + $0x20] sm:$0xff]  }
 0x120   : > { %5882 = vmatmul.mubr.msk.bf16.gmra.mrb[12].mxu0 %vm628_vm2, %v3551_v14  ;;  %v3576_v14 = vrot.slane %v7120_v61, 3  ;;  %v3943_v60 = vsel %vm701_vm0, %v3941_v54, %v3942_v42  ;;  %v3950_v32 = vrot.slane %v7403_v13, 2  ;;  %v1842_v51 = vrot.slane %v7403_v13, 6  ;;  %v7471_v54 = vld [vmem:[%s6649_s16 + $0x58] sm:$0xff]  }
 0x121   : > { %5885 = vmatprep.mubr.msk.bf16.mxu0 %vm628_vm2, %v3553_v15  ;;  %v1817_v15 = vsel %vm1800_vm8, %v1814_v6, %v1816_v52  ;;  %v3952_v6 = vrot.slane %v7417_v2, 2 }
 0x122   : > { %v3577_v37 = vsel %vm3534_vm7, %v3574_v23, %v3576_v14  ;;  %v7435_v23 = vld [vmem:[%s6649_s16 + $0x38] sm:$0xff]  }
 0x126   : > { %5660 = vmatmul.mubr.msk.bf16.gmra.mrb[40].mxu1 %vm628_vm2, %v1425_v50  ;;  %v1822_v50 = vrot.slane %v6444_v62, 6  ;;  %v1844_v62 = vrot.slane %v7417_v2, 6 }
 0x127   : > { %5663 = vmatprep.mubr.msk.bf16.mxu1 %vm628_vm2, %v1434_v55  ;;  %v3579_v55 = vsel %vm3534_vm7, %v3576_v14, %v3578_v18  ;;  %v3956_v14 = vrot.slane %v7435_v23, 2 }
 0x128   : > { %5886 = vmatmul.mubr.msk.bf16.gmra.mrb[16].mxu0 %vm628_vm2, %v3555_v24  ;;  %v1823_v19 = vsel %vm1800_vm8, %v1820_v46, %v1822_v50  ;;  %v7356_v24 = vld [vmem:[%s6649_s16 + $0x98] sm:$0xff]  }
 0x129   : > { %5889 = vmatprep.mubr.msk.bf16.mxu0 %vm628_vm2, %v3557_v5  ;;  %v3581_v5 = vsel %vm3534_vm7, %v3578_v18, %v3580_v63  ;;  %v3582_v16 = vrot.slane %v7356_v24, 3  ;;  %v3957_v48 = vsel %vm701_vm0, %v3954_v47, %v3956_v14  ;;  %v7453_v18 = vld [vmem:[%s6649_s16 + $0x48] sm:$0xff]  }
 0x12e   : > { %5664 = vmatmul.mubr.msk.bf16.gmra.mrb[44].mxu1 %vm628_vm2, %v1443_v45  ;;  %v1825_v45 = vsel %vm1800_vm8, %v1822_v50, %v1824_v33  ;;  %v1846_v50 = vrot.slane %v7421_v7, 6 }
 0x12f   : > { %5669 = vmatprep.mubr.msk.bf16.mxu1 %vm628_vm2, %v1803_v9  ;;  %v3583_v9 = vsel %vm3534_vm7, %v3580_v63, %v3582_v16  ;;  %v3960_v63 = vrot.slane %v7453_v18, 2  ;;  %v1848_v16 = vrot.slane %v7435_v23, 6 }
 0x130   : > { %5890 = vmatmul.mubr.msk.bf16.gmra.mrb[20].mxu0 %vm628_vm2, %v3559_v40  ;;  %v1828_v40 = vrot.slane %v7191_v29, 6 }
 0x131   : > { %5893 = vmatprep.mubr.msk.bf16.mxu0 %vm628_vm2, %v3561_v25  ;;  %v1830_v25 = vrot.slane %v7195_v57, 6  ;;  %v3947_v57 = vsel %vm701_vm0, %v3944_v11, %v3946_v12 }
 0x132   : > { %v1829_v10 = vsel %vm1800_vm8, %v1826_v58, %v1828_v40 }
 0x133   : > { %v1831_v29 = vsel %vm1800_vm8, %v1828_v40, %v1830_v25 }
 0x136   : > { %5670 = vmatmul.mubr.msk.bf16.vlgmr.msra.gmra.mrb[0].mxu1 %vm628_vm2, %v1805_v44  ;;  %v1832_v44 = vrot.slane %v6445_v56, 6  ;;  %v2232_v56 = vrot.slane %v7368_v26, 5 }
 0x137   : > { %5968 = vmatpush3.bf16.msra.mxu1 %v6516_v3  ;;  %5673 = vmatprep.mubr.msk.bf16.mxu1 %vm628_vm2, %v1807_v31  ;;  %v3567_v3 = vsel %vm3534_vm7, %v3564_v21, %v3566_v35  ;;  %v3945_v21 = vsel %vm701_vm0, %v3942_v42, %v3944_v11  ;;  %v1834_v31 = vrot.slane %v7368_v26, 6  ;;  %v3964_v42 = vrot.slane %v7471_v54, 2 }
 0x138   : > { %5894 = vmatmul.mubr.msk.bf16.gmra.mrb[24].mxu0 %vm628_vm2, %v3563_v27  ;;  %v7399_v27 = vld [vmem:[%s6649_s16 + $0x18] sm:$0xff]   ;;  %v1833_v35 = vsel %vm1800_vm8, %v1830_v25, %v1832_v44  ;;  %v2234_v11 = vrot.slane %v7382_v41, 5 }
 0x139   : > { %5897 = vmatprep.mubr.msk.bf16.mxu0 %vm628_vm2, %v3565_v1  ;;  %v3948_v1 = vrot.slane %v7399_v27, 2  ;;  %v1835_v4 = vsel %vm1800_vm8, %v1832_v44, %v1834_v31  ;;  %v1840_v52 = vrot.slane %v7399_v27, 6 }
 0x13e   : > { %5674 = vmatmul.mubr.msk.bf16.gmra.mrb[4].mxu1 %vm628_vm2, %v1809_v36  ;;  %v3949_v36 = vsel %vm701_vm0, %v3946_v12, %v3948_v1  ;;  %v2236_v12 = vrot.slane %v7386_v8, 5 }
 0x13f   : > { %5677 = vmatprep.mubr.msk.bf16.mxu1 %vm628_vm2, %v1811_v28  ;;  %v3951_v28 = vsel %vm701_vm0, %v3948_v1, %v3950_v32  ;;  %v2240_v1 = vrot.slane %v7403_v13, 5  ;;  %v2242_v13 = vrot.slane %v7417_v2, 5 }
 0x140   : > { %5898 = vmatmul.mubr.msk.bf16.gmra.mrb[28].mxu0 %vm628_vm2, %v3567_v3  ;;  %v1836_v3 = vrot.slane %v7382_v41, 6  ;;  %v2237_v44 = vsel %vm2206_vm3, %v2234_v11, %v2236_v12 }
 0x141   : > { %5901 = vmatprep.mubr.msk.bf16.mxu0 %vm628_vm2, %v3569_v0  ;;  %v1838_v0 = vrot.slane %v7386_v8, 6  ;;  %v2238_v8 = vrot.slane %v7399_v27, 5 }
 0x146   : > { %5678 = vmatmul.mubr.msk.bf16.gmra.mrb[8].mxu1 %vm628_vm2, %v1813_v30  ;;  %v1837_v30 = vsel %vm1800_vm8, %v1834_v31, %v1836_v3 }
 0x147   : > { %5681 = vmatprep.mubr.msk.bf16.mxu1 %vm628_vm2, %v1815_v43  ;;  %v1839_v43 = vsel %vm1800_vm8, %v1836_v3, %v1838_v0 }
 0x148   : > { %5902 = vmatmul.mubr.msk.bf16.gmra.mrb[32].mxu0 %vm628_vm2, %v3571_v34  ;;  %v3953_v34 = vsel %vm701_vm0, %v3950_v32, %v3952_v6  ;;  %v6461_v32 = vld [vmem:[%s6649_s16 + $0x78] sm:$0xff]  }
 0x149   : > { %5905 = vmatprep.mubr.msk.bf16.mxu0 %vm628_vm2, %v3573_v38  ;;  %v3955_v38 = vsel %vm701_vm0, %v3952_v6, %v3954_v47  ;;  %v3978_v6 = vrot.slane %v7343_v20, 2  ;;  %v2243_v47 = vsel %vm2206_vm3, %v2240_v1, %v2242_v13  ;;  %v3980_v20 = vrot.slane %v7356_v24, 2 }
 0x14e   : > { %5682 = vmatmul.mubr.msk.bf16.gmra.mrb[12].mxu1 %vm628_vm2, %v1817_v15  ;;  %v7439_v15 = vld [vmem:[%s6649_s16 + $0x40] sm:$0xff]  }
 0x14f   : > { %5685 = vmatprep.mubr.msk.bf16.mxu1 %vm628_vm2, %v1819_v22  ;;  %v3958_v22 = vrot.slane %v7439_v15, 2 }
 0x150   : > { %5906 = vmatmul.mubr.msk.bf16.gmra.mrb[36].mxu0 %vm628_vm2, %v3575_v39  ;;  %v1841_v39 = vsel %vm1800_vm8, %v1838_v0, %v1840_v52  ;;  %v2244_v0 = vrot.slane %v7421_v7, 5  ;;  %v2246_v7 = vrot.slane %v7435_v23, 5 }
 0x151   : > { %5909 = vmatprep.mubr.msk.bf16.mxu0 %vm628_vm2, %v3577_v37  ;;  %v1843_v37 = vsel %vm1800_vm8, %v1840_v52, %v1842_v51  ;;  %v3959_v46 = vsel %vm701_vm0, %v3956_v14, %v3958_v22  ;;  %v3961_v33 = vsel %vm701_vm0, %v3958_v22, %v3960_v63  ;;  %v3981_v14 = vsel %vm701_vm0, %v3978_v6, %v3980_v20  ;;  %v6425_v22 = vld [vmem:[%s6649_s16 + $0xa8] sm:$0xff]  }
 0x152   : > { %v2247_v52 = vsel %vm2206_vm3, %v2244_v0, %v2246_v7 }
 0x156   : > { %5686 = vmatmul.mubr.msk.bf16.gmra.mrb[16].mxu1 %vm628_vm2, %v1821_v49  ;;  %v7457_v49 = vld [vmem:[%s6649_s16 + $0x50] sm:$0xff]  }
 0x157   : > { %5689 = vmatprep.mubr.msk.bf16.mxu1 %vm628_vm2, %v1823_v19  ;;  %v3962_v19 = vrot.slane %v7457_v49, 2  ;;  %v2252_v24 = vrot.slane %v7457_v49, 5 }
 0x158   : > { %5910 = vmatmul.mubr.msk.bf16.gmra.mrb[40].mxu0 %vm628_vm2, %v3579_v55  ;;  %v1845_v55 = vsel %vm1800_vm8, %v1842_v51, %v1844_v62 }
 0x159   : > { %5913 = vmatprep.mubr.msk.bf16.mxu0 %vm628_vm2, %v3581_v5  ;;  %v1847_v5 = vsel %vm1800_vm8, %v1844_v62, %v1846_v50  ;;  %v3963_v58 = vsel %vm701_vm0, %v3960_v63, %v3962_v19  ;;  %v3965_v25 = vsel %vm701_vm0, %v3962_v19, %v3964_v42  ;;  %v6427_v63 = vld [vmem:[%s6649_s16 + $0xb8] sm:$0xff]  }
 0x15a   : > { %v3988_v49 = vrot.slane %v6427_v63, 2 }
 0x15e   : > { %5690 = vmatmul.mubr.msk.bf16.gmra.mrb[20].mxu1 %vm628_vm2, %v1825_v45  ;;  %v6458_v45 = vld [vmem:[%s6649_s16 + $0x60] sm:$0xff]  }
 0x15f   : > { %5693 = vmatprep.mubr.msk.bf16.mxu1 %vm628_vm2, %v1827_v59  ;;  %v3966_v59 = vrot.slane %v6458_v45, 2 }
 0x160   : > { %5914 = vmatmul.mubr.msk.bf16.gmra.mrb[44].mxu0 %vm628_vm2, %v3583_v9  ;;  %v1849_v9 = vsel %vm1800_vm8, %v1846_v50, %v1848_v16 }
 0x161   : > { %5919 = vmatprep.mubr.msk.bf16.mxu0 %vm628_vm2, %v3943_v60  ;;  %v7725_v60 = vrot.slane %v6691_v17, 5  ;;  %v3967_v26 = vsel %vm701_vm0, %v3964_v42, %v3966_v59  ;;  %v6459_v17 = vld [vmem:[%s6649_s16 + $0x68] sm:$0xff]  }
 0x163   : > { %v2233_v40 = vsel %vm2206_vm3, %v7725_v60, %v2232_v56 }
 0x166   : > { %5694 = vmatmul.mubr.msk.bf16.gmra.mrb[24].mxu1 %vm628_vm2, %v1829_v10  ;;  %v3968_v10 = vrot.slane %v6459_v17, 2 }
 0x167   : > { %5697 = vmatprep.mubr.msk.bf16.mxu1 %vm628_vm2, %v1831_v29  ;;  %v6460_v29 = vld [vmem:[%s6649_s16 + $0x70] sm:$0xff]  }
 0x168   : > { %5920 = vmatmul.mubr.msk.bf16.vlgmr.msra.gmra.mrb[0].mxu0 %vm628_vm2, %v3945_v21  ;;  %v3970_v21 = vrot.slane %v6460_v29, 2  ;;  %v3969_v31 = vsel %vm701_vm0, %v3966_v59, %v3968_v10 }
 0x169   : > { %5923 = vmatprep.mubr.msk.bf16.mxu0 %vm628_vm2, %v3947_v57  ;;  %v2235_v57 = vsel %vm2206_vm3, %v2232_v56, %v2234_v11 }
 0x16a   : > { %v3971_v41 = vsel %vm701_vm0, %v3968_v10, %v3970_v21 }
 0x16e   : > { %5698 = vmatmul.mubr.msk.bf16.gmra.mrb[28].mxu1 %vm628_vm2, %v1833_v35  ;;  %v3972_v35 = vrot.slane %v6461_v32, 2 }
 0x16f   : > { %5701 = vmatprep.mubr.msk.bf16.mxu1 %vm628_vm2, %v1835_v4  ;;  %v3974_v4 = vrot.slane %v7120_v61, 2  ;;  %v3976_v61 = vrot.slane %v7143_v53, 2  ;;  %v2248_v53 = vrot.slane %v7439_v15, 5  ;;  %v2250_v15 = vrot.slane %v7453_v18, 5 }
 0x170   : > { %5924 = vmatmul.mubr.msk.bf16.gmra.mrb[4].mxu0 %vm628_vm2, %v3949_v36  ;;  %v2239_v36 = vsel %vm2206_vm3, %v2236_v12, %v2238_v8  ;;  %v3973_v3 = vsel %vm701_vm0, %v3970_v21, %v3972_v35  ;;  %v2254_v18 = vrot.slane %v7471_v54, 5 }
 0x171   : > { %5927 = vmatprep.mubr.msk.bf16.mxu0 %vm628_vm2, %v3951_v28  ;;  %v2241_v28 = vsel %vm2206_vm3, %v2238_v8, %v2240_v1  ;;  %v3975_v27 = vsel %vm701_vm0, %v3972_v35, %v3974_v4  ;;  %v3979_v2 = vsel %vm701_vm0, %v3976_v61, %v3978_v6  ;;  %v2249_v51 = vsel %vm2206_vm3, %v2246_v7, %v2248_v53  ;;  %v7583_v1 = vld [vmem:[%s7683_s3] ss:$0 sm:$0xff] }
 0x172   : > { %v2253_v62 = vsel %vm2206_vm3, %v2250_v15, %v2252_v24 }
 0x176   : > { %5702 = vmatmul.mubr.msk.bf16.gmra.mrb[32].mxu1 %vm628_vm2, %v1837_v30  ;;  %v2245_v30 = vsel %vm2206_vm3, %v2242_v13, %v2244_v0 }
 0x177   : > { %5705 = vmatprep.mubr.msk.bf16.mxu1 %vm628_vm2, %v1839_v43  ;;  %v3977_v43 = vsel %vm701_vm0, %v3974_v4, %v3976_v61 }
 0x178   : > { %5928 = vmatmul.mubr.msk.bf16.gmra.mrb[8].mxu0 %vm628_vm2, %v3953_v34  ;;  %v6424_v34 = vld [vmem:[%s6649_s16 + $0xa0] sm:$0xff]  }
 0x179   : > { %5931 = vmatprep.mubr.msk.bf16.mxu0 %vm628_vm2, %v3955_v38  ;;  %v3982_v38 = vrot.slane %v6424_v34, 2 }
 0x17b   : > { %v3983_v23 = vsel %vm701_vm0, %v3980_v20, %v3982_v38 }
 0x17e   : > { %5706 = vmatmul.mubr.msk.bf16.gmra.mrb[36].mxu1 %vm628_vm2, %v1841_v39  ;;  %v6426_v39 = vld [vmem:[%s6649_s16 + $0xb0] sm:$0xff]  }
 0x17f   : > { %5709 = vmatprep.mubr.msk.bf16.mxu1 %vm628_vm2, %v1843_v37  ;;  %v3984_v37 = vrot.slane %v6425_v22, 2 }
 0x180   : > { %5932 = vmatmul.mubr.msk.bf16.gmra.mrb[12].mxu0 %vm628_vm2, %v3957_v48  ;;  %v3986_v48 = vrot.slane %v6426_v39, 2 }
 0x181   : > { %5935 = vmatprep.mubr.msk.bf16.mxu0 %vm628_vm2, %v3959_v46  ;;  %v2251_v46 = vsel %vm2206_vm3, %v2248_v53, %v2250_v15  ;;  %v3985_v50 = vsel %vm701_vm0, %v3982_v38, %v3984_v37 }
 0x182   : > { %v3987_v19 = vsel %vm701_vm0, %v3984_v37, %v3986_v48 }
 0x186   : > { %5710 = vmatmul.mubr.msk.bf16.gmra.mrb[40].mxu1 %vm628_vm2, %v1845_v55  ;;  %v2255_v55 = vsel %vm2206_vm3, %v2252_v24, %v2254_v18 }
 0x187   : > { %5713 = vmatprep.mubr.msk.bf16.mxu1 %vm628_vm2, %v1847_v5  ;;  %v3989_v5 = vsel %vm701_vm0, %v3986_v48, %v3988_v49 }
 0x188   : > { %5936 = vmatmul.mubr.msk.bf16.gmra.mrb[16].mxu0 %vm628_vm2, %v3961_v33 }
 0x189   : > { %5939 = vmatprep.mubr.msk.bf16.mxu0 %vm628_vm2, %v3963_v58 }
 0x18e   : > { %5714 = vmatmul.mubr.msk.bf16.gmra.mrb[44].mxu1 %vm628_vm2, %v1849_v9 }
 0x18f   : > { %5743 = vmatprep.mubr.msk.bf16.mxu1 %vm628_vm2, %v2233_v40 }
 0x190   : > { %5940 = vmatmul.mubr.msk.bf16.gmra.mrb[20].mxu0 %vm628_vm2, %v3965_v25 }
 0x191   : > { %5943 = vmatprep.mubr.msk.bf16.mxu0 %vm628_vm2, %v3967_v26 }
 0x196   : > { %5744 = vmatmul.mubr.msk.bf16.vlgmr.msra.gmra.mrb[24].mxu1 %vm628_vm2, %v2235_v57 }
 0x197   : > { %5747 = vmatprep.mubr.msk.bf16.mxu1 %vm628_vm2, %v2237_v44 }
 0x198   : > { %5944 = vmatmul.mubr.msk.bf16.gmra.mrb[24].mxu0 %vm628_vm2, %v3969_v31 }
 0x199   : > { %5947 = vmatprep.mubr.msk.bf16.mxu0 %vm628_vm2, %v3971_v41 }
 0x19e   : > { %5748 = vmatmul.mubr.msk.bf16.gmra.mrb[28].mxu1 %vm628_vm2, %v2239_v36 }
 0x19f   : > { %5751 = vmatprep.mubr.msk.bf16.mxu1 %vm628_vm2, %v2241_v28 }
 0x1a0   : > { %5948 = vmatmul.mubr.msk.bf16.gmra.mrb[28].mxu0 %vm628_vm2, %v3973_v3 }
 0x1a1   : > { %5951 = vmatprep.mubr.msk.bf16.mxu0 %vm628_vm2, %v3975_v27 }
 0x1a6   : > { %5752 = vmatmul.mubr.msk.bf16.gmra.mrb[32].mxu1 %vm628_vm2, %v2243_v47 }
 0x1a7   : > { %5755 = vmatprep.mubr.msk.bf16.mxu1 %vm628_vm2, %v2245_v30 }
 0x1a8   : > { %5952 = vmatmul.mubr.msk.bf16.gmra.mrb[32].mxu0 %vm628_vm2, %v3977_v43 }
 0x1a9   : > { %5955 = vmatprep.mubr.msk.bf16.mxu0 %vm628_vm2, %v3979_v2 }
 0x1ae   : > { %5756 = vmatmul.mubr.msk.bf16.gmra.mrb[36].mxu1 %vm628_vm2, %v2247_v52 }
 0x1af   : > { %5759 = vmatprep.mubr.msk.bf16.mxu1 %vm628_vm2, %v2249_v51 }
 0x1b0   : > { %5956 = vmatmul.mubr.msk.bf16.gmra.mrb[36].mxu0 %vm628_vm2, %v3981_v14 }
 0x1b1   : > { %5959 = vmatprep.mubr.msk.bf16.mxu0 %vm628_vm2, %v3983_v23 }
 0x1b6   : > { %5760 = vmatmul.mubr.msk.bf16.gmra.mrb[40].mxu1 %vm628_vm2, %v2251_v46 }
 0x1b7   : > { %5763 = vmatprep.mubr.msk.bf16.mxu1 %vm628_vm2, %v2253_v62 }
 0x1b8   : > { %5960 = vmatmul.mubr.msk.bf16.gmra.mrb[40].mxu0 %vm628_vm2, %v3985_v50 }
 0x1b9   : > { %5963 = vmatprep.mubr.msk.bf16.mxu0 %vm628_vm2, %v3987_v19 }
 0x1be   : > { %5764 = vmatmul.mubr.msk.bf16.gmra.mrb[44].mxu1 %vm628_vm2, %v2255_v55 }
 0x1c0   : > { %5964 = vmatmul.mubr.msk.bf16.gmra.mrb[44].mxu0 %vm628_vm2, %v3989_v5 }
 0x209   : > { %v5671_v33 = vpop.f32.mrb[0].mxu1 }
 0x20a   : > { %v1964_v58 = vpop.f32.mrb[1].mxu1 }
 0x20b   : > { %v5672_v16 = vpop.f32.mrb[2].mxu1 }
 0x20c   : > { %v1967_v56 = vpop.f32.mrb[3].mxu1 }
 0x211   : > { %v5675_v42 = vpop.f32.mrb[4].mxu1 }
 0x212   : > { %v1980_v45 = vpop.f32.mrb[5].mxu1 }
 0x213   : > { %v5676_v54 = vpop.f32.mrb[6].mxu1 }
 0x214   : > { %v1983_v59 = vpop.f32.mrb[7].mxu1 }
 0x219   : > { %v5679_v9 = vpop.f32.mrb[8].mxu1 }
 0x21a   : > { %v1996_v60 = vpop.f32.mrb[9].mxu1 }
 0x21b   : > { %v7551_v40 = vpop.f32.mrb[10].mxu1 }
 0x21c   : > { %v7553_v25 = vpop.f32.mrb[11].mxu1 }
 0x221   : > { %v7555_v26 = vpop.f32.mrb[12].mxu1 }
 0x222   : > { %v7557_v11 = vpop.f32.mrb[13].mxu1 }
 0x223   : > { %v7559_v12 = vpop.f32.mrb[14].mxu1 }
 0x224   : > { %v7561_v17 = vpop.f32.mrb[15].mxu1 }
 0x229   : > { %v7563_v10 = vpop.f32.mrb[16].mxu1 }
 0x22a   : > { %v7565_v29 = vpop.f32.mrb[17].mxu1 }
 0x22b   : > { %v7567_v21 = vpop.f32.mrb[18].mxu1 }
 0x22c   : > { %v7569_v57 = vpop.f32.mrb[19].mxu1 }
 0x231   : > { %v7571_v44 = vpop.f32.mrb[20].mxu1 }
 0x232   : > { %v7573_v31 = vpop.f32.mrb[21].mxu1 }
 0x233   : > { %v7575_v41 = vpop.f32.mrb[22].mxu1 }
 0x234   : > { %v7577_v8 = vpop.f32.mrb[23].mxu1 }
 0x23b   : > { %v5921_v32 = vpop.f32.mrb[0].mxu0 }
 0x23c   : > { %v5969_v35 = vadd.f32 %v5921_v32, %v5671_v33  ;;  %v4104_v4 = vpop.f32.mrb[1].mxu0 }
 0x23d   : > { %v5970_v36 = vadd.f32 %v4104_v4, %v1964_v58  ;;  %v5922_v28 = vpop.f32.mrb[2].mxu0 }
 0x23e   : > { %v4351_v3 = vadd.f32 %v5969_v35, %v7583_v1  ;;  %v5971_v27 = vadd.f32 %v5922_v28, %v5672_v16  ;;  %v4107_v13 = vpop.f32.mrb[3].mxu0 }
 0x23f   : > { %v4349_v0 = vadd.f32 %v5970_v36, %v7583_v1  ;;  %v5972_v61 = vadd.f32 %v4107_v13, %v1967_v56 }
 0x240   : > { %v4352_v6 = vadd.f32 %v5971_v27, %v7583_v1  ;;  %v4399_v30 = vmax.f32 %v4351_v3, 0.0 }
 0x241   : > { %v4350_v47 = vadd.f32 %v5972_v61, %v7583_v1  ;;  %v4397_v2 = vmax.f32 %v4349_v0, 0.0 }
 0x242   : > { %v4400_v43 = vmax.f32 %v4352_v6, 0.0 }
 0x243   : > { %v4398_v34 = vmax.f32 %v4350_v47, 0.0  ;;  %v5925_v7 = vpop.f32.mrb[4].mxu0 }
 0x244   : > { %v5157_v53 = vpack.c.bf16 %v4400_v43, %v4399_v30  ;;  %v5973_v20 = vadd.f32 %v5925_v7, %v5675_v42  ;;  %v4120_v38 = vpop.f32.mrb[5].mxu0 }
 0x245   : > { %v5152_v52 = vpack.c.bf16 %v4398_v34, %v4397_v2  ;;  %v5974_v51 = vadd.f32 %v4120_v38, %v1980_v45  ;;  %v5926_v14 = vpop.f32.mrb[6].mxu0 }
 0x246   : > { %5269 = vst [vmem:[%s7593_s5 + $0x8] sm:$0xff] %v5157_v53   ;;  %v4355_v22 = vadd.f32 %v5973_v20, %v7583_v1  ;;  %v5975_v23 = vadd.f32 %v5926_v14, %v5676_v54  ;;  %v4123_v39 = vpop.f32.mrb[7].mxu0 }
 0x247   : > { %5153 = vst [vmem:[%s7593_s5] sm:$0xff] %v5152_v52   ;;  %v4353_v15 = vadd.f32 %v5974_v51, %v7583_v1  ;;  %v5976_v24 = vadd.f32 %v4123_v39, %v1983_v59 }
 0x248   : > { %v4356_v37 = vadd.f32 %v5975_v23, %v7583_v1  ;;  %v4403_v46 = vmax.f32 %v4355_v22, 0.0 }
 0x249   : > { %v4354_v48 = vadd.f32 %v5976_v24, %v7583_v1  ;;  %v4401_v50 = vmax.f32 %v4353_v15, 0.0 }
 0x24a   : > { %v4404_v62 = vmax.f32 %v4356_v37, 0.0 }
 0x24b   : > { %v4402_v63 = vmax.f32 %v4354_v48, 0.0  ;;  %v5929_v19 = vpop.f32.mrb[8].mxu0 }
 0x24c   : > { %v5167_v18 = vpack.c.bf16 %v4404_v62, %v4403_v46  ;;  %v5977_v49 = vadd.f32 %v5929_v19, %v5679_v9  ;;  %v4136_v55 = vpop.f32.mrb[9].mxu0 }
 0x24d   : > { %v5162_v5 = vpack.c.bf16 %v4402_v63, %v4401_v50  ;;  %v5978_v33 = vadd.f32 %v4136_v55, %v1996_v60  ;;  %v5930_v58 = vpop.f32.mrb[10].mxu0 }
 0x24e   : > { %5271 = vst [vmem:[%s7593_s5 + $0x18] sm:$0xff] %v5167_v18   ;;  %v4359_v16 = vadd.f32 %v5977_v49, %v7583_v1  ;;  %v5979_v56 = vadd.f32 %v5930_v58, %v7551_v40  ;;  %v4139_v42 = vpop.f32.mrb[11].mxu0 }
 0x24f   : > { %5270 = vst [vmem:[%s7593_s5 + $0x10] sm:$0xff] %v5162_v5   ;;  %v4357_v45 = vadd.f32 %v5978_v33, %v7583_v1  ;;  %v5980_v54 = vadd.f32 %v4139_v42, %v7553_v25 }
 0x250   : > { %v4360_v59 = vadd.f32 %v5979_v56, %v7583_v1  ;;  %v4407_v32 = vmax.f32 %v4359_v16, 0.0 }
 0x251   : > { %v4358_v9 = vadd.f32 %v5980_v54, %v7583_v1  ;;  %v4405_v35 = vmax.f32 %v4357_v45, 0.0 }
 0x252   : > { %v4408_v60 = vmax.f32 %v4360_v59, 0.0 }
 0x253   : > { %v4406_v4 = vmax.f32 %v4358_v9, 0.0  ;;  %v5933_v36 = vpop.f32.mrb[12].mxu0 }
 0x254   : > { %v5177_v28 = vpack.c.bf16 %v4408_v60, %v4407_v32  ;;  %v5981_v40 = vadd.f32 %v5933_v36, %v7555_v26  ;;  %v4152_v3 = vpop.f32.mrb[13].mxu0 }
 0x255   : > { %v5172_v27 = vpack.c.bf16 %v4406_v4, %v4405_v35  ;;  %v5982_v13 = vadd.f32 %v4152_v3, %v7557_v11  ;;  %v5934_v0 = vpop.f32.mrb[14].mxu0 }
 0x256   : > { %5273 = vst [vmem:[%s7593_s5 + $0x28] sm:$0xff] %v5177_v28   ;;  %v4363_v25 = vadd.f32 %v5981_v40, %v7583_v1  ;;  %v5983_v61 = vadd.f32 %v5934_v0, %v7559_v12  ;;  %v4155_v6 = vpop.f32.mrb[15].mxu0 }
 0x257   : > { %5272 = vst [vmem:[%s7593_s5 + $0x20] sm:$0xff] %v5172_v27   ;;  %v4361_v47 = vadd.f32 %v5982_v13, %v7583_v1  ;;  %v5984_v30 = vadd.f32 %v4155_v6, %v7561_v17 }
 0x258   : > { %v4364_v43 = vadd.f32 %v5983_v61, %v7583_v1  ;;  %v4411_v2 = vmax.f32 %v4363_v25, 0.0 }
 0x259   : > { %v4362_v26 = vadd.f32 %v5984_v30, %v7583_v1  ;;  %v4409_v34 = vmax.f32 %v4361_v47, 0.0 }
 0x25a   : > { %v4412_v11 = vmax.f32 %v4364_v43, 0.0 }
 0x25b   : > { %v4410_v7 = vmax.f32 %v4362_v26, 0.0  ;;  %v5937_v53 = vpop.f32.mrb[16].mxu0 }
 0x25c   : > { %v5187_v20 = vpack.c.bf16 %v4412_v11, %v4411_v2  ;;  %v5985_v12 = vadd.f32 %v5937_v53, %v7563_v10  ;;  %v4168_v38 = vpop.f32.mrb[17].mxu0 }
 0x25d   : > { %v5182_v52 = vpack.c.bf16 %v4410_v7, %v4409_v34  ;;  %v5986_v51 = vadd.f32 %v4168_v38, %v7565_v29  ;;  %v5938_v14 = vpop.f32.mrb[18].mxu0 }
 0x25e   : > { %5275 = vst [vmem:[%s7593_s5 + $0x38] sm:$0xff] %v5187_v20   ;;  %v4367_v17 = vadd.f32 %v5985_v12, %v7583_v1  ;;  %v5987_v22 = vadd.f32 %v5938_v14, %v7567_v21  ;;  %v4171_v23 = vpop.f32.mrb[19].mxu0 }
 0x25f   : > { %5274 = vst [vmem:[%s7593_s5 + $0x30] sm:$0xff] %v5182_v52   ;;  %v4365_v39 = vadd.f32 %v5986_v51, %v7583_v1  ;;  %v5988_v15 = vadd.f32 %v4171_v23, %v7569_v57 }
 0x260   : > { %v4368_v24 = vadd.f32 %v5987_v22, %v7583_v1  ;;  %v4415_v37 = vmax.f32 %v4367_v17, 0.0 }
 0x261   : > { %v4366_v10 = vadd.f32 %v5988_v15, %v7583_v1  ;;  %v4413_v48 = vmax.f32 %v4365_v39, 0.0 }
 0x262   : > { %v4416_v29 = vmax.f32 %v4368_v24, 0.0 }
 0x263   : > { %v4414_v46 = vmax.f32 %v4366_v10, 0.0  ;;  %v5941_v62 = vpop.f32.mrb[20].mxu0 }
 0x264   : > { %v5197_v50 = vpack.c.bf16 %v4416_v29, %v4415_v37  ;;  %v5989_v21 = vadd.f32 %v5941_v62, %v7571_v44  ;;  %v4184_v63 = vpop.f32.mrb[21].mxu0 }
 0x265   : > { %v5192_v19 = vpack.c.bf16 %v4414_v46, %v4413_v48  ;;  %v5990_v18 = vadd.f32 %v4184_v63, %v7573_v31  ;;  %v5942_v49 = vpop.f32.mrb[22].mxu0 }
 0x266   : > { %5277 = vst [vmem:[%s7593_s5 + $0x48] sm:$0xff] %v5197_v50   ;;  %v4371_v57 = vadd.f32 %v5989_v21, %v7583_v1  ;;  %v5991_v55 = vadd.f32 %v5942_v49, %v7575_v41  ;;  %v4187_v5 = vpop.f32.mrb[23].mxu0 }
 0x267   : > { %5276 = vst [vmem:[%s7593_s5 + $0x40] sm:$0xff] %v5192_v19   ;;  %v4369_v33 = vadd.f32 %v5990_v18, %v7583_v1  ;;  %v5992_v58 = vadd.f32 %v4187_v5, %v7577_v8 }
 0x268   : > { %v4372_v16 = vadd.f32 %v5991_v55, %v7583_v1  ;;  %v4419_v42 = vmax.f32 %v4371_v57, 0.0 }
 0x269   : > { %v4370_v44 = vadd.f32 %v5992_v58, %v7583_v1  ;;  %v5745_v56 = vpop.f32.mrb[24].mxu1  ;;  %v4417_v54 = vmax.f32 %v4369_v33, 0.0 }
 0x26a   : > { %v4420_v31 = vmax.f32 %v4372_v16, 0.0  ;;  %v2466_v45 = vpop.f32.mrb[25].mxu1 }
 0x26b   : > { %v4418_v59 = vmax.f32 %v4370_v44, 0.0  ;;  %v5945_v9 = vpop.f32.mrb[24].mxu0  ;;  %v5746_v41 = vpop.f32.mrb[26].mxu1 }
 0x26c   : > { %v5207_v32 = vpack.c.bf16 %v4420_v31, %v4419_v42  ;;  %v5993_v60 = vadd.f32 %v5945_v9, %v5745_v56  ;;  %v4200_v35 = vpop.f32.mrb[25].mxu0  ;;  %v2469_v4 = vpop.f32.mrb[27].mxu1 }
 0x26d   : > { %v5202_v36 = vpack.c.bf16 %v4418_v59, %v4417_v54  ;;  %v5994_v8 = vadd.f32 %v4200_v35, %v2466_v45  ;;  %v5946_v28 = vpop.f32.mrb[26].mxu0 }
 0x26e   : > { %5279 = vst [vmem:[%s7593_s5 + $0x58] sm:$0xff] %v5207_v32   ;;  %v4375_v40 = vadd.f32 %v5993_v60, %v7583_v1  ;;  %v5995_v3 = vadd.f32 %v5946_v28, %v5746_v41  ;;  %v4203_v27 = vpop.f32.mrb[27].mxu0 }
 0x26f   : > { %5278 = vst [vmem:[%s7593_s5 + $0x50] sm:$0xff] %v5202_v36   ;;  %v4373_v13 = vadd.f32 %v5994_v8, %v7583_v1  ;;  %v5996_v0 = vadd.f32 %v4203_v27, %v2469_v4 }
 0x270   : > { %v4376_v25 = vadd.f32 %v5995_v3, %v7583_v1  ;;  %v4423_v47 = vmax.f32 %v4375_v40, 0.0 }
 0x271   : > { %v4374_v61 = vadd.f32 %v5996_v0, %v7583_v1  ;;  %v5749_v6 = vpop.f32.mrb[28].mxu1  ;;  %v4421_v26 = vmax.f32 %v4373_v13, 0.0 }
 0x272   : > { %v4424_v30 = vmax.f32 %v4376_v25, 0.0  ;;  %v2482_v43 = vpop.f32.mrb[29].mxu1 }
 0x273   : > { %v4422_v2 = vmax.f32 %v4374_v61, 0.0  ;;  %v5949_v11 = vpop.f32.mrb[28].mxu0  ;;  %v5750_v34 = vpop.f32.mrb[30].mxu1 }
 0x274   : > { %v5217_v7 = vpack.c.bf16 %v4424_v30, %v4423_v47  ;;  %v5997_v53 = vadd.f32 %v5949_v11, %v5749_v6  ;;  %v4216_v20 = vpop.f32.mrb[29].mxu0  ;;  %v2485_v12 = vpop.f32.mrb[31].mxu1 }
 0x275   : > { %v5212_v38 = vpack.c.bf16 %v4422_v2, %v4421_v26  ;;  %v5998_v52 = vadd.f32 %v4216_v20, %v2482_v43  ;;  %v5950_v51 = vpop.f32.mrb[30].mxu0 }
 0x276   : > { %5281 = vst [vmem:[%s7593_s5 + $0x68] sm:$0xff] %v5217_v7   ;;  %v4379_v14 = vadd.f32 %v5997_v53, %v7583_v1  ;;  %v5999_v17 = vadd.f32 %v5950_v51, %v5750_v34  ;;  %v4219_v22 = vpop.f32.mrb[31].mxu0 }
 0x277   : > { %5280 = vst [vmem:[%s7593_s5 + $0x60] sm:$0xff] %v5212_v38   ;;  %v4377_v23 = vadd.f32 %v5998_v52, %v7583_v1  ;;  %v6000_v39 = vadd.f32 %v4219_v22, %v2485_v12 }
 0x278   : > { %v4380_v15 = vadd.f32 %v5999_v17, %v7583_v1  ;;  %v4427_v37 = vmax.f32 %v4379_v14, 0.0 }
 0x279   : > { %v4378_v24 = vadd.f32 %v6000_v39, %v7583_v1  ;;  %v5753_v10 = vpop.f32.mrb[32].mxu1  ;;  %v4425_v46 = vmax.f32 %v4377_v23, 0.0 }
 0x27a   : > { %v4428_v29 = vmax.f32 %v4380_v15, 0.0  ;;  %v2498_v48 = vpop.f32.mrb[33].mxu1 }
 0x27b   : > { %v4426_v62 = vmax.f32 %v4378_v24, 0.0  ;;  %v5953_v50 = vpop.f32.mrb[32].mxu0  ;;  %v5754_v21 = vpop.f32.mrb[34].mxu1 }
 0x27c   : > { %v5227_v63 = vpack.c.bf16 %v4428_v29, %v4427_v37  ;;  %v6001_v19 = vadd.f32 %v5953_v50, %v5753_v10  ;;  %v4232_v18 = vpop.f32.mrb[33].mxu0  ;;  %v2501_v49 = vpop.f32.mrb[35].mxu1 }
 0x27d   : > { %v5222_v57 = vpack.c.bf16 %v4426_v62, %v4425_v46  ;;  %v6002_v55 = vadd.f32 %v4232_v18, %v2498_v48  ;;  %v5954_v5 = vpop.f32.mrb[34].mxu0 }
 0x27e   : > { %5283 = vst [vmem:[%s7593_s5 + $0x78] sm:$0xff] %v5227_v63   ;;  %v4383_v33 = vadd.f32 %v6001_v19, %v7583_v1  ;;  %v6003_v58 = vadd.f32 %v5954_v5, %v5754_v21  ;;  %v4235_v16 = vpop.f32.mrb[35].mxu0 }
 0x27f   : > { %5282 = vst [vmem:[%s7593_s5 + $0x70] sm:$0xff] %v5222_v57   ;;  %v4381_v44 = vadd.f32 %v6002_v55, %v7583_v1  ;;  %v6004_v56 = vadd.f32 %v4235_v16, %v2501_v49 }
 0x280   : > { %v4384_v42 = vadd.f32 %v6003_v58, %v7583_v1  ;;  %v4431_v54 = vmax.f32 %v4383_v33, 0.0 }
 0x281   : > { %v4382_v31 = vadd.f32 %v6004_v56, %v7583_v1  ;;  %v5757_v45 = vpop.f32.mrb[36].mxu1  ;;  %v4429_v41 = vmax.f32 %v4381_v44, 0.0 }
 0x282   : > { %v4432_v59 = vmax.f32 %v4384_v42, 0.0  ;;  %v2514_v9 = vpop.f32.mrb[37].mxu1 }
 0x283   : > { %v4430_v32 = vmax.f32 %v4382_v31, 0.0  ;;  %v5957_v60 = vpop.f32.mrb[36].mxu0  ;;  %v5758_v35 = vpop.f32.mrb[38].mxu1 }
 0x284   : > { %v5237_v4 = vpack.c.bf16 %v4432_v59, %v4431_v54  ;;  %v6005_v36 = vadd.f32 %v5957_v60, %v5757_v45  ;;  %v4248_v8 = vpop.f32.mrb[37].mxu0  ;;  %v2517_v28 = vpop.f32.mrb[39].mxu1 }
 0x285   : > { %v5232_v40 = vpack.c.bf16 %v4430_v32, %v4429_v41  ;;  %v6006_v3 = vadd.f32 %v4248_v8, %v2514_v9  ;;  %v5958_v27 = vpop.f32.mrb[38].mxu0 }
 0x286   : > { %5285 = vst [vmem:[%s7593_s5 + $0x88] sm:$0xff] %v5237_v4   ;;  %v4387_v13 = vadd.f32 %v6005_v36, %v7583_v1  ;;  %v6007_v0 = vadd.f32 %v5958_v27, %v5758_v35  ;;  %v4251_v25 = vpop.f32.mrb[39].mxu0 }
 0x287   : > { %5284 = vst [vmem:[%s7593_s5 + $0x80] sm:$0xff] %v5232_v40   ;;  %v4385_v61 = vadd.f32 %v6006_v3, %v7583_v1  ;;  %v6008_v6 = vadd.f32 %v4251_v25, %v2517_v28 }
 0x288   : > { %v4388_v47 = vadd.f32 %v6007_v0, %v7583_v1  ;;  %v4435_v26 = vmax.f32 %v4387_v13, 0.0 }
 0x289   : > { %v4386_v30 = vadd.f32 %v6008_v6, %v7583_v1  ;;  %v5761_v43 = vpop.f32.mrb[40].mxu1  ;;  %v4433_v34 = vmax.f32 %v4385_v61, 0.0 }
 0x28a   : > { %v4436_v2 = vmax.f32 %v4388_v47, 0.0  ;;  %v2530_v11 = vpop.f32.mrb[41].mxu1 }
 0x28b   : > { %v4434_v7 = vmax.f32 %v4386_v30, 0.0  ;;  %v5961_v53 = vpop.f32.mrb[40].mxu0  ;;  %v5762_v20 = vpop.f32.mrb[42].mxu1 }
 0x28c   : > { %v5247_v12 = vpack.c.bf16 %v4436_v2, %v4435_v26  ;;  %v6009_v38 = vadd.f32 %v5961_v53, %v5761_v43  ;;  %v4264_v52 = vpop.f32.mrb[41].mxu0  ;;  %v2533_v51 = vpop.f32.mrb[43].mxu1 }
 0x28d   : > { %v5242_v14 = vpack.c.bf16 %v4434_v7, %v4433_v34  ;;  %v6010_v17 = vadd.f32 %v4264_v52, %v2530_v11  ;;  %v5962_v22 = vpop.f32.mrb[42].mxu0 }
 0x28e   : > { %5287 = vst [vmem:[%s7593_s5 + $0x98] sm:$0xff] %v5247_v12   ;;  %v4391_v23 = vadd.f32 %v6009_v38, %v7583_v1  ;;  %v6011_v39 = vadd.f32 %v5962_v22, %v5762_v20  ;;  %v4267_v15 = vpop.f32.mrb[43].mxu0 }
 0x28f   : > { %5286 = vst [vmem:[%s7593_s5 + $0x90] sm:$0xff] %v5242_v14   ;;  %v4389_v24 = vadd.f32 %v6010_v17, %v7583_v1  ;;  %v6012_v10 = vadd.f32 %v4267_v15, %v2533_v51 }
 0x290   : > { %v4392_v37 = vadd.f32 %v6011_v39, %v7583_v1  ;;  %v4439_v46 = vmax.f32 %v4391_v23, 0.0 }
 0x291   : > { %v4390_v29 = vadd.f32 %v6012_v10, %v7583_v1  ;;  %v5765_v48 = vpop.f32.mrb[44].mxu1  ;;  %v4437_v21 = vmax.f32 %v4389_v24, 0.0 }
 0x292   : > { %v4440_v62 = vmax.f32 %v4392_v37, 0.0  ;;  %v2546_v50 = vpop.f32.mrb[45].mxu1 }
 0x293   : > { %v4438_v63 = vmax.f32 %v4390_v29, 0.0  ;;  %v5965_v19 = vpop.f32.mrb[44].mxu0  ;;  %v5766_v18 = vpop.f32.mrb[46].mxu1 }
 0x294   : > { %v5257_v49 = vpack.c.bf16 %v4440_v62, %v4439_v46  ;;  %v6013_v57 = vadd.f32 %v5965_v19, %v5765_v48  ;;  %v4280_v55 = vpop.f32.mrb[45].mxu0  ;;  %v2549_v5 = vpop.f32.mrb[47].mxu1 }
 0x295   : > { %v5252_v33 = vpack.c.bf16 %v4438_v63, %v4437_v21  ;;  %v6014_v58 = vadd.f32 %v4280_v55, %v2546_v50  ;;  %v5966_v16 = vpop.f32.mrb[46].mxu0 }
 0x296   : > { %5289 = vst [vmem:[%s7593_s5 + $0xa8] sm:$0xff] %v5257_v49   ;;  %v4395_v44 = vadd.f32 %v6013_v57, %v7583_v1  ;;  %v6015_v56 = vadd.f32 %v5966_v16, %v5766_v18  ;;  %v4283_v42 = vpop.f32.mrb[47].mxu0 }
 0x297   : > { %5288 = vst [vmem:[%s7593_s5 + $0xa0] sm:$0xff] %v5252_v33   ;;  %v4393_v31 = vadd.f32 %v6014_v58, %v7583_v1  ;;  %v6016_v45 = vadd.f32 %v4283_v42, %v2549_v5 }
 0x298   : > { %v4396_v54 = vadd.f32 %v6015_v56, %v7583_v1  ;;  %v4443_v9 = vmax.f32 %v4395_v44, 0.0 }
 0x299   : > { %v4394_v59 = vadd.f32 %v6016_v45, %v7583_v1  ;;  %v4441_v32 = vmax.f32 %v4393_v31, 0.0 }
 0x29a   : > { %v4444_v41 = vmax.f32 %v4396_v54, 0.0 }
 0x29b   : > { %v4442_v60 = vmax.f32 %v4394_v59, 0.0 }
 0x29c   : > { %v5267_v35 = vpack.c.bf16 %v4444_v41, %v4443_v9 }
 0x29d   : > { %v5262_v4 = vpack.c.bf16 %v4442_v60, %v4441_v32 }
 0x29e   : > { %5291 = vst [vmem:[%s7593_s5 + $0xb8] sm:$0xff] %v5267_v35  }
 0x29f   : > { %5290 = vst [vmem:[%s7593_s5 + $0xb0] sm:$0xff] %v5262_v4  }
 0x2a0 PF: > { %s14_s15 = sadd.s32 1, %s6468_s15  }
 0x2a1   : > { %p11_p6 = scmp.ge.s32.totalorder %s14_s15, 7  }
 0x2a3   :  { %13 = sbr.rel (!%p11_p6) target bundleno = 1 (0x1), region = 77 }

// kernel: _lambda_.8
= control target key start
LH: loop header
LB: loop body
LE: loop exit
PB: predicated region body
PF: predicated region fallthrough
CT: control target
= control target key end

     0   :  { %s4418_s15 = smov 0   ;;  %s5206_s0 = inlined_call_operand.vmem [shape: bf16[2048,12], index: 0, kind: input, shape index: {}, may-alias: {0,1}]   ;;  %s5207_s1 = inlined_call_operand.vmem [shape: bf16[2048,12], index: 1, kind: input, shape index: {}, may-alias: {0,1}]   ;;  %s5208_s2 = inlined_call_operand.vmem [shape: bf16[9,12,128], index: 2, kind: input, shape index: {}]   ;;  %s5209_s3 = inlined_call_operand.vmem [shape: f32[1,128], index: 3, kind: input, shape index: {}]   ;;  %s5210_s4 = inlined_call_operand.vmem [shape: bf16[1792,128], index: 4, kind: output, shape index: {}]  }
   0x1 LB: > { %s3263_s16 = sadd.s32 4294967295, %s4391_s15   ;;  %p3267_p0 = scmp.ge.s32.totalorder %s4391_s15, 1  ;;  %s4391_s15 = sphi %s4418_s15, %s14_s15  }
   0x2   : > { %p178_p1 = scmp.lt.s32.totalorder %s4391_s15, 8 }
   0x4   : > { %p179_p2 = pnand %p3267_p0, %p178_p1 }
   0x5   : > { %v4359_v0 = vld [vmem:[%s5208_s2 + $0x8] sm:$0x3f] (!%p179_p2)   ;;  %vm444_vm0 = vcmask (!%p179_p2), 1045504   ;;  %s4429_s19 = sshll.u32 (!%p179_p2), %s3263_s16, 5  ;;  %v4435_v1 = vld [vmem:[%s5208_s2 + $0x20] sm:$0x3f] (!%p179_p2)  }
   0x6   : > { %182 = sbr.rel (%p179_p2) target bundleno = 526 (0x20e), region = 36  ;;  %4341 = vmatprep.subr.msk.bf16.mxu1 (!%p179_p2), %vm444_vm0, %v4359_v0  ;;  %v446_v2 = vsel (!%p179_p2), %vm444_vm0, %v4359_v0, 0  ;;  %p211_p3 = scmp.lt.s32.totalorder (!%p179_p2), %s4429_s19, 255  ;;  %v4363_v3 = vld [vmem:[%s5208_s2] sm:$0x3f] (!%p179_p2)   ;;  %4345 = vmatprep.subr.msk.bf16.mxu0 (!%p179_p2), %vm444_vm0, %v4435_v1  ;;  %v4446_v4 = vsel (!%p179_p2), %vm444_vm0, %v4435_v1, 0 }
   0x7   : > { %3778 = vmatpush3.bf16.msra.mxu1 (!%p179_p2), %v446_v2  ;;  %3914 = vmatpush3.bf16.msra.mxu0 (!%p179_p2), %v4446_v4  ;;  %v4364_v5 = vld [vmem:[%s5208_s2 + $0x28] sm:$0x3f] (!%p179_p2)   ;;  %vm356_vm1 = vcmask (!%p179_p2), 1046528   ;;  %vm395_vm2 = vcmask (!%p179_p2), 97280   ;;  %vm1504_vm3 = vcmask (!%p179_p2), 1044480   ;;  %v663_v8 = vsel (!%p179_p2), %vm444_vm0, %v4363_v3, 0 }
   0x8   : > { %4342 = vmatprep.subr.msk.bf16.mxu1 (!%p179_p2), %vm444_vm0, %v4363_v3  ;;  %4347 = vmatprep.subr.msk.bf16.mxu0 (!%p179_p2), %vm444_vm0, %v4364_v5  ;;  %v1878_v10 = vsel (!%p179_p2), %vm444_vm0, %v4364_v5, 0  ;;  %v4486_v19 = vld [vmem:[%s5208_s2 + $0x30] sm:$0x3f] (!%p179_p2)   ;;  %s3496_s7 = sadd.s32 (!%p179_p2), 32, %s4429_s19  ;;  %vm1790_vm4 = vcmask (!%p179_p2), 1043456   ;;  %vm2396_vm7 = vcmask (!%p179_p2), 1042432  }
   0x9   : > { %p218_p4 = scmp.lt.s32.totalorder (!%p179_p2), %s3496_s7, 255  ;;  %v4543_v46 = vld [vmem:[%s5208_s2 + $0x10] sm:$0x3f] (!%p179_p2)   ;;  %vm2076_vm5 = vsmask.f32 (!%p179_p2), 3328  ;;  %vm2682_vm8 = vcmask (!%p179_p2), 1041408  }
   0xa   : > { %vm829_vm6 = vsmask.f32 (!%p179_p2), 6400  ;;  %p225_p5 = scmp.lt.s32.totalorder (!%p179_p2), %s4429_s19, 223 }
   0xd   : > { %s212_s24 = scalar_select %p211_p3, %s4429_s19, 255 }
   0xe   : > { %s5212_s7 = smov (!%p218_p4, %s3496_s7), 255  ;;  %s5214_s19 = smov (!%p225_p5, %s4429_s19), 223 }
   0xf   : > { %s3269_s27 = sshll.u32 %s212_s24, 2  ;;  %s3271_s8 = sshll.u32 %s5212_s7, 2 }
  0x10   : > { %s4457_s30 = scalar_lea.vmem %s5206_s0, %s3269_s27  ;;  %s4538_s11 = scalar_lea.vmem %s5207_s1, %s3271_s8 }
  0x11   : > { %v4461_v6 = vld [vmem:[%s4457_s30] sm:$0xff]   ;;  %v4464_v7 = vld [vmem:[%s4457_s30 + $0x8] sm:$0xff]   ;;  %v4468_v9 = vld [vmem:[%s4457_s30 + $0x10] sm:$0xff]   ;;  %s3273_s24 = sshll.u32 %s5214_s19, 2 }
  0x12   : > { %v357_v11 = vrot.slane %v4461_v6, 1  ;;  %v358_v12 = vrot.slane %v4464_v7, 1  ;;  %v1505_v13 = vrot.slane %v4461_v6, 3  ;;  %v1506_v14 = vrot.slane %v4464_v7, 3  ;;  %v4478_v17 = vld [vmem:[%s4457_s30 + $0x18] sm:$0xff]   ;;  %v4481_v18 = vld [vmem:[%s4457_s30 + $0x20] sm:$0xff]   ;;  %s5153_s27 = scalar_lea.vmem %s5210_s4, %s3273_s24 }
  0x13   : > { %v360_v15 = vrot.slane %v4468_v9, 1  ;;  %v1508_v16 = vrot.slane %v4468_v9, 3  ;;  %v362_v24 = vrot.slane %v4478_v17, 1  ;;  %v1510_v25 = vrot.slane %v4478_v17, 3  ;;  %v4497_v26 = vld [vmem:[%s4457_s30 + $0x28] sm:$0xff]   ;;  %v4515_v35 = vld [vmem:[%s4457_s30 + $0x30] sm:$0xff]  }
  0x14   : > { %v359_v20 = vsel %vm356_vm1, %v357_v11, %v358_v12  ;;  %v1507_v21 = vsel %vm1504_vm3, %v1505_v13, %v1506_v14  ;;  %v364_v29 = vrot.slane %v4481_v18, 1  ;;  %v1512_v30 = vrot.slane %v4481_v18, 3  ;;  %v4520_v38 = vld [vmem:[%s4457_s30 + $0x38] sm:$0xff]   ;;  %v4533_v45 = vld [vmem:[%s4457_s30 + $0x40] sm:$0xff]   ;;  %v4548_v49 = vld [vmem:[%s4457_s30 + $0x48] sm:$0xff]  }
  0x15   : > { %3779 = vmatprep.mubr.msk.bf16.mxu1 %vm395_vm2, %v359_v20  ;;  %3915 = vmatprep.mubr.msk.bf16.mxu0 %vm395_vm2, %v1507_v21  ;;  %v361_v22 = vsel %vm356_vm1, %v358_v12, %v360_v15  ;;  %v1509_v23 = vsel %vm1504_vm3, %v1506_v14, %v1508_v16  ;;  %v363_v27 = vsel %vm356_vm1, %v360_v15, %v362_v24  ;;  %v366_v31 = vrot.slane %v4497_v26, 1  ;;  %v4566_v57 = vld [vmem:[%s4457_s30 + $0x50] sm:$0xff]   ;;  %v4571_v60 = vld [vmem:[%s4457_s30 + $0x58] sm:$0xff]   ;;  %v4584_v5 = vld [vmem:[%s4457_s30 + $0x60] sm:$0xff]  }
  0x16   : > { %3780 = vmatmul.mubr.msk.bf16.vlgmr.msra.gmra.mrb[0].mxu1 %vm395_vm2, %v361_v22  ;;  %3916 = vmatmul.mubr.msk.bf16.vlgmr.msra.gmra.mrb[0].mxu0 %vm395_vm2, %v1509_v23  ;;  %v1511_v28 = vsel %vm1504_vm3, %v1508_v16, %v1510_v25  ;;  %v1514_v32 = vrot.slane %v4497_v26, 3  ;;  %v365_v33 = vsel %vm356_vm1, %v362_v24, %v364_v29  ;;  %v1513_v34 = vsel %vm1504_vm3, %v1510_v25, %v1512_v30  ;;  %v4590_v11 = vld [vmem:[%s4457_s30 + $0x68] sm:$0xff]   ;;  %v4595_v12 = vld [vmem:[%s5208_s2 + $0x38] sm:$0x3f]   ;;  %v4611_v22 = vld [vmem:[%s4457_s30 + $0x70] sm:$0xff]  }
  0x17   : > { %3812 = vmatpush3.bf16.msra.mxu1 %v663_v8  ;;  %3948 = vmatpush3.bf16.msra.mxu0 %v1878_v10  ;;  %v367_v36 = vsel %vm356_vm1, %v364_v29, %v366_v31  ;;  %v368_v39 = vrot.slane %v4515_v35, 1  ;;  %v1516_v40 = vrot.slane %v4515_v35, 3  ;;  %v370_v41 = vrot.slane %v4520_v38, 1  ;;  %v4616_v25 = vld [vmem:[%s4457_s30 + $0x78] sm:$0xff]  }
  0x18   : > { %3783 = vmatprep.mubr.msk.bf16.mxu1 %vm395_vm2, %v363_v27  ;;  %3919 = vmatprep.mubr.msk.bf16.mxu0 %vm395_vm2, %v1511_v28  ;;  %v1515_v37 = vsel %vm1504_vm3, %v1512_v30, %v1514_v32  ;;  %v1518_v42 = vrot.slane %v4520_v38, 3  ;;  %v372_v50 = vrot.slane %v4533_v45, 1  ;;  %v1520_v51 = vrot.slane %v4533_v45, 3 }
  0x19   : > { %4348 = vmatprep.subr.msk.bf16.mxu0 %vm444_vm0, %v4486_v19  ;;  %v369_v43 = vsel %vm356_vm1, %v366_v31, %v368_v39  ;;  %v1517_v44 = vsel %vm1504_vm3, %v1514_v32, %v1516_v40  ;;  %v371_v47 = vsel %vm356_vm1, %v368_v39, %v370_v41  ;;  %4343 = vmatprep.subr.msk.bf16.mxu1 %vm444_vm0, %v4543_v46  ;;  %v374_v52 = vrot.slane %v4548_v49, 1 }
  0x1a   : > { %v1519_v48 = vsel %vm1504_vm3, %v1516_v40, %v1518_v42  ;;  %v1791_v53 = vrot.slane %v4461_v6, 4  ;;  %v1792_v54 = vrot.slane %v4464_v7, 4  ;;  %v373_v55 = vsel %vm356_vm1, %v370_v41, %v372_v50 }
  0x1b   : > { %v1521_v56 = vsel %vm1504_vm3, %v1518_v42, %v1520_v51  ;;  %v375_v58 = vsel %vm356_vm1, %v372_v50, %v374_v52  ;;  %v376_v61 = vrot.slane %v4566_v57, 1  ;;  %v1794_v62 = vrot.slane %v4468_v9, 4 }
  0x1c   : > { %v1793_v59 = vsel %vm1790_vm4, %v1791_v53, %v1792_v54  ;;  %v378_v63 = vrot.slane %v4571_v60, 1  ;;  %v1796_v0 = vrot.slane %v4478_v17, 4  ;;  %v2198_v8 = vsel %vm444_vm0, %v4486_v19, 0 }
  0x1d   : > { %v377_v2 = vsel %vm356_vm1, %v374_v52, %v376_v61  ;;  %v1795_v3 = vsel %vm1790_vm4, %v1792_v54, %v1794_v62  ;;  %v380_v14 = vrot.slane %v4584_v5, 1  ;;  %v1798_v15 = vrot.slane %v4481_v18, 4  ;;  %v4656_v52 = vld [vmem:[%s5208_s2 + $0x18] sm:$0x3f]  }
  0x1e   : > { %3784 = vmatmul.mubr.msk.bf16.gmra.mrb[4].mxu1 %vm395_vm2, %v365_v33  ;;  %3920 = vmatmul.mubr.msk.bf16.gmra.mrb[4].mxu0 %vm395_vm2, %v1513_v34  ;;  %v379_v10 = vsel %vm356_vm1, %v376_v61, %v378_v63  ;;  %v1797_v13 = vsel %vm1790_vm4, %v1794_v62, %v1796_v0  ;;  %v382_v16 = vrot.slane %v4590_v11, 1  ;;  %v1800_v19 = vrot.slane %v4497_v26, 4  ;;  %v4629_v33 = vld [vmem:[%s4538_s11] sm:$0xff]  }
  0x1f   : > { %3787 = vmatprep.mubr.msk.bf16.mxu1 %vm395_vm2, %v367_v36  ;;  %3923 = vmatprep.mubr.msk.bf16.mxu0 %vm395_vm2, %v1515_v37  ;;  %v381_v20 = vsel %vm356_vm1, %v378_v63, %v380_v14  ;;  %v1799_v21 = vsel %vm1790_vm4, %v1796_v0, %v1798_v15  ;;  %v384_v27 = vrot.slane %v4611_v22, 1  ;;  %v1802_v28 = vrot.slane %v4515_v35, 4 }
  0x20   : > { %v383_v23 = vsel %vm356_vm1, %v380_v14, %v382_v16  ;;  %v1801_v24 = vsel %vm1790_vm4, %v1798_v15, %v1800_v19  ;;  %v386_v29 = vrot.slane %v4616_v25, 1  ;;  %v1804_v30 = vrot.slane %v4520_v38, 4 }
  0x21   : > { %v385_v31 = vsel %vm356_vm1, %v382_v16, %v384_v27  ;;  %v1803_v32 = vsel %vm1790_vm4, %v1800_v19, %v1802_v28  ;;  %v388_v37 = vrot.slane %v4629_v33, 1  ;;  %v1806_v39 = vrot.slane %v4533_v45, 4 }
  0x22   : > { %v387_v34 = vsel %vm356_vm1, %v384_v27, %v386_v29  ;;  %v1805_v36 = vsel %vm1790_vm4, %v1802_v28, %v1804_v30  ;;  %v1808_v40 = vrot.slane %v4548_v49, 4  ;;  %v1020_v50 = vsel %vm444_vm0, %v4543_v46, 0 }
  0x23   : > { %v389_v41 = vsel %vm356_vm1, %v386_v29, %v388_v37  ;;  %v1807_v42 = vsel %vm1790_vm4, %v1804_v30, %v1806_v39  ;;  %v1814_v54 = vrot.slane %v4584_v5, 4  ;;  %v1816_v46 = vrot.slane %v4590_v11, 4 }
  0x24   : > { %v830_v61 = vshrl.u32 %v4461_v6, 16  ;;  %v833_v62 = vshll.u32 %v4461_v6, 16  ;;  %v837_v63 = vshrl.u32 %v4464_v7, 16  ;;  %v840_v0 = vshll.u32 %v4464_v7, 16 }
  0x25   : > { %v1822_v15 = vrot.slane %v4629_v33, 4  ;;  %v845_v16 = vshrl.u32 %v4468_v9, 16  ;;  %v848_v19 = vshll.u32 %v4468_v9, 16  ;;  %v864_v37 = vshll.u32 %v4481_v18, 16 }
  0x26   : > { %3788 = vmatmul.mubr.msk.bf16.gmra.mrb[8].mxu1 %vm395_vm2, %v369_v43  ;;  %3924 = vmatmul.mubr.msk.bf16.gmra.mrb[8].mxu0 %vm395_vm2, %v1517_v44  ;;  %v1809_v43 = vsel %vm1790_vm4, %v1806_v39, %v1808_v40  ;;  %v1810_v44 = vrot.slane %v4566_v57, 4  ;;  %v2081_v14 = vrot.slane %v840_v0, 5  ;;  %v869_v39 = vshrl.u32 %v4497_v26, 16 }
  0x27   : > { %3791 = vmatprep.mubr.msk.bf16.mxu1 %vm395_vm2, %v371_v47  ;;  %3927 = vmatprep.mubr.msk.bf16.mxu0 %vm395_vm2, %v1519_v48  ;;  %v1812_v47 = vrot.slane %v4571_v60, 4  ;;  %v2084_v28 = vrot.slane %v845_v16, 4  ;;  %v2085_v29 = vrot.slane %v848_v19, 5 }
  0x28   : > { %v1811_v48 = vsel %vm1790_vm4, %v1808_v40, %v1810_v44  ;;  %v872_v40 = vshll.u32 %v4497_v26, 16 }
  0x29   : > { %v1813_v53 = vsel %vm1790_vm4, %v1810_v44, %v1812_v47  ;;  %v2093_v44 = vrot.slane %v864_v37, 5 }
  0x2e   : > { %3792 = vmatmul.mubr.msk.bf16.gmra.mrb[12].mxu1 %vm395_vm2, %v373_v55  ;;  %3928 = vmatmul.mubr.msk.bf16.gmra.mrb[12].mxu0 %vm395_vm2, %v1521_v56  ;;  %v1815_v55 = vsel %vm1790_vm4, %v1812_v47, %v1814_v54  ;;  %v1817_v56 = vsel %vm1790_vm4, %v1814_v54, %v1816_v46  ;;  %v2484_v47 = vsel %vm444_vm0, %v4595_v12, 0 }
  0x2f   : > { %3795 = vmatprep.mubr.msk.bf16.mxu1 %vm395_vm2, %v375_v58  ;;  %3949 = vmatprep.mubr.msk.bf16.mxu0 %vm395_vm2, %v1793_v59  ;;  %v1818_v58 = vrot.slane %v4611_v22, 4  ;;  %v1820_v59 = vrot.slane %v4616_v25, 4 }
  0x31   : > { %v1823_v27 = vsel %vm1790_vm4, %v1820_v59, %v1822_v15  ;;  %v893_v15 = vshrl.u32 %v4533_v45, 16 }
  0x36   : > { %3796 = vmatmul.mubr.msk.bf16.gmra.mrb[16].mxu1 %vm395_vm2, %v377_v2  ;;  %3950 = vmatmul.mubr.msk.bf16.vlgmr.msra.gmra.mrb[0].mxu0 %vm395_vm2, %v1795_v3  ;;  %v1819_v2 = vsel %vm1790_vm4, %v1816_v46, %v1818_v58  ;;  %v1821_v3 = vsel %vm1790_vm4, %v1818_v58, %v1820_v59  ;;  %v877_v46 = vshrl.u32 %v4515_v35, 16  ;;  %v885_v58 = vshrl.u32 %v4520_v38, 16 }
  0x37   : > { %3982 = vmatpush3.bf16.msra.mxu0 %v2198_v8  ;;  %3799 = vmatprep.mubr.msk.bf16.mxu1 %vm395_vm2, %v379_v10  ;;  %v2077_v8 = vrot.slane %v830_v61, 4  ;;  %v2078_v10 = vrot.slane %v833_v62, 5  ;;  %v888_v59 = vshll.u32 %v4520_v38, 16 }
  0x38   : > { %3953 = vmatprep.mubr.msk.bf16.mxu0 %vm395_vm2, %v1797_v13  ;;  %4349 = vmatprep.subr.msk.bf16.mxu0 %vm444_vm0, %v4595_v12  ;;  %v2080_v13 = vrot.slane %v837_v63, 4 }
  0x3e   : > { %3800 = vmatmul.mubr.msk.bf16.gmra.mrb[20].mxu1 %vm395_vm2, %v381_v20  ;;  %3954 = vmatmul.mubr.msk.bf16.gmra.mrb[4].mxu0 %vm395_vm2, %v1799_v21  ;;  %v2079_v20 = vor.u32 %v2078_v10, %v2077_v8  ;;  %v2082_v21 = vor.u32 %v2081_v14, %v2080_v13  ;;  %v2104_v13 = vrot.slane %v885_v58, 4  ;;  %v2105_v14 = vrot.slane %v888_v59, 5 }
  0x3f   : > { %3803 = vmatprep.mubr.msk.bf16.mxu1 %vm395_vm2, %v383_v23  ;;  %3957 = vmatprep.mubr.msk.bf16.mxu0 %vm395_vm2, %v1801_v24  ;;  %v853_v23 = vshrl.u32 %v4478_v17, 16  ;;  %v856_v24 = vshll.u32 %v4478_v17, 16 }
  0x40   : > { %v2083_v30 = vsel %vm2076_vm5, %v2079_v20, %v2082_v21  ;;  %v896_v20 = vshll.u32 %v4533_v45, 16 }
  0x46   : > { %3804 = vmatmul.mubr.msk.bf16.gmra.mrb[24].mxu1 %vm395_vm2, %v385_v31  ;;  %3958 = vmatmul.mubr.msk.bf16.gmra.mrb[8].mxu0 %vm395_vm2, %v1803_v32  ;;  %v2088_v31 = vrot.slane %v853_v23, 4  ;;  %v2089_v32 = vrot.slane %v856_v24, 5 }
  0x47   : > { %3807 = vmatprep.mubr.msk.bf16.mxu1 %vm395_vm2, %v387_v34  ;;  %3961 = vmatprep.mubr.msk.bf16.mxu0 %vm395_vm2, %v1805_v36  ;;  %v2086_v34 = vor.u32 %v2085_v29, %v2084_v28  ;;  %v861_v36 = vshrl.u32 %v4481_v18, 16  ;;  %v901_v28 = vshrl.u32 %v4548_v49, 16  ;;  %v904_v29 = vshll.u32 %v4548_v49, 16 }
  0x4e   : > { %3808 = vmatmul.mubr.msk.bf16.gmra.mrb[28].mxu1 %vm395_vm2, %v389_v41  ;;  %3962 = vmatmul.mubr.msk.bf16.gmra.mrb[12].mxu0 %vm395_vm2, %v1807_v42  ;;  %v2090_v41 = vor.u32 %v2089_v32, %v2088_v31  ;;  %v2087_v42 = vsel %vm2076_vm5, %v2082_v21, %v2086_v34  ;;  %v2109_v31 = vrot.slane %v896_v20, 5 }
  0x4f   : > { %3813 = vmatprep.mubr.msk.bf16.mxu1 %vm395_vm2, %v4461_v6  ;;  %3965 = vmatprep.mubr.msk.bf16.mxu0 %vm395_vm2, %v1809_v43  ;;  %v2092_v43 = vrot.slane %v861_v36, 4 }
  0x50   : > { %v2091_v54 = vsel %vm2076_vm5, %v2086_v34, %v2090_v41  ;;  %v832_v34 = vrot.slane %v830_v61, 1 }
  0x51   : > { %v2094_v12 = vor.u32 %v2093_v44, %v2092_v43  ;;  %v842_v44 = vrot.slane %v840_v0, 2 }
  0x56   : > { %3814 = vmatmul.mubr.msk.bf16.vlgmr.msra.gmra.mrb[0].mxu1 %vm395_vm2, %v4464_v7  ;;  %3966 = vmatmul.mubr.msk.bf16.gmra.mrb[16].mxu0 %vm395_vm2, %v1811_v48  ;;  %v2096_v48 = vrot.slane %v869_v39, 4 }
  0x57   : > { %3846 = vmatpush3.bf16.msra.mxu1 %v1020_v50  ;;  %3817 = vmatprep.mubr.msk.bf16.mxu1 %vm395_vm2, %v4468_v9  ;;  %v2097_v50 = vrot.slane %v872_v40, 5 }
  0x58   : > { %3969 = vmatprep.mubr.msk.bf16.mxu0 %vm395_vm2, %v1813_v53  ;;  %4344 = vmatprep.subr.msk.bf16.mxu1 %vm444_vm0, %v4656_v52  ;;  %v4738_v53 = vld [vmem:[%s5208_s2 + $0x40] sm:$0x3f]  }
  0x5e   : > { %3818 = vmatmul.mubr.msk.bf16.gmra.mrb[4].mxu1 %vm395_vm2, %v4478_v17  ;;  %3970 = vmatmul.mubr.msk.bf16.gmra.mrb[20].mxu0 %vm395_vm2, %v1815_v55  ;;  %v880_v55 = vshll.u32 %v4515_v35, 16 }
  0x5f   : > { %3821 = vmatprep.mubr.msk.bf16.mxu1 %vm395_vm2, %v4481_v18  ;;  %3973 = vmatprep.mubr.msk.bf16.mxu0 %vm395_vm2, %v1817_v56  ;;  %v2098_v56 = vor.u32 %v2097_v50, %v2096_v48  ;;  %v2113_v48 = vrot.slane %v904_v29, 5 }
  0x60   : > { %v2101_v8 = vrot.slane %v880_v55, 5 }
  0x61   : > { %v2099_v10 = vsel %vm2076_vm5, %v2094_v12, %v2098_v56 }
  0x66   : > { %3822 = vmatmul.mubr.msk.bf16.gmra.mrb[8].mxu1 %vm395_vm2, %v4497_v26  ;;  %3974 = vmatmul.mubr.msk.bf16.gmra.mrb[24].mxu0 %vm395_vm2, %v1819_v2  ;;  %v2095_v2 = vsel %vm2076_vm5, %v2090_v41, %v2094_v12  ;;  %v835_v41 = vrot.slane %v833_v62, 2  ;;  %v909_v62 = vshrl.u32 %v4566_v57, 16  ;;  %v917_v12 = vshrl.u32 %v4571_v60, 16 }
  0x67   : > { %3825 = vmatprep.mubr.msk.bf16.mxu1 %vm395_vm2, %v4515_v35  ;;  %3977 = vmatprep.mubr.msk.bf16.mxu0 %vm395_vm2, %v1821_v3  ;;  %v2100_v3 = vrot.slane %v877_v46, 4 }
  0x68   : > { %v836_v0 = vor.u32 %v835_v41, %v832_v34  ;;  %v933_v41 = vshrl.u32 %v4590_v11, 16 }
  0x69   : > { %v2102_v21 = vor.u32 %v2101_v8, %v2100_v3  ;;  %v850_v8 = vrot.slane %v848_v19, 2 }
  0x6b   : > { %v2103_v32 = vsel %vm2076_vm5, %v2098_v56, %v2102_v21  ;;  %v920_v56 = vshll.u32 %v4571_v60, 16 }
  0x6d   : > { %v2121_v19 = vrot.slane %v920_v56, 5 }
  0x6e   : > { %3826 = vmatmul.mubr.msk.bf16.gmra.mrb[12].mxu1 %vm395_vm2, %v4520_v38  ;;  %3978 = vmatmul.mubr.msk.bf16.gmra.mrb[28].mxu0 %vm395_vm2, %v1823_v27  ;;  %v2106_v27 = vor.u32 %v2105_v14, %v2104_v13 }
  0x6f   : > { %3829 = vmatprep.mubr.msk.bf16.mxu1 %vm395_vm2, %v4533_v45  ;;  %3983 = vmatprep.mubr.msk.bf16.mxu0 %vm395_vm2, %v2083_v30  ;;  %v2108_v30 = vrot.slane %v893_v15, 4 }
  0x70   : > { %v2107_v43 = vsel %vm2076_vm5, %v2102_v21, %v2106_v27 }
  0x71   : > { %v2110_v61 = vor.u32 %v2109_v31, %v2108_v30  ;;  %v855_v30 = vrot.slane %v853_v23, 1 }
  0x73   : > { %v2111_v3 = vsel %vm2076_vm5, %v2106_v27, %v2110_v61  ;;  %v2120_v27 = vrot.slane %v917_v12, 4 }
  0x76   : > { %3830 = vmatmul.mubr.msk.bf16.gmra.mrb[16].mxu1 %vm395_vm2, %v4548_v49  ;;  %3984 = vmatmul.mubr.msk.bf16.vlgmr.msra.gmra.mrb[0].mxu0 %vm395_vm2, %v2087_v42  ;;  %v839_v42 = vrot.slane %v837_v63, 1  ;;  %v912_v63 = vshll.u32 %v4566_v57, 16 }
  0x77   : > { %4016 = vmatpush3.bf16.msra.mxu0 %v2484_v47  ;;  %3833 = vmatprep.mubr.msk.bf16.mxu1 %vm395_vm2, %v4566_v57  ;;  %v2112_v47 = vrot.slane %v901_v28, 4 }
  0x78   : > { %3987 = vmatprep.mubr.msk.bf16.mxu0 %vm395_vm2, %v2091_v54  ;;  %4350 = vmatprep.subr.msk.bf16.mxu0 %vm444_vm0, %v4738_v53  ;;  %v843_v50 = vor.u32 %v842_v44, %v839_v42  ;;  %v2117_v13 = vrot.slane %v912_v63, 5  ;;  %v936_v42 = vshll.u32 %v4590_v11, 16  ;;  %v863_v44 = vrot.slane %v861_v36, 1 }
  0x79   : > { %v2114_v54 = vor.u32 %v2113_v48, %v2112_v47  ;;  %v866_v47 = vrot.slane %v864_v37, 2  ;;  %v871_v48 = vrot.slane %v869_v39, 1  ;;  %v1306_v36 = vsel %vm444_vm0, %v4656_v52, 0 }
  0x7a   : > { %v844_v14 = vsel %vm829_vm6, %v836_v0, %v843_v50  ;;  %v2128_v39 = vrot.slane %v933_v41, 4 }
  0x7b   : > { %v2115_v21 = vsel %vm2076_vm5, %v2110_v61, %v2114_v54  ;;  %v874_v61 = vrot.slane %v872_v40, 2  ;;  %v2129_v40 = vrot.slane %v936_v42, 5 }
  0x7e   : > { %3834 = vmatmul.mubr.msk.bf16.gmra.mrb[20].mxu1 %vm395_vm2, %v4571_v60  ;;  %3988 = vmatmul.mubr.msk.bf16.gmra.mrb[4].mxu0 %vm395_vm2, %v2095_v2  ;;  %v847_v2 = vrot.slane %v845_v16, 1  ;;  %v858_v16 = vrot.slane %v856_v24, 2  ;;  %v928_v24 = vshll.u32 %v4584_v5, 16 }
  0x7f   : > { %3837 = vmatprep.mubr.msk.bf16.mxu1 %vm395_vm2, %v4584_v5  ;;  %3991 = vmatprep.mubr.msk.bf16.mxu0 %vm395_vm2, %v2099_v10  ;;  %v2116_v10 = vrot.slane %v909_v62, 4 }
  0x80   : > { %v851_v31 = vor.u32 %v850_v8, %v847_v2  ;;  %v859_v34 = vor.u32 %v858_v16, %v855_v30  ;;  %v2125_v8 = vrot.slane %v928_v24, 5  ;;  %v949_v30 = vshrl.u32 %v4616_v25, 16 }
  0x81   : > { %v2118_v23 = vor.u32 %v2117_v13, %v2116_v10  ;;  %v875_v10 = vor.u32 %v874_v61, %v871_v48  ;;  %v941_v13 = vshrl.u32 %v4611_v22, 16  ;;  %v952_v16 = vshll.u32 %v4616_v25, 16 }
  0x82   : > { %v852_v0 = vsel %vm829_vm6, %v843_v50, %v851_v31  ;;  %v860_v37 = vsel %vm829_vm6, %v851_v31, %v859_v34  ;;  %v879_v31 = vrot.slane %v877_v46, 1  ;;  %v890_v61 = vrot.slane %v888_v59, 2 }
  0x83   : > { %v2119_v2 = vsel %vm2076_vm5, %v2114_v54, %v2118_v23  ;;  %v867_v54 = vor.u32 %v866_v47, %v863_v44  ;;  %v2132_v47 = vrot.slane %v941_v13, 4  ;;  %v2136_v46 = vrot.slane %v949_v30, 4 }
  0x84   : > { %v961_v59 = vshll.u32 %v4629_v33, 16 }
  0x86   : > { %3838 = vmatmul.mubr.msk.bf16.gmra.mrb[24].mxu1 %vm395_vm2, %v4590_v11  ;;  %3992 = vmatmul.mubr.msk.bf16.gmra.mrb[8].mxu0 %vm395_vm2, %v2103_v32  ;;  %v925_v32 = vshrl.u32 %v4584_v5, 16 }
  0x87   : > { %3841 = vmatprep.mubr.msk.bf16.mxu1 %vm395_vm2, %v4611_v22  ;;  %3995 = vmatprep.mubr.msk.bf16.mxu0 %vm395_vm2, %v2107_v43  ;;  %v2122_v43 = vor.u32 %v2121_v19, %v2120_v27  ;;  %v868_v27 = vsel %vm829_vm6, %v859_v34, %v867_v54  ;;  %v876_v19 = vsel %vm829_vm6, %v867_v54, %v875_v10 }
  0x89   : > { %v2123_v50 = vsel %vm2076_vm5, %v2118_v23, %v2122_v43  ;;  %v882_v23 = vrot.slane %v880_v55, 2  ;;  %v2137_v55 = vrot.slane %v952_v16, 5 }
  0x8e   : > { %3842 = vmatmul.mubr.msk.bf16.gmra.mrb[28].mxu1 %vm395_vm2, %v4616_v25  ;;  %3996 = vmatmul.mubr.msk.bf16.gmra.mrb[12].mxu0 %vm395_vm2, %v2111_v3  ;;  %v2124_v3 = vrot.slane %v925_v32, 4 }
  0x8f   : > { %3847 = vmatprep.mubr.msk.bf16.mxu1 %vm395_vm2, %v844_v14  ;;  %3999 = vmatprep.mubr.msk.bf16.mxu0 %vm395_vm2, %v2115_v21  ;;  %v944_v14 = vshll.u32 %v4611_v22, 16  ;;  %v2130_v21 = vor.u32 %v2129_v40, %v2128_v39  ;;  %v898_v39 = vrot.slane %v896_v20, 2 }
  0x90   : > { %v2126_v52 = vor.u32 %v2125_v8, %v2124_v3  ;;  %v2138_v3 = vor.u32 %v2137_v55, %v2136_v46  ;;  %v2402_v46 = vrot.slane %v4478_v17, 5 }
  0x91   : > { %v2133_v48 = vrot.slane %v944_v14, 5 }
  0x92   : > { %v2127_v44 = vsel %vm2076_vm5, %v2122_v43, %v2126_v52  ;;  %v2131_v34 = vsel %vm2076_vm5, %v2126_v52, %v2130_v21  ;;  %v883_v43 = vor.u32 %v882_v23, %v879_v31  ;;  %v2398_v31 = vrot.slane %v4464_v7, 5 }
  0x93   : > { %v911_v23 = vrot.slane %v909_v62, 1 }
  0x94   : > { %v884_v8 = vsel %vm829_vm6, %v875_v10, %v883_v43  ;;  %v903_v10 = vrot.slane %v901_v28, 1 }
  0x96   : > { %3848 = vmatmul.mubr.msk.bf16.vlgmr.msra.gmra.mrb[0].mxu1 %vm395_vm2, %v852_v0  ;;  %4000 = vmatmul.mubr.msk.bf16.gmra.mrb[16].mxu0 %vm395_vm2, %v2119_v2  ;;  %v958_v0 = vshrl.u32 %v4629_v33, 16 }
  0x97   : > { %3880 = vmatpush3.bf16.msra.mxu1 %v1306_v36  ;;  %3851 = vmatprep.mubr.msk.bf16.mxu1 %vm395_vm2, %v860_v37  ;;  %v895_v36 = vrot.slane %v893_v15, 1  ;;  %v906_v15 = vrot.slane %v904_v29, 2 }
  0x98   : > { %4003 = vmatprep.mubr.msk.bf16.mxu0 %vm395_vm2, %v2123_v50  ;;  %4346 = vmatprep.subr.msk.bf16.mxu1 %vm444_vm0, %v4435_v1  ;;  %v887_v1 = vrot.slane %v885_v58, 1  ;;  %v2134_v58 = vor.u32 %v2133_v48, %v2132_v47  ;;  %v2140_v40 = vrot.slane %v958_v0, 4  ;;  %v2141_v50 = vrot.slane %v961_v59, 5 }
  0x99   : > { %v899_v20 = vor.u32 %v898_v39, %v895_v36  ;;  %v943_v39 = vrot.slane %v941_v13, 1 }
  0x9a   : > { %v891_v2 = vor.u32 %v890_v61, %v887_v1  ;;  %v2135_v37 = vsel %vm2076_vm5, %v2130_v21, %v2134_v58  ;;  %v2139_v52 = vsel %vm2076_vm5, %v2134_v58, %v2138_v3  ;;  %v2142_v21 = vor.u32 %v2141_v50, %v2140_v40 }
  0x9b   : > { %v919_v1 = vrot.slane %v917_v12, 1  ;;  %v2770_v58 = vsel %vm444_vm0, %v4738_v53, 0  ;;  %v2404_v53 = vrot.slane %v4481_v18, 5  ;;  %v946_v40 = vrot.slane %v944_v14, 2 }
  0x9c   : > { %v892_v54 = vsel %vm829_vm6, %v883_v43, %v891_v2  ;;  %v900_v28 = vsel %vm829_vm6, %v891_v2, %v899_v20  ;;  %v2143_v29 = vsel %vm2076_vm5, %v2138_v3, %v2142_v21  ;;  %v930_v43 = vrot.slane %v928_v24, 2 }
  0x9d   : > { %v935_v3 = vrot.slane %v933_v41, 1  ;;  %v2406_v41 = vrot.slane %v4497_v26, 5  ;;  %v947_v13 = vor.u32 %v946_v40, %v943_v39  ;;  %v2408_v14 = vrot.slane %v4515_v35, 5 }
  0x9e   : > { %3852 = vmatmul.mubr.msk.bf16.gmra.mrb[4].mxu1 %vm395_vm2, %v868_v27  ;;  %4004 = vmatmul.mubr.msk.bf16.gmra.mrb[20].mxu0 %vm395_vm2, %v2127_v44  ;;  %v907_v27 = vor.u32 %v906_v15, %v903_v10  ;;  %v914_v44 = vrot.slane %v912_v63, 2  ;;  %v2400_v63 = vrot.slane %v4468_v9, 5  ;;  %v954_v10 = vrot.slane %v952_v16, 2 }
  0x9f   : > { %3855 = vmatprep.mubr.msk.bf16.mxu1 %vm395_vm2, %v876_v19  ;;  %4007 = vmatprep.mubr.msk.bf16.mxu0 %vm395_vm2, %v2131_v34  ;;  %v2397_v19 = vrot.slane %v4461_v6, 5  ;;  %v922_v34 = vrot.slane %v920_v56, 2  ;;  %v927_v56 = vrot.slane %v925_v32, 1  ;;  %v960_v16 = vrot.slane %v958_v0, 1 }
  0xa0   : > { %v908_v47 = vsel %vm829_vm6, %v899_v20, %v907_v27  ;;  %v915_v62 = vor.u32 %v914_v44, %v911_v23  ;;  %v2401_v12 = vsel %vm2396_vm7, %v2398_v31, %v2400_v63  ;;  %v2403_v36 = vsel %vm2396_vm7, %v2400_v63, %v2402_v46 }
  0xa1   : > { %v2399_v48 = vsel %vm2396_vm7, %v2397_v19, %v2398_v31  ;;  %v923_v61 = vor.u32 %v922_v34, %v919_v1  ;;  %v931_v32 = vor.u32 %v930_v43, %v927_v56  ;;  %v2410_v20 = vrot.slane %v4520_v38, 5 }
  0xa2   : > { %v916_v55 = vsel %vm829_vm6, %v907_v27, %v915_v62  ;;  %v963_v27 = vrot.slane %v961_v59, 2  ;;  %v1219_v0 = vrot.slane %v4461_v6, 2  ;;  %v1220_v23 = vrot.slane %v4464_v7, 2 }
  0xa3   : > { %v924_v2 = vsel %vm829_vm6, %v915_v62, %v923_v61  ;;  %v2411_v31 = vsel %vm2396_vm7, %v2408_v14, %v2410_v20  ;;  %v2414_v59 = vrot.slane %v4548_v49, 5  ;;  %v1222_v34 = vrot.slane %v4468_v9, 2 }
  0xa4   : > { %v2416_v62 = vrot.slane %v4566_v57, 5  ;;  %v1224_v63 = vrot.slane %v4478_v17, 2  ;;  %v1226_v43 = vrot.slane %v4481_v18, 2 }
  0xa6   : > { %3856 = vmatmul.mubr.msk.bf16.gmra.mrb[8].mxu1 %vm395_vm2, %v884_v8  ;;  %4008 = vmatmul.mubr.msk.bf16.gmra.mrb[24].mxu0 %vm395_vm2, %v2135_v37  ;;  %v938_v8 = vrot.slane %v936_v42, 2  ;;  %v932_v37 = vsel %vm829_vm6, %v923_v61, %v931_v32  ;;  %v2405_v42 = vsel %vm2396_vm7, %v2402_v46, %v2404_v53  ;;  %v2418_v61 = vrot.slane %v4571_v60, 5 }
  0xa7   : > { %3859 = vmatprep.mubr.msk.bf16.mxu1 %vm395_vm2, %v892_v54  ;;  %4011 = vmatprep.mubr.msk.bf16.mxu0 %vm395_vm2, %v2139_v52  ;;  %v2407_v54 = vsel %vm2396_vm7, %v2404_v53, %v2406_v41  ;;  %v951_v52 = vrot.slane %v949_v30, 1  ;;  %v2409_v30 = vsel %vm2396_vm7, %v2406_v41, %v2408_v14  ;;  %v1223_v46 = vsel %vm444_vm0, %v1220_v23, %v1222_v34 }
  0xa8   : > { %v939_v24 = vor.u32 %v938_v8, %v935_v3  ;;  %v2419_v56 = vsel %vm2396_vm7, %v2416_v62, %v2418_v61  ;;  %v2422_v3 = vrot.slane %v4590_v11, 5  ;;  %v1227_v8 = vsel %vm444_vm0, %v1224_v63, %v1226_v43 }
  0xa9   : > { %v955_v15 = vor.u32 %v954_v10, %v951_v52  ;;  %v1230_v53 = vrot.slane %v4515_v35, 2  ;;  %v1232_v41 = vrot.slane %v4520_v38, 2  ;;  %v2428_v52 = vrot.slane %v4629_v33, 5 }
  0xaa   : > { %v940_v50 = vsel %vm829_vm6, %v931_v32, %v939_v24  ;;  %v948_v21 = vsel %vm829_vm6, %v939_v24, %v947_v13  ;;  %v2424_v24 = vrot.slane %v4611_v22, 5  ;;  %v1236_v10 = vrot.slane %v4548_v49, 2 }
  0xab   : > { %v956_v19 = vsel %vm829_vm6, %v947_v13, %v955_v15  ;;  %v1233_v40 = vsel %vm444_vm0, %v1230_v53, %v1232_v41  ;;  %v2683_v13 = vrot.slane %v4461_v6, 6  ;;  %v2684_v14 = vrot.slane %v4464_v7, 6 }
  0xac   : > { %v2425_v39 = vsel %vm2396_vm7, %v2422_v3, %v2424_v24  ;;  %v1238_v6 = vrot.slane %v4566_v57, 2  ;;  %v2686_v7 = vrot.slane %v4468_v9, 6  ;;  %v1242_v9 = vrot.slane %v4584_v5, 2 }
  0xae   : > { %3860 = vmatmul.mubr.msk.bf16.gmra.mrb[12].mxu1 %vm395_vm2, %v900_v28  ;;  %4012 = vmatmul.mubr.msk.bf16.gmra.mrb[28].mxu0 %vm395_vm2, %v2143_v29  ;;  %v964_v28 = vor.u32 %v963_v27, %v960_v16  ;;  %v2412_v29 = vrot.slane %v4533_v45, 5  ;;  %v1240_v16 = vrot.slane %v4571_v60, 2  ;;  %v2688_v27 = vrot.slane %v4478_v17, 6 }
  0xaf   : > { %3863 = vmatprep.mubr.msk.bf16.mxu1 %vm395_vm2, %v908_v47  ;;  %4017 = vmatprep.mubr.msk.bf16.mxu0 %vm395_vm2, %v2399_v48  ;;  %v1221_v48 = vsel %vm444_vm0, %v1219_v0, %v1220_v23  ;;  %v2690_v17 = vrot.slane %v4481_v18, 6  ;;  %v1244_v0 = vrot.slane %v4590_v11, 2  ;;  %v2692_v23 = vrot.slane %v4497_v26, 6 }
  0xb0   : > { %v965_v44 = vsel %vm829_vm6, %v955_v15, %v964_v28  ;;  %v2413_v47 = vsel %vm2396_vm7, %v2410_v20, %v2412_v29  ;;  %v2415_v1 = vsel %vm2396_vm7, %v2412_v29, %v2414_v59  ;;  %v1241_v28 = vsel %vm444_vm0, %v1238_v6, %v1240_v16 }
  0xb1   : > { %v2689_v29 = vsel %vm2682_vm8, %v2686_v7, %v2688_v27  ;;  %v1246_v18 = vrot.slane %v4611_v22, 2 }
  0xb6   : > { %3864 = vmatmul.mubr.msk.bf16.gmra.mrb[16].mxu1 %vm395_vm2, %v916_v55  ;;  %4018 = vmatmul.mubr.msk.bf16.vlgmr.msra.gmra.mrb[0].mxu0 %vm395_vm2, %v2401_v12  ;;  %v2417_v55 = vsel %vm2396_vm7, %v2414_v59, %v2416_v62  ;;  %v1225_v12 = vsel %vm444_vm0, %v1222_v34, %v1224_v63  ;;  %v1243_v59 = vsel %vm444_vm0, %v1240_v16, %v1242_v9  ;;  %v2696_v34 = vrot.slane %v4520_v38, 6 }
  0xb7   : > { %4050 = vmatpush3.bf16.msra.mxu0 %v2770_v58  ;;  %3867 = vmatprep.mubr.msk.bf16.mxu1 %vm395_vm2, %v924_v2  ;;  %v2420_v58 = vrot.slane %v4584_v5, 5  ;;  %v1228_v2 = vrot.slane %v4497_v26, 2  ;;  %v2694_v26 = vrot.slane %v4515_v35, 6  ;;  %v1247_v62 = vsel %vm444_vm0, %v1244_v0, %v1246_v18 }
  0xb8   : > { %4021 = vmatprep.mubr.msk.bf16.mxu0 %vm395_vm2, %v2403_v36  ;;  %v1250_v35 = vrot.slane %v4629_v33, 2  ;;  %v2698_v38 = vrot.slane %v4533_v45, 6 }
  0xb9   : > { %v2421_v36 = vsel %vm2396_vm7, %v2418_v61, %v2420_v58  ;;  %v1229_v32 = vsel %vm444_vm0, %v1226_v43, %v1228_v2  ;;  %v2695_v63 = vsel %vm2682_vm8, %v2692_v23, %v2694_v26 }
  0xba   : > { %v2699_v43 = vsel %vm2682_vm8, %v2696_v34, %v2698_v38 }
  0xbe   : > { %3868 = vmatmul.mubr.msk.bf16.gmra.mrb[20].mxu1 %vm395_vm2, %v932_v37  ;;  %4022 = vmatmul.mubr.msk.bf16.gmra.mrb[4].mxu0 %vm395_vm2, %v2405_v42  ;;  %v2426_v37 = vrot.slane %v4616_v25, 5  ;;  %v1231_v42 = vsel %vm444_vm0, %v1228_v2, %v1230_v53  ;;  %v1530_v53 = vrot.slane %v4590_v11, 3 }
  0xbf   : > { %3871 = vmatprep.mubr.msk.bf16.mxu1 %vm395_vm2, %v940_v50  ;;  %4025 = vmatprep.mubr.msk.bf16.mxu0 %vm395_vm2, %v2407_v54  ;;  %v1234_v54 = vrot.slane %v4533_v45, 2  ;;  %v2704_v45 = vrot.slane %v4571_v60, 6 }
  0xc0   : > { %v2427_v50 = vsel %vm2396_vm7, %v2424_v24, %v2426_v37  ;;  %v2429_v20 = vsel %vm2396_vm7, %v2426_v37, %v2428_v52  ;;  %v2708_v24 = vrot.slane %v4590_v11, 6  ;;  %v2710_v11 = vrot.slane %v4611_v22, 6 }
  0xc1   : > { %v1235_v15 = vsel %vm444_vm0, %v1232_v41, %v1234_v54 }
  0xc2   : > { %v2711_v52 = vsel %vm2682_vm8, %v2708_v24, %v2710_v11 }
  0xc6   : > { %3872 = vmatmul.mubr.msk.bf16.gmra.mrb[24].mxu1 %vm395_vm2, %v948_v21  ;;  %4026 = vmatmul.mubr.msk.bf16.gmra.mrb[8].mxu0 %vm395_vm2, %v2409_v30  ;;  %v1237_v21 = vsel %vm444_vm0, %v1234_v54, %v1236_v10  ;;  %v2685_v30 = vsel %vm2682_vm8, %v2683_v13, %v2684_v14 }
  0xc7   : > { %3875 = vmatprep.mubr.msk.bf16.mxu1 %vm395_vm2, %v956_v19  ;;  %4029 = vmatprep.mubr.msk.bf16.mxu0 %vm395_vm2, %v2411_v31  ;;  %v1239_v19 = vsel %vm444_vm0, %v1236_v10, %v1238_v6  ;;  %v2687_v31 = vsel %vm2682_vm8, %v2684_v14, %v2686_v7 }
  0xce   : > { %3876 = vmatmul.mubr.msk.bf16.gmra.mrb[28].mxu1 %vm395_vm2, %v965_v44  ;;  %4030 = vmatmul.mubr.msk.bf16.gmra.mrb[12].mxu0 %vm395_vm2, %v2413_v47  ;;  %v2691_v44 = vsel %vm2682_vm8, %v2688_v27, %v2690_v17  ;;  %v1245_v47 = vsel %vm444_vm0, %v1242_v9, %v1244_v0 }
  0xcf   : > { %3881 = vmatprep.mubr.msk.bf16.mxu1 %vm395_vm2, %v1221_v48  ;;  %4033 = vmatprep.mubr.msk.bf16.mxu0 %vm395_vm2, %v2415_v1  ;;  %v2693_v48 = vsel %vm2682_vm8, %v2690_v17, %v2692_v23  ;;  %v1248_v1 = vrot.slane %v4616_v25, 2 }
  0xd1   : > { %v1249_v61 = vsel %vm444_vm0, %v1246_v18, %v1248_v1 }
  0xd6   : > { %3882 = vmatmul.mubr.msk.bf16.vlgmr.msra.gmra.mrb[0].mxu1 %vm395_vm2, %v1223_v46  ;;  %4034 = vmatmul.mubr.msk.bf16.gmra.mrb[16].mxu0 %vm395_vm2, %v2417_v55  ;;  %v2697_v46 = vsel %vm2682_vm8, %v2694_v26, %v2696_v34  ;;  %v1522_v55 = vrot.slane %v4548_v49, 3 }
  0xd7   : > { %4084 = vmatpush3.bf16.msra.mxu1 %v4446_v4  ;;  %3885 = vmatprep.mubr.msk.bf16.mxu1 %vm395_vm2, %v1225_v12  ;;  %v2423_v4 = vsel %vm2396_vm7, %v2420_v58, %v2422_v3  ;;  %v2700_v12 = vrot.slane %v4548_v49, 6  ;;  %v1524_v49 = vrot.slane %v4566_v57, 3  ;;  %v2702_v3 = vrot.slane %v4566_v57, 6 }
  0xd8   : > { %4037 = vmatprep.mubr.msk.bf16.mxu0 %vm395_vm2, %v2419_v56  ;;  %v1251_v56 = vsel %vm444_vm0, %v1248_v1, %v1250_v35  ;;  %v1523_v58 = vsel %vm1504_vm3, %v1520_v51, %v1522_v55  ;;  %v1528_v57 = vrot.slane %v4584_v5, 3 }
  0xd9   : > { %v2701_v2 = vsel %vm2682_vm8, %v2698_v38, %v2700_v12  ;;  %v1525_v51 = vsel %vm1504_vm3, %v1522_v55, %v1524_v49 }
  0xde   : > { %3886 = vmatmul.mubr.msk.bf16.gmra.mrb[4].mxu1 %vm395_vm2, %v1227_v8  ;;  %4038 = vmatmul.mubr.msk.bf16.gmra.mrb[20].mxu0 %vm395_vm2, %v2421_v36  ;;  %v1526_v8 = vrot.slane %v4571_v60, 3  ;;  %v2703_v36 = vsel %vm2682_vm8, %v2700_v12, %v2702_v3  ;;  %v2706_v60 = vrot.slane %v4584_v5, 6  ;;  %v1532_v5 = vrot.slane %v4611_v22, 3 }
  0xdf   : > { %3889 = vmatprep.mubr.msk.bf16.mxu1 %vm395_vm2, %v1229_v32  ;;  %4041 = vmatprep.mubr.msk.bf16.mxu0 %vm395_vm2, %v2423_v4  ;;  %v2705_v4 = vsel %vm2682_vm8, %v2702_v3, %v2704_v45  ;;  %v1536_v22 = vrot.slane %v4629_v33, 3 }
  0xe0   : > { %v1527_v32 = vsel %vm1504_vm3, %v1524_v49, %v1526_v8  ;;  %v1529_v41 = vsel %vm1504_vm3, %v1526_v8, %v1528_v57  ;;  %v2707_v37 = vsel %vm2682_vm8, %v2704_v45, %v2706_v60  ;;  %v1533_v54 = vsel %vm1504_vm3, %v1530_v53, %v1532_v5 }
  0xe6   : > { %3890 = vmatmul.mubr.msk.bf16.gmra.mrb[8].mxu1 %vm395_vm2, %v1231_v42  ;;  %4042 = vmatmul.mubr.msk.bf16.gmra.mrb[24].mxu0 %vm395_vm2, %v2425_v39  ;;  %v1531_v42 = vsel %vm1504_vm3, %v1528_v57, %v1530_v53  ;;  %v2709_v39 = vsel %vm2682_vm8, %v2706_v60, %v2708_v24 }
  0xe7   : > { %3893 = vmatprep.mubr.msk.bf16.mxu1 %vm395_vm2, %v1233_v40  ;;  %4045 = vmatprep.mubr.msk.bf16.mxu0 %vm395_vm2, %v2427_v50  ;;  %v1534_v40 = vrot.slane %v4616_v25, 3  ;;  %v2712_v50 = vrot.slane %v4616_v25, 6  ;;  %v2714_v25 = vrot.slane %v4629_v33, 6 }
  0xe9   : > { %v1535_v10 = vsel %vm1504_vm3, %v1532_v5, %v1534_v40  ;;  %v2713_v13 = vsel %vm2682_vm8, %v2710_v11, %v2712_v50  ;;  %v1537_v14 = vsel %vm1504_vm3, %v1534_v40, %v1536_v22 }
  0xee   : > { %3894 = vmatmul.mubr.msk.bf16.gmra.mrb[12].mxu1 %vm395_vm2, %v1235_v15  ;;  %4046 = vmatmul.mubr.msk.bf16.gmra.mrb[28].mxu0 %vm395_vm2, %v2429_v20  ;;  %v2715_v15 = vsel %vm2682_vm8, %v2712_v50, %v2714_v25 }
  0xef   : > { %3897 = vmatprep.mubr.msk.bf16.mxu1 %vm395_vm2, %v1237_v21  ;;  %4051 = vmatprep.mubr.msk.bf16.mxu0 %vm395_vm2, %v2685_v30 }
  0xf6   : > { %3898 = vmatmul.mubr.msk.bf16.gmra.mrb[16].mxu1 %vm395_vm2, %v1239_v19  ;;  %4052 = vmatmul.mubr.msk.bf16.vlgmr.msra.gmra.mrb[0].mxu0 %vm395_vm2, %v2687_v31 }
  0xf7   : > { %3901 = vmatprep.mubr.msk.bf16.mxu1 %vm395_vm2, %v1241_v28  ;;  %4055 = vmatprep.mubr.msk.bf16.mxu0 %vm395_vm2, %v2689_v29 }
  0xfe   : > { %3902 = vmatmul.mubr.msk.bf16.gmra.mrb[20].mxu1 %vm395_vm2, %v1243_v59  ;;  %4056 = vmatmul.mubr.msk.bf16.gmra.mrb[4].mxu0 %vm395_vm2, %v2691_v44  ;;  %v5143_v59 = vld [vmem:[%s5209_s3] ss:$0 sm:$0xff] }
  0xff   : > { %3905 = vmatprep.mubr.msk.bf16.mxu1 %vm395_vm2, %v1245_v47  ;;  %4059 = vmatprep.mubr.msk.bf16.mxu0 %vm395_vm2, %v2693_v48 }
 0x106   : > { %3906 = vmatmul.mubr.msk.bf16.gmra.mrb[24].mxu1 %vm395_vm2, %v1247_v62  ;;  %4060 = vmatmul.mubr.msk.bf16.gmra.mrb[8].mxu0 %vm395_vm2, %v2695_v63 }
 0x107   : > { %3909 = vmatprep.mubr.msk.bf16.mxu1 %vm395_vm2, %v1249_v61  ;;  %4063 = vmatprep.mubr.msk.bf16.mxu0 %vm395_vm2, %v2697_v46 }
 0x10e   : > { %3910 = vmatmul.mubr.msk.bf16.gmra.mrb[28].mxu1 %vm395_vm2, %v1251_v56  ;;  %4064 = vmatmul.mubr.msk.bf16.gmra.mrb[12].mxu0 %vm395_vm2, %v2699_v43 }
 0x10f   : > { %3931 = vmatprep.mubr.msk.bf16.mxu1 %vm395_vm2, %v1523_v58  ;;  %4067 = vmatprep.mubr.msk.bf16.mxu0 %vm395_vm2, %v2701_v2 }
 0x116   : > { %3932 = vmatmul.mubr.msk.bf16.vlgmr.msra.gmra.mrb[16].mxu1 %vm395_vm2, %v1525_v51  ;;  %4068 = vmatmul.mubr.msk.bf16.gmra.mrb[16].mxu0 %vm395_vm2, %v2703_v36 }
 0x117   : > { %3935 = vmatprep.mubr.msk.bf16.mxu1 %vm395_vm2, %v1527_v32  ;;  %4071 = vmatprep.mubr.msk.bf16.mxu0 %vm395_vm2, %v2705_v4 }
 0x11e   : > { %3936 = vmatmul.mubr.msk.bf16.gmra.mrb[20].mxu1 %vm395_vm2, %v1529_v41  ;;  %4072 = vmatmul.mubr.msk.bf16.gmra.mrb[20].mxu0 %vm395_vm2, %v2707_v37 }
 0x11f   : > { %3939 = vmatprep.mubr.msk.bf16.mxu1 %vm395_vm2, %v1531_v42  ;;  %4075 = vmatprep.mubr.msk.bf16.mxu0 %vm395_vm2, %v2709_v39 }
 0x126   : > { %3940 = vmatmul.mubr.msk.bf16.gmra.mrb[24].mxu1 %vm395_vm2, %v1533_v54  ;;  %4076 = vmatmul.mubr.msk.bf16.gmra.mrb[24].mxu0 %vm395_vm2, %v2711_v52 }
 0x127   : > { %3943 = vmatprep.mubr.msk.bf16.mxu1 %vm395_vm2, %v1535_v10  ;;  %4079 = vmatprep.mubr.msk.bf16.mxu0 %vm395_vm2, %v2713_v13 }
 0x12e   : > { %3944 = vmatmul.mubr.msk.bf16.gmra.mrb[28].mxu1 %vm395_vm2, %v1537_v14  ;;  %4080 = vmatmul.mubr.msk.bf16.gmra.mrb[28].mxu0 %vm395_vm2, %v2715_v15 }
 0x1a9   : > { %v3883_v20 = vpop.f32.mrb[0].mxu1 }
 0x1aa   : > { %v1342_v21 = vpop.f32.mrb[1].mxu1 }
 0x1ab   : > { %v3884_v30 = vpop.f32.mrb[2].mxu1 }
 0x1ac   : > { %v1345_v6 = vpop.f32.mrb[3].mxu1 }
 0x1b1   : > { %v3887_v7 = vpop.f32.mrb[4].mxu1 }
 0x1b2   : > { %v1358_v16 = vpop.f32.mrb[5].mxu1 }
 0x1b3   : > { %v3888_v27 = vpop.f32.mrb[6].mxu1 }
 0x1b4   : > { %v1361_v19 = vpop.f32.mrb[7].mxu1 }
 0x1b9   : > { %v3891_v31 = vpop.f32.mrb[8].mxu1 }
 0x1ba   : > { %v1374_v33 = vpop.f32.mrb[9].mxu1 }
 0x1bb   : > { %v3892_v28 = vpop.f32.mrb[10].mxu1 }
 0x1bc   : > { %v1377_v29 = vpop.f32.mrb[11].mxu1 }
 0x1c1   : > { %v5131_v9 = vpop.f32.mrb[12].mxu1 }
 0x1c2   : > { %v5133_v17 = vpop.f32.mrb[13].mxu1 }
 0x1c3   : > { %v5135_v0 = vpop.f32.mrb[14].mxu1 }
 0x1c4   : > { %v5137_v23 = vpop.f32.mrb[15].mxu1 }
 0x1c9   : > { %v4053_v44 = vpop.f32.mrb[0].mxu0 }
 0x1ca   : > { %v4085_v47 = vadd.f32 %v4053_v44, %v3883_v20  ;;  %v2806_v48 = vpop.f32.mrb[1].mxu0 }
 0x1cb   : > { %v4086_v18 = vadd.f32 %v2806_v48, %v1342_v21  ;;  %v4054_v26 = vpop.f32.mrb[2].mxu0 }
 0x1cc   : > { %v2973_v1 = vadd.f32 %v4085_v47, %v5143_v59  ;;  %v4087_v34 = vadd.f32 %v4054_v26, %v3884_v30  ;;  %v2809_v62 = vpop.f32.mrb[3].mxu0 }
 0x1cd   : > { %v2971_v63 = vadd.f32 %v4086_v18, %v5143_v59  ;;  %v4088_v61 = vadd.f32 %v2809_v62, %v1345_v6 }
 0x1ce   : > { %v2974_v46 = vadd.f32 %v4087_v34, %v5143_v59  ;;  %v3005_v38 = vmax.f32 %v2973_v1, 0.0 }
 0x1cf   : > { %v2972_v35 = vadd.f32 %v4088_v61, %v5143_v59  ;;  %v3003_v12 = vmax.f32 %v2971_v63, 0.0 }
 0x1d0   : > { %v3006_v55 = vmax.f32 %v2974_v46, 0.0 }
 0x1d1   : > { %v3004_v56 = vmax.f32 %v2972_v35, 0.0  ;;  %v4057_v43 = vpop.f32.mrb[4].mxu0 }
 0x1d2   : > { %v3537_v58 = vpack.c.bf16 %v3006_v55, %v3005_v38  ;;  %v4089_v2 = vadd.f32 %v4057_v43, %v3887_v7  ;;  %v2822_v49 = vpop.f32.mrb[5].mxu0 }
 0x1d3   : > { %v3532_v3 = vpack.c.bf16 %v3004_v56, %v3003_v12  ;;  %v4090_v8 = vadd.f32 %v2822_v49, %v1358_v16  ;;  %v4058_v45 = vpop.f32.mrb[6].mxu0 }
 0x1d4   : > { %3609 = vst [vmem:[%s5153_s27 + $0x8] sm:$0xff] %v3537_v58   ;;  %v2977_v51 = vadd.f32 %v4089_v2, %v5143_v59  ;;  %v4091_v36 = vadd.f32 %v4058_v45, %v3888_v27  ;;  %v2825_v32 = vpop.f32.mrb[7].mxu0 }
 0x1d5   : > { %3533 = vst [vmem:[%s5153_s27] sm:$0xff] %v3532_v3   ;;  %v2975_v4 = vadd.f32 %v4090_v8, %v5143_v59  ;;  %v4092_v57 = vadd.f32 %v2825_v32, %v1361_v19 }
 0x1d6   : > { %v2978_v60 = vadd.f32 %v4091_v36, %v5143_v59  ;;  %v3009_v24 = vmax.f32 %v2977_v51, 0.0 }
 0x1d7   : > { %v2976_v53 = vadd.f32 %v4092_v57, %v5143_v59  ;;  %v3007_v37 = vmax.f32 %v2975_v4, 0.0 }
 0x1d8   : > { %v3010_v41 = vmax.f32 %v2978_v60, 0.0 }
 0x1d9   : > { %v3008_v42 = vmax.f32 %v2976_v53, 0.0  ;;  %v4061_v39 = vpop.f32.mrb[8].mxu0 }
 0x1da   : > { %v3547_v5 = vpack.c.bf16 %v3010_v41, %v3009_v24  ;;  %v4093_v11 = vadd.f32 %v4061_v39, %v3891_v31  ;;  %v2838_v40 = vpop.f32.mrb[9].mxu0 }
 0x1db   : > { %v3542_v50 = vpack.c.bf16 %v3008_v42, %v3007_v37  ;;  %v4094_v54 = vadd.f32 %v2838_v40, %v1374_v33  ;;  %v4062_v52 = vpop.f32.mrb[10].mxu0 }
 0x1dc   : > { %3611 = vst [vmem:[%s5153_s27 + $0x18] sm:$0xff] %v3547_v5   ;;  %v2981_v10 = vadd.f32 %v4093_v11, %v5143_v59  ;;  %v4095_v13 = vadd.f32 %v4062_v52, %v3892_v28  ;;  %v2841_v22 = vpop.f32.mrb[11].mxu0 }
 0x1dd   : > { %3610 = vst [vmem:[%s5153_s27 + $0x10] sm:$0xff] %v3542_v50   ;;  %v2979_v25 = vadd.f32 %v4094_v54, %v5143_v59  ;;  %v4096_v14 = vadd.f32 %v2841_v22, %v1377_v29 }
 0x1de   : > { %v2982_v15 = vadd.f32 %v4095_v13, %v5143_v59  ;;  %v3013_v21 = vmax.f32 %v2981_v10, 0.0 }
 0x1df   : > { %v2980_v20 = vadd.f32 %v4096_v14, %v5143_v59  ;;  %v3011_v6 = vmax.f32 %v2979_v25, 0.0 }
 0x1e0   : > { %v3014_v30 = vmax.f32 %v2982_v15, 0.0 }
 0x1e1   : > { %v3012_v7 = vmax.f32 %v2980_v20, 0.0  ;;  %v4065_v16 = vpop.f32.mrb[12].mxu0 }
 0x1e2   : > { %v3557_v27 = vpack.c.bf16 %v3014_v30, %v3013_v21  ;;  %v4097_v19 = vadd.f32 %v4065_v16, %v5131_v9  ;;  %v2854_v31 = vpop.f32.mrb[13].mxu0 }
 0x1e3   : > { %v3552_v33 = vpack.c.bf16 %v3012_v7, %v3011_v6  ;;  %v4098_v28 = vadd.f32 %v2854_v31, %v5133_v17  ;;  %v4066_v44 = vpop.f32.mrb[14].mxu0 }
 0x1e4   : > { %3613 = vst [vmem:[%s5153_s27 + $0x28] sm:$0xff] %v3557_v27   ;;  %v2985_v29 = vadd.f32 %v4097_v19, %v5143_v59  ;;  %v4099_v47 = vadd.f32 %v4066_v44, %v5135_v0  ;;  %v2857_v48 = vpop.f32.mrb[15].mxu0 }
 0x1e5   : > { %3612 = vst [vmem:[%s5153_s27 + $0x20] sm:$0xff] %v3552_v33   ;;  %v2983_v18 = vadd.f32 %v4098_v28, %v5143_v59  ;;  %v4100_v26 = vadd.f32 %v2857_v48, %v5137_v23 }
 0x1e6   : > { %v2986_v1 = vadd.f32 %v4099_v47, %v5143_v59  ;;  %v3017_v34 = vmax.f32 %v2985_v29, 0.0 }
 0x1e7   : > { %v2984_v9 = vadd.f32 %v4100_v26, %v5143_v59  ;;  %v3015_v17 = vmax.f32 %v2983_v18, 0.0 }
 0x1e8   : > { %v3018_v62 = vmax.f32 %v2986_v1, 0.0 }
 0x1e9   : > { %v3016_v63 = vmax.f32 %v2984_v9, 0.0  ;;  %v3933_v61 = vpop.f32.mrb[16].mxu1  ;;  %v4069_v46 = vpop.f32.mrb[16].mxu0 }
 0x1ea   : > { %v3567_v35 = vpack.c.bf16 %v3018_v62, %v3017_v34  ;;  %v4101_v0 = vadd.f32 %v4069_v46, %v3933_v61  ;;  %v1692_v38 = vpop.f32.mrb[17].mxu1  ;;  %v2870_v55 = vpop.f32.mrb[17].mxu0 }
 0x1eb   : > { %v3562_v12 = vpack.c.bf16 %v3016_v63, %v3015_v17  ;;  %v4102_v56 = vadd.f32 %v2870_v55, %v1692_v38  ;;  %v3934_v43 = vpop.f32.mrb[18].mxu1  ;;  %v4070_v23 = vpop.f32.mrb[18].mxu0 }
 0x1ec   : > { %3615 = vst [vmem:[%s5153_s27 + $0x38] sm:$0xff] %v3567_v35   ;;  %v2989_v58 = vadd.f32 %v4101_v0, %v5143_v59  ;;  %v4103_v2 = vadd.f32 %v4070_v23, %v3934_v43  ;;  %v1695_v49 = vpop.f32.mrb[19].mxu1  ;;  %v2873_v3 = vpop.f32.mrb[19].mxu0 }
 0x1ed   : > { %3614 = vst [vmem:[%s5153_s27 + $0x30] sm:$0xff] %v3562_v12   ;;  %v2987_v8 = vadd.f32 %v4102_v56, %v5143_v59  ;;  %v4104_v45 = vadd.f32 %v2873_v3, %v1695_v49 }
 0x1ee   : > { %v2990_v51 = vadd.f32 %v4103_v2, %v5143_v59  ;;  %v3021_v32 = vmax.f32 %v2989_v58, 0.0 }
 0x1ef   : > { %v2988_v36 = vadd.f32 %v4104_v45, %v5143_v59  ;;  %v3019_v57 = vmax.f32 %v2987_v8, 0.0 }
 0x1f0   : > { %v3022_v4 = vmax.f32 %v2990_v51, 0.0 }
 0x1f1   : > { %v3020_v60 = vmax.f32 %v2988_v36, 0.0  ;;  %v3937_v53 = vpop.f32.mrb[20].mxu1  ;;  %v4073_v24 = vpop.f32.mrb[20].mxu0 }
 0x1f2   : > { %v3577_v41 = vpack.c.bf16 %v3022_v4, %v3021_v32  ;;  %v4105_v37 = vadd.f32 %v4073_v24, %v3937_v53  ;;  %v1708_v42 = vpop.f32.mrb[21].mxu1  ;;  %v2886_v39 = vpop.f32.mrb[21].mxu0 }
 0x1f3   : > { %v3572_v5 = vpack.c.bf16 %v3020_v60, %v3019_v57  ;;  %v4106_v11 = vadd.f32 %v2886_v39, %v1708_v42  ;;  %v3938_v40 = vpop.f32.mrb[22].mxu1  ;;  %v4074_v50 = vpop.f32.mrb[22].mxu0 }
 0x1f4   : > { %3617 = vst [vmem:[%s5153_s27 + $0x48] sm:$0xff] %v3577_v41   ;;  %v2993_v54 = vadd.f32 %v4105_v37, %v5143_v59  ;;  %v4107_v52 = vadd.f32 %v4074_v50, %v3938_v40  ;;  %v1711_v10 = vpop.f32.mrb[23].mxu1  ;;  %v2889_v13 = vpop.f32.mrb[23].mxu0 }
 0x1f5   : > { %3616 = vst [vmem:[%s5153_s27 + $0x40] sm:$0xff] %v3572_v5   ;;  %v2991_v22 = vadd.f32 %v4106_v11, %v5143_v59  ;;  %v4108_v25 = vadd.f32 %v2889_v13, %v1711_v10 }
 0x1f6   : > { %v2994_v14 = vadd.f32 %v4107_v52, %v5143_v59  ;;  %v3025_v20 = vmax.f32 %v2993_v54, 0.0 }
 0x1f7   : > { %v2992_v15 = vadd.f32 %v4108_v25, %v5143_v59  ;;  %v3023_v30 = vmax.f32 %v2991_v22, 0.0 }
 0x1f8   : > { %v3026_v21 = vmax.f32 %v2994_v14, 0.0 }
 0x1f9   : > { %v3024_v6 = vmax.f32 %v2992_v15, 0.0  ;;  %v3941_v7 = vpop.f32.mrb[24].mxu1  ;;  %v4077_v16 = vpop.f32.mrb[24].mxu0 }
 0x1fa   : > { %v3587_v27 = vpack.c.bf16 %v3026_v21, %v3025_v20  ;;  %v4109_v19 = vadd.f32 %v4077_v16, %v3941_v7  ;;  %v1724_v31 = vpop.f32.mrb[25].mxu1  ;;  %v2902_v33 = vpop.f32.mrb[25].mxu0 }
 0x1fb   : > { %v3582_v28 = vpack.c.bf16 %v3024_v6, %v3023_v30  ;;  %v4110_v44 = vadd.f32 %v2902_v33, %v1724_v31  ;;  %v3942_v29 = vpop.f32.mrb[26].mxu1  ;;  %v4078_v47 = vpop.f32.mrb[26].mxu0 }
 0x1fc   : > { %3619 = vst [vmem:[%s5153_s27 + $0x58] sm:$0xff] %v3587_v27   ;;  %v2997_v48 = vadd.f32 %v4109_v19, %v5143_v59  ;;  %v4111_v18 = vadd.f32 %v4078_v47, %v3942_v29  ;;  %v1727_v26 = vpop.f32.mrb[27].mxu1  ;;  %v2905_v1 = vpop.f32.mrb[27].mxu0 }
 0x1fd   : > { %3618 = vst [vmem:[%s5153_s27 + $0x50] sm:$0xff] %v3582_v28   ;;  %v2995_v9 = vadd.f32 %v4110_v44, %v5143_v59  ;;  %v4112_v34 = vadd.f32 %v2905_v1, %v1727_v26 }
 0x1fe   : > { %v2998_v62 = vadd.f32 %v4111_v18, %v5143_v59  ;;  %v3029_v63 = vmax.f32 %v2997_v48, 0.0 }
 0x1ff   : > { %v2996_v17 = vadd.f32 %v4112_v34, %v5143_v59  ;;  %v3027_v46 = vmax.f32 %v2995_v9, 0.0 }
 0x200   : > { %v3030_v61 = vmax.f32 %v2998_v62, 0.0 }
 0x201   : > { %v3028_v35 = vmax.f32 %v2996_v17, 0.0  ;;  %v3945_v0 = vpop.f32.mrb[28].mxu1  ;;  %v4081_v38 = vpop.f32.mrb[28].mxu0 }
 0x202   : > { %v3597_v55 = vpack.c.bf16 %v3030_v61, %v3029_v63  ;;  %v4113_v12 = vadd.f32 %v4081_v38, %v3945_v0  ;;  %v1740_v56 = vpop.f32.mrb[29].mxu1  ;;  %v2918_v43 = vpop.f32.mrb[29].mxu0 }
 0x203   : > { %v3592_v23 = vpack.c.bf16 %v3028_v35, %v3027_v46  ;;  %v4114_v58 = vadd.f32 %v2918_v43, %v1740_v56  ;;  %v3946_v2 = vpop.f32.mrb[30].mxu1  ;;  %v4082_v49 = vpop.f32.mrb[30].mxu0 }
 0x204   : > { %3621 = vst [vmem:[%s5153_s27 + $0x68] sm:$0xff] %v3597_v55   ;;  %v3001_v3 = vadd.f32 %v4113_v12, %v5143_v59  ;;  %v4115_v8 = vadd.f32 %v4082_v49, %v3946_v2  ;;  %v1743_v45 = vpop.f32.mrb[31].mxu1  ;;  %v2921_v51 = vpop.f32.mrb[31].mxu0 }
 0x205   : > { %3620 = vst [vmem:[%s5153_s27 + $0x60] sm:$0xff] %v3592_v23   ;;  %v2999_v36 = vadd.f32 %v4114_v58, %v5143_v59  ;;  %v4116_v32 = vadd.f32 %v2921_v51, %v1743_v45 }
 0x206   : > { %v3002_v4 = vadd.f32 %v4115_v8, %v5143_v59  ;;  %v3033_v60 = vmax.f32 %v3001_v3, 0.0 }
 0x207   : > { %v3000_v57 = vadd.f32 %v4116_v32, %v5143_v59  ;;  %v3031_v24 = vmax.f32 %v2999_v36, 0.0 }
 0x208   : > { %v3034_v53 = vmax.f32 %v3002_v4, 0.0 }
 0x209   : > { %v3032_v41 = vmax.f32 %v3000_v57, 0.0 }
 0x20a   : > { %v3607_v37 = vpack.c.bf16 %v3034_v53, %v3033_v60 }
 0x20b   : > { %v3602_v42 = vpack.c.bf16 %v3032_v41, %v3031_v24 }
 0x20c   : > { %3623 = vst [vmem:[%s5153_s27 + $0x78] sm:$0xff] %v3607_v37  }
 0x20d   : > { %3622 = vst [vmem:[%s5153_s27 + $0x70] sm:$0xff] %v3602_v42  }
 0x20e PF: > { %s14_s15 = sadd.s32 1, %s4391_s15  }
 0x20f   : > { %p11_p6 = scmp.ge.s32.totalorder %s14_s15, 9  }
 0x211   :  { %13 = sbr.rel (!%p11_p6) target bundleno = 1 (0x1), region = 77 }

// kernel: _lambda_.9
= control target key start
LH: loop header
LB: loop body
LE: loop exit
PB: predicated region body
PF: predicated region fallthrough
CT: control target
= control target key end

     0   :  { %s3010_s27 = smov 0   ;;  %s3639_s0 = inlined_call_operand.vmem [shape: bf16[1024,24], index: 0, kind: input, shape index: {}, may-alias: {0,1}]   ;;  %s3640_s1 = inlined_call_operand.vmem [shape: bf16[1024,24], index: 1, kind: input, shape index: {}, may-alias: {0,1}]   ;;  %s3641_s2 = inlined_call_operand.vmem [shape: bf16[4,24,96], index: 2, kind: input, shape index: {}]   ;;  %s3642_s3 = inlined_call_operand.vmem [shape: f32[1,96], index: 3, kind: input, shape index: {}]   ;;  %s3643_s4 = inlined_call_operand.vmem [shape: bf16[96,48], index: 4, kind: input, shape index: {}]   ;;  %s3644_s5 = inlined_call_operand.vmem [shape: f32[1,48], index: 5, kind: input, shape index: {}]   ;;  %s3645_s6 = inlined_call_operand.vmem [shape: bf16[48,128], index: 6, kind: input, shape index: {}]   ;;  %s3646_s7 = inlined_call_operand.vmem [shape: f32[1,128], index: 7, kind: input, shape index: {}]   ;;  %s3647_s8 = inlined_call_operand.vmem [shape: f32[768,128], index: 8, kind: output, shape index: {}]  }
   0x1 LB: > { %s2317_s28 = sadd.s32 4294967295, %s2963_s27   ;;  %p2321_p0 = scmp.ge.s32.totalorder %s2963_s27, 1  ;;  %s2963_s27 = sphi %s3010_s27, %s18_s27  }
   0x2   : > { %p278_p1 = scmp.lt.s32.totalorder %s2963_s27, 4 }
   0x4   : > { %p279_p2 = pnand %p2321_p0, %p278_p1 }
   0x5   : > { %v2922_v0 = vld [vmem:[%s3641_s2] sm:$0xff] (!%p279_p2)   ;;  %vm664_vm0 = vcmask (!%p279_p2), 1043456   ;;  %v2923_v1 = vld [vmem:[%s3641_s2 + $0x8] ss:$0 sps:$4 sm:$0xff] (!%p279_p2)   ;;  %s3024_s11 = sshll.u32 (!%p279_p2), %s2317_s28, 5  ;;  %v2926_v3 = vld [vmem:[%s3641_s2 + $0x18] sm:$0xff] (!%p279_p2)  }
   0x6   : > { %282 = sbr.rel (%p279_p2) target bundleno = 869 (0x365), region = 52  ;;  %2624 = vmatprep.subr.bf16.mxu0 (!%p279_p2), %v2922_v0  ;;  %p319_p3 = scmp.lt.s32.totalorder (!%p279_p2), %s3024_s11, 127  ;;  %v871_v2 = vsel (!%p279_p2), %vm664_vm0, %v2923_v1, 0  ;;  %v2944_v4 = vld [vmem:[%s3641_s2 + $0xc] sm:$0xff] (!%p279_p2)   ;;  %vm615_vm1 = vcmask (!%p279_p2), 195584   ;;  %v3067_v11 = vld [vmem:[%s3641_s2 + $0x24] sm:$0xff] (!%p279_p2)  }
   0x7   : > { %2625 = vmatpush3.bf16.msra.mxu0 (!%p279_p2), %v2922_v0  ;;  %2588 = vmatprep.subr.bf16.mxu1 (!%p279_p2), %v2944_v4  ;;  %v2935_v5 = vld [vmem:[%s3641_s2 + $0x20] ss:$0 sps:$4 sm:$0xff] (!%p279_p2)   ;;  %v2947_v6 = vld [vmem:[%s3641_s2 + $0x14] ss:$0 sps:$4 sm:$0xff] (!%p279_p2)   ;;  %s2474_s28 = sadd.s32 (!%p279_p2), 32, %s3024_s11  ;;  %vm1258_vm3 = vcmask (!%p279_p2), 1046528  }
   0x8   : > { %2911 = vmatprep.subr.msk.bf16.mxu0 (!%p279_p2), %vm664_vm0, %v2923_v1  ;;  %2589 = vmatpush3.bf16.msra.mxu1 (!%p279_p2), %v2944_v4  ;;  %v666_v10 = vsel (!%p279_p2), %vm664_vm0, %v2947_v6, 0  ;;  %v1059_v12 = vsel (!%p279_p2), %vm664_vm0, %v2935_v5, 0  ;;  %p326_p4 = scmp.lt.s32.totalorder (!%p279_p2), %s2474_s28, 127  ;;  %vm473_vm2 = vsmask.f32 (!%p279_p2), 7424  ;;  %vm1686_vm4 = vcmask (!%p279_p2), 785408  }
   0x9   : > { %2910 = vmatprep.subr.msk.bf16.mxu1 (!%p279_p2), %vm664_vm0, %v2947_v6  ;;  %vm1975_vm5 = vcmask (!%p279_p2), 392192   ;;  %p333_p5 = scmp.lt.s32.totalorder (!%p279_p2), %s3024_s11, 95 }
   0xb   : > { %2627 = vmatpush3.bf16.msra.mxu0 (!%p279_p2), %v871_v2 }
   0xc   : > { %2660 = vmatprep.subr.bf16.mxu0 (!%p279_p2), %v2926_v3  ;;  %2591 = vmatpush3.bf16.msra.mxu1 (!%p279_p2), %v666_v10 }
   0xd   : > { %s320_s12 = scalar_select %p319_p3, %s3024_s11, 127 }
   0xe   : > { %s3649_s28 = smov (!%p326_p4, %s2474_s28), 127  ;;  %s3651_s11 = smov (!%p333_p5, %s3024_s11), 95 }
   0xf   : > { %s2323_s17 = sshll.u32 %s320_s12, 2  ;;  %s2325_s29 = sshll.u32 %s3649_s28, 2 }
  0x10   : > { %s3039_s20 = scalar_lea.vmem %s3639_s0, %s2323_s17  ;;  %s329_s10 = scalar_lea.vmem %s3640_s1, %s2325_s29 }
  0x11   : > { %v3048_v7 = vld [vmem:[%s3039_s20] sm:$0xff]   ;;  %v3051_v8 = vld [vmem:[%s3039_s20 + $0x8] sm:$0xff]   ;;  %v3057_v9 = vld [vmem:[%s3039_s20 + $0x10] sm:$0xff]   ;;  %s2327_s18 = sshll.u32 %s3651_s11, 3 }
  0x12   : > { %2628 = vmatprep.mubr.msk.bf16.mxu0 %vm615_vm1, %v3048_v7  ;;  %v3073_v13 = vld [vmem:[%s3039_s20 + $0x18] sm:$0xff]   ;;  %v3076_v14 = vld [vmem:[%s3039_s20 + $0x20] sm:$0xff]   ;;  %v3084_v15 = vld [vmem:[%s3039_s20 + $0x28] sm:$0xff]   ;;  %v482_v17 = vshll.u32 %v3051_v8, 16  ;;  %v490_v18 = vshll.u32 %v3057_v9, 16  ;;  %v486_v19 = vshrl.u32 %v3051_v8, 16  ;;  %s3571_s21 = scalar_lea.vmem %s3647_s8, %s2327_s18 }
  0x13   : > { %2629 = vmatmul.mubr.msk.bf16.vlgmr.msra.gmra.mrb[0].mxu0 %vm615_vm1, %v3051_v8  ;;  %v3087_v16 = vld [vmem:[%s3039_s20 + $0x30] sm:$0xff]   ;;  %v3100_v20 = vld [vmem:[%s3039_s20 + $0x38] sm:$0xff]   ;;  %v3103_v22 = vld [vmem:[%s3039_s20 + $0x40] sm:$0xff]   ;;  %v494_v24 = vshrl.u32 %v3057_v9, 16  ;;  %v498_v25 = vshll.u32 %v3073_v13, 16  ;;  %v502_v31 = vshrl.u32 %v3073_v13, 16 }
  0x14   : > { %2661 = vmatpush3.bf16.msra.mxu0 %v2926_v3  ;;  %2632 = vmatprep.mubr.msk.bf16.mxu0 %vm615_vm1, %v3057_v9  ;;  %v484_v21 = vrot.slane %v482_v17, 1  ;;  %v492_v23 = vrot.slane %v490_v18, 1  ;;  %v3107_v26 = vld [vmem:[%s329_s10] sm:$0xff]   ;;  %v3109_v27 = vld [vmem:[%s329_s10 + $0x8] sm:$0xff]   ;;  %v475_v35 = vshrl.u32 %v3048_v7, 16  ;;  %v477_v38 = vshll.u32 %v3048_v7, 16 }
  0x15   : > { %2912 = vmatprep.subr.msk.bf16.mxu0 %vm664_vm0, %v2935_v5  ;;  %v500_v30 = vrot.slane %v498_v25, 1  ;;  %v602_v32 = vshll.u32 %v3107_v26, 16  ;;  %v1038_v33 = vshrl.u32 %v3107_v26, 16  ;;  %v1042_v34 = vshll.u32 %v3109_v27, 16  ;;  %v3127_v39 = vld [vmem:[%s3039_s20 + $0x48] sm:$0xff]   ;;  %v3135_v44 = vld [vmem:[%s3039_s20 + $0x50] sm:$0xff]  }
  0x16   : > { %v488_v28 = vor.u32 %v486_v19, %v484_v21  ;;  %v496_v29 = vor.u32 %v494_v24, %v492_v23  ;;  %v506_v41 = vshll.u32 %v3076_v14, 16  ;;  %v1259_v43 = vrot.slane %v3051_v8, 1  ;;  %v3151_v56 = vld [vmem:[%s3039_s20 + $0x58] sm:$0xff]   ;;  %v3154_v57 = vld [vmem:[%s3039_s20 + $0x60] sm:$0xff]   ;;  %v3171_v62 = vld [vmem:[%s3039_s20 + $0x68] sm:$0xff]  }
  0x17   : > { %v3123_v37 = vrot.slane %v602_v32, 1  ;;  %v1044_v42 = vrot.slane %v1042_v34, 1  ;;  %v510_v45 = vshrl.u32 %v3076_v14, 16  ;;  %v479_v47 = vrot.slane %v477_v38, 1  ;;  %v3211_v19 = vld [vmem:[%s3039_s20 + $0x70] sm:$0xff]  }
  0x18   : > { %2663 = vmatpush3.bf16.msra.mxu0 %v1059_v12  ;;  %v3121_v36 = vsel %vm473_vm2, %v488_v28, %v492_v23  ;;  %v3130_v40 = vsel %vm473_vm2, %v496_v29, %v500_v30  ;;  %v1260_v48 = vrot.slane %v3057_v9, 1  ;;  %v1262_v49 = vrot.slane %v3073_v13, 1  ;;  %v3214_v23 = vld [vmem:[%s3039_s20 + $0x78] sm:$0xff]  }
  0x19   : > { %2696 = vmatprep.subr.bf16.mxu0 %v3067_v11  ;;  %v1040_v46 = vor.u32 %v1038_v33, %v3123_v37  ;;  %v1264_v50 = vrot.slane %v3076_v14, 1  ;;  %v1266_v51 = vrot.slane %v3084_v15, 1  ;;  %v480_v53 = vor.u32 %v479_v47, %v475_v35 }
  0x1a   : > { %v1268_v54 = vrot.slane %v3087_v16, 1  ;;  %v1270_v55 = vrot.slane %v3100_v20, 1  ;;  %v3157_v58 = vsel %vm1258_vm3, %v1259_v43, %v1260_v48  ;;  %v3160_v59 = vsel %vm1258_vm3, %v1260_v48, %v1262_v49 }
  0x1b   : > { %2633 = vmatmul.mubr.msk.bf16.gmra.mrb[4].mxu0 %vm615_vm1, %v3073_v13  ;;  %v3144_v52 = vsel %vm473_vm2, %v1040_v46, %v1044_v42  ;;  %v3163_v60 = vsel %vm1258_vm3, %v1262_v49, %v1264_v50  ;;  %v3166_v61 = vsel %vm1258_vm3, %v1264_v50, %v1266_v51  ;;  %v485_v63 = vsel %vm473_vm2, %v480_v53, %v484_v21 }
  0x1c   : > { %2636 = vmatprep.mubr.msk.bf16.mxu0 %vm615_vm1, %v3076_v14  ;;  %v3175_v0 = vsel %vm1258_vm3, %v1266_v51, %v1268_v54  ;;  %v3178_v1 = vsel %vm1258_vm3, %v1268_v54, %v1270_v55  ;;  %v1272_v2 = vrot.slane %v3103_v22, 1  ;;  %2592 = vmatprep.mubr.msk.bf16.mxu1 %vm615_vm1, %v485_v63  ;;  %v1274_v3 = vrot.slane %v3127_v39, 1 }
  0x1d   : > { %v1276_v4 = vrot.slane %v3135_v44, 1  ;;  %v1278_v5 = vrot.slane %v3151_v56, 1  ;;  %v1280_v6 = vrot.slane %v3154_v57, 1  ;;  %v508_v7 = vrot.slane %v506_v41, 1  ;;  %2593 = vmatmul.mubr.msk.bf16.vlgmr.msra.gmra.mrb[0].mxu1 %vm615_vm1, %v3121_v36 }
  0x1e   : > { %v514_v8 = vshll.u32 %v3084_v15, 16  ;;  %v3190_v9 = vsel %vm1258_vm3, %v1270_v55, %v1272_v2  ;;  %v1282_v10 = vrot.slane %v3171_v62, 1  ;;  %2596 = vmatprep.mubr.msk.bf16.mxu1 %vm615_vm1, %v3130_v40  ;;  %v3196_v12 = vsel %vm1258_vm3, %v1272_v2, %v1274_v3  ;;  %v2948_v2 = vld [vmem:[%s3643_s4] sm:$0xff]  }
  0x1f   : > { %v3199_v13 = vsel %vm1258_vm3, %v1274_v3, %v1276_v4  ;;  %v3202_v14 = vsel %vm1258_vm3, %v1276_v4, %v1278_v5  ;;  %v3205_v17 = vsel %vm1258_vm3, %v1278_v5, %v1280_v6  ;;  %v504_v21 = vor.u32 %v502_v31, %v500_v30  ;;  %v2949_v3 = vld [vmem:[%s3643_s4 + $0x8] sm:$0xff]   ;;  %2732 = vmatprep.subr.bf16.mxu1 %v2948_v2 }
  0x20   : > { %v3208_v18 = vsel %vm1258_vm3, %v1280_v6, %v1282_v10  ;;  %v512_v24 = vor.u32 %v510_v45, %v508_v7  ;;  %v516_v25 = vrot.slane %v514_v8, 1  ;;  %v522_v28 = vshll.u32 %v3087_v16, 16  ;;  %2733 = vmatpush3.bf16.msra.mxu1 %v2948_v2 }
  0x21   : > { %v1284_v29 = vrot.slane %v3211_v19, 1  ;;  %v1286_v32 = vrot.slane %v3214_v23, 1  ;;  %v509_v33 = vsel %vm473_vm2, %v504_v21, %v508_v7  ;;  %v518_v30 = vshrl.u32 %v3084_v15, 16  ;;  %2734 = vmatprep.subr.bf16.mxu1 %v2949_v3  ;;  %v2943_v21 = vld [vmem:[%s3641_s2 + $0x2c] ss:$0 sps:$4 sm:$0xff]  }
  0x22   : > { %v526_v31 = vshrl.u32 %v3087_v16, 16  ;;  %v3230_v35 = vsel %vm473_vm2, %v512_v24, %v516_v25  ;;  %v524_v38 = vrot.slane %v522_v28, 1  ;;  %v530_v41 = vshll.u32 %v3100_v20, 16  ;;  %v2951_v28 = vld [vmem:[%s3643_s4 + $0x18] sm:$0xff]  }
  0x23   : > { %2637 = vmatmul.mubr.msk.bf16.gmra.mrb[8].mxu0 %vm615_vm1, %v3084_v15  ;;  %v3227_v34 = vsel %vm1258_vm3, %v1282_v10, %v1284_v29  ;;  %v3235_v42 = vsel %vm1258_vm3, %v1284_v29, %v1286_v32  ;;  %v520_v15 = vor.u32 %v518_v30, %v516_v25  ;;  %v538_v45 = vshll.u32 %v3103_v22, 16 }
  0x24   : > { %2640 = vmatprep.mubr.msk.bf16.mxu0 %vm615_vm1, %v3087_v16  ;;  %v528_v43 = vor.u32 %v526_v31, %v524_v38  ;;  %v532_v16 = vrot.slane %v530_v41, 1  ;;  %v1288_v46 = vrot.slane %v3107_v26, 1  ;;  %v1290_v47 = vrot.slane %v3109_v27, 1  ;;  %2735 = vmatpush3.bf16.msra.mxu1 %v2949_v3 }
  0x25   : > { %2597 = vmatmul.mubr.msk.bf16.gmra.mrb[4].mxu1 %vm615_vm1, %v509_v33  ;;  %v525_v48 = vsel %vm473_vm2, %v520_v15, %v524_v38  ;;  %v534_v49 = vshrl.u32 %v3100_v20, 16  ;;  %v542_v50 = vshrl.u32 %v3103_v22, 16  ;;  %v540_v54 = vrot.slane %v538_v45, 1  ;;  %v2952_v38 = vld [vmem:[%s3643_s4 + $0x20] sm:$0xff]  }
  0x26   : > { %2600 = vmatprep.mubr.msk.bf16.mxu1 %vm615_vm1, %v3230_v35  ;;  %v3250_v51 = vsel %vm1258_vm3, %v1286_v32, %v1288_v46  ;;  %v3253_v53 = vsel %vm473_vm2, %v528_v43, %v532_v16  ;;  %v546_v26 = vshll.u32 %v3127_v39, 16  ;;  %v3258_v55 = vsel %vm1258_vm3, %v1288_v46, %v1290_v47 }
  0x27   : > { %v544_v27 = vor.u32 %v542_v50, %v540_v54  ;;  %v554_v63 = vshll.u32 %v3135_v44, 16  ;;  %v550_v5 = vshrl.u32 %v3127_v39, 16  ;;  %v558_v8 = vshrl.u32 %v3135_v44, 16 }
  0x28   : > { %v562_v10 = vshll.u32 %v3151_v56, 16  ;;  %v1350_v32 = vsel %vm664_vm0, %v2943_v21, 0  ;;  %v566_v30 = vshrl.u32 %v3151_v56, 16  ;;  %v586_v43 = vshll.u32 %v3211_v19, 16 }
  0x29   : > { %v556_v7 = vrot.slane %v554_v63, 1  ;;  %v590_v47 = vshrl.u32 %v3211_v19, 16 }
  0x2a   : > { %v564_v25 = vrot.slane %v562_v10, 1  ;;  %v588_v46 = vrot.slane %v586_v43, 1 }
  0x2b   : > { %2641 = vmatmul.mubr.msk.bf16.gmra.mrb[12].mxu0 %vm615_vm1, %v3100_v20  ;;  %v536_v20 = vor.u32 %v534_v49, %v532_v16  ;;  %v560_v24 = vor.u32 %v558_v8, %v556_v7  ;;  %v582_v16 = vshrl.u32 %v3171_v62, 16  ;;  %v594_v49 = vshll.u32 %v3214_v23, 16 }
  0x2c   : > { %2644 = vmatprep.mubr.msk.bf16.mxu0 %vm615_vm1, %v3103_v22  ;;  %v548_v22 = vrot.slane %v546_v26, 1  ;;  %v592_v50 = vor.u32 %v590_v47, %v588_v46 }
  0x2d   : > { %2601 = vmatmul.mubr.msk.bf16.gmra.mrb[8].mxu1 %vm615_vm1, %v525_v48  ;;  %v541_v4 = vsel %vm473_vm2, %v536_v20, %v540_v54  ;;  %v598_v54 = vshrl.u32 %v3214_v23, 16 }
  0x2e   : > { %2604 = vmatprep.mubr.msk.bf16.mxu1 %vm615_vm1, %v3253_v53  ;;  %v549_v6 = vsel %vm473_vm2, %v544_v27, %v548_v22  ;;  %v2954_v27 = vld [vmem:[%s3645_s6] sm:$0xff]  }
  0x33   : > { %2645 = vmatmul.mubr.msk.bf16.gmra.mrb[16].mxu0 %vm615_vm1, %v3127_v39  ;;  %v2950_v39 = vld [vmem:[%s3643_s4 + $0x10] sm:$0xff]  }
  0x34   : > { %2648 = vmatprep.mubr.msk.bf16.mxu0 %vm615_vm1, %v3135_v44  ;;  %v570_v44 = vshll.u32 %v3154_v57, 16  ;;  %2736 = vmatprep.subr.bf16.mxu1 %v2950_v39 }
  0x35   : > { %2605 = vmatmul.mubr.msk.bf16.gmra.mrb[12].mxu1 %vm615_vm1, %v541_v4 }
  0x36   : > { %2608 = vmatprep.mubr.msk.bf16.mxu1 %vm615_vm1, %v549_v6  ;;  %v572_v31 = vrot.slane %v570_v44, 1  ;;  %2737 = vmatpush3.bf16.msra.mxu1 %v2950_v39 }
  0x37   : > { %2738 = vmatprep.subr.bf16.mxu1 %v2951_v28 }
  0x3a   : > { %2739 = vmatpush3.bf16.msra.mxu1 %v2951_v28 }
  0x3b   : > { %2649 = vmatmul.mubr.msk.bf16.gmra.mrb[20].mxu0 %vm615_vm1, %v3151_v56  ;;  %v568_v56 = vor.u32 %v566_v30, %v564_v25  ;;  %2740 = vmatprep.subr.bf16.mxu1 %v2952_v38 }
  0x3c   : > { %2652 = vmatprep.mubr.msk.bf16.mxu0 %vm615_vm1, %v3154_v57 }
  0x3e   : > { %2741 = vmatpush3.bf16.msra.mxu1 %v2952_v38 }
  0x43   : > { %2653 = vmatmul.mubr.msk.bf16.gmra.mrb[24].mxu0 %vm615_vm1, %v3171_v62 }
  0x44   : > { %2656 = vmatprep.mubr.msk.bf16.mxu0 %vm615_vm1, %v3211_v19 }
  0x4b   : > { %2657 = vmatmul.mubr.msk.bf16.gmra.mrb[28].mxu0 %vm615_vm1, %v3214_v23 }
  0x4c   : > { %2664 = vmatprep.mubr.msk.bf16.mxu0 %vm615_vm1, %v3121_v36  ;;  %v552_v36 = vor.u32 %v550_v5, %v548_v22 }
  0x4e   : > { %v557_v29 = vsel %vm473_vm2, %v552_v36, %v556_v7 }
  0x4f   : > { %2609 = vmatmul.mubr.msk.bf16.gmra.mrb[16].mxu1 %vm615_vm1, %v557_v29 }
  0x53   : > { %2665 = vmatmul.mubr.msk.bf16.vlgmr.msra.gmra.mrb[0].mxu0 %vm615_vm1, %v3130_v40  ;;  %v565_v40 = vsel %vm473_vm2, %v560_v24, %v564_v25  ;;  %v3427_v24 = vld [vmem:[%s3642_s3] ss:$0 sm:$0xff] }
  0x54   : > { %2697 = vmatpush3.bf16.msra.mxu0 %v3067_v11  ;;  %2668 = vmatprep.mubr.msk.bf16.mxu0 %vm615_vm1, %v509_v33  ;;  %v574_v11 = vshrl.u32 %v3154_v57, 16  ;;  %v578_v33 = vshll.u32 %v3171_v62, 16  ;;  %v573_v57 = vsel %vm473_vm2, %v568_v56, %v572_v31 }
  0x55   : > { %2913 = vmatprep.subr.msk.bf16.mxu0 %vm664_vm0, %v2943_v21  ;;  %2612 = vmatprep.mubr.msk.bf16.mxu1 %vm615_vm1, %v565_v40 }
  0x56   : > { %v576_v41 = vor.u32 %v574_v11, %v572_v31  ;;  %v580_v15 = vrot.slane %v578_v33, 1 }
  0x57   : > { %2613 = vmatmul.mubr.msk.bf16.gmra.mrb[20].mxu1 %vm615_vm1, %v573_v57 }
  0x58   : > { %2699 = vmatpush3.bf16.msra.mxu0 %v1350_v32  ;;  %v581_v45 = vsel %vm473_vm2, %v576_v41, %v580_v15 }
  0x59   : > { %2616 = vmatprep.mubr.msk.bf16.mxu1 %vm615_vm1, %v581_v45 }
  0x5b   : > { %2669 = vmatmul.mubr.msk.bf16.gmra.mrb[4].mxu0 %vm615_vm1, %v3230_v35  ;;  %v584_v35 = vor.u32 %v582_v16, %v580_v15 }
  0x5c   : > { %2672 = vmatprep.mubr.msk.bf16.mxu0 %vm615_vm1, %v525_v48  ;;  %v596_v48 = vrot.slane %v594_v49, 1 }
  0x5d   : > { %v589_v62 = vsel %vm473_vm2, %v584_v35, %v588_v46 }
  0x5e   : > { %v597_v19 = vsel %vm473_vm2, %v592_v50, %v596_v48  ;;  %v600_v26 = vor.u32 %v598_v54, %v596_v48 }
  0x5f   : > { %2617 = vmatmul.mubr.msk.bf16.gmra.mrb[24].mxu1 %vm615_vm1, %v589_v62 }
  0x60   : > { %2620 = vmatprep.mubr.msk.bf16.mxu1 %vm615_vm1, %v597_v19 }
  0x63   : > { %2673 = vmatmul.mubr.msk.bf16.gmra.mrb[8].mxu0 %vm615_vm1, %v3253_v53  ;;  %v605_v53 = vsel %vm473_vm2, %v600_v26, %v3123_v37  ;;  %v2953_v37 = vld [vmem:[%s3643_s4 + $0x28] sm:$0xff]  }
  0x64   : > { %2676 = vmatprep.mubr.msk.bf16.mxu0 %vm615_vm1, %v541_v4  ;;  %2742 = vmatprep.subr.bf16.mxu1 %v2953_v37 }
  0x65   : > { %2743 = vmatpush3.bf16.msra.mxu1 %v2953_v37 }
  0x66   : > { %2776 = vmatprep.subr.bf16.mxu1 %v2954_v27 }
  0x67   : > { %2621 = vmatmul.mubr.msk.bf16.gmra.mrb[28].mxu1 %vm615_vm1, %v605_v53 }
  0x6b   : > { %2677 = vmatmul.mubr.msk.bf16.gmra.mrb[12].mxu0 %vm615_vm1, %v549_v6 }
  0x6c   : > { %2680 = vmatprep.mubr.msk.bf16.mxu0 %vm615_vm1, %v557_v29 }
  0x73   : > { %2681 = vmatmul.mubr.msk.bf16.gmra.mrb[16].mxu0 %vm615_vm1, %v565_v40 }
  0x74   : > { %2684 = vmatprep.mubr.msk.bf16.mxu0 %vm615_vm1, %v573_v57 }
  0x7b   : > { %2685 = vmatmul.mubr.msk.bf16.gmra.mrb[20].mxu0 %vm615_vm1, %v581_v45 }
  0x7c   : > { %2688 = vmatprep.mubr.msk.bf16.mxu0 %vm615_vm1, %v589_v62 }
  0x83   : > { %2689 = vmatmul.mubr.msk.bf16.gmra.mrb[24].mxu0 %vm615_vm1, %v597_v19  ;;  %v2955_v19 = vld [vmem:[%s3645_s6 + $0x8] sm:$0xff]  }
  0x84   : > { %2692 = vmatprep.mubr.msk.bf16.mxu0 %vm615_vm1, %v605_v53 }
  0x8b   : > { %2693 = vmatmul.mubr.msk.bf16.gmra.mrb[28].mxu0 %vm615_vm1, %v3144_v52 }
  0x8c   : > { %2700 = vmatprep.mubr.msk.bf16.mxu0 %vm615_vm1, %v3157_v58 }
  0x93   : > { %2701 = vmatmul.mubr.msk.bf16.vlgmr.msra.gmra.mrb[0].mxu0 %vm615_vm1, %v3160_v59 }
  0x94   : > { %2704 = vmatprep.mubr.msk.bf16.mxu0 %vm615_vm1, %v3163_v60 }
  0x9b   : > { %2705 = vmatmul.mubr.msk.bf16.gmra.mrb[4].mxu0 %vm615_vm1, %v3166_v61 }
  0x9c   : > { %2708 = vmatprep.mubr.msk.bf16.mxu0 %vm615_vm1, %v3175_v0 }
  0xa3   : > { %2709 = vmatmul.mubr.msk.bf16.gmra.mrb[8].mxu0 %vm615_vm1, %v3178_v1 }
  0xa4   : > { %2712 = vmatprep.mubr.msk.bf16.mxu0 %vm615_vm1, %v3190_v9 }
  0xab   : > { %2713 = vmatmul.mubr.msk.bf16.gmra.mrb[12].mxu0 %vm615_vm1, %v3196_v12 }
  0xac   : > { %2716 = vmatprep.mubr.msk.bf16.mxu0 %vm615_vm1, %v3199_v13 }
  0xb3   : > { %2717 = vmatmul.mubr.msk.bf16.gmra.mrb[16].mxu0 %vm615_vm1, %v3202_v14 }
  0xb4   : > { %2720 = vmatprep.mubr.msk.bf16.mxu0 %vm615_vm1, %v3205_v17 }
  0xbb   : > { %2721 = vmatmul.mubr.msk.bf16.gmra.mrb[20].mxu0 %vm615_vm1, %v3208_v18 }
  0xbc   : > { %2724 = vmatprep.mubr.msk.bf16.mxu0 %vm615_vm1, %v3227_v34 }
  0xc3   : > { %2725 = vmatmul.mubr.msk.bf16.gmra.mrb[24].mxu0 %vm615_vm1, %v3235_v42 }
  0xc4   : > { %2728 = vmatprep.mubr.msk.bf16.mxu0 %vm615_vm1, %v3250_v51 }
  0xcb   : > { %2729 = vmatmul.mubr.msk.bf16.gmra.mrb[28].mxu0 %vm615_vm1, %v3258_v55 }
  0xf0   : > { %v2594_v52 = vpop.f32.mrb[0].mxu1 }
  0xf1   : > { %v702_v58 = vpop.f32.mrb[1].mxu1 }
  0xf2   : > { %v2595_v59 = vpop.f32.mrb[2].mxu1 }
  0xf3   : > { %v705_v60 = vpop.f32.mrb[3].mxu1 }
  0xf8   : > { %v2598_v61 = vpop.f32.mrb[4].mxu1 }
  0xf9   : > { %v718_v0 = vpop.f32.mrb[5].mxu1 }
  0xfa   : > { %v2599_v1 = vpop.f32.mrb[6].mxu1 }
  0xfb   : > { %v721_v9 = vpop.f32.mrb[7].mxu1 }
 0x100   : > { %v3373_v12 = vpop.f32.mrb[8].mxu1 }
 0x101   : > { %v3375_v13 = vpop.f32.mrb[9].mxu1 }
 0x102   : > { %v3377_v14 = vpop.f32.mrb[10].mxu1 }
 0x103   : > { %v3379_v17 = vpop.f32.mrb[11].mxu1 }
 0x108   : > { %v3381_v18 = vpop.f32.mrb[12].mxu1 }
 0x109   : > { %v3383_v23 = vpop.f32.mrb[13].mxu1 }
 0x10a   : > { %v3385_v34 = vpop.f32.mrb[14].mxu1 }
 0x10b   : > { %v3387_v42 = vpop.f32.mrb[15].mxu1 }
 0x122   : > { %v3389_v51 = vpop.f32.mrb[16].mxu1 }
 0x123   : > { %v3391_v55 = vpop.f32.mrb[17].mxu1 }
 0x124   : > { %v3393_v20 = vpop.f32.mrb[18].mxu1 }
 0x125   : > { %v3398_v22 = vpop.f32.mrb[19].mxu1 }
 0x12a   : > { %v3400_v63 = vpop.f32.mrb[20].mxu1 }
 0x12b   : > { %v3402_v2 = vpop.f32.mrb[21].mxu1 }
 0x12c   : > { %v3404_v3 = vpop.f32.mrb[22].mxu1 }
 0x12d   : > { %v3406_v4 = vpop.f32.mrb[23].mxu1 }
 0x132   : > { %v3408_v5 = vpop.f32.mrb[24].mxu1 }
 0x133   : > { %v3410_v6 = vpop.f32.mrb[25].mxu1 }
 0x134   : > { %v3412_v7 = vpop.f32.mrb[26].mxu1 }
 0x135   : > { %v3414_v8 = vpop.f32.mrb[27].mxu1 }
 0x13a   : > { %v3416_v10 = vpop.f32.mrb[28].mxu1 }
 0x13b   : > { %v3418_v36 = vpop.f32.mrb[29].mxu1 }
 0x13c   : > { %v3420_v21 = vpop.f32.mrb[30].mxu1 }
 0x13d   : > { %v3422_v39 = vpop.f32.mrb[31].mxu1 }
 0x166   : > { %v2702_v25 = vpop.f32.mrb[0].mxu0 }
 0x167   : > { %v2814_v44 = vadd.f32 %v2702_v25, %v2594_v52  ;;  %v1386_v28 = vpop.f32.mrb[1].mxu0 }
 0x168   : > { %v2815_v29 = vadd.f32 %v1386_v28, %v702_v58  ;;  %v2703_v32 = vpop.f32.mrb[2].mxu0 }
 0x169   : > { %v1553_v30 = vadd.f32 %v2814_v44, %v3427_v24  ;;  %v2816_v40 = vadd.f32 %v2703_v32, %v2595_v59  ;;  %v1389_v31 = vpop.f32.mrb[3].mxu0 }
 0x16a   : > { %v1551_v11 = vadd.f32 %v2815_v29, %v3427_v24  ;;  %v2817_v33 = vadd.f32 %v1389_v31, %v705_v60  ;;  %v2956_v60 = vld [vmem:[%s3645_s6 + $0x10] sm:$0xff]  }
 0x16b   : > { %v1554_v38 = vadd.f32 %v2816_v40, %v3427_v24  ;;  %v1585_v41 = vmax.f32 %v1553_v30, 0.0 }
 0x16c   : > { %v1552_v56 = vadd.f32 %v2817_v33, %v3427_v24  ;;  %v1583_v43 = vmax.f32 %v1551_v11, 0.0 }
 0x16d   : > { %v1586_v15 = vmax.f32 %v1554_v38, 0.0 }
 0x16e   : > { %v1584_v57 = vmax.f32 %v1552_v56, 0.0  ;;  %v2706_v16 = vpop.f32.mrb[4].mxu0 }
 0x16f   : > { %v1629_v45 = vpack.c.bf16 %v1586_v15, %v1585_v41  ;;  %v2818_v46 = vadd.f32 %v2706_v16, %v2598_v61  ;;  %v1402_v47 = vpop.f32.mrb[5].mxu0 }
 0x170   : > { %v1628_v49 = vpack.c.bf16 %v1584_v57, %v1583_v43  ;;  %v2819_v35 = vadd.f32 %v1402_v47, %v718_v0  ;;  %v2707_v50 = vpop.f32.mrb[6].mxu0 }
 0x171   : > { %v1557_v48 = vadd.f32 %v2818_v46, %v3427_v24  ;;  %v2820_v62 = vadd.f32 %v2707_v50, %v2599_v1  ;;  %v1405_v54 = vpop.f32.mrb[7].mxu0 }
 0x172   : > { %v1555_v26 = vadd.f32 %v2819_v35, %v3427_v24  ;;  %v2821_v53 = vadd.f32 %v1405_v54, %v721_v9  ;;  %2744 = vmatprep.mubr.msk.bf16.mxu1 %vm1686_vm4, %v1628_v49 }
 0x173   : > { %v1558_v37 = vadd.f32 %v2820_v62, %v3427_v24  ;;  %2745 = vmatmul.mubr.msk.bf16.vlgmr.msra.gmra.mrb[32].mxu1 %vm1686_vm4, %v1629_v45  ;;  %v1589_v58 = vmax.f32 %v1557_v48, 0.0 }
 0x174   : > { %v1556_v52 = vadd.f32 %v2821_v53, %v3427_v24  ;;  %2777 = vmatpush3.bf16.msra.mxu1 %v2954_v27  ;;  %v1587_v61 = vmax.f32 %v1555_v26, 0.0 }
 0x175   : > { %v1590_v59 = vmax.f32 %v1558_v37, 0.0  ;;  %2778 = vmatprep.subr.bf16.mxu1 %v2955_v19 }
 0x176   : > { %v1588_v0 = vmax.f32 %v1556_v52, 0.0  ;;  %v2710_v1 = vpop.f32.mrb[8].mxu0 }
 0x177   : > { %v1631_v9 = vpack.c.bf16 %v1590_v59, %v1589_v58  ;;  %v2822_v25 = vadd.f32 %v2710_v1, %v3373_v12  ;;  %v1418_v44 = vpop.f32.mrb[9].mxu0 }
 0x178   : > { %v1630_v28 = vpack.c.bf16 %v1588_v0, %v1587_v61  ;;  %v2823_v29 = vadd.f32 %v1418_v44, %v3375_v13  ;;  %v2711_v32 = vpop.f32.mrb[10].mxu0  ;;  %2779 = vmatpush3.bf16.msra.mxu1 %v2955_v19 }
 0x179   : > { %v1561_v27 = vadd.f32 %v2822_v25, %v3427_v24  ;;  %v2824_v30 = vadd.f32 %v2711_v32, %v3377_v14  ;;  %v1421_v40 = vpop.f32.mrb[11].mxu0  ;;  %2780 = vmatprep.subr.bf16.mxu1 %v2956_v60 }
 0x17a   : > { %v1559_v31 = vadd.f32 %v2823_v29, %v3427_v24  ;;  %v2825_v11 = vadd.f32 %v1421_v40, %v3379_v17  ;;  %2748 = vmatprep.mubr.msk.bf16.mxu1 %vm1686_vm4, %v1630_v28 }
 0x17b   : > { %v1562_v12 = vadd.f32 %v2824_v30, %v3427_v24  ;;  %2749 = vmatmul.mubr.msk.bf16.gmra.mrb[36].mxu1 %vm1686_vm4, %v1631_v9  ;;  %v1593_v33 = vmax.f32 %v1561_v27, 0.0 }
 0x17c   : > { %v1560_v13 = vadd.f32 %v2825_v11, %v3427_v24  ;;  %2781 = vmatpush3.bf16.msra.mxu1 %v2956_v60  ;;  %v1591_v56 = vmax.f32 %v1559_v31, 0.0 }
 0x17d   : > { %v1594_v38 = vmax.f32 %v1562_v12, 0.0 }
 0x17e   : > { %v1592_v41 = vmax.f32 %v1560_v13, 0.0  ;;  %v2714_v14 = vpop.f32.mrb[12].mxu0 }
 0x17f   : > { %v1633_v15 = vpack.c.bf16 %v1594_v38, %v1593_v33  ;;  %v2826_v43 = vadd.f32 %v2714_v14, %v3381_v18  ;;  %v1434_v57 = vpop.f32.mrb[13].mxu0 }
 0x180   : > { %v1632_v16 = vpack.c.bf16 %v1592_v41, %v1591_v56  ;;  %v2827_v17 = vadd.f32 %v1434_v57, %v3383_v23  ;;  %v2715_v45 = vpop.f32.mrb[14].mxu0 }
 0x181   : > { %v1565_v46 = vadd.f32 %v2826_v43, %v3427_v24  ;;  %v2828_v47 = vadd.f32 %v2715_v45, %v3385_v34  ;;  %v1437_v49 = vpop.f32.mrb[15].mxu0 }
 0x182   : > { %v1563_v35 = vadd.f32 %v2827_v17, %v3427_v24  ;;  %v2829_v50 = vadd.f32 %v1437_v49, %v3387_v42  ;;  %2752 = vmatprep.mubr.msk.bf16.mxu1 %vm1686_vm4, %v1632_v16 }
 0x183   : > { %v1566_v48 = vadd.f32 %v2828_v47, %v3427_v24  ;;  %2753 = vmatmul.mubr.msk.bf16.gmra.mrb[40].mxu1 %vm1686_vm4, %v1633_v15  ;;  %v1597_v62 = vmax.f32 %v1565_v46, 0.0 }
 0x184   : > { %v1564_v18 = vadd.f32 %v2829_v50, %v3427_v24  ;;  %v1595_v54 = vmax.f32 %v1563_v35, 0.0 }
 0x185   : > { %v1598_v23 = vmax.f32 %v1566_v48, 0.0 }
 0x186   : > { %v1596_v19 = vmax.f32 %v1564_v18, 0.0  ;;  %v2718_v26 = vpop.f32.mrb[16].mxu0 }
 0x187   : > { %v1635_v53 = vpack.c.bf16 %v1598_v23, %v1597_v62  ;;  %v2830_v34 = vadd.f32 %v2718_v26, %v3389_v51  ;;  %v1450_v37 = vpop.f32.mrb[17].mxu0 }
 0x188   : > { %v1634_v52 = vpack.c.bf16 %v1596_v19, %v1595_v54  ;;  %v2831_v42 = vadd.f32 %v1450_v37, %v3391_v55  ;;  %v2719_v58 = vpop.f32.mrb[18].mxu0 }
 0x189   : > { %v1569_v59 = vadd.f32 %v2830_v34, %v3427_v24  ;;  %v2832_v60 = vadd.f32 %v2719_v58, %v3393_v20  ;;  %v1453_v61 = vpop.f32.mrb[19].mxu0 }
 0x18a   : > { %v1567_v0 = vadd.f32 %v2831_v42, %v3427_v24  ;;  %v2833_v1 = vadd.f32 %v1453_v61, %v3398_v22  ;;  %2756 = vmatprep.mubr.msk.bf16.mxu1 %vm1686_vm4, %v1634_v52 }
 0x18b   : > { %v1570_v9 = vadd.f32 %v2832_v60, %v3427_v24  ;;  %2757 = vmatmul.mubr.msk.bf16.gmra.mrb[44].mxu1 %vm1686_vm4, %v1635_v53  ;;  %v1601_v25 = vmax.f32 %v1569_v59, 0.0 }
 0x18c   : > { %v1568_v51 = vadd.f32 %v2833_v1, %v3427_v24  ;;  %v1599_v44 = vmax.f32 %v1567_v0, 0.0 }
 0x18d   : > { %v1602_v55 = vmax.f32 %v1570_v9, 0.0 }
 0x18e   : > { %v1600_v28 = vmax.f32 %v1568_v51, 0.0  ;;  %v2722_v29 = vpop.f32.mrb[20].mxu0 }
 0x18f   : > { %v1637_v32 = vpack.c.bf16 %v1602_v55, %v1601_v25  ;;  %v2834_v20 = vadd.f32 %v2722_v29, %v3400_v63  ;;  %v1466_v27 = vpop.f32.mrb[21].mxu0 }
 0x190   : > { %v1636_v30 = vpack.c.bf16 %v1600_v28, %v1599_v44  ;;  %v2835_v22 = vadd.f32 %v1466_v27, %v3402_v2  ;;  %v2723_v40 = vpop.f32.mrb[22].mxu0 }
 0x191   : > { %v1573_v31 = vadd.f32 %v2834_v20, %v3427_v24  ;;  %v2836_v11 = vadd.f32 %v2723_v40, %v3404_v3  ;;  %v1469_v12 = vpop.f32.mrb[23].mxu0 }
 0x192   : > { %v1571_v13 = vadd.f32 %v2835_v22, %v3427_v24  ;;  %v2837_v33 = vadd.f32 %v1469_v12, %v3406_v4  ;;  %2760 = vmatprep.mubr.msk.bf16.mxu1 %vm1686_vm4, %v1636_v30 }
 0x193   : > { %v1574_v38 = vadd.f32 %v2836_v11, %v3427_v24  ;;  %2761 = vmatmul.mubr.msk.bf16.gmra.mrb[48].mxu1 %vm1686_vm4, %v1637_v32  ;;  %v1605_v56 = vmax.f32 %v1573_v31, 0.0 }
 0x194   : > { %v1572_v63 = vadd.f32 %v2837_v33, %v3427_v24  ;;  %v1603_v41 = vmax.f32 %v1571_v13, 0.0 }
 0x195   : > { %v1606_v2 = vmax.f32 %v1574_v38, 0.0 }
 0x196   : > { %v1604_v14 = vmax.f32 %v1572_v63, 0.0  ;;  %v2726_v15 = vpop.f32.mrb[24].mxu0 }
 0x197   : > { %v1639_v43 = vpack.c.bf16 %v1606_v2, %v1605_v56  ;;  %v2838_v3 = vadd.f32 %v2726_v15, %v3408_v5  ;;  %v1482_v57 = vpop.f32.mrb[25].mxu0 }
 0x198   : > { %v1638_v16 = vpack.c.bf16 %v1604_v14, %v1603_v41  ;;  %v2839_v4 = vadd.f32 %v1482_v57, %v3410_v6  ;;  %v2727_v17 = vpop.f32.mrb[26].mxu0 }
 0x199   : > { %v1577_v45 = vadd.f32 %v2838_v3, %v3427_v24  ;;  %v2840_v46 = vadd.f32 %v2727_v17, %v3412_v7  ;;  %v1485_v47 = vpop.f32.mrb[27].mxu0 }
 0x19a   : > { %v1575_v49 = vadd.f32 %v2839_v4, %v3427_v24  ;;  %v2841_v35 = vadd.f32 %v1485_v47, %v3414_v8  ;;  %2764 = vmatprep.mubr.msk.bf16.mxu1 %vm1686_vm4, %v1638_v16 }
 0x19b   : > { %v1578_v50 = vadd.f32 %v2840_v46, %v3427_v24  ;;  %2765 = vmatmul.mubr.msk.bf16.gmra.mrb[52].mxu1 %vm1686_vm4, %v1639_v43  ;;  %v1609_v48 = vmax.f32 %v1577_v45, 0.0 }
 0x19c   : > { %v1576_v5 = vadd.f32 %v2841_v35, %v3427_v24  ;;  %v1607_v18 = vmax.f32 %v1575_v49, 0.0 }
 0x19d   : > { %v1610_v6 = vmax.f32 %v1578_v50, 0.0 }
 0x19e   : > { %v1608_v62 = vmax.f32 %v1576_v5, 0.0  ;;  %v2730_v23 = vpop.f32.mrb[28].mxu0 }
 0x19f   : > { %v1641_v54 = vpack.c.bf16 %v1610_v6, %v1609_v48  ;;  %v2842_v7 = vadd.f32 %v2730_v23, %v3416_v10  ;;  %v1498_v19 = vpop.f32.mrb[29].mxu0 }
 0x1a0   : > { %v1640_v26 = vpack.c.bf16 %v1608_v62, %v1607_v18  ;;  %v2843_v8 = vadd.f32 %v1498_v19, %v3418_v36  ;;  %v2731_v53 = vpop.f32.mrb[30].mxu0 }
 0x1a1   : > { %v1581_v34 = vadd.f32 %v2842_v7, %v3427_v24  ;;  %v2844_v37 = vadd.f32 %v2731_v53, %v3420_v21  ;;  %v1501_v52 = vpop.f32.mrb[31].mxu0  ;;  %v3510_v21 = vld [vmem:[%s3644_s5] ss:$0 sm:$0xff] }
 0x1a2   : > { %v1579_v42 = vadd.f32 %v2843_v8, %v3427_v24  ;;  %v2845_v58 = vadd.f32 %v1501_v52, %v3422_v39  ;;  %2768 = vmatprep.mubr.msk.bf16.mxu1 %vm1686_vm4, %v1640_v26 }
 0x1a3   : > { %v1582_v59 = vadd.f32 %v2844_v37, %v3427_v24  ;;  %2769 = vmatmul.mubr.msk.bf16.gmra.mrb[56].mxu1 %vm1686_vm4, %v1641_v54  ;;  %v1613_v60 = vmax.f32 %v1581_v34, 0.0 }
 0x1a4   : > { %v1580_v10 = vadd.f32 %v2845_v58, %v3427_v24  ;;  %v1611_v61 = vmax.f32 %v1579_v42, 0.0 }
 0x1a5   : > { %v1614_v36 = vmax.f32 %v1582_v59, 0.0 }
 0x1a6   : > { %v1612_v0 = vmax.f32 %v1580_v10, 0.0 }
 0x1a7   : > { %v1643_v1 = vpack.c.bf16 %v1614_v36, %v1613_v60 }
 0x1a8   : > { %v1642_v9 = vpack.c.bf16 %v1612_v0, %v1611_v61 }
 0x1aa   : > { %2772 = vmatprep.mubr.msk.bf16.mxu1 %vm1686_vm4, %v1642_v9 }
 0x1ab   : > { %2773 = vmatmul.mubr.msk.bf16.gmra.mrb[60].mxu1 %vm1686_vm4, %v1643_v1 }
 0x246   : > { %v2746_v39 = vpop.f32.mrb[32].mxu1 }
 0x247   : > { %v1778_v51 = vadd.f32 %v2746_v39, %v3510_v21  ;;  %v1769_v25 = vpop.f32.mrb[33].mxu1 }
 0x248   : > { %v1770_v24 = vadd.f32 %v3510_v21, %v1769_v25  ;;  %v2747_v55 = vpop.f32.mrb[34].mxu1 }
 0x249   : > { %v1781_v44 = vadd.f32 %v2747_v55, %v3510_v21  ;;  %v1772_v28 = vpop.f32.mrb[35].mxu1  ;;  %v1898_v32 = vmax.f32 %v1778_v51, 0.0 }
 0x24a   : > { %v1773_v29 = vadd.f32 %v3510_v21, %v1772_v28  ;;  %v1896_v27 = vmax.f32 %v1770_v24, 0.0 }
 0x24b   : > { %v1899_v20 = vmax.f32 %v1781_v44, 0.0 }
 0x24c   : > { %v1897_v30 = vmax.f32 %v1773_v29, 0.0 }
 0x24d   : > { %v1936_v22 = vpack.c.bf16 %v1899_v20, %v1898_v32 }
 0x24e   : > { %v1935_v40 = vpack.c.bf16 %v1897_v30, %v1896_v27  ;;  %v2750_v31 = vpop.f32.mrb[36].mxu1 }
 0x24f   : > { %v1794_v11 = vadd.f32 %v2750_v31, %v3510_v21  ;;  %v1785_v12 = vpop.f32.mrb[37].mxu1 }
 0x250   : > { %v1786_v13 = vadd.f32 %v3510_v21, %v1785_v12  ;;  %v2751_v33 = vpop.f32.mrb[38].mxu1  ;;  %2782 = vmatprep.mubr.msk.bf16.mxu1 %vm1975_vm5, %v1935_v40 }
 0x251   : > { %v1797_v38 = vadd.f32 %v2751_v33, %v3510_v21  ;;  %v1788_v63 = vpop.f32.mrb[39].mxu1  ;;  %2783 = vmatmul.mubr.msk.bf16.vlgmr.msra.gmra.mrb[64].mxu1 %vm1975_vm5, %v1936_v22  ;;  %v1902_v2 = vmax.f32 %v1794_v11, 0.0 }
 0x252   : > { %v1789_v56 = vadd.f32 %v3510_v21, %v1788_v63  ;;  %v1900_v14 = vmax.f32 %v1786_v13, 0.0 }
 0x253   : > { %v1903_v41 = vmax.f32 %v1797_v38, 0.0 }
 0x254   : > { %v1901_v15 = vmax.f32 %v1789_v56, 0.0 }
 0x255   : > { %v1938_v43 = vpack.c.bf16 %v1903_v41, %v1902_v2 }
 0x256   : > { %v1937_v3 = vpack.c.bf16 %v1901_v15, %v1900_v14  ;;  %v2754_v57 = vpop.f32.mrb[40].mxu1 }
 0x257   : > { %v1810_v16 = vadd.f32 %v2754_v57, %v3510_v21  ;;  %v1801_v4 = vpop.f32.mrb[41].mxu1 }
 0x258   : > { %v1802_v17 = vadd.f32 %v3510_v21, %v1801_v4  ;;  %v2755_v45 = vpop.f32.mrb[42].mxu1  ;;  %2786 = vmatprep.mubr.msk.bf16.mxu1 %vm1975_vm5, %v1937_v3 }
 0x259   : > { %v1813_v46 = vadd.f32 %v2755_v45, %v3510_v21  ;;  %v1804_v47 = vpop.f32.mrb[43].mxu1  ;;  %2787 = vmatmul.mubr.msk.bf16.gmra.mrb[68].mxu1 %vm1975_vm5, %v1938_v43  ;;  %v1906_v35 = vmax.f32 %v1810_v16, 0.0 }
 0x25a   : > { %v1805_v49 = vadd.f32 %v3510_v21, %v1804_v47  ;;  %v1904_v5 = vmax.f32 %v1802_v17, 0.0 }
 0x25b   : > { %v1907_v50 = vmax.f32 %v1813_v46, 0.0 }
 0x25c   : > { %v1905_v48 = vmax.f32 %v1805_v49, 0.0 }
 0x25d   : > { %v1940_v6 = vpack.c.bf16 %v1907_v50, %v1906_v35 }
 0x25e   : > { %v1939_v18 = vpack.c.bf16 %v1905_v48, %v1904_v5  ;;  %v2758_v62 = vpop.f32.mrb[44].mxu1 }
 0x25f   : > { %v1826_v23 = vadd.f32 %v2758_v62, %v3510_v21  ;;  %v1817_v54 = vpop.f32.mrb[45].mxu1 }
 0x260   : > { %v1818_v7 = vadd.f32 %v3510_v21, %v1817_v54  ;;  %v2759_v19 = vpop.f32.mrb[46].mxu1  ;;  %2790 = vmatprep.mubr.msk.bf16.mxu1 %vm1975_vm5, %v1939_v18 }
 0x261   : > { %v1829_v26 = vadd.f32 %v2759_v19, %v3510_v21  ;;  %v1820_v8 = vpop.f32.mrb[47].mxu1  ;;  %2791 = vmatmul.mubr.msk.bf16.gmra.mrb[72].mxu1 %vm1975_vm5, %v1940_v6  ;;  %v1910_v34 = vmax.f32 %v1826_v23, 0.0 }
 0x262   : > { %v1821_v53 = vadd.f32 %v3510_v21, %v1820_v8  ;;  %v1908_v52 = vmax.f32 %v1818_v7, 0.0 }
 0x263   : > { %v1911_v37 = vmax.f32 %v1829_v26, 0.0 }
 0x264   : > { %v1909_v42 = vmax.f32 %v1821_v53, 0.0  ;;  %v3565_v53 = vld [vmem:[%s3646_s7] ss:$0 sm:$0xff] }
 0x265   : > { %v1942_v58 = vpack.c.bf16 %v1911_v37, %v1910_v34 }
 0x266   : > { %v1941_v59 = vpack.c.bf16 %v1909_v42, %v1908_v52  ;;  %v2762_v10 = vpop.f32.mrb[48].mxu1 }
 0x267   : > { %v1842_v60 = vadd.f32 %v2762_v10, %v3510_v21  ;;  %v1833_v36 = vpop.f32.mrb[49].mxu1 }
 0x268   : > { %v1834_v61 = vadd.f32 %v3510_v21, %v1833_v36  ;;  %v2763_v0 = vpop.f32.mrb[50].mxu1  ;;  %2794 = vmatprep.mubr.msk.bf16.mxu1 %vm1975_vm5, %v1941_v59 }
 0x269   : > { %v1845_v1 = vadd.f32 %v2763_v0, %v3510_v21  ;;  %v1836_v9 = vpop.f32.mrb[51].mxu1  ;;  %2795 = vmatmul.mubr.msk.bf16.gmra.mrb[76].mxu1 %vm1975_vm5, %v1942_v58  ;;  %v1914_v51 = vmax.f32 %v1842_v60, 0.0 }
 0x26a   : > { %v1837_v39 = vadd.f32 %v3510_v21, %v1836_v9  ;;  %v1912_v24 = vmax.f32 %v1834_v61, 0.0 }
 0x26b   : > { %v1915_v25 = vmax.f32 %v1845_v1, 0.0 }
 0x26c   : > { %v1913_v55 = vmax.f32 %v1837_v39, 0.0 }
 0x26d   : > { %v1944_v44 = vpack.c.bf16 %v1915_v25, %v1914_v51 }
 0x26e   : > { %v1943_v28 = vpack.c.bf16 %v1913_v55, %v1912_v24  ;;  %v2766_v29 = vpop.f32.mrb[52].mxu1 }
 0x26f   : > { %v1858_v32 = vadd.f32 %v2766_v29, %v3510_v21  ;;  %v1849_v20 = vpop.f32.mrb[53].mxu1 }
 0x270   : > { %v1850_v27 = vadd.f32 %v3510_v21, %v1849_v20  ;;  %v2767_v30 = vpop.f32.mrb[54].mxu1  ;;  %2798 = vmatprep.mubr.msk.bf16.mxu1 %vm1975_vm5, %v1943_v28 }
 0x271   : > { %v1861_v22 = vadd.f32 %v2767_v30, %v3510_v21  ;;  %v1852_v40 = vpop.f32.mrb[55].mxu1  ;;  %2799 = vmatmul.mubr.msk.bf16.gmra.mrb[80].mxu1 %vm1975_vm5, %v1944_v44  ;;  %v1918_v11 = vmax.f32 %v1858_v32, 0.0 }
 0x272   : > { %v1853_v31 = vadd.f32 %v3510_v21, %v1852_v40  ;;  %v1916_v13 = vmax.f32 %v1850_v27, 0.0 }
 0x273   : > { %v1919_v12 = vmax.f32 %v1861_v22, 0.0 }
 0x274   : > { %v1917_v33 = vmax.f32 %v1853_v31, 0.0 }
 0x275   : > { %v1946_v38 = vpack.c.bf16 %v1919_v12, %v1918_v11 }
 0x276   : > { %v1945_v63 = vpack.c.bf16 %v1917_v33, %v1916_v13  ;;  %v2770_v56 = vpop.f32.mrb[56].mxu1 }
 0x277   : > { %v1874_v2 = vadd.f32 %v2770_v56, %v3510_v21  ;;  %v1865_v41 = vpop.f32.mrb[57].mxu1 }
 0x278   : > { %v1866_v14 = vadd.f32 %v3510_v21, %v1865_v41  ;;  %v2771_v15 = vpop.f32.mrb[58].mxu1  ;;  %2802 = vmatprep.mubr.msk.bf16.mxu1 %vm1975_vm5, %v1945_v63 }
 0x279   : > { %v1877_v43 = vadd.f32 %v2771_v15, %v3510_v21  ;;  %v1868_v3 = vpop.f32.mrb[59].mxu1  ;;  %2803 = vmatmul.mubr.msk.bf16.gmra.mrb[84].mxu1 %vm1975_vm5, %v1946_v38  ;;  %v1922_v16 = vmax.f32 %v1874_v2, 0.0 }
 0x27a   : > { %v1869_v57 = vadd.f32 %v3510_v21, %v1868_v3  ;;  %v1920_v17 = vmax.f32 %v1866_v14, 0.0 }
 0x27b   : > { %v1923_v4 = vmax.f32 %v1877_v43, 0.0 }
 0x27c   : > { %v1921_v45 = vmax.f32 %v1869_v57, 0.0 }
 0x27d   : > { %v1948_v46 = vpack.c.bf16 %v1923_v4, %v1922_v16 }
 0x27e   : > { %v1947_v47 = vpack.c.bf16 %v1921_v45, %v1920_v17  ;;  %v2774_v49 = vpop.f32.mrb[60].mxu1 }
 0x27f   : > { %v1890_v35 = vadd.f32 %v2774_v49, %v3510_v21  ;;  %v1881_v50 = vpop.f32.mrb[61].mxu1 }
 0x280   : > { %v1882_v5 = vadd.f32 %v3510_v21, %v1881_v50  ;;  %v2775_v48 = vpop.f32.mrb[62].mxu1  ;;  %2806 = vmatprep.mubr.msk.bf16.mxu1 %vm1975_vm5, %v1947_v47 }
 0x281   : > { %v1893_v6 = vadd.f32 %v2775_v48, %v3510_v21  ;;  %v1884_v18 = vpop.f32.mrb[63].mxu1  ;;  %2807 = vmatmul.mubr.msk.bf16.gmra.mrb[88].mxu1 %vm1975_vm5, %v1948_v46  ;;  %v1926_v23 = vmax.f32 %v1890_v35, 0.0 }
 0x282   : > { %v1885_v62 = vadd.f32 %v3510_v21, %v1884_v18  ;;  %v1924_v7 = vmax.f32 %v1882_v5, 0.0 }
 0x283   : > { %v1927_v54 = vmax.f32 %v1893_v6, 0.0 }
 0x284   : > { %v1925_v19 = vmax.f32 %v1885_v62, 0.0 }
 0x285   : > { %v1950_v26 = vpack.c.bf16 %v1927_v54, %v1926_v23 }
 0x286   : > { %v1949_v8 = vpack.c.bf16 %v1925_v19, %v1924_v7 }
 0x288   : > { %2810 = vmatprep.mubr.msk.bf16.mxu1 %vm1975_vm5, %v1949_v8 }
 0x289   : > { %2811 = vmatmul.mubr.msk.bf16.gmra.mrb[92].mxu1 %vm1975_vm5, %v1950_v26 }
 0x324   : > { %v2784_v34 = vpop.f32.mrb[64].mxu1 }
 0x325   : > { %v2067_v21 = vadd.f32 %v2784_v34, %v3565_v53  ;;  %v2058_v37 = vpop.f32.mrb[65].mxu1 }
 0x326   : > { %v2059_v52 = vadd.f32 %v3565_v53, %v2058_v37  ;;  %v2785_v42 = vpop.f32.mrb[66].mxu1 }
 0x327   : > { %v2187_v58 = vmax.f32 %v2067_v21, 0.0  ;;  %v2070_v59 = vadd.f32 %v2785_v42, %v3565_v53  ;;  %v2061_v10 = vpop.f32.mrb[67].mxu1 }
 0x328   : > { %v2185_v60 = vmax.f32 %v2059_v52, 0.0  ;;  %v2062_v36 = vadd.f32 %v3565_v53, %v2061_v10 }
 0x329   : > { %2219 = vst [vmem:[%s3571_s21 + $0x10] sm:$0xff] %v2187_v58  ;;  %v2188_v61 = vmax.f32 %v2070_v59, 0.0 }
 0x32a   : > { %2217 = vst [vmem:[%s3571_s21] sm:$0xff] %v2185_v60  ;;  %v2186_v0 = vmax.f32 %v2062_v36, 0.0 }
 0x32b   : > { %2220 = vst [vmem:[%s3571_s21 + $0x18] sm:$0xff] %v2188_v61 }
 0x32c   : > { %2218 = vst [vmem:[%s3571_s21 + $0x8] sm:$0xff] %v2186_v0  ;;  %v2788_v1 = vpop.f32.mrb[68].mxu1 }
 0x32d   : > { %v2083_v9 = vadd.f32 %v2788_v1, %v3565_v53  ;;  %v2074_v39 = vpop.f32.mrb[69].mxu1 }
 0x32e   : > { %v2075_v51 = vadd.f32 %v3565_v53, %v2074_v39  ;;  %v2789_v25 = vpop.f32.mrb[70].mxu1 }
 0x32f   : > { %v2191_v24 = vmax.f32 %v2083_v9, 0.0  ;;  %v2086_v55 = vadd.f32 %v2789_v25, %v3565_v53  ;;  %v2077_v44 = vpop.f32.mrb[71].mxu1 }
 0x330   : > { %v2189_v28 = vmax.f32 %v2075_v51, 0.0  ;;  %v2078_v29 = vadd.f32 %v3565_v53, %v2077_v44 }
 0x331   : > { %2223 = vst [vmem:[%s3571_s21 + $0x30] sm:$0xff] %v2191_v24  ;;  %v2192_v32 = vmax.f32 %v2086_v55, 0.0 }
 0x332   : > { %2221 = vst [vmem:[%s3571_s21 + $0x20] sm:$0xff] %v2189_v28  ;;  %v2190_v20 = vmax.f32 %v2078_v29, 0.0 }
 0x333   : > { %2224 = vst [vmem:[%s3571_s21 + $0x38] sm:$0xff] %v2192_v32 }
 0x334   : > { %2222 = vst [vmem:[%s3571_s21 + $0x28] sm:$0xff] %v2190_v20  ;;  %v2792_v27 = vpop.f32.mrb[72].mxu1 }
 0x335   : > { %v2099_v30 = vadd.f32 %v2792_v27, %v3565_v53  ;;  %v2090_v22 = vpop.f32.mrb[73].mxu1 }
 0x336   : > { %v2091_v40 = vadd.f32 %v3565_v53, %v2090_v22  ;;  %v2793_v31 = vpop.f32.mrb[74].mxu1 }
 0x337   : > { %v2195_v11 = vmax.f32 %v2099_v30, 0.0  ;;  %v2102_v12 = vadd.f32 %v2793_v31, %v3565_v53  ;;  %v2093_v13 = vpop.f32.mrb[75].mxu1 }
 0x338   : > { %v2193_v33 = vmax.f32 %v2091_v40, 0.0  ;;  %v2094_v38 = vadd.f32 %v3565_v53, %v2093_v13 }
 0x339   : > { %2227 = vst [vmem:[%s3571_s21 + $0x50] sm:$0xff] %v2195_v11  ;;  %v2196_v63 = vmax.f32 %v2102_v12, 0.0 }
 0x33a   : > { %2225 = vst [vmem:[%s3571_s21 + $0x40] sm:$0xff] %v2193_v33  ;;  %v2194_v56 = vmax.f32 %v2094_v38, 0.0 }
 0x33b   : > { %2228 = vst [vmem:[%s3571_s21 + $0x58] sm:$0xff] %v2196_v63 }
 0x33c   : > { %2226 = vst [vmem:[%s3571_s21 + $0x48] sm:$0xff] %v2194_v56  ;;  %v2796_v2 = vpop.f32.mrb[76].mxu1 }
 0x33d   : > { %v2115_v41 = vadd.f32 %v2796_v2, %v3565_v53  ;;  %v2106_v14 = vpop.f32.mrb[77].mxu1 }
 0x33e   : > { %v2107_v15 = vadd.f32 %v3565_v53, %v2106_v14  ;;  %v2797_v43 = vpop.f32.mrb[78].mxu1 }
 0x33f   : > { %v2199_v3 = vmax.f32 %v2115_v41, 0.0  ;;  %v2118_v57 = vadd.f32 %v2797_v43, %v3565_v53  ;;  %v2109_v16 = vpop.f32.mrb[79].mxu1 }
 0x340   : > { %v2197_v4 = vmax.f32 %v2107_v15, 0.0  ;;  %v2110_v17 = vadd.f32 %v3565_v53, %v2109_v16 }
 0x341   : > { %2231 = vst [vmem:[%s3571_s21 + $0x70] sm:$0xff] %v2199_v3  ;;  %v2200_v45 = vmax.f32 %v2118_v57, 0.0 }
 0x342   : > { %2229 = vst [vmem:[%s3571_s21 + $0x60] sm:$0xff] %v2197_v4  ;;  %v2198_v46 = vmax.f32 %v2110_v17, 0.0 }
 0x343   : > { %2232 = vst [vmem:[%s3571_s21 + $0x78] sm:$0xff] %v2200_v45 }
 0x344   : > { %2230 = vst [vmem:[%s3571_s21 + $0x68] sm:$0xff] %v2198_v46  ;;  %v2800_v47 = vpop.f32.mrb[80].mxu1 }
 0x345   : > { %v2131_v49 = vadd.f32 %v2800_v47, %v3565_v53  ;;  %v2122_v35 = vpop.f32.mrb[81].mxu1 }
 0x346   : > { %v2123_v50 = vadd.f32 %v3565_v53, %v2122_v35  ;;  %v2801_v5 = vpop.f32.mrb[82].mxu1 }
 0x347   : > { %v2203_v48 = vmax.f32 %v2131_v49, 0.0  ;;  %v2134_v6 = vadd.f32 %v2801_v5, %v3565_v53  ;;  %v2125_v18 = vpop.f32.mrb[83].mxu1 }
 0x348   : > { %v2201_v62 = vmax.f32 %v2123_v50, 0.0  ;;  %v2126_v23 = vadd.f32 %v3565_v53, %v2125_v18 }
 0x349   : > { %2235 = vst [vmem:[%s3571_s21 + $0x90] sm:$0xff] %v2203_v48  ;;  %v2204_v54 = vmax.f32 %v2134_v6, 0.0 }
 0x34a   : > { %2233 = vst [vmem:[%s3571_s21 + $0x80] sm:$0xff] %v2201_v62  ;;  %v2202_v7 = vmax.f32 %v2126_v23, 0.0 }
 0x34b   : > { %2236 = vst [vmem:[%s3571_s21 + $0x98] sm:$0xff] %v2204_v54 }
 0x34c   : > { %2234 = vst [vmem:[%s3571_s21 + $0x88] sm:$0xff] %v2202_v7  ;;  %v2804_v19 = vpop.f32.mrb[84].mxu1 }
 0x34d   : > { %v2147_v26 = vadd.f32 %v2804_v19, %v3565_v53  ;;  %v2138_v8 = vpop.f32.mrb[85].mxu1 }
 0x34e   : > { %v2139_v34 = vadd.f32 %v3565_v53, %v2138_v8  ;;  %v2805_v21 = vpop.f32.mrb[86].mxu1 }
 0x34f   : > { %v2207_v37 = vmax.f32 %v2147_v26, 0.0  ;;  %v2150_v52 = vadd.f32 %v2805_v21, %v3565_v53  ;;  %v2141_v42 = vpop.f32.mrb[87].mxu1 }
 0x350   : > { %v2205_v58 = vmax.f32 %v2139_v34, 0.0  ;;  %v2142_v59 = vadd.f32 %v3565_v53, %v2141_v42 }
 0x351   : > { %2239 = vst [vmem:[%s3571_s21 + $0xb0] sm:$0xff] %v2207_v37  ;;  %v2208_v10 = vmax.f32 %v2150_v52, 0.0 }
 0x352   : > { %2237 = vst [vmem:[%s3571_s21 + $0xa0] sm:$0xff] %v2205_v58  ;;  %v2206_v60 = vmax.f32 %v2142_v59, 0.0 }
 0x353   : > { %2240 = vst [vmem:[%s3571_s21 + $0xb8] sm:$0xff] %v2208_v10 }
 0x354   : > { %2238 = vst [vmem:[%s3571_s21 + $0xa8] sm:$0xff] %v2206_v60  ;;  %v2808_v36 = vpop.f32.mrb[88].mxu1 }
 0x355   : > { %v2163_v61 = vadd.f32 %v2808_v36, %v3565_v53  ;;  %v2154_v0 = vpop.f32.mrb[89].mxu1 }
 0x356   : > { %v2155_v1 = vadd.f32 %v3565_v53, %v2154_v0  ;;  %v2809_v9 = vpop.f32.mrb[90].mxu1 }
 0x357   : > { %v2211_v39 = vmax.f32 %v2163_v61, 0.0  ;;  %v2166_v51 = vadd.f32 %v2809_v9, %v3565_v53  ;;  %v2157_v25 = vpop.f32.mrb[91].mxu1 }
 0x358   : > { %v2209_v24 = vmax.f32 %v2155_v1, 0.0  ;;  %v2158_v55 = vadd.f32 %v3565_v53, %v2157_v25 }
 0x359   : > { %2243 = vst [vmem:[%s3571_s21 + $0xd0] sm:$0xff] %v2211_v39  ;;  %v2212_v44 = vmax.f32 %v2166_v51, 0.0 }
 0x35a   : > { %2241 = vst [vmem:[%s3571_s21 + $0xc0] sm:$0xff] %v2209_v24  ;;  %v2210_v28 = vmax.f32 %v2158_v55, 0.0 }
 0x35b   : > { %2244 = vst [vmem:[%s3571_s21 + $0xd8] sm:$0xff] %v2212_v44 }
 0x35c   : > { %2242 = vst [vmem:[%s3571_s21 + $0xc8] sm:$0xff] %v2210_v28  ;;  %v2812_v29 = vpop.f32.mrb[92].mxu1 }
 0x35d   : > { %v2179_v32 = vadd.f32 %v2812_v29, %v3565_v53  ;;  %v2170_v20 = vpop.f32.mrb[93].mxu1 }
 0x35e   : > { %v2171_v27 = vadd.f32 %v3565_v53, %v2170_v20  ;;  %v2813_v30 = vpop.f32.mrb[94].mxu1 }
 0x35f   : > { %v2215_v22 = vmax.f32 %v2179_v32, 0.0  ;;  %v2182_v40 = vadd.f32 %v2813_v30, %v3565_v53  ;;  %v2173_v31 = vpop.f32.mrb[95].mxu1 }
 0x360   : > { %v2213_v11 = vmax.f32 %v2171_v27, 0.0  ;;  %v2174_v12 = vadd.f32 %v3565_v53, %v2173_v31 }
 0x361   : > { %2247 = vst [vmem:[%s3571_s21 + $0xf0] sm:$0xff] %v2215_v22  ;;  %v2216_v13 = vmax.f32 %v2182_v40, 0.0 }
 0x362   : > { %2245 = vst [vmem:[%s3571_s21 + $0xe0] sm:$0xff] %v2213_v11  ;;  %v2214_v33 = vmax.f32 %v2174_v12, 0.0 }
 0x363   : > { %2248 = vst [vmem:[%s3571_s21 + $0xf8] sm:$0xff] %v2216_v13 }
 0x364   : > { %2246 = vst [vmem:[%s3571_s21 + $0xe8] sm:$0xff] %v2214_v33 }
 0x365 PF: > { %s18_s27 = sadd.s32 1, %s2963_s27  }
 0x366   : > { %p15_p6 = scmp.ge.s32.totalorder %s18_s27, 5  }
 0x368   :  { %17 = sbr.rel (!%p15_p6) target bundleno = 1 (0x1), region = 88 }

</bundles_post_ra>
